<compile_context>
chip_gen: v6e
topology: v6e:2x2x1
jax: 0.10.0
libtpu: 0.0.40
codegen_flags: <defaults>
</compile_context>

<pallas_src>
import functools

import jax
import jax.numpy as jnp
from jax import lax
from jax.experimental import pallas as pl
from jax.experimental.pallas import tpu as pltpu

LEAK = 0.2
EPS = 1e-5
ACT_DTYPE = jnp.bfloat16           # inter-layer activations / MXU inputs
VMEM_LIMIT = 32 * 1024 * 1024      # explicit budget, safe on v5e/v6e/v7x


# ---------------------------------------------------------------------------
# Weight / glue preprocessing (cheap XLA; no activation duplication)
# ---------------------------------------------------------------------------
def _banded_weights(w, w_in, stride, pad):
    """PyTorch OIHW (Co,Ci,KH,KW) -> (KH, Wp*Ci, Wo*Co) banded matrices.

    B_kh[(stride*wo+kw)*Ci + ci, wo*Co + co] = w[co, ci, kh, kw], so one output
    row of the conv is sum_kh  in_row_kh @ B_kh  (in_row_kh = padded image row).
    """
    co, ci, khn, kwn = w.shape
    wp = w_in + 2 * pad
    wo = (wp - kwn) // stride + 1
    wo_idx = jnp.arange(wo)
    mats = []
    for kh in range(khn):
        b = jnp.zeros((wp * ci, wo * co), jnp.float32)
        for kw in range(kwn):
            p = jnp.zeros((wp, wo), jnp.float32)
            p = p.at[stride * wo_idx + kw, wo_idx].set(1.0)
            b = b + jnp.kron(p, w[:, :, kh, kw].T.astype(jnp.float32))
        mats.append(b)
    return jnp.stack(mats)                         # (KH, Wp*Ci, Wo*Co)


def _prep_eo(x, c_in):
    """(N, H, W*C) activation -> zero-padded even/odd row-parity arrays."""
    xp = jnp.pad(x, ((0, 0), (1, 1), (c_in, c_in)))      # H-pad 1 row, W-pad 1 pixel
    return xp[:, 0::2, :], xp[:, 1::2, :]                # each (N, H//2+1, (W+2)*C)


def _bn_side_inputs(w, gamma, beta, w_in):
    co = w.shape[0]
    wo = w_in // 2
    b = _banded_weights(w, w_in, 2, 1).astype(ACT_DTYPE)
    s = jnp.tile(jnp.eye(co, dtype=jnp.float32), (wo, 1))   # (Wo*Co, Co) channel pooling
    st = jnp.transpose(s)                                   # (Co, Wo*Co) broadcast-back
    g = gamma.reshape(1, co).astype(jnp.float32)
    bt = beta.reshape(1, co).astype(jnp.float32)
    return b, s, st, g, bt


# ---------------------------------------------------------------------------
# Kernel helpers
# ---------------------------------------------------------------------------
def _dotf32(a, b):
    return jnp.dot(a, b, preferred_element_type=jnp.float32)


def _conv_rows(e_ref, o_ref, b_ref, i, ho):
    """4x4 / stride-2 / pad-1 conv for batch element i via 4 banded matmuls."""
    y = _dotf32(e_ref[i, 0:ho, :], b_ref[0, :, :])              # kh = 0
    y = y + _dotf32(o_ref[i, 0:ho, :], b_ref[1, :, :])          # kh = 1
    y = y + _dotf32(e_ref[i, 1:ho + 1, :], b_ref[2, :, :])      # kh = 2
    y = y + _dotf32(o_ref[i, 1:ho + 1, :], b_ref[3, :, :])      # kh = 3
    return y                                                     # (ho, Wo*Co) f32


def _lrelu(v):
    return jnp.where(v >= 0, v, LEAK * v)


def _batchnorm_scale_shift(ys, s_ref, st_ref, g_ref, bt_ref, cnt):
    """Exact training-mode batch stats (biased var) on the (rows, Wo*Co) slabs."""
    co = s_ref.shape[1]
    csum = jnp.zeros((1, co), jnp.float32)
    for y in ys:
        csum = csum + _dotf32(jnp.sum(y, axis=0, keepdims=True), s_ref[...])
    mean = csum / cnt                                            # (1, Co)
    mean_w = _dotf32(mean, st_ref[...])                          # (1, Wo*Co)
    vsum = jnp.zeros((1, co), jnp.float32)
    for y in ys:                                                 # two-pass variance
        c = y - mean_w
        vsum = vsum + _dotf32(jnp.sum(c * c, axis=0, keepdims=True), s_ref[...])
    var = vsum / cnt
    scale = g_ref[...] * lax.rsqrt(var + EPS)                    # (1, Co)
    shift = bt_ref[...] - mean * scale
    return _dotf32(scale, st_ref[...]), _dotf32(shift, st_ref[...])   # (1, Wo*Co)


# ---------------------------------------------------------------------------
# Kernels
# ---------------------------------------------------------------------------
def _conv_lrelu_kernel(e_ref, o_ref, b_ref, out_ref, *, ho):
    y = _conv_rows(e_ref, o_ref, b_ref, 0, ho)
    out_ref[0, :, :] = _lrelu(y).astype(out_ref.dtype)


def _conv_bn_lrelu_kernel(e_ref, o_ref, b_ref, s_ref, st_ref, g_ref, bt_ref,
                          out_ref, *, n, ho, wo):
    ys = [_conv_rows(e_ref, o_ref, b_ref, i, ho) for i in range(n)]
    scale_w, shift_w = _batchnorm_scale_shift(ys, s_ref, st_ref, g_ref, bt_ref,
                                              float(n * ho * wo))
    for i in range(n):
        out_ref[i, :, :] = _lrelu(ys[i] * scale_w + shift_w).astype(out_ref.dtype)


def _conv_bn_lrelu_head_kernel(e_ref, o_ref, b_ref, s_ref, st_ref, g_ref, bt_ref,
                               w5_ref, out_ref, *, n, ho, wo):
    # Layer 4 (conv+BN+LeakyReLU) with layer 5 (4x4 valid conv -> 1 + sigmoid)
    # fused as an elementwise-multiply + full-reduction epilogue.
    ys = [_conv_rows(e_ref, o_ref, b_ref, i, ho) for i in range(n)]
    scale_w, shift_w = _batchnorm_scale_shift(ys, s_ref, st_ref, g_ref, bt_ref,
                                              float(n * ho * wo))
    for i in range(n):
        a = _lrelu(ys[i] * scale_w + shift_w)                 # (ho, Wo*Co) f32
        prod = a * w5_ref[...]
        logit = jnp.sum(jnp.sum(prod, axis=1, keepdims=True), axis=0, keepdims=True)
        out_ref[i:i + 1, :] = 1.0 / (1.0 + jnp.exp(-logit))   # exact sigmoid, f32


# ---------------------------------------------------------------------------
# pallas_call wrappers
# ---------------------------------------------------------------------------
def conv_lrelu(x, w, h_in, w_in, c_in):
    n = x.shape[0]
    co = w.shape[0]
    hq, ho, wo = h_in // 2 + 1, h_in // 2, w_in // 2
    wpc, woc = (w_in + 2) * c_in, wo * co
    e, o = _prep_eo(x, c_in)
    b = _banded_weights(w, w_in, 2, 1).astype(ACT_DTYPE)
    return pl.pallas_call(
        functools.partial(_conv_lrelu_kernel, ho=ho),
        out_shape=jax.ShapeDtypeStruct((n, ho, woc), ACT_DTYPE),
        grid=(n,),
        in_specs=[pl.BlockSpec((1, hq, wpc), lambda i: (i, 0, 0)),
                  pl.BlockSpec((1, hq, wpc), lambda i: (i, 0, 0)),
                  pl.BlockSpec((4, wpc, woc), lambda i: (0, 0, 0))],
        out_specs=pl.BlockSpec((1, ho, woc), lambda i: (i, 0, 0)),
        compiler_params=pltpu.CompilerParams(
            dimension_semantics=("parallel",), vmem_limit_bytes=VMEM_LIMIT),
    )(e, o, b)


def conv_bn_lrelu(x, w, gamma, beta, h_in, w_in, c_in):
    n = x.shape[0]
    co = w.shape[0]
    hq, ho, wo = h_in // 2 + 1, h_in // 2, w_in // 2
    wpc, woc = (w_in + 2) * c_in, wo * co
    e, o = _prep_eo(x, c_in)
    b, s, st, g, bt = _bn_side_inputs(w, gamma, beta, w_in)
    return pl.pallas_call(
        functools.partial(_conv_bn_lrelu_kernel, n=n, ho=ho, wo=wo),
        out_shape=jax.ShapeDtypeStruct((n, ho, woc), ACT_DTYPE),
        grid=(1,),
        in_specs=[pl.BlockSpec((n, hq, wpc), lambda i: (0, 0, 0)),
                  pl.BlockSpec((n, hq, wpc), lambda i: (0, 0, 0)),
                  pl.BlockSpec((4, wpc, woc), lambda i: (0, 0, 0)),
                  pl.BlockSpec((woc, co), lambda i: (0, 0)),
                  pl.BlockSpec((co, woc), lambda i: (0, 0)),
                  pl.BlockSpec((1, co), lambda i: (0, 0)),
                  pl.BlockSpec((1, co), lambda i: (0, 0))],
        out_specs=pl.BlockSpec((n, ho, woc), lambda i: (0, 0, 0)),
        compiler_params=pltpu.CompilerParams(
            dimension_semantics=("arbitrary",), vmem_limit_bytes=VMEM_LIMIT),
    )(e, o, b, s, st, g, bt)


def conv_bn_lrelu_sigmoid_head(x, w, gamma, beta, w5, h_in, w_in, c_in):
    n = x.shape[0]
    co = w.shape[0]
    hq, ho, wo = h_in // 2 + 1, h_in // 2, w_in // 2
    wpc, woc = (w_in + 2) * c_in, wo * co
    e, o = _prep_eo(x, c_in)
    b, s, st, g, bt = _bn_side_inputs(w, gamma, beta, w_in)
    # final 4x4 valid conv (Co4 -> 1): (1, C, 4, 4) -> (4, 4*C) map matching
    # the (rows, W*C) activation layout.
    w5map = w5[0].transpose(1, 2, 0).reshape(ho, woc).astype(jnp.float32)
    return pl.pallas_call(
        functools.partial(_conv_bn_lrelu_head_kernel, n=n, ho=ho, wo=wo),
        out_shape=jax.ShapeDtypeStruct((n, 1), jnp.float32),
        grid=(1,),
        in_specs=[pl.BlockSpec((n, hq, wpc), lambda i: (0, 0, 0)),
                  pl.BlockSpec((n, hq, wpc), lambda i: (0, 0, 0)),
                  pl.BlockSpec((4, wpc, woc), lambda i: (0, 0, 0)),
                  pl.BlockSpec((woc, co), lambda i: (0, 0)),
                  pl.BlockSpec((co, woc), lambda i: (0, 0)),
                  pl.BlockSpec((1, co), lambda i: (0, 0)),
                  pl.BlockSpec((1, co), lambda i: (0, 0)),
                  pl.BlockSpec((ho, woc), lambda i: (0, 0))],
        out_specs=pl.BlockSpec((n, 1), lambda i: (0, 0)),
        compiler_params=pltpu.CompilerParams(
            dimension_semantics=("arbitrary",), vmem_limit_bytes=VMEM_LIMIT),
    )(e, o, b, s, st, g, bt, w5map)


# ---------------------------------------------------------------------------
# Full forward (4 pallas_calls; only reshape/pad/slice glue in XLA)
# ---------------------------------------------------------------------------
def discriminator_forward(x_nchw, params):
    n, c0, h, w = x_nchw.shape
    # One layout change at the model boundary: NCHW -> (N, H, W*C), bf16.
    x = x_nchw.transpose(0, 2, 3, 1).reshape(n, h, w * c0).astype(ACT_DTYPE)
    c1, c2, c3 = (params["w1"].shape[0], params["w2"].shape[0], params["w3"].shape[0])
    h1 = conv_lrelu(x, params["w1"], h, w, c0)
    h2 = conv_bn_lrelu(h1, params["w2"], params["g2"], params["b2"], h // 2, w // 2, c1)
    h3 = conv_bn_lrelu(h2, params["w3"], params["g3"], params["b3"], h // 4, w // 4, c2)
    y = conv_bn_lrelu_sigmoid_head(h3, params["w4"], params["g4"], params["b4"],
                                   params["w5"], h // 8, w // 8, c3)
    return y.reshape(n, 1, 1, 1)


# ---------------------------------------------------------------------------
# Deterministic parameter init (shapes from the PyTorch module; ndf scaled down)
# ---------------------------------------------------------------------------
def init_params(key, ndf=8, nc=1):
    ks = jax.random.split(key, 5)

    def w(k, co, ci):
        return (0.02 * jax.random.normal(k, (co, ci, 4, 4))).astype(jnp.float32)

    return {
        "w1": w(ks[0], ndf, nc),
        "w2": w(ks[1], ndf * 2, ndf),
        "w3": w(ks[2], ndf * 4, ndf * 2),
        "w4": w(ks[3], ndf * 8, ndf * 4),
        "w5": w(ks[4], 1, ndf * 8),
        "g2": jnp.ones((ndf * 2,), jnp.float32), "b2": jnp.zeros((ndf * 2,), jnp.float32),
        "g3": jnp.ones((ndf * 4,), jnp.float32), "b3": jnp.zeros((ndf * 4,), jnp.float32),
        "g4": jnp.ones((ndf * 8,), jnp.float32), "b4": jnp.zeros((ndf * 8,), jnp.float32),
    }


# ---------------------------------------------------------------------------
# Pure-JAX f32 reference (lax.conv) for a correctness sanity check
# ---------------------------------------------------------------------------
def _ref_forward(x, params):
    def conv(x, w, s, p):
        return lax.conv_general_dilated(
            x, w, (s, s), [(p, p), (p, p)],
            dimension_numbers=("NCHW", "OIHW", "NCHW"))

    def lrelu(v):
        return jnp.where(v >= 0, v, LEAK * v)

    def bn(v, g, b):
        mean = jnp.mean(v, axis=(0, 2, 3), keepdims=True)
        var = jnp.mean((v - mean) ** 2, axis=(0, 2, 3), keepdims=True)
        return (v - mean) * lax.rsqrt(var + EPS) * g.reshape(1, -1, 1, 1) \
            + b.reshape(1, -1, 1, 1)

    h = lrelu(conv(x, params["w1"], 2, 1))
    h = lrelu(bn(conv(h, params["w2"], 2, 1), params["g2"], params["b2"]))
    h = lrelu(bn(conv(h, params["w3"], 2, 1), params["g3"], params["b3"]))
    h = lrelu(bn(conv(h, params["w4"], 2, 1), params["g4"], params["b4"]))
    return jax.nn.sigmoid(conv(h, params["w5"], 1, 0))


if __name__ == "__main__":
    key = jax.random.PRNGKey(0)
    kx, kp = jax.random.split(key)
    N, nc, ndf = 2, 1, 8   # small config; 64x64 input required by the 5-layer stride pattern
    x = jax.random.normal(kx, (N, nc, 64, 64), jnp.float32)
    params = init_params(kp, ndf=ndf, nc=nc)

    fwd = jax.jit(discriminator_forward)
    out = jax.block_until_ready(fwd(x, params))
    ref = jax.block_until_ready(jax.jit(_ref_forward)(x, params))

    assert out.shape == (N, 1, 1, 1), out.shape
    # bf16 MXU inputs / bf16 inter-layer activations (f32 accumulate + f32 BN
    # epilogue) vs. the pure-f32 reference -> loose tolerance.
    assert jnp.allclose(out, ref, atol=2e-2, rtol=2e-2), (out, ref)
    print("KERNEL_OK")
</pallas_src>

<mosaic_0001>
module attributes {stable_mosaic.version = 11 : i64} {
  func.func @_conv_lrelu_kernel(%arg0: i32, %arg1: memref<1x33x66xbf16, #tpu.memory_space<vmem>>, %arg2: memref<1x33x66xbf16, #tpu.memory_space<vmem>>, %arg3: memref<4x66x256xbf16, #tpu.memory_space<vmem>>, %arg4: memref<1x32x256xbf16, #tpu.memory_space<vmem>>) attributes {dimension_semantics = [#tpu.dimension_semantics<parallel>], iteration_bounds = array<i64: 2>, scalar_prefetch = 0 : i64, scratch_operands = 0 : i64, tpu.core_type = #tpu.core_type<tc>, window_params = [{transform_indices = @transform_0, window_bounds = array<i64: 1, 33, 66>}, {transform_indices = @transform_1, window_bounds = array<i64: 1, 33, 66>}, {pipeline_mode = #tpu.pipeline_mode<synchronous>, transform_indices = @transform_2, window_bounds = array<i64: 4, 66, 256>}, {transform_indices = @transform_3, window_bounds = array<i64: 1, 32, 256>}]} {
    %c0 = arith.constant 0 : index
    %c0_0 = arith.constant 0 : index
    %c0_1 = arith.constant 0 : index
    %0 = vector.load %arg1[%c0, %c0_0, %c0_1] : memref<1x33x66xbf16, #tpu.memory_space<vmem>>, vector<1x32x66xbf16>
    %1 = vector.shape_cast %0 : vector<1x32x66xbf16> to vector<32x66xbf16>
    %c0_2 = arith.constant 0 : index
    %c0_3 = arith.constant 0 : index
    %c0_4 = arith.constant 0 : index
    %2 = vector.load %arg3[%c0_2, %c0_3, %c0_4] : memref<4x66x256xbf16, #tpu.memory_space<vmem>>, vector<1x66x256xbf16>
    %3 = vector.shape_cast %2 : vector<1x66x256xbf16> to vector<66x256xbf16>
    %cst = arith.constant dense<0.000000e+00> : vector<32x256xf32>
    %4 = tpu.matmul %1, %3, %cst {dimension_numbers = #tpu.dot_dimension_numbers<[1], [0], [0], [1], [0, 0, 1, 1], [], []>} : vector<32x66xbf16>, vector<66x256xbf16>, vector<32x256xf32> -> vector<32x256xf32>
    %c0_5 = arith.constant 0 : index
    %c0_6 = arith.constant 0 : index
    %c0_7 = arith.constant 0 : index
    %5 = vector.load %arg2[%c0_5, %c0_6, %c0_7] : memref<1x33x66xbf16, #tpu.memory_space<vmem>>, vector<1x32x66xbf16>
    %6 = vector.shape_cast %5 : vector<1x32x66xbf16> to vector<32x66xbf16>
    %c1 = arith.constant 1 : index
    %c0_8 = arith.constant 0 : index
    %c0_9 = arith.constant 0 : index
    %7 = vector.load %arg3[%c1, %c0_8, %c0_9] : memref<4x66x256xbf16, #tpu.memory_space<vmem>>, vector<1x66x256xbf16>
    %8 = vector.shape_cast %7 : vector<1x66x256xbf16> to vector<66x256xbf16>
    %cst_10 = arith.constant dense<0.000000e+00> : vector<32x256xf32>
    %9 = tpu.matmul %6, %8, %cst_10 {dimension_numbers = #tpu.dot_dimension_numbers<[1], [0], [0], [1], [0, 0, 1, 1], [], []>} : vector<32x66xbf16>, vector<66x256xbf16>, vector<32x256xf32> -> vector<32x256xf32>
    %10 = arith.addf %4, %9 : vector<32x256xf32>
    %c0_11 = arith.constant 0 : index
    %c1_12 = arith.constant 1 : index
    %c0_13 = arith.constant 0 : index
    %11 = vector.load %arg1[%c0_11, %c1_12, %c0_13] : memref<1x33x66xbf16, #tpu.memory_space<vmem>>, vector<1x32x66xbf16>
    %12 = vector.shape_cast %11 : vector<1x32x66xbf16> to vector<32x66xbf16>
    %c2 = arith.constant 2 : index
    %c0_14 = arith.constant 0 : index
    %c0_15 = arith.constant 0 : index
    %13 = vector.load %arg3[%c2, %c0_14, %c0_15] : memref<4x66x256xbf16, #tpu.memory_space<vmem>>, vector<1x66x256xbf16>
    %14 = vector.shape_cast %13 : vector<1x66x256xbf16> to vector<66x256xbf16>
    %cst_16 = arith.constant dense<0.000000e+00> : vector<32x256xf32>
    %15 = tpu.matmul %12, %14, %cst_16 {dimension_numbers = #tpu.dot_dimension_numbers<[1], [0], [0], [1], [0, 0, 1, 1], [], []>} : vector<32x66xbf16>, vector<66x256xbf16>, vector<32x256xf32> -> vector<32x256xf32>
    %16 = arith.addf %10, %15 : vector<32x256xf32>
    %c0_17 = arith.constant 0 : index
    %c1_18 = arith.constant 1 : index
    %c0_19 = arith.constant 0 : index
    %17 = vector.load %arg2[%c0_17, %c1_18, %c0_19] : memref<1x33x66xbf16, #tpu.memory_space<vmem>>, vector<1x32x66xbf16>
    %18 = vector.shape_cast %17 : vector<1x32x66xbf16> to vector<32x66xbf16>
    %c3 = arith.constant 3 : index
    %c0_20 = arith.constant 0 : index
    %c0_21 = arith.constant 0 : index
    %19 = vector.load %arg3[%c3, %c0_20, %c0_21] : memref<4x66x256xbf16, #tpu.memory_space<vmem>>, vector<1x66x256xbf16>
    %20 = vector.shape_cast %19 : vector<1x66x256xbf16> to vector<66x256xbf16>
    %cst_22 = arith.constant dense<0.000000e+00> : vector<32x256xf32>
    %21 = tpu.matmul %18, %20, %cst_22 {dimension_numbers = #tpu.dot_dimension_numbers<[1], [0], [0], [1], [0, 0, 1, 1], [], []>} : vector<32x66xbf16>, vector<66x256xbf16>, vector<32x256xf32> -> vector<32x256xf32>
    %22 = arith.addf %16, %21 : vector<32x256xf32>
    %cst_23 = arith.constant 0.000000e+00 : f32
    %23 = vector.broadcast %cst_23 : f32 to vector<32x256xf32>
    %24 = arith.cmpf oge, %22, %23 : vector<32x256xf32>
    %cst_24 = arith.constant 2.000000e-01 : f32
    %25 = vector.broadcast %cst_24 : f32 to vector<32x256xf32>
    %26 = arith.mulf %25, %22 : vector<32x256xf32>
    %27 = arith.select %24, %22, %26 : vector<32x256xi1>, vector<32x256xf32>
    %28 = arith.truncf %27 : vector<32x256xf32> to vector<32x256xbf16>
    %c0_25 = arith.constant 0 : index
    %c0_26 = arith.constant 0 : index
    %c0_27 = arith.constant 0 : index
    %29 = vector.load %arg4[%c0_25, %c0_26, %c0_27] : memref<1x32x256xbf16, #tpu.memory_space<vmem>>, vector<1x32x256xbf16>
    %30 = vector.shape_cast %29 : vector<1x32x256xbf16> to vector<32x256xbf16>
    %31 = vector.shape_cast %28 : vector<32x256xbf16> to vector<1x32x256xbf16>
    tpu.vector_store %arg4[%c0_25, %c0_26, %c0_27], %31 {strides = array<i32>} : memref<1x32x256xbf16, #tpu.memory_space<vmem>>, vector<1x32x256xbf16>,
    return
  }
  func.func @transform_0(%arg0: i32) -> (i32, i32, i32) {
    %c0_i32 = arith.constant 0 : i32
    %c0_i32_0 = arith.constant 0 : i32
    %c0_i32_1 = arith.constant 0 : i32
    return %arg0, %c0_i32, %c0_i32_0 : i32, i32, i32
  }
  func.func @transform_1(%arg0: i32) -> (i32, i32, i32) {
    %c0_i32 = arith.constant 0 : i32
    %c0_i32_0 = arith.constant 0 : i32
    %c0_i32_1 = arith.constant 0 : i32
    return %arg0, %c0_i32, %c0_i32_0 : i32, i32, i32
  }
  func.func @transform_2(%arg0: i32) -> (i32, i32, i32) {
    %c0_i32 = arith.constant 0 : i32
    %c0_i32_0 = arith.constant 0 : i32
    %c0_i32_1 = arith.constant 0 : i32
    %c0_i32_2 = arith.constant 0 : i32
    return %c0_i32, %c0_i32_0, %c0_i32_1 : i32, i32, i32
  }
  func.func @transform_3(%arg0: i32) -> (i32, i32, i32) {
    %c0_i32 = arith.constant 0 : i32
    %c0_i32_0 = arith.constant 0 : i32
    %c0_i32_1 = arith.constant 0 : i32
    return %arg0, %c0_i32, %c0_i32_0 : i32, i32, i32
  }
}

module attributes {stable_mosaic.version = 11 : i64} {
  func.func @_conv_bn_lrelu_kernel(%arg0: i32, %arg1: memref<2x17x272xbf16, #tpu.memory_space<vmem>>, %arg2: memref<2x17x272xbf16, #tpu.memory_space<vmem>>, %arg3: memref<4x272x256xbf16, #tpu.memory_space<vmem>>, %arg4: memref<256x16xf32, #tpu.memory_space<vmem>>, %arg5: memref<16x256xf32, #tpu.memory_space<vmem>>, %arg6: memref<1x16xf32, #tpu.memory_space<vmem>>, %arg7: memref<1x16xf32, #tpu.memory_space<vmem>>, %arg8: memref<2x16x256xbf16, #tpu.memory_space<vmem>>) attributes {dimension_semantics = [#tpu.dimension_semantics<arbitrary>], iteration_bounds = array<i64: 1>, scalar_prefetch = 0 : i64, scratch_operands = 0 : i64, tpu.core_type = #tpu.core_type<tc>, window_params = [{pipeline_mode = #tpu.pipeline_mode<synchronous>, transform_indices = @transform_0, window_bounds = array<i64: 2, 17, 272>}, {pipeline_mode = #tpu.pipeline_mode<synchronous>, transform_indices = @transform_1, window_bounds = array<i64: 2, 17, 272>}, {pipeline_mode = #tpu.pipeline_mode<synchronous>, transform_indices = @transform_2, window_bounds = array<i64: 4, 272, 256>}, {pipeline_mode = #tpu.pipeline_mode<synchronous>, transform_indices = @transform_3, window_bounds = array<i64: 256, 16>}, {pipeline_mode = #tpu.pipeline_mode<synchronous>, transform_indices = @transform_4, window_bounds = array<i64: 16, 256>}, {pipeline_mode = #tpu.pipeline_mode<synchronous>, transform_indices = @transform_5, window_bounds = array<i64: 1, 16>}, {pipeline_mode = #tpu.pipeline_mode<synchronous>, transform_indices = @transform_6, window_bounds = array<i64: 1, 16>}, {pipeline_mode = #tpu.pipeline_mode<synchronous>, transform_indices = @transform_7, window_bounds = array<i64: 2, 16, 256>}]} {
    %c0 = arith.constant 0 : index
    %c0_0 = arith.constant 0 : index
    %c0_1 = arith.constant 0 : index
    %0 = vector.load %arg1[%c0, %c0_0, %c0_1] : memref<2x17x272xbf16, #tpu.memory_space<vmem>>, vector<1x16x272xbf16>
    %1 = vector.shape_cast %0 : vector<1x16x272xbf16> to vector<16x272xbf16>
    %c0_2 = arith.constant 0 : index
    %c0_3 = arith.constant 0 : index
    %c0_4 = arith.constant 0 : index
    %2 = vector.load %arg3[%c0_2, %c0_3, %c0_4] : memref<4x272x256xbf16, #tpu.memory_space<vmem>>, vector<1x272x256xbf16>
    %3 = vector.shape_cast %2 : vector<1x272x256xbf16> to vector<272x256xbf16>
    %cst = arith.constant dense<0.000000e+00> : vector<16x256xf32>
    %4 = tpu.matmul %1, %3, %cst {dimension_numbers = #tpu.dot_dimension_numbers<[1], [0], [0], [1], [0, 0, 1, 1], [], []>} : vector<16x272xbf16>, vector<272x256xbf16>, vector<16x256xf32> -> vector<16x256xf32>
    %c0_5 = arith.constant 0 : index
    %c0_6 = arith.constant 0 : index
    %c0_7 = arith.constant 0 : index
    %5 = vector.load %arg2[%c0_5, %c0_6, %c0_7] : memref<2x17x272xbf16, #tpu.memory_space<vmem>>, vector<1x16x272xbf16>
    %6 = vector.shape_cast %5 : vector<1x16x272xbf16> to vector<16x272xbf16>
    %c1 = arith.constant 1 : index
    %c0_8 = arith.constant 0 : index
    %c0_9 = arith.constant 0 : index
    %7 = vector.load %arg3[%c1, %c0_8, %c0_9] : memref<4x272x256xbf16, #tpu.memory_space<vmem>>, vector<1x272x256xbf16>
    %8 = vector.shape_cast %7 : vector<1x272x256xbf16> to vector<272x256xbf16>
    %cst_10 = arith.constant dense<0.000000e+00> : vector<16x256xf32>
    %9 = tpu.matmul %6, %8, %cst_10 {dimension_numbers = #tpu.dot_dimension_numbers<[1], [0], [0], [1], [0, 0, 1, 1], [], []>} : vector<16x272xbf16>, vector<272x256xbf16>, vector<16x256xf32> -> vector<16x256xf32>
    %10 = arith.addf %4, %9 : vector<16x256xf32>
    %c0_11 = arith.constant 0 : index
    %c1_12 = arith.constant 1 : index
    %c0_13 = arith.constant 0 : index
    %11 = vector.load %arg1[%c0_11, %c1_12, %c0_13] : memref<2x17x272xbf16, #tpu.memory_space<vmem>>, vector<1x16x272xbf16>
    %12 = vector.shape_cast %11 : vector<1x16x272xbf16> to vector<16x272xbf16>
    %c2 = arith.constant 2 : index
    %c0_14 = arith.constant 0 : index
    %c0_15 = arith.constant 0 : index
    %13 = vector.load %arg3[%c2, %c0_14, %c0_15] : memref<4x272x256xbf16, #tpu.memory_space<vmem>>, vector<1x272x256xbf16>
    %14 = vector.shape_cast %13 : vector<1x272x256xbf16> to vector<272x256xbf16>
    %cst_16 = arith.constant dense<0.000000e+00> : vector<16x256xf32>
    %15 = tpu.matmul %12, %14, %cst_16 {dimension_numbers = #tpu.dot_dimension_numbers<[1], [0], [0], [1], [0, 0, 1, 1], [], []>} : vector<16x272xbf16>, vector<272x256xbf16>, vector<16x256xf32> -> vector<16x256xf32>
    %16 = arith.addf %10, %15 : vector<16x256xf32>
    %c0_17 = arith.constant 0 : index
    %c1_18 = arith.constant 1 : index
    %c0_19 = arith.constant 0 : index
    %17 = vector.load %arg2[%c0_17, %c1_18, %c0_19] : memref<2x17x272xbf16, #tpu.memory_space<vmem>>, vector<1x16x272xbf16>
    %18 = vector.shape_cast %17 : vector<1x16x272xbf16> to vector<16x272xbf16>
    %c3 = arith.constant 3 : index
    %c0_20 = arith.constant 0 : index
    %c0_21 = arith.constant 0 : index
    %19 = vector.load %arg3[%c3, %c0_20, %c0_21] : memref<4x272x256xbf16, #tpu.memory_space<vmem>>, vector<1x272x256xbf16>
    %20 = vector.shape_cast %19 : vector<1x272x256xbf16> to vector<272x256xbf16>
    %cst_22 = arith.constant dense<0.000000e+00> : vector<16x256xf32>
    %21 = tpu.matmul %18, %20, %cst_22 {dimension_numbers = #tpu.dot_dimension_numbers<[1], [0], [0], [1], [0, 0, 1, 1], [], []>} : vector<16x272xbf16>, vector<272x256xbf16>, vector<16x256xf32> -> vector<16x256xf32>
    %22 = arith.addf %16, %21 : vector<16x256xf32>
    %c1_23 = arith.constant 1 : index
    %c0_24 = arith.constant 0 : index
    %c0_25 = arith.constant 0 : index
    %23 = vector.load %arg1[%c1_23, %c0_24, %c0_25] : memref<2x17x272xbf16, #tpu.memory_space<vmem>>, vector<1x16x272xbf16>
    %24 = vector.shape_cast %23 : vector<1x16x272xbf16> to vector<16x272xbf16>
    %c0_26 = arith.constant 0 : index
    %c0_27 = arith.constant 0 : index
    %c0_28 = arith.constant 0 : index
    %25 = vector.load %arg3[%c0_26, %c0_27, %c0_28] : memref<4x272x256xbf16, #tpu.memory_space<vmem>>, vector<1x272x256xbf16>
    %26 = vector.shape_cast %25 : vector<1x272x256xbf16> to vector<272x256xbf16>
    %cst_29 = arith.constant dense<0.000000e+00> : vector<16x256xf32>
    %27 = tpu.matmul %24, %26, %cst_29 {dimension_numbers = #tpu.dot_dimension_numbers<[1], [0], [0], [1], [0, 0, 1, 1], [], []>} : vector<16x272xbf16>, vector<272x256xbf16>, vector<16x256xf32> -> vector<16x256xf32>
    %c1_30 = arith.constant 1 : index
    %c0_31 = arith.constant 0 : index
    %c0_32 = arith.constant 0 : index
    %28 = vector.load %arg2[%c1_30, %c0_31, %c0_32] : memref<2x17x272xbf16, #tpu.memory_space<vmem>>, vector<1x16x272xbf16>
    %29 = vector.shape_cast %28 : vector<1x16x272xbf16> to vector<16x272xbf16>
    %c1_33 = arith.constant 1 : index
    %c0_34 = arith.constant 0 : index
    %c0_35 = arith.constant 0 : index
    %30 = vector.load %arg3[%c1_33, %c0_34, %c0_35] : memref<4x272x256xbf16, #tpu.memory_space<vmem>>, vector<1x272x256xbf16>
    %31 = vector.shape_cast %30 : vector<1x272x256xbf16> to vector<272x256xbf16>
    %cst_36 = arith.constant dense<0.000000e+00> : vector<16x256xf32>
    %32 = tpu.matmul %29, %31, %cst_36 {dimension_numbers = #tpu.dot_dimension_numbers<[1], [0], [0], [1], [0, 0, 1, 1], [], []>} : vector<16x272xbf16>, vector<272x256xbf16>, vector<16x256xf32> -> vector<16x256xf32>
    %33 = arith.addf %27, %32 : vector<16x256xf32>
    %c1_37 = arith.constant 1 : index
    %c1_38 = arith.constant 1 : index
    %c0_39 = arith.constant 0 : index
    %34 = vector.load %arg1[%c1_37, %c1_38, %c0_39] : memref<2x17x272xbf16, #tpu.memory_space<vmem>>, vector<1x16x272xbf16>
    %35 = vector.shape_cast %34 : vector<1x16x272xbf16> to vector<16x272xbf16>
    %c2_40 = arith.constant 2 : index
    %c0_41 = arith.constant 0 : index
    %c0_42 = arith.constant 0 : index
    %36 = vector.load %arg3[%c2_40, %c0_41, %c0_42] : memref<4x272x256xbf16, #tpu.memory_space<vmem>>, vector<1x272x256xbf16>
    %37 = vector.shape_cast %36 : vector<1x272x256xbf16> to vector<272x256xbf16>
    %cst_43 = arith.constant dense<0.000000e+00> : vector<16x256xf32>
    %38 = tpu.matmul %35, %37, %cst_43 {dimension_numbers = #tpu.dot_dimension_numbers<[1], [0], [0], [1], [0, 0, 1, 1], [], []>} : vector<16x272xbf16>, vector<272x256xbf16>, vector<16x256xf32> -> vector<16x256xf32>
    %39 = arith.addf %33, %38 : vector<16x256xf32>
    %c1_44 = arith.constant 1 : index
    %c1_45 = arith.constant 1 : index
    %c0_46 = arith.constant 0 : index
    %40 = vector.load %arg2[%c1_44, %c1_45, %c0_46] : memref<2x17x272xbf16, #tpu.memory_space<vmem>>, vector<1x16x272xbf16>
    %41 = vector.shape_cast %40 : vector<1x16x272xbf16> to vector<16x272xbf16>
    %c3_47 = arith.constant 3 : index
    %c0_48 = arith.constant 0 : index
    %c0_49 = arith.constant 0 : index
    %42 = vector.load %arg3[%c3_47, %c0_48, %c0_49] : memref<4x272x256xbf16, #tpu.memory_space<vmem>>, vector<1x272x256xbf16>
    %43 = vector.shape_cast %42 : vector<1x272x256xbf16> to vector<272x256xbf16>
    %cst_50 = arith.constant dense<0.000000e+00> : vector<16x256xf32>
    %44 = tpu.matmul %41, %43, %cst_50 {dimension_numbers = #tpu.dot_dimension_numbers<[1], [0], [0], [1], [0, 0, 1, 1], [], []>} : vector<16x272xbf16>, vector<272x256xbf16>, vector<16x256xf32> -> vector<16x256xf32>
    %45 = arith.addf %39, %44 : vector<16x256xf32>
    %cst_51 = arith.constant 0.000000e+00 : f32
    %46 = vector.broadcast %cst_51 : f32 to vector<1x16xf32>
    %cst_52 = arith.constant dense<0.000000e+00> : vector<256xf32>
    %47 = vector.multi_reduction <add>, %22, %cst_52 [0] : vector<16x256xf32> to vector<256xf32>
    %48 = vector.shape_cast %47 : vector<256xf32> to vector<1x256xf32>
    %c0_53 = arith.constant 0 : index
    %c0_54 = arith.constant 0 : index
    %49 = vector.load %arg4[%c0_53, %c0_54] : memref<256x16xf32, #tpu.memory_space<vmem>>, vector<256x16xf32>
    %cst_55 = arith.constant dense<0.000000e+00> : vector<1x16xf32>
    %50 = tpu.matmul %48, %49, %cst_55 {dimension_numbers = #tpu.dot_dimension_numbers<[1], [0], [0], [1], [0, 0, 1, 1], [], []>} : vector<1x256xf32>, vector<256x16xf32>, vector<1x16xf32> -> vector<1x16xf32>
    %51 = arith.addf %46, %50 : vector<1x16xf32>
    %cst_56 = arith.constant dense<0.000000e+00> : vector<256xf32>
    %52 = vector.multi_reduction <add>, %45, %cst_56 [0] : vector<16x256xf32> to vector<256xf32>
    %53 = vector.shape_cast %52 : vector<256xf32> to vector<1x256xf32>
    %c0_57 = arith.constant 0 : index
    %c0_58 = arith.constant 0 : index
    %54 = vector.load %arg4[%c0_57, %c0_58] : memref<256x16xf32, #tpu.memory_space<vmem>>, vector<256x16xf32>
    %cst_59 = arith.constant dense<0.000000e+00> : vector<1x16xf32>
    %55 = tpu.matmul %53, %54, %cst_59 {dimension_numbers = #tpu.dot_dimension_numbers<[1], [0], [0], [1], [0, 0, 1, 1], [], []>} : vector<1x256xf32>, vector<256x16xf32>, vector<1x16xf32> -> vector<1x16xf32>
    %56 = arith.addf %51, %55 : vector<1x16xf32>
    %cst_60 = arith.constant 5.120000e+02 : f32
    %57 = vector.broadcast %cst_60 : f32 to vector<1x16xf32>
    %58 = arith.divf %56, %57 : vector<1x16xf32>
    %c0_61 = arith.constant 0 : index
    %c0_62 = arith.constant 0 : index
    %59 = vector.load %arg5[%c0_61, %c0_62] : memref<16x256xf32, #tpu.memory_space<vmem>>, vector<16x256xf32>
    %cst_63 = arith.constant dense<0.000000e+00> : vector<1x256xf32>
    %60 = tpu.matmul %58, %59, %cst_63 {dimension_numbers = #tpu.dot_dimension_numbers<[1], [0], [0], [1], [0, 0, 1, 1], [], []>} : vector<1x16xf32>, vector<16x256xf32>, vector<1x256xf32> -> vector<1x256xf32>
    %cst_64 = arith.constant 0.000000e+00 : f32
    %61 = vector.broadcast %cst_64 : f32 to vector<1x16xf32>
    %62 = vector.broadcast %60 : vector<1x256xf32> to vector<16x256xf32>
    %63 = arith.subf %22, %62 : vector<16x256xf32>
    %64 = arith.mulf %63, %63 : vector<16x256xf32>
    %cst_65 = arith.constant dense<0.000000e+00> : vector<256xf32>
    %65 = vector.multi_reduction <add>, %64, %cst_65 [0] : vector<16x256xf32> to vector<256xf32>
    %66 = vector.shape_cast %65 : vector<256xf32> to vector<1x256xf32>
    %c0_66 = arith.constant 0 : index
    %c0_67 = arith.constant 0 : index
    %67 = vector.load %arg4[%c0_66, %c0_67] : memref<256x16xf32, #tpu.memory_space<vmem>>, vector<256x16xf32>
    %cst_68 = arith.constant dense<0.000000e+00> : vector<1x16xf32>
    %68 = tpu.matmul %66, %67, %cst_68 {dimension_numbers = #tpu.dot_dimension_numbers<[1], [0], [0], [1], [0, 0, 1, 1], [], []>} : vector<1x256xf32>, vector<256x16xf32>, vector<1x16xf32> -> vector<1x16xf32>
    %69 = arith.addf %61, %68 : vector<1x16xf32>
    %70 = vector.broadcast %60 : vector<1x256xf32> to vector<16x256xf32>
    %71 = arith.subf %45, %70 : vector<16x256xf32>
    %72 = arith.mulf %71, %71 : vector<16x256xf32>
    %cst_69 = arith.constant dense<0.000000e+00> : vector<256xf32>
    %73 = vector.multi_reduction <add>, %72, %cst_69 [0] : vector<16x256xf32> to vector<256xf32>
    %74 = vector.shape_cast %73 : vector<256xf32> to vector<1x256xf32>
    %c0_70 = arith.constant 0 : index
    %c0_71 = arith.constant 0 : index
    %75 = vector.load %arg4[%c0_70, %c0_71] : memref<256x16xf32, #tpu.memory_space<vmem>>, vector<256x16xf32>
    %cst_72 = arith.constant dense<0.000000e+00> : vector<1x16xf32>
    %76 = tpu.matmul %74, %75, %cst_72 {dimension_numbers = #tpu.dot_dimension_numbers<[1], [0], [0], [1], [0, 0, 1, 1], [], []>} : vector<1x256xf32>, vector<256x16xf32>, vector<1x16xf32> -> vector<1x16xf32>
    %77 = arith.addf %69, %76 : vector<1x16xf32>
    %cst_73 = arith.constant 5.120000e+02 : f32
    %78 = vector.broadcast %cst_73 : f32 to vector<1x16xf32>
    %79 = arith.divf %77, %78 : vector<1x16xf32>
    %c0_74 = arith.constant 0 : index
    %c0_75 = arith.constant 0 : index
    %80 = vector.load %arg6[%c0_74, %c0_75] : memref<1x16xf32, #tpu.memory_space<vmem>>, vector<1x16xf32>
    %cst_76 = arith.constant 9.99999974E-6 : f32
    %81 = vector.broadcast %cst_76 : f32 to vector<1x16xf32>
    %82 = arith.addf %79, %81 : vector<1x16xf32>
    %83 = math.rsqrt %82 : vector<1x16xf32>
    %84 = arith.mulf %80, %83 : vector<1x16xf32>
    %c0_77 = arith.constant 0 : index
    %c0_78 = arith.constant 0 : index
    %85 = vector.load %arg7[%c0_77, %c0_78] : memref<1x16xf32, #tpu.memory_space<vmem>>, vector<1x16xf32>
    %86 = arith.mulf %58, %84 : vector<1x16xf32>
    %87 = arith.subf %85, %86 : vector<1x16xf32>
    %c0_79 = arith.constant 0 : index
    %c0_80 = arith.constant 0 : index
    %88 = vector.load %arg5[%c0_79, %c0_80] : memref<16x256xf32, #tpu.memory_space<vmem>>, vector<16x256xf32>
    %cst_81 = arith.constant dense<0.000000e+00> : vector<1x256xf32>
    %89 = tpu.matmul %84, %88, %cst_81 {dimension_numbers = #tpu.dot_dimension_numbers<[1], [0], [0], [1], [0, 0, 1, 1], [], []>} : vector<1x16xf32>, vector<16x256xf32>, vector<1x256xf32> -> vector<1x256xf32>
    %c0_82 = arith.constant 0 : index
    %c0_83 = arith.constant 0 : index
    %90 = vector.load %arg5[%c0_82, %c0_83] : memref<16x256xf32, #tpu.memory_space<vmem>>, vector<16x256xf32>
    %cst_84 = arith.constant dense<0.000000e+00> : vector<1x256xf32>
    %91 = tpu.matmul %87, %90, %cst_84 {dimension_numbers = #tpu.dot_dimension_numbers<[1], [0], [0], [1], [0, 0, 1, 1], [], []>} : vector<1x16xf32>, vector<16x256xf32>, vector<1x256xf32> -> vector<1x256xf32>
    %92 = vector.broadcast %89 : vector<1x256xf32> to vector<16x256xf32>
    %93 = arith.mulf %22, %92 : vector<16x256xf32>
    %94 = vector.broadcast %91 : vector<1x256xf32> to vector<16x256xf32>
    %95 = arith.addf %93, %94 : vector<16x256xf32>
    %cst_85 = arith.constant 0.000000e+00 : f32
    %96 = vector.broadcast %cst_85 : f32 to vector<16x256xf32>
    %97 = arith.cmpf oge, %95, %96 : vector<16x256xf32>
    %cst_86 = arith.constant 2.000000e-01 : f32
    %98 = vector.broadcast %cst_86 : f32 to vector<16x256xf32>
    %99 = arith.mulf %98, %95 : vector<16x256xf32>
    %100 = arith.select %97, %95, %99 : vector<16x256xi1>, vector<16x256xf32>
    %101 = arith.truncf %100 : vector<16x256xf32> to vector<16x256xbf16>
    %c0_87 = arith.constant 0 : index
    %c0_88 = arith.constant 0 : index
    %c0_89 = arith.constant 0 : index
    %102 = vector.load %arg8[%c0_87, %c0_88, %c0_89] : memref<2x16x256xbf16, #tpu.memory_space<vmem>>, vector<1x16x256xbf16>
    %103 = vector.shape_cast %102 : vector<1x16x256xbf16> to vector<16x256xbf16>
    %104 = vector.shape_cast %101 : vector<16x256xbf16> to vector<1x16x256xbf16>
    tpu.vector_store %arg8[%c0_87, %c0_88, %c0_89], %104 {strides = array<i32>} : memref<2x16x256xbf16, #tpu.memory_space<vmem>>, vector<1x16x256xbf16>,
    %105 = vector.broadcast %89 : vector<1x256xf32> to vector<16x256xf32>
    %106 = arith.mulf %45, %105 : vector<16x256xf32>
    %107 = vector.broadcast %91 : vector<1x256xf32> to vector<16x256xf32>
    %108 = arith.addf %106, %107 : vector<16x256xf32>
    %cst_90 = arith.constant 0.000000e+00 : f32
    %109 = vector.broadcast %cst_90 : f32 to vector<16x256xf32>
    %110 = arith.cmpf oge, %108, %109 : vector<16x256xf32>
    %cst_91 = arith.constant 2.000000e-01 : f32
    %111 = vector.broadcast %cst_91 : f32 to vector<16x256xf32>
    %112 = arith.mulf %111, %108 : vector<16x256xf32>
    %113 = arith.select %110, %108, %112 : vector<16x256xi1>, vector<16x256xf32>
    %114 = arith.truncf %113 : vector<16x256xf32> to vector<16x256xbf16>
    %c1_92 = arith.constant 1 : index
    %c0_93 = arith.constant 0 : index
    %c0_94 = arith.constant 0 : index
    %115 = vector.load %arg8[%c1_92, %c0_93, %c0_94] : memref<2x16x256xbf16, #tpu.memory_space<vmem>>, vector<1x16x256xbf16>
    %116 = vector.shape_cast %115 : vector<1x16x256xbf16> to vector<16x256xbf16>
    %117 = vector.shape_cast %114 : vector<16x256xbf16> to vector<1x16x256xbf16>
    tpu.vector_store %arg8[%c1_92, %c0_93, %c0_94], %117 {strides = array<i32>} : memref<2x16x256xbf16, #tpu.memory_space<vmem>>, vector<1x16x256xbf16>,
    return
  }
  func.func @transform_0(%arg0: i32) -> (i32, i32, i32) {
    %c0_i32 = arith.constant 0 : i32
    %c0_i32_0 = arith.constant 0 : i32
    %c0_i32_1 = arith.constant 0 : i32
    %c0_i32_2 = arith.constant 0 : i32
    return %c0_i32, %c0_i32_0, %c0_i32_1 : i32, i32, i32
  }
  func.func @transform_1(%arg0: i32) -> (i32, i32, i32) {
    %c0_i32 = arith.constant 0 : i32
    %c0_i32_0 = arith.constant 0 : i32
    %c0_i32_1 = arith.constant 0 : i32
    %c0_i32_2 = arith.constant 0 : i32
    return %c0_i32, %c0_i32_0, %c0_i32_1 : i32, i32, i32
  }
  func.func @transform_2(%arg0: i32) -> (i32, i32, i32) {
    %c0_i32 = arith.constant 0 : i32
    %c0_i32_0 = arith.constant 0 : i32
    %c0_i32_1 = arith.constant 0 : i32
    %c0_i32_2 = arith.constant 0 : i32
    return %c0_i32, %c0_i32_0, %c0_i32_1 : i32, i32, i32
  }
  func.func @transform_3(%arg0: i32) -> (i32, i32) {
    %c0_i32 = arith.constant 0 : i32
    %c0_i32_0 = arith.constant 0 : i32
    %c0_i32_1 = arith.constant 0 : i32
    return %c0_i32, %c0_i32_0 : i32, i32
  }
  func.func @transform_4(%arg0: i32) -> (i32, i32) {
    %c0_i32 = arith.constant 0 : i32
    %c0_i32_0 = arith.constant 0 : i32
    %c0_i32_1 = arith.constant 0 : i32
    return %c0_i32, %c0_i32_0 : i32, i32
  }
  func.func @transform_5(%arg0: i32) -> (i32, i32) {
    %c0_i32 = arith.constant 0 : i32
    %c0_i32_0 = arith.constant 0 : i32
    %c0_i32_1 = arith.constant 0 : i32
    return %c0_i32, %c0_i32_0 : i32, i32
  }
  func.func @transform_6(%arg0: i32) -> (i32, i32) {
    %c0_i32 = arith.constant 0 : i32
    %c0_i32_0 = arith.constant 0 : i32
    %c0_i32_1 = arith.constant 0 : i32
    return %c0_i32, %c0_i32_0 : i32, i32
  }
  func.func @transform_7(%arg0: i32) -> (i32, i32, i32) {
    %c0_i32 = arith.constant 0 : i32
    %c0_i32_0 = arith.constant 0 : i32
    %c0_i32_1 = arith.constant 0 : i32
    %c0_i32_2 = arith.constant 0 : i32
    return %c0_i32, %c0_i32_0, %c0_i32_1 : i32, i32, i32
  }
}

module attributes {stable_mosaic.version = 11 : i64} {
  func.func @_conv_bn_lrelu_kernel(%arg0: i32, %arg1: memref<2x9x288xbf16, #tpu.memory_space<vmem>>, %arg2: memref<2x9x288xbf16, #tpu.memory_space<vmem>>, %arg3: memref<4x288x256xbf16, #tpu.memory_space<vmem>>, %arg4: memref<256x32xf32, #tpu.memory_space<vmem>>, %arg5: memref<32x256xf32, #tpu.memory_space<vmem>>, %arg6: memref<1x32xf32, #tpu.memory_space<vmem>>, %arg7: memref<1x32xf32, #tpu.memory_space<vmem>>, %arg8: memref<2x8x256xbf16, #tpu.memory_space<vmem>>) attributes {dimension_semantics = [#tpu.dimension_semantics<arbitrary>], iteration_bounds = array<i64: 1>, scalar_prefetch = 0 : i64, scratch_operands = 0 : i64, tpu.core_type = #tpu.core_type<tc>, window_params = [{pipeline_mode = #tpu.pipeline_mode<synchronous>, transform_indices = @transform_0, window_bounds = array<i64: 2, 9, 288>}, {pipeline_mode = #tpu.pipeline_mode<synchronous>, transform_indices = @transform_1, window_bounds = array<i64: 2, 9, 288>}, {pipeline_mode = #tpu.pipeline_mode<synchronous>, transform_indices = @transform_2, window_bounds = array<i64: 4, 288, 256>}, {pipeline_mode = #tpu.pipeline_mode<synchronous>, transform_indices = @transform_3, window_bounds = array<i64: 256, 32>}, {pipeline_mode = #tpu.pipeline_mode<synchronous>, transform_indices = @transform_4, window_bounds = array<i64: 32, 256>}, {pipeline_mode = #tpu.pipeline_mode<synchronous>, transform_indices = @transform_5, window_bounds = array<i64: 1, 32>}, {pipeline_mode = #tpu.pipeline_mode<synchronous>, transform_indices = @transform_6, window_bounds = array<i64: 1, 32>}, {pipeline_mode = #tpu.pipeline_mode<synchronous>, transform_indices = @transform_7, window_bounds = array<i64: 2, 8, 256>}]} {
    %c0 = arith.constant 0 : index
    %c0_0 = arith.constant 0 : index
    %c0_1 = arith.constant 0 : index
    %0 = vector.load %arg1[%c0, %c0_0, %c0_1] : memref<2x9x288xbf16, #tpu.memory_space<vmem>>, vector<1x8x288xbf16>
    %1 = vector.shape_cast %0 : vector<1x8x288xbf16> to vector<8x288xbf16>
    %c0_2 = arith.constant 0 : index
    %c0_3 = arith.constant 0 : index
    %c0_4 = arith.constant 0 : index
    %2 = vector.load %arg3[%c0_2, %c0_3, %c0_4] : memref<4x288x256xbf16, #tpu.memory_space<vmem>>, vector<1x288x256xbf16>
    %3 = vector.shape_cast %2 : vector<1x288x256xbf16> to vector<288x256xbf16>
    %cst = arith.constant dense<0.000000e+00> : vector<8x256xf32>
    %4 = tpu.matmul %1, %3, %cst {dimension_numbers = #tpu.dot_dimension_numbers<[1], [0], [0], [1], [0, 0, 1, 1], [], []>} : vector<8x288xbf16>, vector<288x256xbf16>, vector<8x256xf32> -> vector<8x256xf32>
    %c0_5 = arith.constant 0 : index
    %c0_6 = arith.constant 0 : index
    %c0_7 = arith.constant 0 : index
    %5 = vector.load %arg2[%c0_5, %c0_6, %c0_7] : memref<2x9x288xbf16, #tpu.memory_space<vmem>>, vector<1x8x288xbf16>
    %6 = vector.shape_cast %5 : vector<1x8x288xbf16> to vector<8x288xbf16>
    %c1 = arith.constant 1 : index
    %c0_8 = arith.constant 0 : index
    %c0_9 = arith.constant 0 : index
    %7 = vector.load %arg3[%c1, %c0_8, %c0_9] : memref<4x288x256xbf16, #tpu.memory_space<vmem>>, vector<1x288x256xbf16>
    %8 = vector.shape_cast %7 : vector<1x288x256xbf16> to vector<288x256xbf16>
    %cst_10 = arith.constant dense<0.000000e+00> : vector<8x256xf32>
    %9 = tpu.matmul %6, %8, %cst_10 {dimension_numbers = #tpu.dot_dimension_numbers<[1], [0], [0], [1], [0, 0, 1, 1], [], []>} : vector<8x288xbf16>, vector<288x256xbf16>, vector<8x256xf32> -> vector<8x256xf32>
    %10 = arith.addf %4, %9 : vector<8x256xf32>
    %c0_11 = arith.constant 0 : index
    %c1_12 = arith.constant 1 : index
    %c0_13 = arith.constant 0 : index
    %11 = vector.load %arg1[%c0_11, %c1_12, %c0_13] : memref<2x9x288xbf16, #tpu.memory_space<vmem>>, vector<1x8x288xbf16>
    %12 = vector.shape_cast %11 : vector<1x8x288xbf16> to vector<8x288xbf16>
    %c2 = arith.constant 2 : index
    %c0_14 = arith.constant 0 : index
    %c0_15 = arith.constant 0 : index
    %13 = vector.load %arg3[%c2, %c0_14, %c0_15] : memref<4x288x256xbf16, #tpu.memory_space<vmem>>, vector<1x288x256xbf16>
    %14 = vector.shape_cast %13 : vector<1x288x256xbf16> to vector<288x256xbf16>
    %cst_16 = arith.constant dense<0.000000e+00> : vector<8x256xf32>
    %15 = tpu.matmul %12, %14, %cst_16 {dimension_numbers = #tpu.dot_dimension_numbers<[1], [0], [0], [1], [0, 0, 1, 1], [], []>} : vector<8x288xbf16>, vector<288x256xbf16>, vector<8x256xf32> -> vector<8x256xf32>
    %16 = arith.addf %10, %15 : vector<8x256xf32>
    %c0_17 = arith.constant 0 : index
    %c1_18 = arith.constant 1 : index
    %c0_19 = arith.constant 0 : index
    %17 = vector.load %arg2[%c0_17, %c1_18, %c0_19] : memref<2x9x288xbf16, #tpu.memory_space<vmem>>, vector<1x8x288xbf16>
    %18 = vector.shape_cast %17 : vector<1x8x288xbf16> to vector<8x288xbf16>
    %c3 = arith.constant 3 : index
    %c0_20 = arith.constant 0 : index
    %c0_21 = arith.constant 0 : index
    %19 = vector.load %arg3[%c3, %c0_20, %c0_21] : memref<4x288x256xbf16, #tpu.memory_space<vmem>>, vector<1x288x256xbf16>
    %20 = vector.shape_cast %19 : vector<1x288x256xbf16> to vector<288x256xbf16>
    %cst_22 = arith.constant dense<0.000000e+00> : vector<8x256xf32>
    %21 = tpu.matmul %18, %20, %cst_22 {dimension_numbers = #tpu.dot_dimension_numbers<[1], [0], [0], [1], [0, 0, 1, 1], [], []>} : vector<8x288xbf16>, vector<288x256xbf16>, vector<8x256xf32> -> vector<8x256xf32>
    %22 = arith.addf %16, %21 : vector<8x256xf32>
    %c1_23 = arith.constant 1 : index
    %c0_24 = arith.constant 0 : index
    %c0_25 = arith.constant 0 : index
    %23 = vector.load %arg1[%c1_23, %c0_24, %c0_25] : memref<2x9x288xbf16, #tpu.memory_space<vmem>>, vector<1x8x288xbf16>
    %24 = vector.shape_cast %23 : vector<1x8x288xbf16> to vector<8x288xbf16>
    %c0_26 = arith.constant 0 : index
    %c0_27 = arith.constant 0 : index
    %c0_28 = arith.constant 0 : index
    %25 = vector.load %arg3[%c0_26, %c0_27, %c0_28] : memref<4x288x256xbf16, #tpu.memory_space<vmem>>, vector<1x288x256xbf16>
    %26 = vector.shape_cast %25 : vector<1x288x256xbf16> to vector<288x256xbf16>
    %cst_29 = arith.constant dense<0.000000e+00> : vector<8x256xf32>
    %27 = tpu.matmul %24, %26, %cst_29 {dimension_numbers = #tpu.dot_dimension_numbers<[1], [0], [0], [1], [0, 0, 1, 1], [], []>} : vector<8x288xbf16>, vector<288x256xbf16>, vector<8x256xf32> -> vector<8x256xf32>
    %c1_30 = arith.constant 1 : index
    %c0_31 = arith.constant 0 : index
    %c0_32 = arith.constant 0 : index
    %28 = vector.load %arg2[%c1_30, %c0_31, %c0_32] : memref<2x9x288xbf16, #tpu.memory_space<vmem>>, vector<1x8x288xbf16>
    %29 = vector.shape_cast %28 : vector<1x8x288xbf16> to vector<8x288xbf16>
    %c1_33 = arith.constant 1 : index
    %c0_34 = arith.constant 0 : index
    %c0_35 = arith.constant 0 : index
    %30 = vector.load %arg3[%c1_33, %c0_34, %c0_35] : memref<4x288x256xbf16, #tpu.memory_space<vmem>>, vector<1x288x256xbf16>
    %31 = vector.shape_cast %30 : vector<1x288x256xbf16> to vector<288x256xbf16>
    %cst_36 = arith.constant dense<0.000000e+00> : vector<8x256xf32>
    %32 = tpu.matmul %29, %31, %cst_36 {dimension_numbers = #tpu.dot_dimension_numbers<[1], [0], [0], [1], [0, 0, 1, 1], [], []>} : vector<8x288xbf16>, vector<288x256xbf16>, vector<8x256xf32> -> vector<8x256xf32>
    %33 = arith.addf %27, %32 : vector<8x256xf32>
    %c1_37 = arith.constant 1 : index
    %c1_38 = arith.constant 1 : index
    %c0_39 = arith.constant 0 : index
    %34 = vector.load %arg1[%c1_37, %c1_38, %c0_39] : memref<2x9x288xbf16, #tpu.memory_space<vmem>>, vector<1x8x288xbf16>
    %35 = vector.shape_cast %34 : vector<1x8x288xbf16> to vector<8x288xbf16>
    %c2_40 = arith.constant 2 : index
    %c0_41 = arith.constant 0 : index
    %c0_42 = arith.constant 0 : index
    %36 = vector.load %arg3[%c2_40, %c0_41, %c0_42] : memref<4x288x256xbf16, #tpu.memory_space<vmem>>, vector<1x288x256xbf16>
    %37 = vector.shape_cast %36 : vector<1x288x256xbf16> to vector<288x256xbf16>
    %cst_43 = arith.constant dense<0.000000e+00> : vector<8x256xf32>
    %38 = tpu.matmul %35, %37, %cst_43 {dimension_numbers = #tpu.dot_dimension_numbers<[1], [0], [0], [1], [0, 0, 1, 1], [], []>} : vector<8x288xbf16>, vector<288x256xbf16>, vector<8x256xf32> -> vector<8x256xf32>
    %39 = arith.addf %33, %38 : vector<8x256xf32>
    %c1_44 = arith.constant 1 : index
    %c1_45 = arith.constant 1 : index
    %c0_46 = arith.constant 0 : index
    %40 = vector.load %arg2[%c1_44, %c1_45, %c0_46] : memref<2x9x288xbf16, #tpu.memory_space<vmem>>, vector<1x8x288xbf16>
    %41 = vector.shape_cast %40 : vector<1x8x288xbf16> to vector<8x288xbf16>
    %c3_47 = arith.constant 3 : index
    %c0_48 = arith.constant 0 : index
    %c0_49 = arith.constant 0 : index
    %42 = vector.load %arg3[%c3_47, %c0_48, %c0_49] : memref<4x288x256xbf16, #tpu.memory_space<vmem>>, vector<1x288x256xbf16>
    %43 = vector.shape_cast %42 : vector<1x288x256xbf16> to vector<288x256xbf16>
    %cst_50 = arith.constant dense<0.000000e+00> : vector<8x256xf32>
    %44 = tpu.matmul %41, %43, %cst_50 {dimension_numbers = #tpu.dot_dimension_numbers<[1], [0], [0], [1], [0, 0, 1, 1], [], []>} : vector<8x288xbf16>, vector<288x256xbf16>, vector<8x256xf32> -> vector<8x256xf32>
    %45 = arith.addf %39, %44 : vector<8x256xf32>
    %cst_51 = arith.constant 0.000000e+00 : f32
    %46 = vector.broadcast %cst_51 : f32 to vector<1x32xf32>
    %cst_52 = arith.constant dense<0.000000e+00> : vector<256xf32>
    %47 = vector.multi_reduction <add>, %22, %cst_52 [0] : vector<8x256xf32> to vector<256xf32>
    %48 = vector.shape_cast %47 : vector<256xf32> to vector<1x256xf32>
    %c0_53 = arith.constant 0 : index
    %c0_54 = arith.constant 0 : index
    %49 = vector.load %arg4[%c0_53, %c0_54] : memref<256x32xf32, #tpu.memory_space<vmem>>, vector<256x32xf32>
    %cst_55 = arith.constant dense<0.000000e+00> : vector<1x32xf32>
    %50 = tpu.matmul %48, %49, %cst_55 {dimension_numbers = #tpu.dot_dimension_numbers<[1], [0], [0], [1], [0, 0, 1, 1], [], []>} : vector<1x256xf32>, vector<256x32xf32>, vector<1x32xf32> -> vector<1x32xf32>
    %51 = arith.addf %46, %50 : vector<1x32xf32>
    %cst_56 = arith.constant dense<0.000000e+00> : vector<256xf32>
    %52 = vector.multi_reduction <add>, %45, %cst_56 [0] : vector<8x256xf32> to vector<256xf32>
    %53 = vector.shape_cast %52 : vector<256xf32> to vector<1x256xf32>
    %c0_57 = arith.constant 0 : index
    %c0_58 = arith.constant 0 : index
    %54 = vector.load %arg4[%c0_57, %c0_58] : memref<256x32xf32, #tpu.memory_space<vmem>>, vector<256x32xf32>
    %cst_59 = arith.constant dense<0.000000e+00> : vector<1x32xf32>
    %55 = tpu.matmul %53, %54, %cst_59 {dimension_numbers = #tpu.dot_dimension_numbers<[1], [0], [0], [1], [0, 0, 1, 1], [], []>} : vector<1x256xf32>, vector<256x32xf32>, vector<1x32xf32> -> vector<1x32xf32>
    %56 = arith.addf %51, %55 : vector<1x32xf32>
    %cst_60 = arith.constant 1.280000e+02 : f32
    %57 = vector.broadcast %cst_60 : f32 to vector<1x32xf32>
    %58 = arith.divf %56, %57 : vector<1x32xf32>
    %c0_61 = arith.constant 0 : index
    %c0_62 = arith.constant 0 : index
    %59 = vector.load %arg5[%c0_61, %c0_62] : memref<32x256xf32, #tpu.memory_space<vmem>>, vector<32x256xf32>
    %cst_63 = arith.constant dense<0.000000e+00> : vector<1x256xf32>
    %60 = tpu.matmul %58, %59, %cst_63 {dimension_numbers = #tpu.dot_dimension_numbers<[1], [0], [0], [1], [0, 0, 1, 1], [], []>} : vector<1x32xf32>, vector<32x256xf32>, vector<1x256xf32> -> vector<1x256xf32>
    %cst_64 = arith.constant 0.000000e+00 : f32
    %61 = vector.broadcast %cst_64 : f32 to vector<1x32xf32>
    %62 = vector.broadcast %60 : vector<1x256xf32> to vector<8x256xf32>
    %63 = arith.subf %22, %62 : vector<8x256xf32>
    %64 = arith.mulf %63, %63 : vector<8x256xf32>
    %cst_65 = arith.constant dense<0.000000e+00> : vector<256xf32>
    %65 = vector.multi_reduction <add>, %64, %cst_65 [0] : vector<8x256xf32> to vector<256xf32>
    %66 = vector.shape_cast %65 : vector<256xf32> to vector<1x256xf32>
    %c0_66 = arith.constant 0 : index
    %c0_67 = arith.constant 0 : index
    %67 = vector.load %arg4[%c0_66, %c0_67] : memref<256x32xf32, #tpu.memory_space<vmem>>, vector<256x32xf32>
    %cst_68 = arith.constant dense<0.000000e+00> : vector<1x32xf32>
    %68 = tpu.matmul %66, %67, %cst_68 {dimension_numbers = #tpu.dot_dimension_numbers<[1], [0], [0], [1], [0, 0, 1, 1], [], []>} : vector<1x256xf32>, vector<256x32xf32>, vector<1x32xf32> -> vector<1x32xf32>
    %69 = arith.addf %61, %68 : vector<1x32xf32>
    %70 = vector.broadcast %60 : vector<1x256xf32> to vector<8x256xf32>
    %71 = arith.subf %45, %70 : vector<8x256xf32>
    %72 = arith.mulf %71, %71 : vector<8x256xf32>
    %cst_69 = arith.constant dense<0.000000e+00> : vector<256xf32>
    %73 = vector.multi_reduction <add>, %72, %cst_69 [0] : vector<8x256xf32> to vector<256xf32>
    %74 = vector.shape_cast %73 : vector<256xf32> to vector<1x256xf32>
    %c0_70 = arith.constant 0 : index
    %c0_71 = arith.constant 0 : index
    %75 = vector.load %arg4[%c0_70, %c0_71] : memref<256x32xf32, #tpu.memory_space<vmem>>, vector<256x32xf32>
    %cst_72 = arith.constant dense<0.000000e+00> : vector<1x32xf32>
    %76 = tpu.matmul %74, %75, %cst_72 {dimension_numbers = #tpu.dot_dimension_numbers<[1], [0], [0], [1], [0, 0, 1, 1], [], []>} : vector<1x256xf32>, vector<256x32xf32>, vector<1x32xf32> -> vector<1x32xf32>
    %77 = arith.addf %69, %76 : vector<1x32xf32>
    %cst_73 = arith.constant 1.280000e+02 : f32
    %78 = vector.broadcast %cst_73 : f32 to vector<1x32xf32>
    %79 = arith.divf %77, %78 : vector<1x32xf32>
    %c0_74 = arith.constant 0 : index
    %c0_75 = arith.constant 0 : index
    %80 = vector.load %arg6[%c0_74, %c0_75] : memref<1x32xf32, #tpu.memory_space<vmem>>, vector<1x32xf32>
    %cst_76 = arith.constant 9.99999974E-6 : f32
    %81 = vector.broadcast %cst_76 : f32 to vector<1x32xf32>
    %82 = arith.addf %79, %81 : vector<1x32xf32>
    %83 = math.rsqrt %82 : vector<1x32xf32>
    %84 = arith.mulf %80, %83 : vector<1x32xf32>
    %c0_77 = arith.constant 0 : index
    %c0_78 = arith.constant 0 : index
    %85 = vector.load %arg7[%c0_77, %c0_78] : memref<1x32xf32, #tpu.memory_space<vmem>>, vector<1x32xf32>
    %86 = arith.mulf %58, %84 : vector<1x32xf32>
    %87 = arith.subf %85, %86 : vector<1x32xf32>
    %c0_79 = arith.constant 0 : index
    %c0_80 = arith.constant 0 : index
    %88 = vector.load %arg5[%c0_79, %c0_80] : memref<32x256xf32, #tpu.memory_space<vmem>>, vector<32x256xf32>
    %cst_81 = arith.constant dense<0.000000e+00> : vector<1x256xf32>
    %89 = tpu.matmul %84, %88, %cst_81 {dimension_numbers = #tpu.dot_dimension_numbers<[1], [0], [0], [1], [0, 0, 1, 1], [], []>} : vector<1x32xf32>, vector<32x256xf32>, vector<1x256xf32> -> vector<1x256xf32>
    %c0_82 = arith.constant 0 : index
    %c0_83 = arith.constant 0 : index
    %90 = vector.load %arg5[%c0_82, %c0_83] : memref<32x256xf32, #tpu.memory_space<vmem>>, vector<32x256xf32>
    %cst_84 = arith.constant dense<0.000000e+00> : vector<1x256xf32>
    %91 = tpu.matmul %87, %90, %cst_84 {dimension_numbers = #tpu.dot_dimension_numbers<[1], [0], [0], [1], [0, 0, 1, 1], [], []>} : vector<1x32xf32>, vector<32x256xf32>, vector<1x256xf32> -> vector<1x256xf32>
    %92 = vector.broadcast %89 : vector<1x256xf32> to vector<8x256xf32>
    %93 = arith.mulf %22, %92 : vector<8x256xf32>
    %94 = vector.broadcast %91 : vector<1x256xf32> to vector<8x256xf32>
    %95 = arith.addf %93, %94 : vector<8x256xf32>
    %cst_85 = arith.constant 0.000000e+00 : f32
    %96 = vector.broadcast %cst_85 : f32 to vector<8x256xf32>
    %97 = arith.cmpf oge, %95, %96 : vector<8x256xf32>
    %cst_86 = arith.constant 2.000000e-01 : f32
    %98 = vector.broadcast %cst_86 : f32 to vector<8x256xf32>
    %99 = arith.mulf %98, %95 : vector<8x256xf32>
    %100 = arith.select %97, %95, %99 : vector<8x256xi1>, vector<8x256xf32>
    %101 = arith.truncf %100 : vector<8x256xf32> to vector<8x256xbf16>
    %c0_87 = arith.constant 0 : index
    %c0_88 = arith.constant 0 : index
    %c0_89 = arith.constant 0 : index
    %102 = vector.load %arg8[%c0_87, %c0_88, %c0_89] : memref<2x8x256xbf16, #tpu.memory_space<vmem>>, vector<1x8x256xbf16>
    %103 = vector.shape_cast %102 : vector<1x8x256xbf16> to vector<8x256xbf16>
    %104 = vector.shape_cast %101 : vector<8x256xbf16> to vector<1x8x256xbf16>
    tpu.vector_store %arg8[%c0_87, %c0_88, %c0_89], %104 {strides = array<i32>} : memref<2x8x256xbf16, #tpu.memory_space<vmem>>, vector<1x8x256xbf16>,
    %105 = vector.broadcast %89 : vector<1x256xf32> to vector<8x256xf32>
    %106 = arith.mulf %45, %105 : vector<8x256xf32>
    %107 = vector.broadcast %91 : vector<1x256xf32> to vector<8x256xf32>
    %108 = arith.addf %106, %107 : vector<8x256xf32>
    %cst_90 = arith.constant 0.000000e+00 : f32
    %109 = vector.broadcast %cst_90 : f32 to vector<8x256xf32>
    %110 = arith.cmpf oge, %108, %109 : vector<8x256xf32>
    %cst_91 = arith.constant 2.000000e-01 : f32
    %111 = vector.broadcast %cst_91 : f32 to vector<8x256xf32>
    %112 = arith.mulf %111, %108 : vector<8x256xf32>
    %113 = arith.select %110, %108, %112 : vector<8x256xi1>, vector<8x256xf32>
    %114 = arith.truncf %113 : vector<8x256xf32> to vector<8x256xbf16>
    %c1_92 = arith.constant 1 : index
    %c0_93 = arith.constant 0 : index
    %c0_94 = arith.constant 0 : index
    %115 = vector.load %arg8[%c1_92, %c0_93, %c0_94] : memref<2x8x256xbf16, #tpu.memory_space<vmem>>, vector<1x8x256xbf16>
    %116 = vector.shape_cast %115 : vector<1x8x256xbf16> to vector<8x256xbf16>
    %117 = vector.shape_cast %114 : vector<8x256xbf16> to vector<1x8x256xbf16>
    tpu.vector_store %arg8[%c1_92, %c0_93, %c0_94], %117 {strides = array<i32>} : memref<2x8x256xbf16, #tpu.memory_space<vmem>>, vector<1x8x256xbf16>,
    return
  }
  func.func @transform_0(%arg0: i32) -> (i32, i32, i32) {
    %c0_i32 = arith.constant 0 : i32
    %c0_i32_0 = arith.constant 0 : i32
    %c0_i32_1 = arith.constant 0 : i32
    %c0_i32_2 = arith.constant 0 : i32
    return %c0_i32, %c0_i32_0, %c0_i32_1 : i32, i32, i32
  }
  func.func @transform_1(%arg0: i32) -> (i32, i32, i32) {
    %c0_i32 = arith.constant 0 : i32
    %c0_i32_0 = arith.constant 0 : i32
    %c0_i32_1 = arith.constant 0 : i32
    %c0_i32_2 = arith.constant 0 : i32
    return %c0_i32, %c0_i32_0, %c0_i32_1 : i32, i32, i32
  }
  func.func @transform_2(%arg0: i32) -> (i32, i32, i32) {
    %c0_i32 = arith.constant 0 : i32
    %c0_i32_0 = arith.constant 0 : i32
    %c0_i32_1 = arith.constant 0 : i32
    %c0_i32_2 = arith.constant 0 : i32
    return %c0_i32, %c0_i32_0, %c0_i32_1 : i32, i32, i32
  }
  func.func @transform_3(%arg0: i32) -> (i32, i32) {
    %c0_i32 = arith.constant 0 : i32
    %c0_i32_0 = arith.constant 0 : i32
    %c0_i32_1 = arith.constant 0 : i32
    return %c0_i32, %c0_i32_0 : i32, i32
  }
  func.func @transform_4(%arg0: i32) -> (i32, i32) {
    %c0_i32 = arith.constant 0 : i32
    %c0_i32_0 = arith.constant 0 : i32
    %c0_i32_1 = arith.constant 0 : i32
    return %c0_i32, %c0_i32_0 : i32, i32
  }
  func.func @transform_5(%arg0: i32) -> (i32, i32) {
    %c0_i32 = arith.constant 0 : i32
    %c0_i32_0 = arith.constant 0 : i32
    %c0_i32_1 = arith.constant 0 : i32
    return %c0_i32, %c0_i32_0 : i32, i32
  }
  func.func @transform_6(%arg0: i32) -> (i32, i32) {
    %c0_i32 = arith.constant 0 : i32
    %c0_i32_0 = arith.constant 0 : i32
    %c0_i32_1 = arith.constant 0 : i32
    return %c0_i32, %c0_i32_0 : i32, i32
  }
  func.func @transform_7(%arg0: i32) -> (i32, i32, i32) {
    %c0_i32 = arith.constant 0 : i32
    %c0_i32_0 = arith.constant 0 : i32
    %c0_i32_1 = arith.constant 0 : i32
    %c0_i32_2 = arith.constant 0 : i32
    return %c0_i32, %c0_i32_0, %c0_i32_1 : i32, i32, i32
  }
}

module attributes {stable_mosaic.version = 11 : i64} {
  func.func @_conv_bn_lrelu_head_kernel(%arg0: i32, %arg1: memref<2x5x320xbf16, #tpu.memory_space<vmem>>, %arg2: memref<2x5x320xbf16, #tpu.memory_space<vmem>>, %arg3: memref<4x320x256xbf16, #tpu.memory_space<vmem>>, %arg4: memref<256x64xf32, #tpu.memory_space<vmem>>, %arg5: memref<64x256xf32, #tpu.memory_space<vmem>>, %arg6: memref<1x64xf32, #tpu.memory_space<vmem>>, %arg7: memref<1x64xf32, #tpu.memory_space<vmem>>, %arg8: memref<4x256xf32, #tpu.memory_space<vmem>>, %arg9: memref<2x1xf32, #tpu.memory_space<vmem>>) attributes {dimension_semantics = [#tpu.dimension_semantics<arbitrary>], iteration_bounds = array<i64: 1>, scalar_prefetch = 0 : i64, scratch_operands = 0 : i64, tpu.core_type = #tpu.core_type<tc>, window_params = [{pipeline_mode = #tpu.pipeline_mode<synchronous>, transform_indices = @transform_0, window_bounds = array<i64: 2, 5, 320>}, {pipeline_mode = #tpu.pipeline_mode<synchronous>, transform_indices = @transform_1, window_bounds = array<i64: 2, 5, 320>}, {pipeline_mode = #tpu.pipeline_mode<synchronous>, transform_indices = @transform_2, window_bounds = array<i64: 4, 320, 256>}, {pipeline_mode = #tpu.pipeline_mode<synchronous>, transform_indices = @transform_3, window_bounds = array<i64: 256, 64>}, {pipeline_mode = #tpu.pipeline_mode<synchronous>, transform_indices = @transform_4, window_bounds = array<i64: 64, 256>}, {pipeline_mode = #tpu.pipeline_mode<synchronous>, transform_indices = @transform_5, window_bounds = array<i64: 1, 64>}, {pipeline_mode = #tpu.pipeline_mode<synchronous>, transform_indices = @transform_6, window_bounds = array<i64: 1, 64>}, {pipeline_mode = #tpu.pipeline_mode<synchronous>, transform_indices = @transform_7, window_bounds = array<i64: 4, 256>}, {pipeline_mode = #tpu.pipeline_mode<synchronous>, transform_indices = @transform_8, window_bounds = array<i64: 2, 1>}]} {
    %c0 = arith.constant 0 : index
    %c0_0 = arith.constant 0 : index
    %c0_1 = arith.constant 0 : index
    %0 = vector.load %arg1[%c0, %c0_0, %c0_1] : memref<2x5x320xbf16, #tpu.memory_space<vmem>>, vector<1x4x320xbf16>
    %1 = vector.shape_cast %0 : vector<1x4x320xbf16> to vector<4x320xbf16>
    %c0_2 = arith.constant 0 : index
    %c0_3 = arith.constant 0 : index
    %c0_4 = arith.constant 0 : index
    %2 = vector.load %arg3[%c0_2, %c0_3, %c0_4] : memref<4x320x256xbf16, #tpu.memory_space<vmem>>, vector<1x320x256xbf16>
    %3 = vector.shape_cast %2 : vector<1x320x256xbf16> to vector<320x256xbf16>
    %cst = arith.constant dense<0.000000e+00> : vector<4x256xf32>
    %4 = tpu.matmul %1, %3, %cst {dimension_numbers = #tpu.dot_dimension_numbers<[1], [0], [0], [1], [0, 0, 1, 1], [], []>} : vector<4x320xbf16>, vector<320x256xbf16>, vector<4x256xf32> -> vector<4x256xf32>
    %c0_5 = arith.constant 0 : index
    %c0_6 = arith.constant 0 : index
    %c0_7 = arith.constant 0 : index
    %5 = vector.load %arg2[%c0_5, %c0_6, %c0_7] : memref<2x5x320xbf16, #tpu.memory_space<vmem>>, vector<1x4x320xbf16>
    %6 = vector.shape_cast %5 : vector<1x4x320xbf16> to vector<4x320xbf16>
    %c1 = arith.constant 1 : index
    %c0_8 = arith.constant 0 : index
    %c0_9 = arith.constant 0 : index
    %7 = vector.load %arg3[%c1, %c0_8, %c0_9] : memref<4x320x256xbf16, #tpu.memory_space<vmem>>, vector<1x320x256xbf16>
    %8 = vector.shape_cast %7 : vector<1x320x256xbf16> to vector<320x256xbf16>
    %cst_10 = arith.constant dense<0.000000e+00> : vector<4x256xf32>
    %9 = tpu.matmul %6, %8, %cst_10 {dimension_numbers = #tpu.dot_dimension_numbers<[1], [0], [0], [1], [0, 0, 1, 1], [], []>} : vector<4x320xbf16>, vector<320x256xbf16>, vector<4x256xf32> -> vector<4x256xf32>
    %10 = arith.addf %4, %9 : vector<4x256xf32>
    %c0_11 = arith.constant 0 : index
    %c1_12 = arith.constant 1 : index
    %c0_13 = arith.constant 0 : index
    %11 = vector.load %arg1[%c0_11, %c1_12, %c0_13] : memref<2x5x320xbf16, #tpu.memory_space<vmem>>, vector<1x4x320xbf16>
    %12 = vector.shape_cast %11 : vector<1x4x320xbf16> to vector<4x320xbf16>
    %c2 = arith.constant 2 : index
    %c0_14 = arith.constant 0 : index
    %c0_15 = arith.constant 0 : index
    %13 = vector.load %arg3[%c2, %c0_14, %c0_15] : memref<4x320x256xbf16, #tpu.memory_space<vmem>>, vector<1x320x256xbf16>
    %14 = vector.shape_cast %13 : vector<1x320x256xbf16> to vector<320x256xbf16>
    %cst_16 = arith.constant dense<0.000000e+00> : vector<4x256xf32>
    %15 = tpu.matmul %12, %14, %cst_16 {dimension_numbers = #tpu.dot_dimension_numbers<[1], [0], [0], [1], [0, 0, 1, 1], [], []>} : vector<4x320xbf16>, vector<320x256xbf16>, vector<4x256xf32> -> vector<4x256xf32>
    %16 = arith.addf %10, %15 : vector<4x256xf32>
    %c0_17 = arith.constant 0 : index
    %c1_18 = arith.constant 1 : index
    %c0_19 = arith.constant 0 : index
    %17 = vector.load %arg2[%c0_17, %c1_18, %c0_19] : memref<2x5x320xbf16, #tpu.memory_space<vmem>>, vector<1x4x320xbf16>
    %18 = vector.shape_cast %17 : vector<1x4x320xbf16> to vector<4x320xbf16>
    %c3 = arith.constant 3 : index
    %c0_20 = arith.constant 0 : index
    %c0_21 = arith.constant 0 : index
    %19 = vector.load %arg3[%c3, %c0_20, %c0_21] : memref<4x320x256xbf16, #tpu.memory_space<vmem>>, vector<1x320x256xbf16>
    %20 = vector.shape_cast %19 : vector<1x320x256xbf16> to vector<320x256xbf16>
    %cst_22 = arith.constant dense<0.000000e+00> : vector<4x256xf32>
    %21 = tpu.matmul %18, %20, %cst_22 {dimension_numbers = #tpu.dot_dimension_numbers<[1], [0], [0], [1], [0, 0, 1, 1], [], []>} : vector<4x320xbf16>, vector<320x256xbf16>, vector<4x256xf32> -> vector<4x256xf32>
    %22 = arith.addf %16, %21 : vector<4x256xf32>
    %c1_23 = arith.constant 1 : index
    %c0_24 = arith.constant 0 : index
    %c0_25 = arith.constant 0 : index
    %23 = vector.load %arg1[%c1_23, %c0_24, %c0_25] : memref<2x5x320xbf16, #tpu.memory_space<vmem>>, vector<1x4x320xbf16>
    %24 = vector.shape_cast %23 : vector<1x4x320xbf16> to vector<4x320xbf16>
    %c0_26 = arith.constant 0 : index
    %c0_27 = arith.constant 0 : index
    %c0_28 = arith.constant 0 : index
    %25 = vector.load %arg3[%c0_26, %c0_27, %c0_28] : memref<4x320x256xbf16, #tpu.memory_space<vmem>>, vector<1x320x256xbf16>
    %26 = vector.shape_cast %25 : vector<1x320x256xbf16> to vector<320x256xbf16>
    %cst_29 = arith.constant dense<0.000000e+00> : vector<4x256xf32>
    %27 = tpu.matmul %24, %26, %cst_29 {dimension_numbers = #tpu.dot_dimension_numbers<[1], [0], [0], [1], [0, 0, 1, 1], [], []>} : vector<4x320xbf16>, vector<320x256xbf16>, vector<4x256xf32> -> vector<4x256xf32>
    %c1_30 = arith.constant 1 : index
    %c0_31 = arith.constant 0 : index
    %c0_32 = arith.constant 0 : index
    %28 = vector.load %arg2[%c1_30, %c0_31, %c0_32] : memref<2x5x320xbf16, #tpu.memory_space<vmem>>, vector<1x4x320xbf16>
    %29 = vector.shape_cast %28 : vector<1x4x320xbf16> to vector<4x320xbf16>
    %c1_33 = arith.constant 1 : index
    %c0_34 = arith.constant 0 : index
    %c0_35 = arith.constant 0 : index
    %30 = vector.load %arg3[%c1_33, %c0_34, %c0_35] : memref<4x320x256xbf16, #tpu.memory_space<vmem>>, vector<1x320x256xbf16>
    %31 = vector.shape_cast %30 : vector<1x320x256xbf16> to vector<320x256xbf16>
    %cst_36 = arith.constant dense<0.000000e+00> : vector<4x256xf32>
    %32 = tpu.matmul %29, %31, %cst_36 {dimension_numbers = #tpu.dot_dimension_numbers<[1], [0], [0], [1], [0, 0, 1, 1], [], []>} : vector<4x320xbf16>, vector<320x256xbf16>, vector<4x256xf32> -> vector<4x256xf32>
    %33 = arith.addf %27, %32 : vector<4x256xf32>
    %c1_37 = arith.constant 1 : index
    %c1_38 = arith.constant 1 : index
    %c0_39 = arith.constant 0 : index
    %34 = vector.load %arg1[%c1_37, %c1_38, %c0_39] : memref<2x5x320xbf16, #tpu.memory_space<vmem>>, vector<1x4x320xbf16>
    %35 = vector.shape_cast %34 : vector<1x4x320xbf16> to vector<4x320xbf16>
    %c2_40 = arith.constant 2 : index
    %c0_41 = arith.constant 0 : index
    %c0_42 = arith.constant 0 : index
    %36 = vector.load %arg3[%c2_40, %c0_41, %c0_42] : memref<4x320x256xbf16, #tpu.memory_space<vmem>>, vector<1x320x256xbf16>
    %37 = vector.shape_cast %36 : vector<1x320x256xbf16> to vector<320x256xbf16>
    %cst_43 = arith.constant dense<0.000000e+00> : vector<4x256xf32>
    %38 = tpu.matmul %35, %37, %cst_43 {dimension_numbers = #tpu.dot_dimension_numbers<[1], [0], [0], [1], [0, 0, 1, 1], [], []>} : vector<4x320xbf16>, vector<320x256xbf16>, vector<4x256xf32> -> vector<4x256xf32>
    %39 = arith.addf %33, %38 : vector<4x256xf32>
    %c1_44 = arith.constant 1 : index
    %c1_45 = arith.constant 1 : index
    %c0_46 = arith.constant 0 : index
    %40 = vector.load %arg2[%c1_44, %c1_45, %c0_46] : memref<2x5x320xbf16, #tpu.memory_space<vmem>>, vector<1x4x320xbf16>
    %41 = vector.shape_cast %40 : vector<1x4x320xbf16> to vector<4x320xbf16>
    %c3_47 = arith.constant 3 : index
    %c0_48 = arith.constant 0 : index
    %c0_49 = arith.constant 0 : index
    %42 = vector.load %arg3[%c3_47, %c0_48, %c0_49] : memref<4x320x256xbf16, #tpu.memory_space<vmem>>, vector<1x320x256xbf16>
    %43 = vector.shape_cast %42 : vector<1x320x256xbf16> to vector<320x256xbf16>
    %cst_50 = arith.constant dense<0.000000e+00> : vector<4x256xf32>
    %44 = tpu.matmul %41, %43, %cst_50 {dimension_numbers = #tpu.dot_dimension_numbers<[1], [0], [0], [1], [0, 0, 1, 1], [], []>} : vector<4x320xbf16>, vector<320x256xbf16>, vector<4x256xf32> -> vector<4x256xf32>
    %45 = arith.addf %39, %44 : vector<4x256xf32>
    %cst_51 = arith.constant 0.000000e+00 : f32
    %46 = vector.broadcast %cst_51 : f32 to vector<1x64xf32>
    %cst_52 = arith.constant dense<0.000000e+00> : vector<256xf32>
    %47 = vector.multi_reduction <add>, %22, %cst_52 [0] : vector<4x256xf32> to vector<256xf32>
    %48 = vector.shape_cast %47 : vector<256xf32> to vector<1x256xf32>
    %c0_53 = arith.constant 0 : index
    %c0_54 = arith.constant 0 : index
    %49 = vector.load %arg4[%c0_53, %c0_54] : memref<256x64xf32, #tpu.memory_space<vmem>>, vector<256x64xf32>
    %cst_55 = arith.constant dense<0.000000e+00> : vector<1x64xf32>
    %50 = tpu.matmul %48, %49, %cst_55 {dimension_numbers = #tpu.dot_dimension_numbers<[1], [0], [0], [1], [0, 0, 1, 1], [], []>} : vector<1x256xf32>, vector<256x64xf32>, vector<1x64xf32> -> vector<1x64xf32>
    %51 = arith.addf %46, %50 : vector<1x64xf32>
    %cst_56 = arith.constant dense<0.000000e+00> : vector<256xf32>
    %52 = vector.multi_reduction <add>, %45, %cst_56 [0] : vector<4x256xf32> to vector<256xf32>
    %53 = vector.shape_cast %52 : vector<256xf32> to vector<1x256xf32>
    %c0_57 = arith.constant 0 : index
    %c0_58 = arith.constant 0 : index
    %54 = vector.load %arg4[%c0_57, %c0_58] : memref<256x64xf32, #tpu.memory_space<vmem>>, vector<256x64xf32>
    %cst_59 = arith.constant dense<0.000000e+00> : vector<1x64xf32>
    %55 = tpu.matmul %53, %54, %cst_59 {dimension_numbers = #tpu.dot_dimension_numbers<[1], [0], [0], [1], [0, 0, 1, 1], [], []>} : vector<1x256xf32>, vector<256x64xf32>, vector<1x64xf32> -> vector<1x64xf32>
    %56 = arith.addf %51, %55 : vector<1x64xf32>
    %cst_60 = arith.constant 3.200000e+01 : f32
    %57 = vector.broadcast %cst_60 : f32 to vector<1x64xf32>
    %58 = arith.divf %56, %57 : vector<1x64xf32>
    %c0_61 = arith.constant 0 : index
    %c0_62 = arith.constant 0 : index
    %59 = vector.load %arg5[%c0_61, %c0_62] : memref<64x256xf32, #tpu.memory_space<vmem>>, vector<64x256xf32>
    %cst_63 = arith.constant dense<0.000000e+00> : vector<1x256xf32>
    %60 = tpu.matmul %58, %59, %cst_63 {dimension_numbers = #tpu.dot_dimension_numbers<[1], [0], [0], [1], [0, 0, 1, 1], [], []>} : vector<1x64xf32>, vector<64x256xf32>, vector<1x256xf32> -> vector<1x256xf32>
    %cst_64 = arith.constant 0.000000e+00 : f32
    %61 = vector.broadcast %cst_64 : f32 to vector<1x64xf32>
    %62 = vector.broadcast %60 : vector<1x256xf32> to vector<4x256xf32>
    %63 = arith.subf %22, %62 : vector<4x256xf32>
    %64 = arith.mulf %63, %63 : vector<4x256xf32>
    %cst_65 = arith.constant dense<0.000000e+00> : vector<256xf32>
    %65 = vector.multi_reduction <add>, %64, %cst_65 [0] : vector<4x256xf32> to vector<256xf32>
    %66 = vector.shape_cast %65 : vector<256xf32> to vector<1x256xf32>
    %c0_66 = arith.constant 0 : index
    %c0_67 = arith.constant 0 : index
    %67 = vector.load %arg4[%c0_66, %c0_67] : memref<256x64xf32, #tpu.memory_space<vmem>>, vector<256x64xf32>
    %cst_68 = arith.constant dense<0.000000e+00> : vector<1x64xf32>
    %68 = tpu.matmul %66, %67, %cst_68 {dimension_numbers = #tpu.dot_dimension_numbers<[1], [0], [0], [1], [0, 0, 1, 1], [], []>} : vector<1x256xf32>, vector<256x64xf32>, vector<1x64xf32> -> vector<1x64xf32>
    %69 = arith.addf %61, %68 : vector<1x64xf32>
    %70 = vector.broadcast %60 : vector<1x256xf32> to vector<4x256xf32>
    %71 = arith.subf %45, %70 : vector<4x256xf32>
    %72 = arith.mulf %71, %71 : vector<4x256xf32>
    %cst_69 = arith.constant dense<0.000000e+00> : vector<256xf32>
    %73 = vector.multi_reduction <add>, %72, %cst_69 [0] : vector<4x256xf32> to vector<256xf32>
    %74 = vector.shape_cast %73 : vector<256xf32> to vector<1x256xf32>
    %c0_70 = arith.constant 0 : index
    %c0_71 = arith.constant 0 : index
    %75 = vector.load %arg4[%c0_70, %c0_71] : memref<256x64xf32, #tpu.memory_space<vmem>>, vector<256x64xf32>
    %cst_72 = arith.constant dense<0.000000e+00> : vector<1x64xf32>
    %76 = tpu.matmul %74, %75, %cst_72 {dimension_numbers = #tpu.dot_dimension_numbers<[1], [0], [0], [1], [0, 0, 1, 1], [], []>} : vector<1x256xf32>, vector<256x64xf32>, vector<1x64xf32> -> vector<1x64xf32>
    %77 = arith.addf %69, %76 : vector<1x64xf32>
    %cst_73 = arith.constant 3.200000e+01 : f32
    %78 = vector.broadcast %cst_73 : f32 to vector<1x64xf32>
    %79 = arith.divf %77, %78 : vector<1x64xf32>
    %c0_74 = arith.constant 0 : index
    %c0_75 = arith.constant 0 : index
    %80 = vector.load %arg6[%c0_74, %c0_75] : memref<1x64xf32, #tpu.memory_space<vmem>>, vector<1x64xf32>
    %cst_76 = arith.constant 9.99999974E-6 : f32
    %81 = vector.broadcast %cst_76 : f32 to vector<1x64xf32>
    %82 = arith.addf %79, %81 : vector<1x64xf32>
    %83 = math.rsqrt %82 : vector<1x64xf32>
    %84 = arith.mulf %80, %83 : vector<1x64xf32>
    %c0_77 = arith.constant 0 : index
    %c0_78 = arith.constant 0 : index
    %85 = vector.load %arg7[%c0_77, %c0_78] : memref<1x64xf32, #tpu.memory_space<vmem>>, vector<1x64xf32>
    %86 = arith.mulf %58, %84 : vector<1x64xf32>
    %87 = arith.subf %85, %86 : vector<1x64xf32>
    %c0_79 = arith.constant 0 : index
    %c0_80 = arith.constant 0 : index
    %88 = vector.load %arg5[%c0_79, %c0_80] : memref<64x256xf32, #tpu.memory_space<vmem>>, vector<64x256xf32>
    %cst_81 = arith.constant dense<0.000000e+00> : vector<1x256xf32>
    %89 = tpu.matmul %84, %88, %cst_81 {dimension_numbers = #tpu.dot_dimension_numbers<[1], [0], [0], [1], [0, 0, 1, 1], [], []>} : vector<1x64xf32>, vector<64x256xf32>, vector<1x256xf32> -> vector<1x256xf32>
    %c0_82 = arith.constant 0 : index
    %c0_83 = arith.constant 0 : index
    %90 = vector.load %arg5[%c0_82, %c0_83] : memref<64x256xf32, #tpu.memory_space<vmem>>, vector<64x256xf32>
    %cst_84 = arith.constant dense<0.000000e+00> : vector<1x256xf32>
    %91 = tpu.matmul %87, %90, %cst_84 {dimension_numbers = #tpu.dot_dimension_numbers<[1], [0], [0], [1], [0, 0, 1, 1], [], []>} : vector<1x64xf32>, vector<64x256xf32>, vector<1x256xf32> -> vector<1x256xf32>
    %92 = vector.broadcast %89 : vector<1x256xf32> to vector<4x256xf32>
    %93 = arith.mulf %22, %92 : vector<4x256xf32>
    %94 = vector.broadcast %91 : vector<1x256xf32> to vector<4x256xf32>
    %95 = arith.addf %93, %94 : vector<4x256xf32>
    %cst_85 = arith.constant 0.000000e+00 : f32
    %96 = vector.broadcast %cst_85 : f32 to vector<4x256xf32>
    %97 = arith.cmpf oge, %95, %96 : vector<4x256xf32>
    %cst_86 = arith.constant 2.000000e-01 : f32
    %98 = vector.broadcast %cst_86 : f32 to vector<4x256xf32>
    %99 = arith.mulf %98, %95 : vector<4x256xf32>
    %100 = arith.select %97, %95, %99 : vector<4x256xi1>, vector<4x256xf32>
    %c0_87 = arith.constant 0 : index
    %c0_88 = arith.constant 0 : index
    %101 = vector.load %arg8[%c0_87, %c0_88] : memref<4x256xf32, #tpu.memory_space<vmem>>, vector<4x256xf32>
    %102 = arith.mulf %100, %101 : vector<4x256xf32>
    %cst_89 = arith.constant dense<0.000000e+00> : vector<4xf32>
    %103 = vector.multi_reduction <add>, %102, %cst_89 [1] : vector<4x256xf32> to vector<4xf32>
    %104 = vector.shape_cast %103 : vector<4xf32> to vector<4x1xf32>
    %cst_90 = arith.constant dense<0.000000e+00> : vector<1xf32>
    %105 = vector.multi_reduction <add>, %104, %cst_90 [0] : vector<4x1xf32> to vector<1xf32>
    %106 = vector.shape_cast %105 : vector<1xf32> to vector<1x1xf32>
    %cst_91 = arith.constant 0.000000e+00 : f32
    %107 = vector.broadcast %cst_91 : f32 to vector<1x1xf32>
    %108 = arith.subf %107, %106 : vector<1x1xf32>
    %109 = math.exp %108 : vector<1x1xf32>
    %cst_92 = arith.constant 1.000000e+00 : f32
    %110 = vector.broadcast %cst_92 : f32 to vector<1x1xf32>
    %111 = arith.addf %110, %109 : vector<1x1xf32>
    %cst_93 = arith.constant 1.000000e+00 : f32
    %112 = vector.broadcast %cst_93 : f32 to vector<1x1xf32>
    %113 = arith.divf %112, %111 : vector<1x1xf32>
    %c0_94 = arith.constant 0 : index
    %c0_95 = arith.constant 0 : index
    %114 = vector.load %arg9[%c0_94, %c0_95] : memref<2x1xf32, #tpu.memory_space<vmem>>, vector<1x1xf32>
    tpu.vector_store %arg9[%c0_94, %c0_95], %113 {strides = array<i32>} : memref<2x1xf32, #tpu.memory_space<vmem>>, vector<1x1xf32>,
    %115 = vector.broadcast %89 : vector<1x256xf32> to vector<4x256xf32>
    %116 = arith.mulf %45, %115 : vector<4x256xf32>
    %117 = vector.broadcast %91 : vector<1x256xf32> to vector<4x256xf32>
    %118 = arith.addf %116, %117 : vector<4x256xf32>
    %cst_96 = arith.constant 0.000000e+00 : f32
    %119 = vector.broadcast %cst_96 : f32 to vector<4x256xf32>
    %120 = arith.cmpf oge, %118, %119 : vector<4x256xf32>
    %cst_97 = arith.constant 2.000000e-01 : f32
    %121 = vector.broadcast %cst_97 : f32 to vector<4x256xf32>
    %122 = arith.mulf %121, %118 : vector<4x256xf32>
    %123 = arith.select %120, %118, %122 : vector<4x256xi1>, vector<4x256xf32>
    %c0_98 = arith.constant 0 : index
    %c0_99 = arith.constant 0 : index
    %124 = vector.load %arg8[%c0_98, %c0_99] : memref<4x256xf32, #tpu.memory_space<vmem>>, vector<4x256xf32>
    %125 = arith.mulf %123, %124 : vector<4x256xf32>
    %cst_100 = arith.constant dense<0.000000e+00> : vector<4xf32>
    %126 = vector.multi_reduction <add>, %125, %cst_100 [1] : vector<4x256xf32> to vector<4xf32>
    %127 = vector.shape_cast %126 : vector<4xf32> to vector<4x1xf32>
    %cst_101 = arith.constant dense<0.000000e+00> : vector<1xf32>
    %128 = vector.multi_reduction <add>, %127, %cst_101 [0] : vector<4x1xf32> to vector<1xf32>
    %129 = vector.shape_cast %128 : vector<1xf32> to vector<1x1xf32>
    %cst_102 = arith.constant 0.000000e+00 : f32
    %130 = vector.broadcast %cst_102 : f32 to vector<1x1xf32>
    %131 = arith.subf %130, %129 : vector<1x1xf32>
    %132 = math.exp %131 : vector<1x1xf32>
    %cst_103 = arith.constant 1.000000e+00 : f32
    %133 = vector.broadcast %cst_103 : f32 to vector<1x1xf32>
    %134 = arith.addf %133, %132 : vector<1x1xf32>
    %cst_104 = arith.constant 1.000000e+00 : f32
    %135 = vector.broadcast %cst_104 : f32 to vector<1x1xf32>
    %136 = arith.divf %135, %134 : vector<1x1xf32>
    %c1_105 = arith.constant 1 : index
    %c0_106 = arith.constant 0 : index
    %137 = vector.load %arg9[%c1_105, %c0_106] : memref<2x1xf32, #tpu.memory_space<vmem>>, vector<1x1xf32>
    tpu.vector_store %arg9[%c1_105, %c0_106], %136 {strides = array<i32>} : memref<2x1xf32, #tpu.memory_space<vmem>>, vector<1x1xf32>,
    return
  }
  func.func @transform_0(%arg0: i32) -> (i32, i32, i32) {
    %c0_i32 = arith.constant 0 : i32
    %c0_i32_0 = arith.constant 0 : i32
    %c0_i32_1 = arith.constant 0 : i32
    %c0_i32_2 = arith.constant 0 : i32
    return %c0_i32, %c0_i32_0, %c0_i32_1 : i32, i32, i32
  }
  func.func @transform_1(%arg0: i32) -> (i32, i32, i32) {
    %c0_i32 = arith.constant 0 : i32
    %c0_i32_0 = arith.constant 0 : i32
    %c0_i32_1 = arith.constant 0 : i32
    %c0_i32_2 = arith.constant 0 : i32
    return %c0_i32, %c0_i32_0, %c0_i32_1 : i32, i32, i32
  }
  func.func @transform_2(%arg0: i32) -> (i32, i32, i32) {
    %c0_i32 = arith.constant 0 : i32
    %c0_i32_0 = arith.constant 0 : i32
    %c0_i32_1 = arith.constant 0 : i32
    %c0_i32_2 = arith.constant 0 : i32
    return %c0_i32, %c0_i32_0, %c0_i32_1 : i32, i32, i32
  }
  func.func @transform_3(%arg0: i32) -> (i32, i32) {
    %c0_i32 = arith.constant 0 : i32
    %c0_i32_0 = arith.constant 0 : i32
    %c0_i32_1 = arith.constant 0 : i32
    return %c0_i32, %c0_i32_0 : i32, i32
  }
  func.func @transform_4(%arg0: i32) -> (i32, i32) {
    %c0_i32 = arith.constant 0 : i32
    %c0_i32_0 = arith.constant 0 : i32
    %c0_i32_1 = arith.constant 0 : i32
    return %c0_i32, %c0_i32_0 : i32, i32
  }
  func.func @transform_5(%arg0: i32) -> (i32, i32) {
    %c0_i32 = arith.constant 0 : i32
    %c0_i32_0 = arith.constant 0 : i32
    %c0_i32_1 = arith.constant 0 : i32
    return %c0_i32, %c0_i32_0 : i32, i32
  }
  func.func @transform_6(%arg0: i32) -> (i32, i32) {
    %c0_i32 = arith.constant 0 : i32
    %c0_i32_0 = arith.constant 0 : i32
    %c0_i32_1 = arith.constant 0 : i32
    return %c0_i32, %c0_i32_0 : i32, i32
  }
  func.func @transform_7(%arg0: i32) -> (i32, i32) {
    %c0_i32 = arith.constant 0 : i32
    %c0_i32_0 = arith.constant 0 : i32
    %c0_i32_1 = arith.constant 0 : i32
    return %c0_i32, %c0_i32_0 : i32, i32
  }
  func.func @transform_8(%arg0: i32) -> (i32, i32) {
    %c0_i32 = arith.constant 0 : i32
    %c0_i32_0 = arith.constant 0 : i32
    %c0_i32_1 = arith.constant 0 : i32
    return %c0_i32, %c0_i32_0 : i32, i32
  }
}

</mosaic_0001>

<bundles_post_ra>
// kernel: discriminator_forward.4
= control target key start
LH: loop header
LB: loop body
LE: loop exit
PB: predicated region body
PF: predicated region fallthrough
CT: control target
= control target key end

     0   :  { %s1127_s12 = smov 0   ;;  %s1307_s0 = inlined_call_operand.vmem [shape: bf16[2,33,66], index: 0, kind: input, shape index: {}]   ;;  %s1308_s1 = inlined_call_operand.vmem [shape: bf16[2,33,66], index: 1, kind: input, shape index: {}]   ;;  %s1309_s2 = inlined_call_operand.vmem [shape: bf16[4,66,256], index: 2, kind: input, shape index: {}]   ;;  %s1310_s3 = inlined_call_operand.vmem [shape: bf16[2,32,256], index: 3, kind: output, shape index: {}]  }
   0x1 LB: > { %s913_s13 = sadd.s32 4294967295, %s1104_s12   ;;  %p917_p0 = scmp.ge.s32.totalorder %s1104_s12, 1  ;;  %s1104_s12 = sphi %s1127_s12, %s13_s12  }
   0x2   : > { %p147_p1 = scmp.lt.s32.totalorder %s1104_s12, 3 }
   0x4   : > { %p148_p2 = pnand %p917_p0, %p147_p1 }
   0x5   : > { %p176_p3 = scmp.lt.s32.totalorder (!%p148_p2), %s913_s13, 1 }
   0x6   : > { %151 = sbr.rel (%p148_p2) target bundleno = 271 (0x10f), region = 32 }
   0xb   : > { %v930_v0 = vld [vmem:[%s1309_s2 + $0x88] sm:$0x11]  ;;  %vm281_vm0 = vcmask 1040384   ;;  %v204_v1 = vld [vmem:[%s1309_s2 + $0x40] sm:$0x11]  ;;  %s1312_s13 = smov (!%p176_p3, %s913_s13), 1 }
   0xc   : > { %v942_v2 = vcombine.high %v930_v0, %v930_v0  ;;  %v957_v3 = vcombine.high %v204_v1, %v204_v1  ;;  %v941_v4 = vcombine.low %v930_v0, %v930_v0  ;;  %v956_v5 = vcombine.low %v204_v1, %v204_v1  ;;  %v1036_v6 = vld [vmem:[%s1309_s2 + $0x7c] ss:$8 sps:$4 sm:$0xff]   ;;  %v1040_v8 = vld [vmem:[%s1309_s2 + $0x78] ss:$8 sps:$4 sm:$0xff]   ;;  %v1042_v12 = vld [vmem:[%s1309_s2 + $0x6c] ss:$8 sps:$4 sm:$0xff]  }
   0xd   : > { %v1038_v7 = vld [vmem:[%s1309_s2 + $0x34] ss:$8 sps:$4 sm:$0xff]   ;;  %v1041_v11 = vld [vmem:[%s1309_s2 + $0x30] ss:$8 sps:$4 sm:$0xff]   ;;  %v1044_v13 = vld [vmem:[%s1309_s2 + $0x24] ss:$8 sps:$4 sm:$0xff]  }
   0xe   : > { %943 = vmatprep.subr.msk.bf16.mxu0 %vm281_vm0, %v942_v2  ;;  %958 = vmatprep.subr.msk.bf16.mxu1 %vm281_vm0, %v957_v3  ;;  %v283_v9 = vsel %vm281_vm0, %v941_v4, 0  ;;  %v403_v10 = vsel %vm281_vm0, %v956_v5, 0  ;;  %v1106_v14 = vmov 0   ;;  %s1022_s30 = smul.u32 20, %s1312_s13  ;;  %v1046_v15 = vld [vmem:[%s1309_s2 + $0x68] ss:$8 sps:$4 sm:$0xff]  }
   0xf   : > { %295 = vmatpush1.bf16.msra.mxu0 %v283_v9  ;;  %415 = vmatpush1.bf16.msra.mxu1 %v403_v10  ;;  %v1047_v16 = vld [vmem:[%s1309_s2 + $0x20] ss:$8 sps:$4 sm:$0xff]   ;;  %v1048_v17 = vld [vmem:[%s1309_s2 + $0x5c] ss:$8 sps:$4 sm:$0xff]   ;;  %v1053_v20 = vld [vmem:[%s1309_s2 + $0x10] ss:$8 sps:$4 sm:$0xff]  }
  0x10   : > { %296 = vmatprep.subr.bf16.mxu0 %v1036_v6  ;;  %416 = vmatprep.subr.bf16.mxu1 %v1038_v7  ;;  %v1050_v18 = vld [vmem:[%s1309_s2 + $0x14] ss:$8 sps:$4 sm:$0xff]   ;;  %s1183_s16 = scalar_lea.vmem %s1308_s1, %s1022_s30  ;;  %v1052_v19 = vld [vmem:[%s1309_s2 + $0x58] ss:$8 sps:$4 sm:$0xff]   ;;  %s1191_s21 = scalar_lea.vmem %s1307_s0, %s1022_s30  ;;  %v1056_v22 = vld [vmem:[%s1309_s2 + $0x4] ss:$8 sps:$4 sm:$0xff]  }
  0x11   : > { %320 = vmatprep.mubr.bf16.mxu0 %v1106_v14  ;;  %440 = vmatprep.mubr.bf16.mxu1 %v1106_v14  ;;  %v1054_v21 = vld [vmem:[%s1309_s2 + $0x4c] ss:$8 sps:$4 sm:$0xff]   ;;  %v994_v24 = vld [vmem:[%s1309_s2 + $0x118] sm:$0x11]  ;;  %v1058_v25 = vld [vmem:[%s1309_s2 + $0x48] ss:$8 sps:$4 sm:$0xff]  }
  0x12   : > { %v969_v23 = vld [vmem:[%s1309_s2 + $0xd0] sm:$0x11]  ;;  %v1059_v26 = vld [vmem:[%s1309_s2] ss:$8 sps:$4 sm:$0xff]   ;;  %v1007_v28 = vcombine.high %v994_v24, %v994_v24  ;;  %v1006_v30 = vcombine.low %v994_v24, %v994_v24  ;;  %vm274_vm1 = vcmask 539648  }
  0x13   : > { %297 = vmatpush1.bf16.msra.mxu0 %v1040_v8  ;;  %417 = vmatpush1.bf16.msra.mxu1 %v1041_v11  ;;  %v982_v27 = vcombine.high %v969_v23, %v969_v23  ;;  %v981_v29 = vcombine.low %v969_v23, %v969_v23  ;;  %v1060_v31 = vld [vmem:[%s1183_s16] sm:$0xff]   ;;  %v1071_v36 = vld [vmem:[%s1309_s2 + $0x10c] ss:$8 sps:$4 sm:$0xff]   ;;  %v1069_v38 = vld [vmem:[%s1309_s2 + $0x108] ss:$8 sps:$4 sm:$0xff]  }
  0x14   : > { %298 = vmatprep.subr.bf16.mxu0 %v1042_v12  ;;  %418 = vmatprep.subr.bf16.mxu1 %v1044_v13  ;;  %v1061_v32 = vld [vmem:[%s1191_s21] sm:$0xff]   ;;  %v728_v35 = vsel %vm281_vm0, %v1006_v30, 0  ;;  %v1072_v39 = vld [vmem:[%s1183_s16 + $0x8] sm:$0xff]   ;;  %v1076_v41 = vld [vmem:[%s1309_s2 + $0xb4] ss:$8 sps:$4 sm:$0xff]  }
  0x15   : > { %v1068_v33 = vld [vmem:[%s1309_s2 + $0xc4] ss:$8 sps:$4 sm:$0xff]   ;;  %v562_v34 = vsel %vm281_vm0, %v981_v29, 0  ;;  %v1066_v37 = vld [vmem:[%s1309_s2 + $0xc0] ss:$8 sps:$4 sm:$0xff]  }
  0x16   : > { %v1073_v40 = vld [vmem:[%s1191_s21 + $0x8] sm:$0xff]   ;;  %v1079_v42 = vld [vmem:[%s1309_s2 + $0xfc] ss:$8 sps:$4 sm:$0xff]   ;;  %v1074_v43 = vld [vmem:[%s1309_s2 + $0xb0] ss:$8 sps:$4 sm:$0xff]  }
  0x17   : > { %299 = vmatpush1.bf16.msra.mxu0 %v1046_v15  ;;  %419 = vmatpush1.bf16.msra.mxu1 %v1047_v16  ;;  %v1077_v44 = vld [vmem:[%s1309_s2 + $0xf8] ss:$8 sps:$4 sm:$0xff]   ;;  %v1082_v45 = vld [vmem:[%s1309_s2 + $0xa4] ss:$8 sps:$4 sm:$0xff]   ;;  %v1083_v52 = vld [vmem:[%s1309_s2 + $0xe8] ss:$8 sps:$4 sm:$0xff]  }
  0x18   : > { %300 = vmatprep.subr.bf16.mxu0 %v1048_v17  ;;  %420 = vmatprep.subr.bf16.mxu1 %v1050_v18  ;;  %v1085_v46 = vld [vmem:[%s1309_s2 + $0xec] ss:$8 sps:$4 sm:$0xff]   ;;  %v1092_v47 = vld [vmem:[%s1191_s21] sm:$0xff]   ;;  %v1086_v62 = vld [vmem:[%s1309_s2 + $0x90] ss:$8 sps:$4 sm:$0xff]  }
  0x19   : > { %v1093_v48 = vld [vmem:[%s1191_s21 + $0x8] sm:$0xff]   ;;  %v493_v50 = vshll.u32 %v1092_v47, 16  ;;  %v1094_v51 = vld [vmem:[%s1183_s16] sm:$0xff]   ;;  %v491_v53 = vshrl.u32 %v1092_v47, 16  ;;  %v1088_v59 = vld [vmem:[%s1309_s2 + $0x94] ss:$8 sps:$4 sm:$0xff]  }
  0x1a   : > { %v1080_v49 = vld [vmem:[%s1309_s2 + $0xa0] ss:$8 sps:$4 sm:$0xff]   ;;  %v498_v56 = vshll.u32 %v1093_v48, 16  ;;  %v657_v57 = vshrl.u32 %v1094_v51, 16  ;;  %v659_v58 = vshll.u32 %v1094_v51, 16  ;;  %v502_v7 = vshrl.u32 %v1093_v48, 16 }
  0x1b   : > { %301 = vmatpush1.bf16.msra.mxu0 %v1052_v19  ;;  %421 = vmatpush1.bf16.msra.mxu1 %v1053_v20  ;;  %v1095_v54 = vld [vmem:[%s1183_s16 + $0x8] sm:$0xff]   ;;  %v495_v55 = vrot.slane %v493_v50, 1  ;;  %v1091_v60 = vld [vmem:[%s1309_s2 + $0xdc] ss:$8 sps:$4 sm:$0xff]   ;;  %v1089_v0 = vld [vmem:[%s1309_s2 + $0xd8] ss:$8 sps:$4 sm:$0xff]  }
  0x1c   : > { %302 = vmatprep.subr.bf16.mxu0 %v1054_v21  ;;  %422 = vmatprep.subr.bf16.mxu1 %v1056_v22  ;;  %v664_v61 = vshll.u32 %v1095_v54, 16  ;;  %v661_v63 = vrot.slane %v659_v58, 1  ;;  %v1096_v1 = vld [vmem:[%s1191_s21 + $0x10] ss:$0 sps:$4 sm:$0x11]   ;;  %v500_v3 = vrot.slane %v498_v56, 1 }
  0x1d   : > { %v496_v2 = vor.u32 %v495_v55, %v491_v53  ;;  %v1097_v6 = vld [vmem:[%s1183_s16 + $0x10] ss:$0 sps:$4 sm:$0x11]   ;;  %vm489_vm2 = vsmask.f32 7424  ;;  %v506_v8 = vshll.u32 %v1096_v1, 16 }
  0x1e   : > { %v662_v4 = vor.u32 %v661_v63, %v657_v57  ;;  %v666_v5 = vrot.slane %v664_v61, 1  ;;  %v668_v11 = vshrl.u32 %v1095_v54, 16  ;;  %v672_v12 = vshll.u32 %v1097_v6, 16  ;;  %s1017_s16 = sshll.u32 %s1312_s13, 5 }
  0x1f   : > { %303 = vmatpush1.bf16.msra.mxu0 %v1058_v25  ;;  %423 = vmatpush1.bf16.msra.mxu1 %v1059_v26  ;;  %v501_v9 = vsel %vm489_vm2, %v496_v2, %v500_v3  ;;  %v504_v13 = vor.u32 %v502_v7, %v500_v3  ;;  %v508_v15 = vrot.slane %v506_v8, 1  ;;  %s1298_s23 = scalar_lea.vmem %s1310_s3, %s1017_s16 }
  0x20   : > { %983 = vmatprep.subr.msk.bf16.mxu0 %vm281_vm0, %v982_v27  ;;  %1008 = vmatprep.subr.msk.bf16.mxu1 %vm281_vm0, %v1007_v28  ;;  %v667_v10 = vsel %vm489_vm2, %v662_v4, %v666_v5  ;;  %v670_v16 = vor.u32 %v668_v11, %v666_v5  ;;  %v674_v17 = vrot.slane %v672_v12, 1 }
  0x21   : > { %v509_v18 = vsel %vm489_vm2, %v504_v13, %v508_v15 }
  0x22   : > { %944 = vmatmul.mubr.msk.bf16.vlgmr.msra.gmra.mxu0 %vm274_vm1, %v1060_v31  ;;  %959 = vmatmul.mubr.msk.bf16.vlgmr.msra.gmra.mxu1 %vm274_vm1, %v1061_v32  ;;  %v675_v19 = vsel %vm489_vm2, %v670_v16, %v674_v17 }
  0x23   : > { %574 = vmatpush1.bf16.msra.mxu0 %v562_v34  ;;  %740 = vmatpush1.bf16.msra.mxu1 %v728_v35 }
  0x24   : > { %575 = vmatprep.subr.bf16.mxu0 %v1068_v33  ;;  %741 = vmatprep.subr.bf16.mxu1 %v1071_v36 }
  0x25   : > { %330 = vmatprep.mubr.bf16.mxu0 %v1106_v14  ;;  %450 = vmatprep.mubr.bf16.mxu1 %v1106_v14 }
  0x27   : > { %576 = vmatpush1.bf16.msra.mxu0 %v1066_v37  ;;  %742 = vmatpush1.bf16.msra.mxu1 %v1069_v38 }
  0x28   : > { %577 = vmatprep.subr.bf16.mxu0 %v1076_v41  ;;  %743 = vmatprep.subr.bf16.mxu1 %v1079_v42 }
  0x2a   : > { %945 = vmatmul.mubr.msk.bf16.gmra.mxu0 %vm274_vm1, %v1072_v39  ;;  %960 = vmatmul.mubr.msk.bf16.gmra.mxu1 %vm274_vm1, %v1073_v40 }
  0x2b   : > { %578 = vmatpush1.bf16.msra.mxu0 %v1074_v43  ;;  %744 = vmatpush1.bf16.msra.mxu1 %v1077_v44 }
  0x2c   : > { %579 = vmatprep.subr.bf16.mxu0 %v1082_v45  ;;  %745 = vmatprep.subr.bf16.mxu1 %v1085_v46 }
  0x2d   : > { %599 = vmatprep.mubr.bf16.mxu0 %v1106_v14  ;;  %765 = vmatprep.mubr.bf16.mxu1 %v1106_v14 }
  0x2f   : > { %580 = vmatpush1.bf16.msra.mxu0 %v1080_v49  ;;  %746 = vmatpush1.bf16.msra.mxu1 %v1083_v52 }
  0x30   : > { %581 = vmatprep.subr.bf16.mxu0 %v1088_v59  ;;  %747 = vmatprep.subr.bf16.mxu1 %v1091_v60 }
  0x33   : > { %582 = vmatpush1.bf16.msra.mxu0 %v1086_v62  ;;  %748 = vmatpush1.bf16.msra.mxu1 %v1089_v0 }
  0x36   : > { %984 = vmatmul.mubr.msk.bf16.vlgmr.msra.gmra.mxu0 %vm274_vm1, %v501_v9  ;;  %1009 = vmatmul.mubr.msk.bf16.vlgmr.msra.gmra.mxu1 %vm274_vm1, %v667_v10 }
  0x37   : > { %609 = vmatprep.mubr.bf16.mxu0 %v1106_v14  ;;  %775 = vmatprep.mubr.bf16.mxu1 %v1106_v14 }
  0x3e   : > { %985 = vmatmul.mubr.msk.bf16.gmra.mxu0 %vm274_vm1, %v509_v18  ;;  %1010 = vmatmul.mubr.msk.bf16.gmra.mxu1 %vm274_vm1, %v675_v19 }
  0xe2   : > { %v322_v20 = vpop.f32.mrf.mxu0  ;;  %v442_v21 = vpop.f32.mrf.mxu1 }
  0xe3   : > { %v443_v35 = vadd.f32 %v442_v21, %v322_v20 }
  0xe4   : > { %v324_v22 = vpop.f32.mrf.mxu0  ;;  %v444_v23 = vpop.f32.mrf.mxu1 }
  0xe5   : > { %v445_v38 = vadd.f32 %v444_v23, %v324_v22 }
  0xe6   : > { %v326_v24 = vpop.f32.mrf.mxu0  ;;  %v446_v25 = vpop.f32.mrf.mxu1 }
  0xe7   : > { %v447_v42 = vadd.f32 %v446_v25, %v326_v24 }
  0xe8   : > { %v328_v26 = vpop.f32.mrf.mxu0  ;;  %v448_v14 = vpop.f32.mrf.mxu1 }
  0xe9   : > { %v449_v50 = vadd.f32 %v448_v14, %v328_v26 }
  0xea   : > { %v332_v27 = vpop.f32.mrf.mxu0  ;;  %v452_v28 = vpop.f32.mrf.mxu1 }
  0xeb   : > { %v453_v53 = vadd.f32 %v452_v28, %v332_v27 }
  0xec   : > { %v334_v29 = vpop.f32.mrf.mxu0  ;;  %v454_v30 = vpop.f32.mrf.mxu1 }
  0xed   : > { %v455_v59 = vadd.f32 %v454_v30, %v334_v29 }
  0xee   : > { %v336_v31 = vpop.f32.mrf.mxu0  ;;  %v456_v32 = vpop.f32.mrf.mxu1 }
  0xef   : > { %v457_v4 = vadd.f32 %v456_v32, %v336_v31 }
  0xf0   : > { %v338_v33 = vpop.f32.mrf.mxu0  ;;  %v458_v34 = vpop.f32.mrf.mxu1 }
  0xf1   : > { %v459_v13 = vadd.f32 %v458_v34, %v338_v33 }
  0xf6   : > { %v601_v36 = vpop.f32.mrf.mxu0  ;;  %v767_v37 = vpop.f32.mrf.mxu1 }
  0xf7   : > { %v620_v39 = vadd.f32 %v601_v36, %v443_v35 }
  0xf8   : > { %v603_v40 = vpop.f32.mrf.mxu0  ;;  %v769_v41 = vpop.f32.mrf.mxu1 }
  0xf9   : > { %v786_v43 = vadd.f32 %v767_v37, %v620_v39  ;;  %v621_v44 = vadd.f32 %v603_v40, %v445_v38 }
  0xfa   : > { %v605_v45 = vpop.f32.mrf.mxu0  ;;  %v771_v46 = vpop.f32.mrf.mxu1 }
  0xfb   : > { %v802_v47 = vmul.f32 0.2, %v786_v43  ;;  %v787_v48 = vadd.f32 %v769_v41, %v621_v44  ;;  %v622_v49 = vadd.f32 %v605_v45, %v447_v42  ;;  %vm794_vm3 = vcmp.ge.f32.partialorder %v786_v43, 0.0 }
  0xfc   : > { %v607_v51 = vpop.f32.mrf.mxu0  ;;  %v773_v52 = vpop.f32.mrf.mxu1 }
  0xfd   : > { %vm795_vm4 = vcmp.ge.f32.partialorder %v787_v48, 0.0  ;;  %v803_v54 = vmul.f32 0.2, %v787_v48  ;;  %v788_v55 = vadd.f32 %v771_v46, %v622_v49  ;;  %v623_v56 = vadd.f32 %v607_v51, %v449_v50 }
  0xfe   : > { %v611_v57 = vpop.f32.mrf.mxu0  ;;  %v777_v58 = vpop.f32.mrf.mxu1  ;;  %v810_v60 = vsel %vm794_vm3, %v786_v43, %v802_v47 }
  0xff   : > { %v811_v61 = vsel %vm795_vm4, %v787_v48, %v803_v54  ;;  %v624_v62 = vadd.f32 %v611_v57, %v453_v53  ;;  %v804_v0 = vmul.f32 0.2, %v788_v55  ;;  %v789_v1 = vadd.f32 %v773_v52, %v623_v56 }
 0x100   : > { %v1018_v63 = vpack.c.bf16 %v811_v61, %v810_v60  ;;  %v613_v2 = vpop.f32.mrf.mxu0  ;;  %v779_v3 = vpop.f32.mrf.mxu1  ;;  %vm796_vm5 = vcmp.ge.f32.partialorder %v788_v55, 0.0 }
 0x101   : > { %v790_v5 = vadd.f32 %v777_v58, %v624_v62  ;;  %v625_v6 = vadd.f32 %v613_v2, %v455_v59  ;;  %vm797_vm6 = vcmp.ge.f32.partialorder %v789_v1, 0.0  ;;  %v805_v7 = vmul.f32 0.2, %v789_v1 }
 0x102   : > { %842 = vst [vmem:[%s1298_s23] sm:$0xff] %v1018_v63  ;;  %v615_v8 = vpop.f32.mrf.mxu0  ;;  %v781_v12 = vpop.f32.mrf.mxu1  ;;  %v812_v15 = vsel %vm796_vm5, %v788_v55, %v804_v0 }
 0x103   : > { %v806_v9 = vmul.f32 0.2, %v790_v5  ;;  %v791_v10 = vadd.f32 %v779_v3, %v625_v6  ;;  %v626_v11 = vadd.f32 %v615_v8, %v457_v4  ;;  %v813_v16 = vsel %vm797_vm6, %v789_v1, %v805_v7 }
 0x104   : > { %vm798_vm7 = vcmp.ge.f32.partialorder %v790_v5, 0.0  ;;  %v617_v17 = vpop.f32.mrf.mxu0  ;;  %v1019_v18 = vpack.c.bf16 %v813_v16, %v812_v15  ;;  %v783_v24 = vpop.f32.mrf.mxu1 }
 0x105   : > { %vm799_vm8 = vcmp.ge.f32.partialorder %v791_v10, 0.0  ;;  %v807_v19 = vmul.f32 0.2, %v791_v10  ;;  %v792_v20 = vadd.f32 %v781_v12, %v626_v11  ;;  %v627_v21 = vadd.f32 %v617_v17, %v459_v13 }
 0x106   : > { %843 = vst [vmem:[%s1298_s23 + $0x8] sm:$0xff] %v1019_v18  ;;  %v814_v22 = vsel %vm798_vm7, %v790_v5, %v806_v9 }
 0x107   : > { %v815_v23 = vsel %vm799_vm8, %v791_v10, %v807_v19  ;;  %v808_v26 = vmul.f32 0.2, %v792_v20  ;;  %v793_v14 = vadd.f32 %v783_v24, %v627_v21  ;;  %vm800_vm9 = vcmp.ge.f32.partialorder %v792_v20, 0.0 }
 0x108   : > { %v1020_v25 = vpack.c.bf16 %v815_v23, %v814_v22 }
 0x109   : > { %vm801_vm10 = vcmp.ge.f32.partialorder %v793_v14, 0.0  ;;  %v809_v27 = vmul.f32 0.2, %v793_v14  ;;  %v816_v28 = vsel %vm800_vm9, %v792_v20, %v808_v26 }
 0x10a   : > { %844 = vst [vmem:[%s1298_s23 + $0x10] sm:$0xff] %v1020_v25 }
 0x10b   : > { %v817_v29 = vsel %vm801_vm10, %v793_v14, %v809_v27 }
 0x10c   : > { %v1021_v30 = vpack.c.bf16 %v817_v29, %v816_v28 }
 0x10e   : > { %845 = vst [vmem:[%s1298_s23 + $0x18] sm:$0xff] %v1021_v30 }
 0x10f PF: > { %s13_s12 = sadd.s32 1, %s1104_s12  }
 0x110   : > { %p10_p4 = scmp.ge.s32.totalorder %s13_s12, 4  }
 0x112   :  { %12 = sbr.rel (!%p10_p4) target bundleno = 1 (0x1), region = 68 }

// kernel: tile.19
= control target key start
LH: loop header
LB: loop body
LE: loop exit
PB: predicated region body
PF: predicated region fallthrough
CT: control target
= control target key end

     0   :  { %vm65_vm0 = vcmask 1043458   ;;  %s105_s6 = smov 3  ;;  %vm70_vm1 = vcmask 1045508   ;;  %vm75_vm2 = vcmask 1047558   ;;  %s108_s9 = smov 12  ;;  %vm4_vm3 = vcmask 1047556   ;;  %s1498_s0 = inlined_call_operand.vmem [shape: f32[16,16,16], index: 0, kind: input, shape index: {}]   ;;  %s1499_s1 = inlined_call_operand.vmem [shape: f32[256,16], index: 1, kind: output, shape index: {}]  }
   0x1   :  { %v726_v0 = vld [vmem:[%s1498_s0 + $0x87] ss:$16 sm:%s105_s6]   ;;  %s113_s10 = smov 48  ;;  %s118_s15 = smov 192  ;;  %vm6_vm4 = vcmask 130048   ;;  %vm79_vm5 = vcmask 1048448  }
   0x2   :  { %v727_v1 = vld [vmem:[%s1498_s0 + $0x87] ss:$16 sm:%s108_s9]   ;;  %s60_s16 = smov 3  ;;  %s63_s21 = smov 12  ;;  %vm170_vm6 = vcmask 917248   ;;  %vm261_vm7 = vcmask 786048  }
   0x3   :  { %v728_v2 = vld [vmem:[%s1498_s0 + $0x87] ss:$16 sm:%s113_s10]   ;;  %v111_v3 = vsel %vm65_vm0, %v727_v1, %v726_v0  ;;  %s68_s22 = smov 48  ;;  %s73_s27 = smov 192  ;;  %vm352_vm8 = vcmask 654848   ;;  %vm443_vm9 = vcmask 523648  }
   0x4   :  { %v729_v4 = vld [vmem:[%s1498_s0 + $0x87] ss:$16 sm:%s118_s15]   ;;  %v116_v6 = vsel %vm70_vm1, %v728_v2, %v111_v3  ;;  %s128_s28 = smov 3  ;;  %s131_s4 = smov 12  ;;  %vm534_vm10 = vcmask 392448   ;;  %vm625_vm11 = vcmask 261248  }
   0x5   :  { %v717_v5 = vld [vmem:[%s1498_s0 + $0x7] ss:$16 sm:%s60_s16]   ;;  %v121_v9 = vsel %vm75_vm2, %v729_v4, %v116_v6  ;;  %v731_v12 = vld [vmem:[%s1498_s0 + $0x8f] ss:$16 sm:%s128_s28]   ;;  %s136_s5 = smov 48  ;;  %s857_s6 = smov 112  }
   0x6   :  { %v718_v7 = vld [vmem:[%s1498_s0 + $0x7] ss:$16 sm:%s63_s21]   ;;  %122 = vrot.lane.b32.xlu1 %v121_v9, %s857_s6  ;;  %s141_s9 = smov 192  ;;  %s82_s10 = smov 3 }
   0x7   :  { %v719_v8 = vld [vmem:[%s1498_s0 + $0x7] ss:$16 sm:%s68_s22]   ;;  %v66_v10 = vsel %vm65_vm0, %v718_v7, %v717_v5  ;;  %v732_v14 = vld [vmem:[%s1498_s0 + $0x8f] ss:$16 sm:%s131_s4]   ;;  %s85_s15 = smov 12  ;;  %s90_s16 = smov 48 }
   0x8   :  { %v720_v11 = vld [vmem:[%s1498_s0 + $0x7] ss:$16 sm:%s73_s27]   ;;  %v71_v13 = vsel %vm70_vm1, %v719_v8, %v66_v10  ;;  %v134_v16 = vsel %vm65_vm0, %v732_v14, %v731_v12  ;;  %v733_v17 = vld [vmem:[%s1498_s0 + $0x8f] ss:$16 sm:%s136_s5]   ;;  %s95_s19 = smov 192  ;;  %s173_s24 = smov 3 }
   0x9   :  { %v76_v15 = vsel %vm75_vm2, %v720_v11, %v71_v13  ;;  %v734_v18 = vld [vmem:[%s1498_s0 + $0x8f] ss:$16 sm:%s141_s9]   ;;  %v139_v19 = vsel %vm70_vm1, %v733_v17, %v134_v16  ;;  %s176_s25 = smov 12  ;;  %s181_s28 = smov 48  ;;  %v740_v27 = vld [vmem:[%s1498_s0 + $0xe] ss:$16 sm:%s173_s24]  }
   0xa   :  { %77 = vrot.lane.b32.xlu0 %v76_v15, %s857_s6  ;;  %v721_v20 = vld [vmem:[%s1498_s0 + $0xf] ss:$16 sm:%s82_s10]   ;;  %v144_v21 = vsel %vm75_vm2, %v734_v18, %v139_v19  ;;  %s186_s29 = smov 192  ;;  %s151_s5 = smov 3 }
   0xb   :  { %v722_v22 = vld [vmem:[%s1498_s0 + $0xf] ss:$16 sm:%s85_s15]   ;;  %145 = vrot.lane.b32.xlu1 %v144_v21, %s857_s6  ;;  %s154_s7 = smov 12  ;;  %s159_s12 = smov 48 }
   0xc   :  { %v723_v23 = vld [vmem:[%s1498_s0 + $0xf] ss:$16 sm:%s90_s16]   ;;  %v88_v24 = vsel %vm65_vm0, %v722_v22, %v721_v20  ;;  %v741_v28 = vld [vmem:[%s1498_s0 + $0xe] ss:$16 sm:%s176_s25]   ;;  %s164_s13 = smov 192  ;;  %s219_s15 = smov 3 }
   0xd   :  { %v724_v25 = vld [vmem:[%s1498_s0 + $0xf] ss:$16 sm:%s95_s19]   ;;  %v93_v26 = vsel %vm70_vm1, %v723_v23, %v88_v24  ;;  %v179_v30 = vsel %vm65_vm0, %v741_v28, %v740_v27  ;;  %v742_v31 = vld [vmem:[%s1498_s0 + $0xe] ss:$16 sm:%s181_s28]   ;;  %s222_s16 = smov 12  ;;  %s227_s21 = smov 48 }
   0xe   :  { %v98_v29 = vsel %vm75_vm2, %v724_v25, %v93_v26  ;;  %v743_v32 = vld [vmem:[%s1498_s0 + $0xe] ss:$16 sm:%s186_s29]   ;;  %v184_v33 = vsel %vm70_vm1, %v742_v31, %v179_v30  ;;  %v736_v34 = vld [vmem:[%s1498_s0 + $0x6] ss:$16 sm:%s151_s5]   ;;  %s232_s22 = smov 192  ;;  %s858_s23 = smov 96  }
   0xf   :  { %99 = vrot.lane.b32.xlu0 %v98_v29, %s857_s6  ;;  %v189_v35 = vsel %vm75_vm2, %v743_v32, %v184_v33  ;;  %v737_v36 = vld [vmem:[%s1498_s0 + $0x6] ss:$16 sm:%s154_s7]   ;;  %s196_s26 = smov 3  ;;  %s199_s2 = smov 12 }
  0x10   :  { %v738_v37 = vld [vmem:[%s1498_s0 + $0x6] ss:$16 sm:%s159_s12]   ;;  %190 = vrot.lane.b32.xlu1 %v189_v35, %s858_s23  ;;  %v157_v38 = vsel %vm65_vm0, %v737_v36, %v736_v34  ;;  %s204_s3 = smov 48  ;;  %s209_s9 = smov 192 }
  0x11   :  { %v739_v39 = vld [vmem:[%s1498_s0 + $0x6] ss:$16 sm:%s164_s13]   ;;  %v162_v40 = vsel %vm70_vm1, %v738_v37, %v157_v38  ;;  %v750_v41 = vld [vmem:[%s1498_s0 + $0x8e] ss:$16 sm:%s219_s15]   ;;  %s264_s12 = smov 3  ;;  %s267_s13 = smov 12 }
  0x12   :  { %v751_v42 = vld [vmem:[%s1498_s0 + $0x8e] ss:$16 sm:%s222_s16]   ;;  %v167_v43 = vsel %vm75_vm2, %v739_v39, %v162_v40  ;;  %v745_v48 = vld [vmem:[%s1498_s0 + $0x86] ss:$16 sm:%s196_s26]   ;;  %s272_s17 = smov 48  ;;  %s277_s18 = smov 192 }
  0x13   :  { %v225_v44 = vsel %vm65_vm0, %v751_v42, %v750_v41  ;;  %v752_v45 = vld [vmem:[%s1498_s0 + $0x8e] ss:$16 sm:%s227_s21]   ;;  %168 = vrot.lane.b32.xlu0 %v167_v43, %s858_s23  ;;  %s242_s21 = smov 3  ;;  %s245_s27 = smov 12 }
  0x14   :  { %v753_v46 = vld [vmem:[%s1498_s0 + $0x8e] ss:$16 sm:%s232_s22]   ;;  %v230_v47 = vsel %vm70_vm1, %v752_v45, %v225_v44  ;;  %v746_v50 = vld [vmem:[%s1498_s0 + $0x86] ss:$16 sm:%s199_s2]   ;;  %s250_s28 = smov 48  ;;  %s255_s4 = smov 192 }
  0x15   :  { %v235_v49 = vsel %vm75_vm2, %v753_v46, %v230_v47  ;;  %v747_v51 = vld [vmem:[%s1498_s0 + $0x86] ss:$16 sm:%s204_s3]   ;;  %v202_v52 = vsel %vm65_vm0, %v746_v50, %v745_v48  ;;  %v759_v55 = vld [vmem:[%s1498_s0 + $0xd] ss:$16 sm:%s264_s12]   ;;  %s310_s7 = smov 3  ;;  %s313_s8 = smov 12 }
  0x16   :  { %236 = vrot.lane.b32.xlu1 %v235_v49, %s858_s23  ;;  %v748_v53 = vld [vmem:[%s1498_s0 + $0x86] ss:$16 sm:%s209_s9]   ;;  %v207_v54 = vsel %vm70_vm1, %v747_v51, %v202_v52  ;;  %s323_s6 = smov 192  ;;  %s859_s14 = smov 80  }
  0x17   :  { %v760_v56 = vld [vmem:[%s1498_s0 + $0xd] ss:$16 sm:%s267_s13]   ;;  %v212_v57 = vsel %vm75_vm2, %v748_v53, %v207_v54  ;;  %v755_v62 = vld [vmem:[%s1498_s0 + $0x5] ss:$16 sm:%s242_s21]   ;;  %s318_s13 = smov 48  ;;  %s290_s22 = smov 12 }
  0x18   :  { %v270_v58 = vsel %vm65_vm0, %v760_v56, %v759_v55  ;;  %v761_v59 = vld [vmem:[%s1498_s0 + $0xd] ss:$16 sm:%s272_s17]   ;;  %213 = vrot.lane.b32.xlu0 %v212_v57, %s858_s23  ;;  %s287_s17 = smov 3  ;;  %s295_s24 = smov 48 }
  0x19   :  { %v762_v60 = vld [vmem:[%s1498_s0 + $0xd] ss:$16 sm:%s277_s18]   ;;  %v275_v61 = vsel %vm70_vm1, %v761_v59, %v270_v58  ;;  %v756_v0 = vld [vmem:[%s1498_s0 + $0x5] ss:$16 sm:%s245_s27]   ;;  %s300_s29 = smov 192  ;;  %s355_s3 = smov 3 }
  0x1a   :  { %v280_v63 = vsel %vm75_vm2, %v762_v60, %v275_v61  ;;  %v757_v1 = vld [vmem:[%s1498_s0 + $0x5] ss:$16 sm:%s250_s28]   ;;  %v248_v2 = vsel %vm65_vm0, %v756_v0, %v755_v62  ;;  %v769_v5 = vld [vmem:[%s1498_s0 + $0x8d] ss:$16 sm:%s310_s7]   ;;  %s363_s9 = smov 48  ;;  %s368_s10 = smov 192 }
  0x1b   :  { %281 = vrot.lane.b32.xlu1 %v280_v63, %s859_s14  ;;  %v758_v3 = vld [vmem:[%s1498_s0 + $0x5] ss:$16 sm:%s255_s4]   ;;  %v253_v4 = vsel %vm70_vm1, %v757_v1, %v248_v2  ;;  %s358_s4 = smov 12  ;;  %s336_s18 = smov 12 }
  0x1c   :  { %v770_v6 = vld [vmem:[%s1498_s0 + $0x8d] ss:$16 sm:%s313_s8]   ;;  %v258_v7 = vsel %vm75_vm2, %v758_v3, %v253_v4  ;;  %v764_v12 = vld [vmem:[%s1498_s0 + $0x85] ss:$16 sm:%s287_s17]   ;;  %s341_s19 = smov 48  ;;  %s346_s25 = smov 192 }
  0x1d   :  { %v316_v8 = vsel %vm65_vm0, %v770_v6, %v769_v5  ;;  %v771_v9 = vld [vmem:[%s1498_s0 + $0x8d] ss:$16 sm:%s318_s13]   ;;  %259 = vrot.lane.b32.xlu0 %v258_v7, %s859_s14  ;;  %s333_s13 = smov 3  ;;  %s401_s27 = smov 3 }
  0x1e   :  { %v772_v10 = vld [vmem:[%s1498_s0 + $0x8d] ss:$16 sm:%s323_s6]   ;;  %v321_v11 = vsel %vm70_vm1, %v771_v9, %v316_v8  ;;  %v765_v14 = vld [vmem:[%s1498_s0 + $0x85] ss:$16 sm:%s290_s22]   ;;  %s404_s28 = smov 12  ;;  %s414_s23 = smov 192 }
  0x1f   :  { %v326_v13 = vsel %vm75_vm2, %v772_v10, %v321_v11  ;;  %v766_v15 = vld [vmem:[%s1498_s0 + $0x85] ss:$16 sm:%s295_s24]   ;;  %v293_v16 = vsel %vm65_vm0, %v765_v14, %v764_v12  ;;  %v778_v19 = vld [vmem:[%s1498_s0 + $0xc] ss:$16 sm:%s355_s3]   ;;  %s860_s5 = smov 64   ;;  %s381_s6 = smov 12 }
  0x20   :  { %327 = vrot.lane.b32.xlu1 %v326_v13, %s859_s14  ;;  %v767_v17 = vld [vmem:[%s1498_s0 + $0x85] ss:$16 sm:%s300_s29]   ;;  %v298_v18 = vsel %vm70_vm1, %v766_v15, %v293_v16  ;;  %s386_s15 = smov 48  ;;  %s391_s20 = smov 192 }
  0x21   :  { %v779_v20 = vld [vmem:[%s1498_s0 + $0xc] ss:$16 sm:%s358_s4]   ;;  %v303_v21 = vsel %vm75_vm2, %v767_v17, %v298_v18  ;;  %v774_v26 = vld [vmem:[%s1498_s0 + $0x4] ss:$16 sm:%s333_s13]   ;;  %s409_s4 = smov 48  ;;  %s446_s24 = smov 3 }
  0x22   :  { %v361_v22 = vsel %vm65_vm0, %v779_v20, %v778_v19  ;;  %v780_v23 = vld [vmem:[%s1498_s0 + $0xc] ss:$16 sm:%s363_s9]   ;;  %304 = vrot.lane.b32.xlu0 %v303_v21, %s859_s14  ;;  %s378_s9 = smov 3  ;;  %s454_s29 = smov 48 }
  0x23   :  { %v781_v24 = vld [vmem:[%s1498_s0 + $0xc] ss:$16 sm:%s368_s10]   ;;  %v366_v25 = vsel %vm70_vm1, %v780_v23, %v361_v22  ;;  %v775_v28 = vld [vmem:[%s1498_s0 + $0x4] ss:$16 sm:%s336_s18]   ;;  %s459_s30 = smov 192  ;;  %s427_s10 = smov 12 }
  0x24   :  { %v371_v27 = vsel %vm75_vm2, %v781_v24, %v366_v25  ;;  %v776_v29 = vld [vmem:[%s1498_s0 + $0x4] ss:$16 sm:%s341_s19]   ;;  %v339_v30 = vsel %vm65_vm0, %v775_v28, %v774_v26  ;;  %v788_v33 = vld [vmem:[%s1498_s0 + $0x8c] ss:$16 sm:%s401_s27]   ;;  %s432_s11 = smov 48  ;;  %s437_s16 = smov 192 }
  0x25   :  { %372 = vrot.lane.b32.xlu1 %v371_v27, %s860_s5  ;;  %v777_v31 = vld [vmem:[%s1498_s0 + $0x4] ss:$16 sm:%s346_s25]   ;;  %v344_v32 = vsel %vm70_vm1, %v776_v29, %v339_v30  ;;  %s449_s25 = smov 12  ;;  %s492_s18 = smov 3 }
  0x26   :  { %v789_v34 = vld [vmem:[%s1498_s0 + $0x8c] ss:$16 sm:%s404_s28]   ;;  %v349_v35 = vsel %vm75_vm2, %v777_v31, %v344_v32  ;;  %v783_v40 = vld [vmem:[%s1498_s0 + $0x84] ss:$16 sm:%s378_s9]   ;;  %s495_s19 = smov 12  ;;  %s505_s14 = smov 192 }
  0x27   :  { %v407_v36 = vsel %vm65_vm0, %v789_v34, %v788_v33  ;;  %v790_v37 = vld [vmem:[%s1498_s0 + $0x8c] ss:$16 sm:%s409_s4]   ;;  %350 = vrot.lane.b32.xlu0 %v349_v35, %s860_s5  ;;  %s424_s4 = smov 3  ;;  %s861_s26 = smov 48  }
  0x28   :  { %v791_v38 = vld [vmem:[%s1498_s0 + $0x8c] ss:$16 sm:%s414_s23]   ;;  %v412_v39 = vsel %vm70_vm1, %v790_v37, %v407_v36  ;;  %v784_v42 = vld [vmem:[%s1498_s0 + $0x84] ss:$16 sm:%s381_s6]   ;;  %s472_s23 = smov 12  ;;  %s477_s7 = smov 48 }
  0x29   :  { %v417_v41 = vsel %vm75_vm2, %v791_v38, %v412_v39  ;;  %v785_v43 = vld [vmem:[%s1498_s0 + $0x84] ss:$16 sm:%s386_s15]   ;;  %v384_v44 = vsel %vm65_vm0, %v784_v42, %v783_v40  ;;  %v797_v47 = vld [vmem:[%s1498_s0 + $0xb] ss:$16 sm:%s446_s24]   ;;  %s482_s12 = smov 192  ;;  %s537_s15 = smov 3 }
  0x2a   :  { %418 = vrot.lane.b32.xlu1 %v417_v41, %s860_s5  ;;  %v786_v45 = vld [vmem:[%s1498_s0 + $0x84] ss:$16 sm:%s391_s20]   ;;  %v389_v46 = vsel %vm70_vm1, %v785_v43, %v384_v44  ;;  %s545_s20 = smov 48  ;;  %s550_s21 = smov 192 }
  0x2b   :  { %v798_v48 = vld [vmem:[%s1498_s0 + $0xb] ss:$16 sm:%s449_s25]   ;;  %v394_v49 = vsel %vm75_vm2, %v786_v45, %v389_v46  ;;  %v793_v54 = vld [vmem:[%s1498_s0 + $0x3] ss:$16 sm:%s424_s4]   ;;  %s500_s25 = smov 48  ;;  %s523_s2 = smov 48 }
  0x2c   :  { %v452_v50 = vsel %vm65_vm0, %v798_v48, %v797_v47  ;;  %v799_v51 = vld [vmem:[%s1498_s0 + $0xb] ss:$16 sm:%s454_s29]   ;;  %395 = vrot.lane.b32.xlu0 %v394_v49, %s860_s5  ;;  %s469_s29 = smov 3  ;;  %s528_s8 = smov 192 }
  0x2d   :  { %v800_v52 = vld [vmem:[%s1498_s0 + $0xb] ss:$16 sm:%s459_s30]   ;;  %v457_v53 = vsel %vm70_vm1, %v799_v51, %v452_v50  ;;  %v794_v56 = vld [vmem:[%s1498_s0 + $0x3] ss:$16 sm:%s427_s10]   ;;  %s518_s30 = smov 12  ;;  %s583_s10 = smov 3 }
  0x2e   :  { %v462_v55 = vsel %vm75_vm2, %v800_v52, %v457_v53  ;;  %v795_v57 = vld [vmem:[%s1498_s0 + $0x3] ss:$16 sm:%s432_s11]   ;;  %v430_v58 = vsel %vm65_vm0, %v794_v56, %v793_v54  ;;  %v807_v61 = vld [vmem:[%s1498_s0 + $0x8b] ss:$16 sm:%s492_s18]   ;;  %s586_s11 = smov 12  ;;  %s596_s5 = smov 192 }
  0x2f   :  { %463 = vrot.lane.b32.xlu1 %v462_v55, %s861_s26  ;;  %v796_v59 = vld [vmem:[%s1498_s0 + $0x3] ss:$16 sm:%s437_s16]   ;;  %v435_v60 = vsel %vm70_vm1, %v795_v57, %v430_v58  ;;  %s540_s16 = smov 12  ;;  %s862_s17 = smov 32  }
  0x30   :  { %v808_v62 = vld [vmem:[%s1498_s0 + $0x8b] ss:$16 sm:%s495_s19]   ;;  %v440_v63 = vsel %vm75_vm2, %v796_v59, %v435_v60  ;;  %v802_v4 = vld [vmem:[%s1498_s0 + $0x83] ss:$16 sm:%s469_s29]   ;;  %s568_s27 = smov 48  ;;  %s573_s3 = smov 192 }
  0x31   :  { %v498_v0 = vsel %vm65_vm0, %v808_v62, %v807_v61  ;;  %v809_v1 = vld [vmem:[%s1498_s0 + $0x8b] ss:$16 sm:%s500_s25]   ;;  %441 = vrot.lane.b32.xlu0 %v440_v63, %s861_s26  ;;  %s515_s25 = smov 3  ;;  %s641_s13 = smov 192 }
  0x32   :  { %v810_v2 = vld [vmem:[%s1498_s0 + $0x8b] ss:$16 sm:%s505_s14]   ;;  %v503_v3 = vsel %vm70_vm1, %v809_v1, %v498_v0  ;;  %v803_v6 = vld [vmem:[%s1498_s0 + $0x83] ss:$16 sm:%s472_s23]   ;;  %s563_s14 = smov 12  ;;  %s609_s24 = smov 12 }
  0x33   :  { %v508_v5 = vsel %vm75_vm2, %v810_v2, %v503_v3  ;;  %v804_v7 = vld [vmem:[%s1498_s0 + $0x83] ss:$16 sm:%s477_s7]   ;;  %v475_v8 = vsel %vm65_vm0, %v803_v6, %v802_v4  ;;  %v816_v11 = vld [vmem:[%s1498_s0 + $0xa] ss:$16 sm:%s537_s15]   ;;  %s628_s7 = smov 3  ;;  %s677_s4 = smov 12 }
  0x34   :  { %509 = vrot.lane.b32.xlu1 %v508_v5, %s861_s26  ;;  %v805_v9 = vld [vmem:[%s1498_s0 + $0x83] ss:$16 sm:%s482_s12]   ;;  %v480_v10 = vsel %vm70_vm1, %v804_v7, %v475_v8  ;;  %s636_s12 = smov 48  ;;  %v2_v38 = vld [vmem:[%s1498_s0] ss:$8 sm:$0xf]  }
  0x35   :  { %v817_v12 = vld [vmem:[%s1498_s0 + $0xa] ss:$16 sm:%s540_s16]   ;;  %v485_v13 = vsel %vm75_vm2, %v805_v9, %v480_v10  ;;  %v812_v18 = vld [vmem:[%s1498_s0 + $0x2] ss:$16 sm:%s515_s25]   ;;  %s591_s16 = smov 48  ;;  %s614_s25 = smov 48 }
  0x36   :  { %v543_v14 = vsel %vm65_vm0, %v817_v12, %v816_v11  ;;  %v818_v15 = vld [vmem:[%s1498_s0 + $0xa] ss:$16 sm:%s545_s20]   ;;  %486 = vrot.lane.b32.xlu0 %v485_v13, %s861_s26  ;;  %s560_s20 = smov 3  ;;  %v3_v48 = vld [vmem:[%s1498_s0] ss:$8 sm:$0xf0]  }
  0x37   :  { %v819_v16 = vld [vmem:[%s1498_s0 + $0xa] ss:$16 sm:%s550_s21]   ;;  %v548_v17 = vsel %vm70_vm1, %v818_v15, %v543_v14  ;;  %v813_v20 = vld [vmem:[%s1498_s0 + $0x2] ss:$16 sm:%s518_s30]   ;;  %s619_s30 = smov 192  ;;  %v5_v52 = vsel %vm4_vm3, %v3_v48, %v2_v38  ;;  %s664_s26 = smov 192 }
  0x38   :  { %v553_v19 = vsel %vm75_vm2, %v819_v16, %v548_v17  ;;  %v814_v21 = vld [vmem:[%s1498_s0 + $0x2] ss:$16 sm:%s523_s2]   ;;  %v521_v22 = vsel %vm65_vm0, %v813_v20, %v812_v18  ;;  %v826_v25 = vld [vmem:[%s1498_s0 + $0x8a] ss:$16 sm:%s583_s10]   ;;  %s674_s2 = smov 3 }
  0x39   :  { %554 = vrot.lane.b32.xlu1 %v553_v19, %s862_s17  ;;  %v815_v23 = vld [vmem:[%s1498_s0 + $0x2] ss:$16 sm:%s528_s8]   ;;  %v526_v24 = vsel %vm70_vm1, %v814_v21, %v521_v22  ;;  %s631_s8 = smov 12  ;;  %7 = vst.msk [vmem:[%s1499_s1] ss:$8 sm:$0x3] %vm6_vm4, %v5_v52  }
  0x3a   :  { %v827_v26 = vld [vmem:[%s1498_s0 + $0x8a] ss:$16 sm:%s586_s11]   ;;  %v531_v27 = vsel %vm75_vm2, %v815_v23, %v526_v24  ;;  %v821_v32 = vld [vmem:[%s1498_s0 + $0x82] ss:$16 sm:%s560_s20]   ;;  %s682_s11 = smov 48 }
  0x3b   :  { %v589_v28 = vsel %vm65_vm0, %v827_v26, %v826_v25  ;;  %v828_v29 = vld [vmem:[%s1498_s0 + $0x8a] ss:$16 sm:%s591_s16]   ;;  %532 = vrot.lane.b32.xlu0 %v531_v27, %s862_s17  ;;  %s606_s16 = smov 3  ;;  %696 = vst.msk [vmem:[%s1499_s1 - $0xf] ss:$8 sm:$0xc] %vm6_vm4, %v5_v52  }
  0x3c   :  { %v829_v30 = vld [vmem:[%s1498_s0 + $0x8a] ss:$16 sm:%s596_s5]   ;;  %v594_v31 = vsel %vm70_vm1, %v828_v29, %v589_v28  ;;  %v822_v34 = vld [vmem:[%s1498_s0 + $0x82] ss:$16 sm:%s563_s14]  }
  0x3d   :  { %v599_v33 = vsel %vm75_vm2, %v829_v30, %v594_v31  ;;  %v823_v35 = vld [vmem:[%s1498_s0 + $0x82] ss:$16 sm:%s568_s27]   ;;  %v566_v36 = vsel %vm65_vm0, %v822_v34, %v821_v32  ;;  %v835_v40 = vld [vmem:[%s1498_s0 + $0x9] ss:$16 sm:%s628_s7]  }
  0x3e   :  { %600 = vrot.lane.b32.xlu1 %v599_v33, %s862_s17  ;;  %v824_v37 = vld [vmem:[%s1498_s0 + $0x82] ss:$16 sm:%s573_s3]   ;;  %v571_v39 = vsel %vm70_vm1, %v823_v35, %v566_v36  ;;  %697 = vst.msk [vmem:[%s1499_s1 - $0x1e] ss:$8 sm:$0x30] %vm6_vm4, %v5_v52   ;;  %s659_s3 = smov 48 }
  0x3f   :  { %v836_v41 = vld [vmem:[%s1498_s0 + $0x9] ss:$16 sm:%s631_s8]   ;;  %v576_v42 = vsel %vm75_vm2, %v824_v37, %v571_v39  ;;  %v831_v47 = vld [vmem:[%s1498_s0 + $0x1] ss:$16 sm:%s606_s16]   ;;  %s651_s16 = smov 3 }
  0x40   :  { %v634_v43 = vsel %vm65_vm0, %v836_v41, %v835_v40  ;;  %v837_v44 = vld [vmem:[%s1498_s0 + $0x9] ss:$16 sm:%s636_s12]   ;;  %577 = vrot.lane.b32.xlu0 %v576_v42, %s862_s17  ;;  %s687_s12 = smov 192  ;;  %698 = vst.msk [vmem:[%s1499_s1 - $0x2d] ss:$8 sm:$0xc0] %vm6_vm4, %v5_v52  }
  0x41   :  { %v838_v45 = vld [vmem:[%s1498_s0 + $0x9] ss:$16 sm:%s641_s13]   ;;  %v639_v46 = vsel %vm70_vm1, %v837_v44, %v634_v43  ;;  %v832_v50 = vld [vmem:[%s1498_s0 + $0x1] ss:$16 sm:%s609_s24]   ;;  %s863_s13 = smov 16   ;;  %s654_s17 = smov 12 }
  0x42   :  { %v644_v49 = vsel %vm75_vm2, %v838_v45, %v639_v46  ;;  %v833_v51 = vld [vmem:[%s1498_s0 + $0x1] ss:$16 sm:%s614_s25]   ;;  %v612_v53 = vsel %vm65_vm0, %v832_v50, %v831_v47  ;;  %v699_v55 = vld [vmem:[%s1498_s0 + $0x40] ss:$8 sm:$0xf]  }
  0x43   :  { %645 = vrot.lane.b32.xlu1 %v644_v49, %s863_s13  ;;  %v834_v54 = vld [vmem:[%s1498_s0 + $0x1] ss:$16 sm:%s619_s30]   ;;  %v617_v56 = vsel %vm70_vm1, %v833_v51, %v612_v53  ;;  %v700_v1 = vld [vmem:[%s1498_s0 + $0x40] ss:$8 sm:$0xf0]  }
  0x44   :  { %v845_v57 = vld [vmem:[%s1498_s0 + $0x89] ss:$16 sm:%s674_s2]   ;;  %v622_v59 = vsel %vm75_vm2, %v834_v54, %v617_v56  ;;  %v840_v0 = vld [vmem:[%s1498_s0 + $0x81] ss:$16 sm:%s651_s16]   ;;  %v19_v5 = vsel %vm4_vm3, %v700_v1, %v699_v55 }
  0x45   :  { %v846_v58 = vld [vmem:[%s1498_s0 + $0x89] ss:$16 sm:%s677_s4]   ;;  %623 = vrot.lane.b32.xlu0 %v622_v59, %s863_s13  ;;  %701 = vst.msk [vmem:[%s1499_s1 + $0x4] ss:$8 sm:$0x3] %vm6_vm4, %v19_v5  }
  0x46   :  { %v680_v60 = vsel %vm65_vm0, %v846_v58, %v845_v57  ;;  %v847_v61 = vld [vmem:[%s1498_s0 + $0x89] ss:$16 sm:%s682_s11]   ;;  %v841_v3 = vld [vmem:[%s1498_s0 + $0x81] ss:$16 sm:%s654_s17]  }
  0x47   :  { %v848_v62 = vld [vmem:[%s1498_s0 + $0x89] ss:$16 sm:%s687_s12]   ;;  %v685_v63 = vsel %vm70_vm1, %v847_v61, %v680_v60  ;;  %v842_v4 = vld [vmem:[%s1498_s0 + $0x81] ss:$16 sm:%s659_s3]   ;;  %v657_v6 = vsel %vm65_vm0, %v841_v3, %v840_v0 }
  0x48   :  { %v690_v2 = vsel %vm75_vm2, %v848_v62, %v685_v63  ;;  %v843_v7 = vld [vmem:[%s1498_s0 + $0x81] ss:$16 sm:%s664_s26]   ;;  %702 = vst.msk [vmem:[%s1499_s1 - $0xb] ss:$8 sm:$0xc] %vm6_vm4, %v19_v5   ;;  %v662_v9 = vsel %vm70_vm1, %v842_v4, %v657_v6 }
  0x49   :  { %691 = vrot.lane.b32.xlu1 %v690_v2, %s863_s13  ;;  %703 = vst.msk [vmem:[%s1499_s1 - $0x1a] ss:$8 sm:$0x30] %vm6_vm4, %v19_v5   ;;  %704 = vst.msk [vmem:[%s1499_s1 - $0x29] ss:$8 sm:$0xc0] %vm6_vm4, %v19_v5   ;;  %v667_v12 = vsel %vm75_vm2, %v843_v7, %v662_v9 }
  0x4a   :  { %v705_v8 = vld [vmem:[%s1498_s0 + $0x80] ss:$8 sm:$0xf]   ;;  %668 = vrot.lane.b32.xlu0 %v667_v12, %s863_s13 }
  0x4b   :  { %v706_v10 = vld [vmem:[%s1498_s0 + $0x80] ss:$8 sm:$0xf0]  }
  0x4c   :  { %v711_v11 = vld [vmem:[%s1498_s0 + $0xc0] ss:$8 sm:$0xf]   ;;  %v34_v13 = vsel %vm4_vm3, %v706_v10, %v705_v8 }
  0x4d   :  { %v712_v14 = vld [vmem:[%s1498_s0 + $0xc0] ss:$8 sm:$0xf0]   ;;  %707 = vst.msk [vmem:[%s1499_s1 + $0x10] ss:$8 sm:$0x3] %vm6_vm4, %v34_v13  }
  0x4e   :  { %708 = vst.msk [vmem:[%s1499_s1 + $0x1] ss:$8 sm:$0xc] %vm6_vm4, %v34_v13   ;;  %709 = vst.msk [vmem:[%s1499_s1 - $0xe] ss:$8 sm:$0x30] %vm6_vm4, %v34_v13   ;;  %v49_v15 = vsel %vm4_vm3, %v712_v14, %v711_v11 }
  0x4f   :  { %710 = vst.msk [vmem:[%s1499_s1 - $0x1d] ss:$8 sm:$0xc0] %vm6_vm4, %v34_v13   ;;  %713 = vst.msk [vmem:[%s1499_s1 + $0x14] ss:$8 sm:$0x3] %vm6_vm4, %v49_v15  }
  0x50   :  { %714 = vst.msk [vmem:[%s1499_s1 + $0x5] ss:$8 sm:$0xc] %vm6_vm4, %v49_v15   ;;  %715 = vst.msk [vmem:[%s1499_s1 - $0xa] ss:$8 sm:$0x30] %vm6_vm4, %v49_v15  }
  0x51   :  { %716 = vst.msk [vmem:[%s1499_s1 - $0x19] ss:$8 sm:$0xc0] %vm6_vm4, %v49_v15  }
  0x78   :  { %v123_v16 = vpop.permute.xlu1 %122  }
  0x79   :  { %730 = vst.msk [vmem:[%s1499_s1 + $0x10] sm:$0xff] %vm79_vm5, %v123_v16  }
  0x7c   :  { %v78_v17 = vpop.permute.xlu0 %77  }
  0x7d   :  { %80 = vst.msk [vmem:[%s1499_s1] sm:$0xff] %vm79_vm5, %v78_v17   ;;  %v146_v18 = vpop.permute.xlu1 %145  }
  0x7e   :  { %735 = vst.msk [vmem:[%s1499_s1 + $0x18] sm:$0xff] %vm79_vm5, %v146_v18  }
  0x81   :  { %v100_v19 = vpop.permute.xlu0 %99  }
  0x82   :  { %725 = vst.msk [vmem:[%s1499_s1 + $0x8] sm:$0xff] %vm79_vm5, %v100_v19   ;;  %v191_v20 = vpop.permute.xlu1 %190  }
  0x83   :  { %744 = vst.msk [vmem:[%s1499_s1 + $0x8] sm:$0xff] %vm170_vm6, %v191_v20  }
  0x85   :  { %v169_v21 = vpop.permute.xlu0 %168  }
  0x86   :  { %171 = vst.msk [vmem:[%s1499_s1] sm:$0xff] %vm170_vm6, %v169_v21  }
  0x88   :  { %v237_v22 = vpop.permute.xlu1 %236  }
  0x89   :  { %754 = vst.msk [vmem:[%s1499_s1 + $0x18] sm:$0xff] %vm170_vm6, %v237_v22  }
  0x8a   :  { %v214_v23 = vpop.permute.xlu0 %213  }
  0x8b   :  { %749 = vst.msk [vmem:[%s1499_s1 + $0x10] sm:$0xff] %vm170_vm6, %v214_v23  }
  0x8d   :  { %v282_v24 = vpop.permute.xlu1 %281  }
  0x8e   :  { %763 = vst.msk [vmem:[%s1499_s1 + $0x8] sm:$0xff] %vm261_vm7, %v282_v24  }
  0x8f   :  { %v260_v25 = vpop.permute.xlu0 %259  }
  0x90   :  { %262 = vst.msk [vmem:[%s1499_s1] sm:$0xff] %vm261_vm7, %v260_v25  }
  0x92   :  { %v328_v26 = vpop.permute.xlu1 %327  }
  0x93   :  { %773 = vst.msk [vmem:[%s1499_s1 + $0x18] sm:$0xff] %vm261_vm7, %v328_v26  }
  0x94   :  { %v305_v27 = vpop.permute.xlu0 %304  }
  0x95   :  { %768 = vst.msk [vmem:[%s1499_s1 + $0x10] sm:$0xff] %vm261_vm7, %v305_v27  }
  0x97   :  { %v373_v28 = vpop.permute.xlu1 %372  }
  0x98   :  { %782 = vst.msk [vmem:[%s1499_s1 + $0x8] sm:$0xff] %vm352_vm8, %v373_v28  }
  0x99   :  { %v351_v29 = vpop.permute.xlu0 %350  }
  0x9a   :  { %353 = vst.msk [vmem:[%s1499_s1] sm:$0xff] %vm352_vm8, %v351_v29  }
  0x9c   :  { %v419_v30 = vpop.permute.xlu1 %418  }
  0x9d   :  { %792 = vst.msk [vmem:[%s1499_s1 + $0x18] sm:$0xff] %vm352_vm8, %v419_v30  }
  0x9e   :  { %v396_v31 = vpop.permute.xlu0 %395  }
  0x9f   :  { %787 = vst.msk [vmem:[%s1499_s1 + $0x10] sm:$0xff] %vm352_vm8, %v396_v31  }
  0xa1   :  { %v464_v32 = vpop.permute.xlu1 %463  }
  0xa2   :  { %801 = vst.msk [vmem:[%s1499_s1 + $0x8] sm:$0xff] %vm443_vm9, %v464_v32  }
  0xa3   :  { %v442_v33 = vpop.permute.xlu0 %441  }
  0xa4   :  { %444 = vst.msk [vmem:[%s1499_s1] sm:$0xff] %vm443_vm9, %v442_v33  }
  0xa6   :  { %v510_v34 = vpop.permute.xlu1 %509  }
  0xa7   :  { %811 = vst.msk [vmem:[%s1499_s1 + $0x18] sm:$0xff] %vm443_vm9, %v510_v34  }
  0xa8   :  { %v487_v35 = vpop.permute.xlu0 %486  }
  0xa9   :  { %806 = vst.msk [vmem:[%s1499_s1 + $0x10] sm:$0xff] %vm443_vm9, %v487_v35  }
  0xab   :  { %v555_v36 = vpop.permute.xlu1 %554  }
  0xac   :  { %820 = vst.msk [vmem:[%s1499_s1 + $0x8] sm:$0xff] %vm534_vm10, %v555_v36  }
  0xad   :  { %v533_v37 = vpop.permute.xlu0 %532  }
  0xae   :  { %535 = vst.msk [vmem:[%s1499_s1] sm:$0xff] %vm534_vm10, %v533_v37  }
  0xb0   :  { %v601_v38 = vpop.permute.xlu1 %600  }
  0xb1   :  { %830 = vst.msk [vmem:[%s1499_s1 + $0x18] sm:$0xff] %vm534_vm10, %v601_v38  }
  0xb2   :  { %v578_v39 = vpop.permute.xlu0 %577  }
  0xb3   :  { %825 = vst.msk [vmem:[%s1499_s1 + $0x10] sm:$0xff] %vm534_vm10, %v578_v39  }
  0xb5   :  { %v646_v40 = vpop.permute.xlu1 %645  }
  0xb6   :  { %839 = vst.msk [vmem:[%s1499_s1 + $0x8] sm:$0xff] %vm625_vm11, %v646_v40  }
  0xb7   :  { %v624_v41 = vpop.permute.xlu0 %623  }
  0xb8   :  { %626 = vst.msk [vmem:[%s1499_s1] sm:$0xff] %vm625_vm11, %v624_v41  }
  0xbb   :  { %v692_v42 = vpop.permute.xlu1 %691  }
  0xbc   :  { %849 = vst.msk [vmem:[%s1499_s1 + $0x18] sm:$0xff] %vm625_vm11, %v692_v42   ;;  %v669_v43 = vpop.permute.xlu0 %668  }
  0xbd   :  { %844 = vst.msk [vmem:[%s1499_s1 + $0x10] sm:$0xff] %vm625_vm11, %v669_v43  }

// kernel: discriminator_forward.5
= control target key start
LH: loop header
LB: loop body
LE: loop exit
PB: predicated region body
PF: predicated region fallthrough
CT: control target
= control target key end

     0   :  { %v4906_v1 = vmov 0   ;;  %vm289_vm0 = vcmask 130048   ;;  %vm715_vm1 = vsmask.f32 7424  ;;  %s4898_s2 = inlined_call_operand.vmem [shape: bf16[4,272,256], index: 2, kind: input, shape index: {}]   ;;  %s4899_s1 = inlined_call_operand.vmem [shape: bf16[2,17,272], index: 1, kind: input, shape index: {}]   ;;  %s4900_s0 = inlined_call_operand.vmem [shape: bf16[2,17,272], index: 0, kind: input, shape index: {}]   ;;  %s4901_s3 = inlined_call_operand.vmem [shape: f32[256,16], index: 3, kind: input, shape index: {}]   ;;  %s4902_s4 = inlined_call_operand.vmem [shape: f32[16,256], index: 4, kind: input, shape index: {}]   ;;  %s4903_s5 = inlined_call_operand.vmem [shape: f32[1,16], index: 5, kind: input, shape index: {}]   ;;  %s4904_s6 = inlined_call_operand.vmem [shape: f32[1,16], index: 6, kind: input, shape index: {}]   ;;  %s4905_s7 = inlined_call_operand.vmem [shape: bf16[2,16,256], index: 7, kind: output, shape index: {}]  }
   0x1   :  { %v3371_v0 = vld [vmem:[%s4898_s2 + $0x184] ss:$8 sps:$4 sm:$0xff]   ;;  %368 = vmatprep.mubr.bf16.mxu1 %v4906_v1  ;;  %v3377_v2 = vld [vmem:[%s4898_s2 + $0x214] ss:$8 sps:$4 sm:$0xff]   ;;  %v3383_v3 = vld [vmem:[%s4898_s2 + $0x180] ss:$8 sps:$4 sm:$0xff]  }
   0x2   :  { %293 = vmatprep.subr.bf16.mxu0 %v3371_v0  ;;  %v3388_v4 = vld [vmem:[%s4898_s2 + $0x210] ss:$8 sps:$4 sm:$0xff]   ;;  %350 = vmatprep.subr.bf16.mxu1 %v3377_v2  ;;  %v3394_v5 = vld [vmem:[%s4898_s2 + $0x174] ss:$8 sps:$4 sm:$0xff]   ;;  %v3422_v10 = vld [vmem:[%s4898_s2 + $0x164] ss:$8 sps:$4 sm:$0xff]  }
   0x3   :  { %294 = vmatpush1.bf16.msra.mxu0 %v3383_v3  ;;  %351 = vmatpush1.bf16.msra.mxu1 %v3388_v4  ;;  %v3096_v6 = vld [vmem:[%s4899_s1 + $0x8] ss:$12 sps:$4 sm:$0xff]   ;;  %v3405_v7 = vld [vmem:[%s4898_s2 + $0x70] ss:$8 sps:$4 sm:$0xff]   ;;  %v3434_v12 = vld [vmem:[%s4898_s2 + $0x64] ss:$8 sps:$4 sm:$0xff]  }
   0x4   :  { %295 = vmatprep.subr.bf16.mxu0 %v3394_v5  ;;  %v3410_v8 = vld [vmem:[%s4898_s2 + $0x74] ss:$8 sps:$4 sm:$0xff]   ;;  %v3415_v9 = vld [vmem:[%s4898_s2 + $0x170] ss:$8 sps:$4 sm:$0xff]   ;;  %v3429_v11 = vld [vmem:[%s4898_s2 + $0x60] ss:$8 sps:$4 sm:$0xff]  }
   0x5   :  { %567 = vmatprep.subr.bf16.mxu1 %v3410_v8  ;;  %v3439_v13 = vld [vmem:[%s4898_s2 + $0x160] ss:$8 sps:$4 sm:$0xff]   ;;  %v3445_v14 = vld [vmem:[%s4898_s2 + $0x154] ss:$8 sps:$4 sm:$0xff]   ;;  %v3451_v15 = vld [vmem:[%s4898_s2 + $0x50] ss:$8 sps:$4 sm:$0xff]  }
   0x6   :  { %2702 = vmatmul.mubr.msk.bf16.vlgmr.msra.gmra.mxu1 %vm289_vm0, %v3096_v6  ;;  %v3456_v16 = vld [vmem:[%s4898_s2 + $0x54] ss:$8 sps:$4 sm:$0xff]   ;;  %v3463_v17 = vld [vmem:[%s4898_s2 + $0x150] ss:$8 sps:$4 sm:$0xff]   ;;  %v3470_v18 = vld [vmem:[%s4898_s2 + $0x144] ss:$8 sps:$4 sm:$0xff]  }
   0x7   :  { %296 = vmatpush1.bf16.msra.mxu0 %v3415_v9  ;;  %568 = vmatpush1.bf16.msra.mxu1 %v3405_v7  ;;  %v3475_v19 = vld [vmem:[%s4898_s2 + $0x44] ss:$8 sps:$4 sm:$0xff]   ;;  %v3482_v20 = vld [vmem:[%s4898_s2 + $0x40] ss:$8 sps:$4 sm:$0xff]   ;;  %v3492_v22 = vld [vmem:[%s4898_s2 + $0x134] ss:$8 sps:$4 sm:$0xff]  }
   0x8   :  { %297 = vmatprep.subr.bf16.mxu0 %v3422_v10  ;;  %569 = vmatprep.subr.bf16.mxu1 %v3434_v12  ;;  %v3487_v21 = vld [vmem:[%s4898_s2 + $0x140] ss:$8 sps:$4 sm:$0xff]   ;;  %v3499_v23 = vld [vmem:[%s4898_s2 + $0x34] ss:$8 sps:$4 sm:$0xff]   ;;  %v3504_v24 = vld [vmem:[%s4898_s2 + $0x30] ss:$8 sps:$4 sm:$0xff]  }
   0x9   :  { %v3511_v25 = vld [vmem:[%s4898_s2 + $0x130] ss:$8 sps:$4 sm:$0xff]   ;;  %v3518_v26 = vld [vmem:[%s4898_s2 + $0x124] ss:$8 sps:$4 sm:$0xff]   ;;  %v3530_v28 = vld [vmem:[%s4898_s2 + $0x20] ss:$8 sps:$4 sm:$0xff]  }
   0xa   :  { %v3523_v27 = vld [vmem:[%s4898_s2 + $0x24] ss:$8 sps:$4 sm:$0xff]   ;;  %v3535_v29 = vld [vmem:[%s4898_s2 + $0x120] ss:$8 sps:$4 sm:$0xff]   ;;  %v3540_v30 = vld [vmem:[%s4898_s2 + $0x114] ss:$8 sps:$4 sm:$0xff]  }
   0xb   :  { %298 = vmatpush1.bf16.msra.mxu0 %v3439_v13  ;;  %570 = vmatpush1.bf16.msra.mxu1 %v3429_v11  ;;  %v3547_v31 = vld [vmem:[%s4898_s2 + $0x14] ss:$8 sps:$4 sm:$0xff]   ;;  %v3552_v32 = vld [vmem:[%s4898_s2 + $0x10] ss:$8 sps:$4 sm:$0xff]   ;;  %v3566_v34 = vld [vmem:[%s4898_s2 + $0x204] ss:$8 sps:$4 sm:$0xff]  }
   0xc   :  { %299 = vmatprep.subr.bf16.mxu0 %v3445_v14  ;;  %571 = vmatprep.subr.bf16.mxu1 %v3456_v16  ;;  %v3559_v33 = vld [vmem:[%s4898_s2 + $0x110] ss:$8 sps:$4 sm:$0xff]   ;;  %v3571_v35 = vld [vmem:[%s4898_s2 + $0x4] ss:$8 sps:$4 sm:$0xff]   ;;  %v3578_v36 = vld [vmem:[%s4898_s2] ss:$8 sps:$4 sm:$0xff]  }
   0xd   :  { %v3583_v37 = vld [vmem:[%s4898_s2 + $0x200] ss:$8 sps:$4 sm:$0xff]   ;;  %v3588_v38 = vld [vmem:[%s4898_s2 + $0x1f4] ss:$8 sps:$4 sm:$0xff]   ;;  %v3600_v40 = vld [vmem:[%s4898_s2 + $0xf0] ss:$8 sps:$4 sm:$0xff]  }
   0xe   :  { %v3595_v39 = vld [vmem:[%s4898_s2 + $0xf4] ss:$8 sps:$4 sm:$0xff]   ;;  %v3607_v41 = vld [vmem:[%s4898_s2 + $0x1f0] ss:$8 sps:$4 sm:$0xff]   ;;  %v3614_v42 = vld [vmem:[%s4898_s2 + $0x1e4] ss:$8 sps:$4 sm:$0xff]  }
   0xf   :  { %300 = vmatpush1.bf16.msra.mxu0 %v3463_v17  ;;  %572 = vmatpush1.bf16.msra.mxu1 %v3451_v15  ;;  %v3619_v43 = vld [vmem:[%s4898_s2 + $0xe4] ss:$8 sps:$4 sm:$0xff]   ;;  %v3626_v44 = vld [vmem:[%s4898_s2 + $0xe0] ss:$8 sps:$4 sm:$0xff]   ;;  %v3636_v46 = vld [vmem:[%s4898_s2 + $0x1d4] ss:$8 sps:$4 sm:$0xff]  }
  0x10   :  { %301 = vmatprep.subr.bf16.mxu0 %v3470_v18  ;;  %573 = vmatprep.subr.bf16.mxu1 %v3475_v19  ;;  %5020 = vst [vmem:[#allocation2_spill] sm:$0xff] %v3619_v43  ;;  %5021 = vst [vmem:[#allocation3_spill] sm:$0xff] %v3626_v44  ;;  %v3631_v45 = vld [vmem:[%s4898_s2 + $0x1e0] ss:$8 sps:$4 sm:$0xff]   ;;  %v3643_v47 = vld [vmem:[%s4898_s2 + $0xd4] ss:$8 sps:$4 sm:$0xff]  }
  0x11   :  { %5022 = vst [vmem:[#allocation4_spill] sm:$0xff] %v3643_v47  ;;  %v3648_v48 = vld [vmem:[%s4898_s2 + $0xd0] ss:$8 sps:$4 sm:$0xff]   ;;  %v3660_v50 = vld [vmem:[%s4898_s2 + $0x1c4] ss:$8 sps:$4 sm:$0xff]  }
  0x12   :  { %5023 = vst [vmem:[#allocation5_spill] sm:$0xff] %v3648_v48  ;;  %v3653_v49 = vld [vmem:[%s4898_s2 + $0x1d0] ss:$8 sps:$4 sm:$0xff]   ;;  %5024 = vst [vmem:[#allocation6_spill] sm:$0xff] %v3660_v50  ;;  %v3672_v52 = vld [vmem:[%s4898_s2 + $0xc4] ss:$8 sps:$4 sm:$0xff]  }
  0x13   :  { %302 = vmatpush1.bf16.msra.mxu0 %v3487_v21  ;;  %574 = vmatpush1.bf16.msra.mxu1 %v3482_v20  ;;  %v3665_v51 = vld [vmem:[%s4899_s1 + $0x4] ss:$12 sps:$4 sm:$0xff]   ;;  %5025 = vst [vmem:[#allocation7_spill] sm:$0xff] %v3672_v52  ;;  %v3678_v53 = vld [vmem:[%s4898_s2 + $0xc0] ss:$8 sps:$4 sm:$0xff]  }
  0x14   :  { %303 = vmatprep.subr.bf16.mxu0 %v3492_v22  ;;  %575 = vmatprep.subr.bf16.mxu1 %v3499_v23  ;;  %5026 = vst [vmem:[#allocation8_spill] sm:$0xff] %v3678_v53  ;;  %v3683_v54 = vld [vmem:[%s4898_s2 + $0x1c0] ss:$8 sps:$4 sm:$0xff]   ;;  %v3690_v55 = vld [vmem:[%s4898_s2 + $0x1b4] ss:$8 sps:$4 sm:$0xff]  }
  0x15   :  { %325 = vmatprep.mubr.bf16.mxu0 %v3665_v51  ;;  %5027 = vst [vmem:[#allocation9_spill] sm:$0xff] %v3683_v54  ;;  %5028 = vst [vmem:[#allocation10_spill] sm:$0xff] %v3690_v55  ;;  %v3695_v56 = vld [vmem:[%s4900_s0 + $0x4] ss:$12 sps:$4 sm:$0xff]   ;;  %v3702_v57 = vld [vmem:[%s4898_s2 + $0xb4] ss:$8 sps:$4 sm:$0xff]  }
  0x16   :  { %5029 = vst [vmem:[#allocation11_spill] sm:$0xff] %v3702_v57  ;;  %599 = vmatprep.mubr.bf16.mxu1 %v3695_v56  ;;  %v3710_v58 = vld [vmem:[%s4898_s2 + $0xb0] ss:$8 sps:$4 sm:$0xff]   ;;  %v3722_v60 = vld [vmem:[%s4898_s2 + $0x1a4] ss:$8 sps:$4 sm:$0xff]  }
  0x17   :  { %304 = vmatpush1.bf16.msra.mxu0 %v3511_v25  ;;  %576 = vmatpush1.bf16.msra.mxu1 %v3504_v24  ;;  %5030 = vst [vmem:[#allocation12_spill] sm:$0xff] %v3710_v58  ;;  %v3715_v59 = vld [vmem:[%s4898_s2 + $0x1b0] ss:$8 sps:$4 sm:$0xff]   ;;  %5032 = vst [vmem:[#allocation14_spill] sm:$0xff] %v3722_v60  ;;  %v3727_v61 = vld [vmem:[%s4898_s2 + $0xa4] ss:$8 sps:$4 sm:$0xff]  }
  0x18   :  { %305 = vmatprep.subr.bf16.mxu0 %v3518_v26  ;;  %577 = vmatprep.subr.bf16.mxu1 %v3523_v27  ;;  %5031 = vst [vmem:[#allocation13_spill] sm:$0xff] %v3715_v59  ;;  %5033 = vst [vmem:[#allocation15_spill] sm:$0xff] %v3727_v61  ;;  %v3734_v62 = vld [vmem:[%s4898_s2 + $0xa0] ss:$8 sps:$4 sm:$0xff]   ;;  %v3746_v6 = vld [vmem:[%s4898_s2 + $0x194] ss:$8 sps:$4 sm:$0xff]  }
  0x19   :  { %5034 = vst [vmem:[#allocation16_spill] sm:$0xff] %v3734_v62  ;;  %v3739_v63 = vld [vmem:[%s4898_s2 + $0x1a0] ss:$8 sps:$4 sm:$0xff]   ;;  %5036 = vst [vmem:[#allocation18_spill] sm:$0xff] %v3746_v6  ;;  %v3751_v1 = vld [vmem:[%s4898_s2 + $0x94] ss:$8 sps:$4 sm:$0xff]  }
  0x1a   :  { %5035 = vst [vmem:[#allocation17_spill] sm:$0xff] %v3739_v63  ;;  %5037 = vst [vmem:[#allocation19_spill] sm:$0xff] %v3751_v1 }
  0x1b   :  { %306 = vmatpush1.bf16.msra.mxu0 %v3535_v29  ;;  %578 = vmatpush1.bf16.msra.mxu1 %v3530_v28 }
  0x1c   :  { %307 = vmatprep.subr.bf16.mxu0 %v3540_v30  ;;  %579 = vmatprep.subr.bf16.mxu1 %v3547_v31 }
  0x1f   :  { %308 = vmatpush1.bf16.msra.mxu0 %v3559_v33  ;;  %580 = vmatpush1.bf16.msra.mxu1 %v3552_v32 }
  0x20   :  { %309 = vmatprep.subr.bf16.mxu0 %v3566_v34  ;;  %581 = vmatprep.subr.bf16.mxu1 %v3571_v35 }
  0x23   :  { %310 = vmatpush2.bf16.msra.mxu0 %v3583_v37  ;;  %582 = vmatpush1.bf16.msra.mxu1 %v3578_v36 }
  0x24   :  { %311 = vmatprep.subr.bf16.mxu0 %v3588_v38  ;;  %583 = vmatprep.subr.bf16.mxu1 %v3595_v39 }
  0x27   :  { %312 = vmatpush2.bf16.msra.mxu0 %v3607_v41  ;;  %584 = vmatpush2.bf16.msra.mxu1 %v3600_v40 }
  0x28   :  { %313 = vmatprep.subr.bf16.mxu0 %v3614_v42  ;;  %585 = vmatprep.subr.bf16.mxu1 %v3619_v43 }
  0x2b   :  { %314 = vmatpush2.bf16.msra.mxu0 %v3631_v45  ;;  %586 = vmatpush2.bf16.msra.mxu1 %v3626_v44  ;;  %v3857_v44 = vld [vmem:[%s4898_s2 + $0x3a4] ss:$8 sps:$4 sm:$0xff]  }
  0x2c   :  { %315 = vmatprep.subr.bf16.mxu0 %v3636_v46  ;;  %587 = vmatprep.subr.bf16.mxu1 %v3643_v47  ;;  %5052 = vst [vmem:[#allocation33_spill] sm:$0xff] %v3857_v44 }
  0x2f   :  { %316 = vmatpush2.bf16.msra.mxu0 %v3653_v49  ;;  %588 = vmatpush2.bf16.msra.mxu1 %v3648_v48  ;;  %v3830_v48 = vld [vmem:[%s4898_s2 + $0x284] ss:$8 sps:$4 sm:$0xff]  }
  0x30   :  { %317 = vmatprep.subr.bf16.mxu0 %v3660_v50  ;;  %589 = vmatprep.subr.bf16.mxu1 %v3672_v52  ;;  %v3807_v52 = vld [vmem:[%s4898_s2 + $0x324] ss:$8 sps:$4 sm:$0xff]   ;;  %5048 = vst [vmem:[#allocation29_spill] sm:$0xff] %v3830_v48 }
  0x31   :  { %5045 = vst [vmem:[#allocation27_spill] sm:$0xff] %v3807_v52 }
  0x33   :  { %318 = vmatpush2.bf16.msra.mxu0 %v3683_v54  ;;  %590 = vmatpush2.bf16.msra.mxu1 %v3678_v53  ;;  %v3773_v53 = vld [vmem:[%s4898_s2 + $0x104] ss:$8 sps:$4 sm:$0xff]  }
  0x34   :  { %319 = vmatprep.subr.bf16.mxu0 %v3690_v55  ;;  %591 = vmatprep.subr.bf16.mxu1 %v3702_v57  ;;  %v3761_v57 = vld [vmem:[%s4898_s2 + $0x190] ss:$8 sps:$4 sm:$0xff]   ;;  %5041 = vst [vmem:[#allocation23_spill] sm:$0xff] %v3773_v53 }
  0x35   :  { %5039 = vst [vmem:[#allocation21_spill] sm:$0xff] %v3761_v57 }
  0x37   :  { %320 = vmatpush2.bf16.msra.mxu0 %v3715_v59  ;;  %592 = vmatpush2.bf16.msra.mxu1 %v3710_v58  ;;  %v3756_v58 = vld [vmem:[%s4898_s2 + $0x90] ss:$8 sps:$4 sm:$0xff]   ;;  %v5047_v59 = vmov 0  }
  0x38   :  { %321 = vmatprep.subr.bf16.mxu0 %v3722_v60  ;;  %593 = vmatprep.subr.bf16.mxu1 %v3727_v61  ;;  %5038 = vst [vmem:[#allocation20_spill] sm:$0xff] %v3756_v58  ;;  %v3768_v61 = vld [vmem:[%s4898_s2 + $0x84] ss:$8 sps:$4 sm:$0xff]   ;;  %v3790_v60 = vld [vmem:[%s4898_s2 + $0x100] ss:$8 sps:$4 sm:$0xff]  }
  0x39   :  { %5040 = vst [vmem:[#allocation22_spill] sm:$0xff] %v3768_v61  ;;  %5043 = vst [vmem:[#allocation25_spill] sm:$0xff] %v3790_v60 }
  0x3b   :  { %322 = vmatpush2.bf16.msra.mxu0 %v3739_v63  ;;  %594 = vmatpush2.bf16.msra.mxu1 %v3734_v62  ;;  %v3780_v63 = vld [vmem:[%s4899_s1] ss:$12 sps:$4 sm:$0xff]  }
  0x3c   :  { %323 = vmatprep.subr.bf16.mxu0 %v3746_v6  ;;  %595 = vmatprep.subr.bf16.mxu1 %v3751_v1  ;;  %v3785_v62 = vld [vmem:[%s4898_s2 + $0x80] ss:$8 sps:$4 sm:$0xff]   ;;  %v3802_v6 = vld [vmem:[%s4898_s2 + $0x294] ss:$8 sps:$4 sm:$0xff]  }
  0x3d   :  { %5042 = vst [vmem:[#allocation24_spill] sm:$0xff] %v3785_v62  ;;  %v3216_v1 = vld [vmem:[%s4900_s0 + $0x8] ss:$12 sps:$4 sm:$0xff]   ;;  %5044 = vst [vmem:[#allocation26_spill] sm:$0xff] %v3802_v6 }
  0x3e   :  { %v741_v55 = vshrl.u32 %v3216_v1, 16 }
  0x3f   :  { %324 = vmatpush2.bf16.msra.mxu0 %v3761_v57  ;;  %596 = vmatpush2.bf16.msra.mxu1 %v3756_v58  ;;  %v3813_v58 = vld [vmem:[%s4900_s0] ss:$12 sps:$4 sm:$0xff]   ;;  %v743_v57 = vshll.u32 %v3216_v1, 16  ;;  %v3865_v1 = vld [vmem:[%s4898_s2 + $0x270] ss:$8 sps:$4 sm:$0xff]  }
  0x40   :  { %597 = vmatprep.subr.bf16.mxu1 %v3768_v61  ;;  %624 = vmatprep.subr.bf16.mxu0 %v3773_v53  ;;  %v3818_v61 = vld [vmem:[%s4898_s2 + $0x290] ss:$8 sps:$4 sm:$0xff]   ;;  %v3217_v53 = vld [vmem:[%s4900_s0 + $0x20] ss:$0 sps:$4 sm:$0x11]   ;;  %5053 = vst [vmem:[#allocation34_spill] sm:$0xff] %v3865_v1 }
  0x41   :  { %5046 = vst [vmem:[#allocation28_spill] sm:$0xff] %v3818_v61  ;;  %v745_v47 = vrot.slane %v743_v57, 1  ;;  %v748_v54 = vshll.u32 %v3217_v53, 16 }
  0x42   :  { %326 = vmatmul.mubr.bf16.vlgmr.msra.gmra.mxu0 %v3780_v63 }
  0x43   :  { %598 = vmatpush2.bf16.msra.mxu1 %v3785_v62  ;;  %625 = vmatpush1.bf16.msra.mxu0 %v3790_v60  ;;  %v3200_v62 = vld [vmem:[%s4900_s0 + $0x8] ss:$12 sps:$4 sm:$0xff]   ;;  %v746_v53 = vor.u32 %v745_v47, %v741_v55  ;;  %v750_v57 = vrot.slane %v748_v54, 1 }
  0x44   :  { %927 = vmatprep.subr.bf16.mxu1 %v3802_v6  ;;  %642 = vmatprep.mubr.bf16.mxu0 %v5047_v59  ;;  %v3840_v60 = vld [vmem:[%s4898_s2 + $0x280] ss:$8 sps:$4 sm:$0xff]   ;;  %v3890_v55 = vld [vmem:[%s4898_s2 + $0x394] ss:$8 sps:$4 sm:$0xff]  }
  0x45   :  { %984 = vmatprep.subr.bf16.mxu0 %v3807_v52  ;;  %5049 = vst [vmem:[#allocation30_spill] sm:$0xff] %v3840_v60  ;;  %v3845_v6 = vld [vmem:[%s4898_s2 + $0x320] ss:$8 sps:$4 sm:$0xff]   ;;  %v3852_v52 = vld [vmem:[%s4898_s2 + $0x274] ss:$8 sps:$4 sm:$0xff]   ;;  %v751_v54 = vsel %vm715_vm1, %v746_v53, %v750_v57  ;;  %5057 = vst [vmem:[#allocation38_spill] sm:$0xff] %v3890_v55 }
  0x46   :  { %600 = vmatmul.mubr.bf16.vlgmr.msra.gmra.mxu1 %v3813_v58  ;;  %5050 = vst [vmem:[#allocation31_spill] sm:$0xff] %v3845_v6  ;;  %5051 = vst [vmem:[#allocation32_spill] sm:$0xff] %v3852_v52  ;;  %v3883_v47 = vld [vmem:[%s4898_s2 + $0x260] ss:$8 sps:$4 sm:$0xff]   ;;  %v3907_v53 = vld [vmem:[%s4898_s2 + $0x250] ss:$8 sps:$4 sm:$0xff]  }
  0x47   :  { %928 = vmatpush1.bf16.msra.mxu1 %v3818_v61  ;;  %5056 = vst [vmem:[#allocation37_spill] sm:$0xff] %v3883_v47  ;;  %5060 = vst [vmem:[#allocation41_spill] sm:$0xff] %v3907_v53  ;;  %v3914_v57 = vld [vmem:[%s4898_s2 + $0x384] ss:$8 sps:$4 sm:$0xff]  }
  0x48   :  { %929 = vmatprep.subr.bf16.mxu1 %v3830_v48  ;;  %v3872_v48 = vld [vmem:[%s4898_s2 + $0x264] ss:$8 sps:$4 sm:$0xff]   ;;  %5061 = vst [vmem:[#allocation42_spill] sm:$0xff] %v3914_v57 }
  0x49   :  { %5054 = vst [vmem:[#allocation35_spill] sm:$0xff] %v3872_v48 }
  0x4a   :  { %2740 = vmatmul.mubr.msk.bf16.vlgmr.msra.gmra.mxu0 %vm289_vm0, %v3200_v62  ;;  %v3878_v62 = vld [vmem:[%s4898_s2 + $0x3a0] ss:$8 sps:$4 sm:$0xff]  }
  0x4b   :  { %930 = vmatpush1.bf16.msra.mxu1 %v3840_v60  ;;  %985 = vmatpush1.bf16.msra.mxu0 %v3845_v6  ;;  %5055 = vst [vmem:[#allocation36_spill] sm:$0xff] %v3878_v62  ;;  %v1094_v6 = vshll.u32 %v3665_v51, 16  ;;  %v3991_v60 = vld [vmem:[%s4898_s2 + $0x220] ss:$8 sps:$4 sm:$0xff]  }
  0x4c   :  { %931 = vmatprep.subr.bf16.mxu1 %v3852_v52  ;;  %1002 = vmatprep.mubr.bf16.mxu0 %v5047_v59  ;;  %v729_v52 = vshrl.u32 %v3695_v56, 16  ;;  %5072 = vst [vmem:[#allocation53_spill] sm:$0xff] %v3991_v60 }
  0x4d   :  { %1290 = vmatprep.subr.bf16.mxu0 %v3857_v44  ;;  %v3896_v44 = vld [vmem:[%s4898_s2 + $0x254] ss:$8 sps:$4 sm:$0xff]   ;;  %v1096_v61 = vrot.slane %v1094_v6, 1 }
  0x4e   :  { %5058 = vst [vmem:[#allocation39_spill] sm:$0xff] %v3896_v44 }
  0x4f   :  { %932 = vmatpush1.bf16.msra.mxu1 %v3865_v1  ;;  %v3902_v1 = vld [vmem:[%s4898_s2 + $0x390] ss:$8 sps:$4 sm:$0xff]  }
  0x50   :  { %933 = vmatprep.subr.bf16.mxu1 %v3872_v48  ;;  %5059 = vst [vmem:[#allocation40_spill] sm:$0xff] %v3902_v1  ;;  %v731_v48 = vshll.u32 %v3695_v56, 16  ;;  %v3971_v56 = vld [vmem:[%s4898_s2 + $0x364] ss:$8 sps:$4 sm:$0xff]  }
  0x51   :  { %5069 = vst [vmem:[#allocation50_spill] sm:$0xff] %v3971_v56 }
  0x52   :  { %2815 = vmatmul.mubr.msk.bf16.vlgmr.msra.gmra.mxu0 %vm289_vm0, %v751_v54  ;;  %v3921_v54 = vld [vmem:[%s4898_s2 + $0x244] ss:$8 sps:$4 sm:$0xff]  }
  0x53   :  { %1291 = vmatpush1.bf16.msra.mxu0 %v3878_v62  ;;  %934 = vmatpush1.bf16.msra.mxu1 %v3883_v47  ;;  %5062 = vst [vmem:[#allocation43_spill] sm:$0xff] %v3921_v54  ;;  %v3926_v62 = vld [vmem:[%s4898_s2 + $0x380] ss:$8 sps:$4 sm:$0xff]  }
  0x54   :  { %1292 = vmatprep.subr.bf16.mxu0 %v3890_v55  ;;  %935 = vmatprep.subr.bf16.mxu1 %v3896_v44  ;;  %5063 = vst [vmem:[#allocation44_spill] sm:$0xff] %v3926_v62  ;;  %v3931_v47 = vld [vmem:[%s4898_s2 + $0x240] ss:$8 sps:$4 sm:$0xff]   ;;  %v3939_v44 = vld [vmem:[%s4898_s2 + $0x374] ss:$8 sps:$4 sm:$0xff]  }
  0x55   :  { %5064 = vst [vmem:[#allocation45_spill] sm:$0xff] %v3931_v47  ;;  %5065 = vst [vmem:[#allocation46_spill] sm:$0xff] %v3939_v44  ;;  %v3946_v55 = vld [vmem:[%s4898_s2 + $0x234] ss:$8 sps:$4 sm:$0xff]  }
  0x56   :  { %5066 = vst [vmem:[#allocation47_spill] sm:$0xff] %v3946_v55 }
  0x57   :  { %1293 = vmatpush1.bf16.msra.mxu0 %v3902_v1  ;;  %936 = vmatpush1.bf16.msra.mxu1 %v3907_v53  ;;  %v3952_v53 = vld [vmem:[%s4898_s2 + $0x370] ss:$8 sps:$4 sm:$0xff]  }
  0x58   :  { %1294 = vmatprep.subr.bf16.mxu0 %v3914_v57  ;;  %937 = vmatprep.subr.bf16.mxu1 %v3921_v54  ;;  %5067 = vst [vmem:[#allocation48_spill] sm:$0xff] %v3952_v53  ;;  %v3957_v1 = vld [vmem:[%s4898_s2 + $0x230] ss:$8 sps:$4 sm:$0xff]   ;;  %v733_v57 = vrot.slane %v731_v48, 1  ;;  %v3976_v48 = vld [vmem:[%s4898_s2 + $0x224] ss:$8 sps:$4 sm:$0xff]  }
  0x59   :  { %5068 = vst [vmem:[#allocation49_spill] sm:$0xff] %v3957_v1  ;;  %v3964_v54 = vld [vmem:[%s4900_s0 + $0x18] sm:$0x11]  ;;  %5070 = vst [vmem:[#allocation51_spill] sm:$0xff] %v3976_v48 }
  0x5b   :  { %1295 = vmatpush1.bf16.msra.mxu0 %v3926_v62  ;;  %938 = vmatpush1.bf16.msra.mxu1 %v3931_v47  ;;  %v2779_v47 = vcombine.high %v3964_v54, %v3964_v54  ;;  %v3983_v62 = vld [vmem:[%s4898_s2 + $0x360] ss:$8 sps:$4 sm:$0xff]  }
  0x5c   :  { %1296 = vmatprep.subr.bf16.mxu0 %v3939_v44  ;;  %939 = vmatprep.subr.bf16.mxu1 %v3946_v55  ;;  %5071 = vst [vmem:[#allocation52_spill] sm:$0xff] %v3983_v62  ;;  %v734_v44 = vor.u32 %v733_v57, %v729_v52  ;;  %v3998_v52 = vld [vmem:[%s4898_s2 + $0x354] ss:$8 sps:$4 sm:$0xff]  }
  0x5d   :  { %v736_v55 = vshll.u32 %v2779_v47, 16  ;;  %5073 = vst [vmem:[#allocation54_spill] sm:$0xff] %v3998_v52  ;;  %v4003_v47 = vld [vmem:[%s4898_s2 + $0x314] ss:$8 sps:$4 sm:$0xff]  }
  0x5e   :  { %5074 = vst [vmem:[#allocation55_spill] sm:$0xff] %v4003_v47 }
  0x5f   :  { %1297 = vmatpush1.bf16.msra.mxu0 %v3952_v53  ;;  %940 = vmatpush1.bf16.msra.mxu1 %v3957_v1  ;;  %v738_v57 = vrot.slane %v736_v55, 1  ;;  %v1092_v1 = vshrl.u32 %v3665_v51, 16  ;;  %v4009_v53 = vld [vmem:[%s4898_s2 + $0x350] ss:$8 sps:$4 sm:$0xff]   ;;  %v4029_v55 = vld [vmem:[%s4898_s2 + $0x344] ss:$8 sps:$4 sm:$0xff]  }
  0x60   :  { %1298 = vmatprep.subr.bf16.mxu0 %v3971_v56  ;;  %941 = vmatprep.subr.bf16.mxu1 %v3976_v48  ;;  %5075 = vst [vmem:[#allocation56_spill] sm:$0xff] %v4009_v53  ;;  %v4014_v48 = vld [vmem:[%s4898_s2 + $0x310] ss:$8 sps:$4 sm:$0xff]   ;;  %5077 = vst [vmem:[#allocation58_spill] sm:$0xff] %v4029_v55 }
  0x61   :  { %5076 = vst [vmem:[#allocation57_spill] sm:$0xff] %v4014_v48  ;;  %v739_v56 = vsel %vm715_vm1, %v734_v44, %v738_v57  ;;  %v4022_v51 = vld [vmem:[%s4899_s1 + $0x18] sm:$0x11]  ;;  %v4034_v44 = vld [vmem:[%s4898_s2 + $0x304] ss:$8 sps:$4 sm:$0xff]  }
  0x62   :  { %5078 = vst [vmem:[#allocation59_spill] sm:$0xff] %v4034_v44  ;;  %v2854_v6 = vcombine.high %v4022_v51, %v4022_v51  ;;  %959 = vmatprep.mubr.bf16.mxu1 %v739_v56  ;;  %v4041_v57 = vld [vmem:[%s4898_s2 + $0x340] ss:$8 sps:$4 sm:$0xff]   ;;  %v4053_v56 = vld [vmem:[%s4898_s2 + $0x334] ss:$8 sps:$4 sm:$0xff]   ;;  %v2853_v43 = vcombine.low %v4022_v51, %v4022_v51 }
  0x63   :  { %1299 = vmatpush1.bf16.msra.mxu0 %v3983_v62  ;;  %942 = vmatpush1.bf16.msra.mxu1 %v3991_v60  ;;  %5079 = vst [vmem:[#allocation60_spill] sm:$0xff] %v4041_v57  ;;  %v4048_v60 = vld [vmem:[%s4898_s2 + $0x300] ss:$8 sps:$4 sm:$0xff]   ;;  %5081 = vst [vmem:[#allocation62_spill] sm:$0xff] %v4053_v56 }
  0x64   :  { %1300 = vmatprep.subr.bf16.mxu0 %v3998_v52  ;;  %943 = vmatprep.subr.bf16.mxu1 %v4003_v47  ;;  %v1097_v47 = vor.u32 %v1096_v61, %v1092_v1  ;;  %v1099_v52 = vshll.u32 %v2854_v6, 16  ;;  %5080 = vst [vmem:[#allocation61_spill] sm:$0xff] %v4048_v60  ;;  %v4060_v61 = vld [vmem:[%s4898_s2 + $0x2f4] ss:$8 sps:$4 sm:$0xff]   ;;  %v4065_v6 = vld [vmem:[%s4898_s2 + $0x330] ss:$8 sps:$4 sm:$0xff]  }
  0x65   :  { %5082 = vst [vmem:[#allocation63_spill] sm:$0xff] %v4060_v61  ;;  %5083 = vst [vmem:[#allocation64_spill] sm:$0xff] %v4065_v6 }
  0x66   :  { %v1101_v1 = vrot.slane %v1099_v52, 1  ;;  %v4080_v52 = vld [vmem:[%s4898_s2 + $0x424] ss:$8 sps:$4 sm:$0xff]  }
  0x67   :  { %1301 = vmatpush1.bf16.msra.mxu0 %v4009_v53  ;;  %944 = vmatpush2.bf16.msra.mxu1 %v4014_v48  ;;  %v4070_v48 = vld [vmem:[%s4898_s2 + $0x2f0] ss:$8 sps:$4 sm:$0xff]   ;;  %5085 = vst [vmem:[#allocation66_spill] sm:$0xff] %v4080_v52 }
  0x68   :  { %1302 = vmatprep.subr.bf16.mxu0 %v4029_v55  ;;  %945 = vmatprep.subr.bf16.mxu1 %v4034_v44  ;;  %5084 = vst [vmem:[#allocation65_spill] sm:$0xff] %v4070_v48  ;;  %v1102_v55 = vsel %vm715_vm1, %v1097_v47, %v1101_v1  ;;  %v4085_v44 = vld [vmem:[%s4898_s2 + $0x2e4] ss:$8 sps:$4 sm:$0xff]   ;;  %v4092_v47 = vld [vmem:[%s4898_s2 + $0x420] ss:$8 sps:$4 sm:$0xff]  }
  0x69   :  { %5086 = vst [vmem:[#allocation67_spill] sm:$0xff] %v4085_v44  ;;  %1322 = vmatprep.mubr.bf16.mxu0 %v1102_v55  ;;  %5087 = vst [vmem:[#allocation68_spill] sm:$0xff] %v4092_v47  ;;  %v4097_v1 = vld [vmem:[%s4898_s2 + $0x2e0] ss:$8 sps:$4 sm:$0xff]   ;;  %v4104_v55 = vld [vmem:[%s4898_s2 + $0x414] ss:$8 sps:$4 sm:$0xff]  }
  0x6a   :  { %5088 = vst [vmem:[#allocation69_spill] sm:$0xff] %v4097_v1  ;;  %5089 = vst [vmem:[#allocation70_spill] sm:$0xff] %v4104_v55 }
  0x6b   :  { %1303 = vmatpush1.bf16.msra.mxu0 %v4041_v57  ;;  %946 = vmatpush2.bf16.msra.mxu1 %v4048_v60 }
  0x6c   :  { %1304 = vmatprep.subr.bf16.mxu0 %v4053_v56  ;;  %947 = vmatprep.subr.bf16.mxu1 %v4060_v61  ;;  %v719_v61 = vshll.u32 %v3813_v58, 16 }
  0x6e   :  { %v721_v56 = vrot.slane %v719_v61, 1  ;;  %v4183_v61 = vld [vmem:[%s4898_s2 + $0x3e4] ss:$8 sps:$4 sm:$0xff]  }
  0x6f   :  { %1305 = vmatpush1.bf16.msra.mxu0 %v4065_v6  ;;  %948 = vmatpush2.bf16.msra.mxu1 %v4070_v48  ;;  %v4109_v48 = vld [vmem:[%s4898_s2 + $0x2d4] ss:$8 sps:$4 sm:$0xff]   ;;  %v2778_v6 = vcombine.low %v3964_v54, %v3964_v54  ;;  %5101 = vst [vmem:[#allocation82_spill] sm:$0xff] %v4183_v61 }
  0x70   :  { %1306 = vmatprep.subr.bf16.mxu0 %v4080_v52  ;;  %949 = vmatprep.subr.bf16.mxu1 %v4085_v44  ;;  %5090 = vst [vmem:[#allocation71_spill] sm:$0xff] %v4109_v48  ;;  %v4116_v52 = vld [vmem:[%s4898_s2 + $0x410] ss:$8 sps:$4 sm:$0xff]   ;;  %v4155_v54 = vld [vmem:[%s4898_s2 + $0x3f4] ss:$8 sps:$4 sm:$0xff]  }
  0x71   :  { %5091 = vst [vmem:[#allocation72_spill] sm:$0xff] %v4116_v52  ;;  %v4121_v44 = vld [vmem:[%s4898_s2 + $0x2d0] ss:$8 sps:$4 sm:$0xff]   ;;  %5097 = vst [vmem:[#allocation78_spill] sm:$0xff] %v4155_v54  ;;  %v724_v60 = vshll.u32 %v2778_v6, 16 }
  0x72   :  { %5092 = vst [vmem:[#allocation73_spill] sm:$0xff] %v4121_v44  ;;  %v4188_v6 = vld [vmem:[%s4898_s2 + $0x2a4] ss:$8 sps:$4 sm:$0xff]  }
  0x73   :  { %1307 = vmatpush2.bf16.msra.mxu0 %v4092_v47  ;;  %950 = vmatpush2.bf16.msra.mxu1 %v4097_v1  ;;  %v4128_v47 = vld [vmem:[%s4898_s2 + $0x404] ss:$8 sps:$4 sm:$0xff]   ;;  %5102 = vst [vmem:[#allocation83_spill] sm:$0xff] %v4188_v6  ;;  %v726_v57 = vrot.slane %v724_v60, 1  ;;  %v4210_v60 = vld [vmem:[%s4898_s2 + $0x3d4] ss:$8 sps:$4 sm:$0xff]  }
  0x74   :  { %1308 = vmatprep.subr.bf16.mxu0 %v4104_v55  ;;  %951 = vmatprep.subr.bf16.mxu1 %v4109_v48  ;;  %5093 = vst [vmem:[#allocation74_spill] sm:$0xff] %v4128_v47  ;;  %v4133_v1 = vld [vmem:[%s4898_s2 + $0x2c4] ss:$8 sps:$4 sm:$0xff]   ;;  %v4143_v48 = vld [vmem:[%s4898_s2 + $0x400] ss:$8 sps:$4 sm:$0xff]   ;;  %5103 = vst [vmem:[#allocation84_spill] sm:$0xff] %v4210_v60 }
  0x75   :  { %5094 = vst [vmem:[#allocation75_spill] sm:$0xff] %v4133_v1  ;;  %5095 = vst [vmem:[#allocation76_spill] sm:$0xff] %v4143_v48  ;;  %v4148_v55 = vld [vmem:[%s4898_s2 + $0x2c0] ss:$8 sps:$4 sm:$0xff]  }
  0x76   :  { %5096 = vst [vmem:[#allocation77_spill] sm:$0xff] %v4148_v55 }
  0x77   :  { %1309 = vmatpush2.bf16.msra.mxu0 %v4116_v52  ;;  %952 = vmatpush2.bf16.msra.mxu1 %v4121_v44  ;;  %v4160_v44 = vld [vmem:[%s4898_s2 + $0x2b4] ss:$8 sps:$4 sm:$0xff]   ;;  %v717_v52 = vshrl.u32 %v3813_v58, 16 }
  0x78   :  { %1310 = vmatprep.subr.bf16.mxu0 %v4128_v47  ;;  %953 = vmatprep.subr.bf16.mxu1 %v4133_v1  ;;  %5098 = vst [vmem:[#allocation79_spill] sm:$0xff] %v4160_v44  ;;  %v4168_v1 = vld [vmem:[%s4898_s2 + $0x3f0] ss:$8 sps:$4 sm:$0xff]   ;;  %v3304_v58 = vld [vmem:[%s4899_s1 + $0x8] ss:$12 sps:$4 sm:$0xff]  }
  0x79   :  { %5099 = vst [vmem:[#allocation80_spill] sm:$0xff] %v4168_v1  ;;  %v4173_v47 = vld [vmem:[%s4898_s2 + $0x2b0] ss:$8 sps:$4 sm:$0xff]   ;;  %v1106_v53 = vshll.u32 %v3304_v58, 16 }
  0x7a   :  { %5100 = vst [vmem:[#allocation81_spill] sm:$0xff] %v4173_v47 }
  0x7b   :  { %1311 = vmatpush2.bf16.msra.mxu0 %v4143_v48  ;;  %954 = vmatpush2.bf16.msra.mxu1 %v4148_v55  ;;  %v4193_v55 = vld [vmem:[%s4898_s2 + $0x3e0] ss:$8 sps:$4 sm:$0xff]   ;;  %v722_v48 = vor.u32 %v721_v56, %v717_v52  ;;  %v4215_v56 = vld [vmem:[%s4898_s2 + $0x434] ss:$8 sps:$4 sm:$0xff]   ;;  %v4220_v52 = vld [vmem:[%s4898_s2 + $0x3d0] ss:$8 sps:$4 sm:$0xff]  }
  0x7c   :  { %1312 = vmatprep.subr.bf16.mxu0 %v4155_v54  ;;  %955 = vmatprep.subr.bf16.mxu1 %v4160_v44  ;;  %v4200_v44 = vld [vmem:[%s4898_s2 + $0x2a0] ss:$8 sps:$4 sm:$0xff]   ;;  %v1108_v62 = vrot.slane %v1106_v53, 1 }
  0x7d   :  { %v3305_v54 = vld [vmem:[%s4899_s1 + $0x20] ss:$0 sps:$4 sm:$0x11]  }
  0x7e   :  { %v1111_v50 = vshll.u32 %v3305_v54, 16  ;;  %v4245_v53 = vld [vmem:[%s4898_s2 + $0x3c0] ss:$8 sps:$4 sm:$0xff]  }
  0x7f   :  { %1313 = vmatpush2.bf16.msra.mxu0 %v4168_v1  ;;  %956 = vmatpush2.bf16.msra.mxu1 %v4173_v47  ;;  %v727_v47 = vsel %vm715_vm1, %v722_v48, %v726_v57  ;;  %v1104_v1 = vshrl.u32 %v3304_v58, 16  ;;  %v4237_v48 = vld [vmem:[%s4898_s2 + $0x3c4] ss:$8 sps:$4 sm:$0xff]   ;;  %v1080_v57 = vshrl.u32 %v3780_v63, 16 }
  0x80   :  { %1314 = vmatprep.subr.bf16.mxu0 %v4183_v61  ;;  %957 = vmatprep.subr.bf16.mxu1 %v4188_v6  ;;  %v1082_v61 = vshll.u32 %v3780_v63, 16  ;;  %v4229_v6 = vld [vmem:[%s4898_s2 + $0x430] ss:$8 sps:$4 sm:$0xff]   ;;  %v1113_v54 = vrot.slane %v1111_v50, 1 }
  0x81   :  { %v1109_v51 = vor.u32 %v1108_v62, %v1104_v1  ;;  %v4260_v63 = vld [vmem:[%s4898_s2 + $0x3b0] ss:$8 sps:$4 sm:$0xff]   ;;  %v4267_v1 = vld [vmem:[%s4899_s1 + $0x28] ss:$12 sps:$4 sm:$0xff]  }
  0x82   :  { %v1084_v58 = vrot.slane %v1082_v61, 1  ;;  %v1798_v61 = vshll.u32 %v4267_v1, 16 }
  0x83   :  { %1315 = vmatpush2.bf16.msra.mxu0 %v4193_v55  ;;  %958 = vmatpush2.bf16.msra.mxu1 %v4200_v44 }
  0x84   :  { %1316 = vmatprep.subr.bf16.mxu0 %v4210_v60  ;;  %1347 = vmatprep.subr.bf16.mxu1 %v4215_v56  ;;  %v1087_v60 = vshll.u32 %v2853_v43, 16  ;;  %v1114_v43 = vsel %vm715_vm1, %v1109_v51, %v1113_v54  ;;  %v1085_v50 = vor.u32 %v1084_v58, %v1080_v57  ;;  %v5129_v57 = vld [vmem:[#allocation28_spill] sm:$0xff] }
  0x86   :  { %960 = vmatmul.mubr.bf16.vlgmr.msra.gmra.mxu1 %v727_v47  ;;  %v4252_v47 = vld [vmem:[%s4898_s2 + $0x3b4] ss:$8 sps:$4 sm:$0xff]   ;;  %v1089_v62 = vrot.slane %v1087_v60, 1 }
  0x87   :  { %1317 = vmatpush2.bf16.msra.mxu0 %v4220_v52  ;;  %1348 = vmatpush1.bf16.msra.mxu1 %v4229_v6  ;;  %v5128_v60 = vld [vmem:[#allocation24_spill] sm:$0xff] }
  0x88   :  { %1318 = vmatprep.subr.bf16.mxu0 %v4237_v48  ;;  %1365 = vmatprep.mubr.bf16.mxu1 %v5047_v59 }
  0x89   :  { %1408 = vmatprep.subr.bf16.mxu1 %v3371_v0  ;;  %v1090_v0 = vsel %vm715_vm1, %v1085_v50, %v1089_v62  ;;  %v5131_v50 = vld [vmem:[#allocation27_spill] sm:$0xff]  ;;  %v1796_v62 = vshrl.u32 %v4267_v1, 16 }
  0x8b   :  { %1319 = vmatpush2.bf16.msra.mxu0 %v4245_v53 }
  0x8c   :  { %1320 = vmatprep.subr.bf16.mxu0 %v4252_v47 }
  0x8e   :  { %2890 = vmatmul.mubr.msk.bf16.vlgmr.msra.gmra.mxu1 %vm289_vm0, %v1114_v43  ;;  %v5130_v43 = vld [vmem:[#allocation29_spill] sm:$0xff] }
  0x8f   :  { %1321 = vmatpush2.bf16.msra.mxu0 %v4260_v63  ;;  %1409 = vmatpush1.bf16.msra.mxu1 %v3383_v3  ;;  %v3308_v3 = vld [vmem:[%s4899_s1 + $0x2c] ss:$12 sps:$4 sm:$0xff]  }
  0x90   :  { %1410 = vmatprep.subr.bf16.mxu1 %v3394_v5  ;;  %1465 = vmatprep.subr.bf16.mxu0 %v3377_v2  ;;  %v4289_v2 = vld [vmem:[%s4900_s0 + $0x28] ss:$12 sps:$4 sm:$0xff]   ;;  %v5105_v5 = vld [vmem:[#allocation6_spill] sm:$0xff] }
  0x91   :  { %1440 = vmatprep.mubr.bf16.mxu1 %v4267_v1 }
  0x92   :  { %1323 = vmatmul.mubr.bf16.vlgmr.msra.gmra.mxu0 %v1090_v0  ;;  %v1800_v0 = vrot.slane %v1798_v61, 1  ;;  %v5165_v61 = vld [vmem:[#allocation63_spill] sm:$0xff] }
  0x93   :  { %1411 = vmatpush1.bf16.msra.mxu1 %v3415_v9  ;;  %1466 = vmatpush1.bf16.msra.mxu0 %v3388_v4  ;;  %v5104_v4 = vld [vmem:[#allocation2_spill] sm:$0xff]  ;;  %v5108_v9 = vld [vmem:[#allocation4_spill] sm:$0xff] }
  0x94   :  { %1412 = vmatprep.subr.bf16.mxu1 %v3422_v10  ;;  %1483 = vmatprep.mubr.bf16.mxu0 %v5047_v59  ;;  %v5109_v10 = vld [vmem:[#allocation10_spill] sm:$0xff] }
  0x95   :  { %1512 = vmatprep.subr.bf16.mxu0 %v3410_v8  ;;  %v5107_v8 = vld [vmem:[#allocation9_spill] sm:$0xff] }
  0x97   :  { %1413 = vmatpush1.bf16.msra.mxu1 %v3439_v13  ;;  %v5112_v13 = vld [vmem:[#allocation7_spill] sm:$0xff] }
  0x98   :  { %1414 = vmatprep.subr.bf16.mxu1 %v3445_v14  ;;  %v5113_v14 = vld [vmem:[#allocation14_spill] sm:$0xff] }
  0x9a   :  { %2902 = vmatmul.mubr.msk.bf16.vlgmr.msra.gmra.mxu0 %vm289_vm0, %v3308_v3 }
  0x9b   :  { %1513 = vmatpush1.bf16.msra.mxu0 %v3405_v7  ;;  %1415 = vmatpush1.bf16.msra.mxu1 %v3463_v17  ;;  %v5106_v7 = vld [vmem:[#allocation3_spill] sm:$0xff]  ;;  %v4342_v17 = vld [vmem:[%s4900_s0 + $0x3c] sm:$0x11] }
  0x9c   :  { %1514 = vmatprep.subr.bf16.mxu0 %v3434_v12  ;;  %1416 = vmatprep.subr.bf16.mxu1 %v3470_v18  ;;  %v5111_v12 = vld [vmem:[#allocation13_spill] sm:$0xff]  ;;  %v5116_v18 = vld [vmem:[#allocation11_spill] sm:$0xff] }
  0x9d   :  { %1544 = vmatprep.mubr.bf16.mxu0 %v4289_v2 }
  0x9f   :  { %1515 = vmatpush1.bf16.msra.mxu0 %v3429_v11  ;;  %1417 = vmatpush1.bf16.msra.mxu1 %v3487_v21  ;;  %v5110_v11 = vld [vmem:[#allocation5_spill] sm:$0xff]  ;;  %v2917_v21 = vcombine.high %v4342_v17, %v4342_v17 }
  0xa0   :  { %1516 = vmatprep.subr.bf16.mxu0 %v3456_v16  ;;  %1418 = vmatprep.subr.bf16.mxu1 %v3492_v22  ;;  %v5115_v16 = vld [vmem:[#allocation17_spill] sm:$0xff]  ;;  %v1640_v22 = vshll.u32 %v4289_v2, 16 }
  0xa3   :  { %1517 = vmatpush1.bf16.msra.mxu0 %v3451_v15  ;;  %1419 = vmatpush1.bf16.msra.mxu1 %v3511_v25  ;;  %v5114_v15 = vld [vmem:[#allocation8_spill] sm:$0xff]  ;;  %v5120_v25 = vld [vmem:[#allocation15_spill] sm:$0xff] }
  0xa4   :  { %1518 = vmatprep.subr.bf16.mxu0 %v3475_v19  ;;  %1420 = vmatprep.subr.bf16.mxu1 %v3518_v26  ;;  %v5117_v19 = vld [vmem:[#allocation18_spill] sm:$0xff]  ;;  %v5121_v26 = vld [vmem:[#allocation23_spill] sm:$0xff] }
  0xa7   :  { %1519 = vmatpush1.bf16.msra.mxu0 %v3482_v20  ;;  %1421 = vmatpush1.bf16.msra.mxu1 %v3535_v29  ;;  %v4349_v20 = vld [vmem:[%s4899_s1 + $0x24] ss:$12 sps:$4 sm:$0xff]   ;;  %v1645_v29 = vshll.u32 %v2917_v21, 16 }
  0xa8   :  { %1520 = vmatprep.subr.bf16.mxu0 %v3499_v23  ;;  %1422 = vmatprep.subr.bf16.mxu1 %v3540_v30  ;;  %v5118_v23 = vld [vmem:[#allocation12_spill] sm:$0xff] }
  0xa9   :  { %v5122_v30 = vld [vmem:[#allocation16_spill] sm:$0xff] }
  0xaa   :  { %v5142_v21 = vld [vmem:[#allocation40_spill] sm:$0xff] }
  0xab   :  { %1521 = vmatpush1.bf16.msra.mxu0 %v3504_v24  ;;  %1423 = vmatpush1.bf16.msra.mxu1 %v3559_v33  ;;  %v5119_v24 = vld [vmem:[#allocation21_spill] sm:$0xff]  ;;  %v5124_v33 = vld [vmem:[#allocation19_spill] sm:$0xff] }
  0xac   :  { %1522 = vmatprep.subr.bf16.mxu0 %v3523_v27  ;;  %1424 = vmatprep.subr.bf16.mxu1 %v3566_v34  ;;  %v1638_v27 = vshrl.u32 %v4289_v2, 16  ;;  %v5125_v34 = vld [vmem:[#allocation26_spill] sm:$0xff] }
  0xad   :  { %v5132_v2 = vld [vmem:[#allocation30_spill] sm:$0xff] }
  0xaf   :  { %1523 = vmatpush1.bf16.msra.mxu0 %v3530_v28  ;;  %1425 = vmatpush2.bf16.msra.mxu1 %v3583_v37  ;;  %v1642_v28 = vrot.slane %v1640_v22, 1  ;;  %v1647_v37 = vrot.slane %v1645_v29, 1  ;;  %v5143_v22 = vld [vmem:[#allocation41_spill] sm:$0xff]  ;;  %v5150_v29 = vld [vmem:[#allocation48_spill] sm:$0xff] }
  0xb0   :  { %1524 = vmatprep.subr.bf16.mxu0 %v3547_v31  ;;  %1426 = vmatprep.subr.bf16.mxu1 %v3588_v38  ;;  %v5123_v31 = vld [vmem:[#allocation25_spill] sm:$0xff]  ;;  %v5126_v38 = vld [vmem:[#allocation20_spill] sm:$0xff] }
  0xb3   :  { %1525 = vmatpush1.bf16.msra.mxu0 %v3552_v32  ;;  %1427 = vmatpush2.bf16.msra.mxu1 %v3607_v41  ;;  %v3316_v32 = vld [vmem:[%s4900_s0 + $0x2c] ss:$12 sps:$4 sm:$0xff]   ;;  %v4378_v41 = vld [vmem:[%s4899_s1 + $0x3c] sm:$0x11] }
  0xb4   :  { %1526 = vmatprep.subr.bf16.mxu0 %v3571_v35  ;;  %1428 = vmatprep.subr.bf16.mxu1 %v3614_v42  ;;  %v3312_v35 = vld [vmem:[%s4900_s0 + $0x2c] ss:$12 sps:$4 sm:$0xff]   ;;  %v5127_v42 = vld [vmem:[#allocation22_spill] sm:$0xff]  ;;  %v1650_v51 = vshrl.u32 %v3316_v32, 16 }
  0xb7   :  { %1527 = vmatpush1.bf16.msra.mxu0 %v3578_v36  ;;  %1429 = vmatpush2.bf16.msra.mxu1 %v3631_v45  ;;  %v1643_v36 = vor.u32 %v1642_v28, %v1638_v27  ;;  %v4385_v45 = vld [vmem:[%s4900_s0 + $0x24] ss:$12 sps:$4 sm:$0xff]   ;;  %v5149_v28 = vld [vmem:[#allocation47_spill] sm:$0xff] }
  0xb8   :  { %1528 = vmatprep.subr.bf16.mxu0 %v3595_v39  ;;  %1430 = vmatprep.subr.bf16.mxu1 %v3636_v46  ;;  %v3317_v39 = vld [vmem:[%s4900_s0 + $0x44] ss:$0 sps:$4 sm:$0x11]  }
  0xb9   :  { %v1648_v46 = vsel %vm715_vm1, %v1643_v36, %v1647_v37  ;;  %v1657_v58 = vshll.u32 %v3317_v39, 16  ;;  %v5148_v27 = vld [vmem:[#allocation46_spill] sm:$0xff]  ;;  %v5157_v36 = vld [vmem:[#allocation55_spill] sm:$0xff]  ;;  %v5158_v37 = vld [vmem:[#allocation56_spill] sm:$0xff] }
  0xba   :  { %v5160_v39 = vld [vmem:[#allocation58_spill] sm:$0xff] }
  0xbb   :  { %1529 = vmatpush2.bf16.msra.mxu0 %v3600_v40  ;;  %1431 = vmatpush2.bf16.msra.mxu1 %v3653_v49  ;;  %v1652_v40 = vshll.u32 %v3316_v32, 16  ;;  %v2930_v49 = vcombine.high %v4378_v41, %v4378_v41  ;;  %v5153_v32 = vld [vmem:[#allocation51_spill] sm:$0xff] }
  0xbc   :  { %1530 = vmatprep.subr.bf16.mxu0 %v5104_v4  ;;  %1432 = vmatprep.subr.bf16.mxu1 %v5105_v5  ;;  %v5133_v4 = vld [vmem:[#allocation31_spill] sm:$0xff] }
  0xbd   :  { %v1654_v54 = vrot.slane %v1652_v40, 1  ;;  %v1803_v3 = vshll.u32 %v2930_v49, 16  ;;  %v5161_v40 = vld [vmem:[#allocation59_spill] sm:$0xff]  ;;  %v5164_v49 = vld [vmem:[#allocation62_spill] sm:$0xff] }
  0xbf   :  { %1531 = vmatpush2.bf16.msra.mxu0 %v5106_v7  ;;  %1433 = vmatpush2.bf16.msra.mxu1 %v5107_v8  ;;  %v1655_v5 = vor.u32 %v1654_v54, %v1650_v51  ;;  %v1659_v7 = vrot.slane %v1657_v58, 1  ;;  %v5134_v8 = vld [vmem:[#allocation32_spill] sm:$0xff]  ;;  %v5168_v51 = vld [vmem:[#allocation66_spill] sm:$0xff]  ;;  %v5169_v54 = vld [vmem:[#allocation67_spill] sm:$0xff] }
  0xc0   :  { %1532 = vmatprep.subr.bf16.mxu0 %v5108_v9  ;;  %1434 = vmatprep.subr.bf16.mxu1 %v5109_v10  ;;  %v5135_v9 = vld [vmem:[#allocation33_spill] sm:$0xff]  ;;  %v1801_v10 = vor.u32 %v1800_v0, %v1796_v62  ;;  %v5170_v58 = vld [vmem:[#allocation68_spill] sm:$0xff]  ;;  %v5173_v62 = vld [vmem:[#allocation71_spill] sm:$0xff] }
  0xc1   :  { %v1660_v1 = vsel %vm715_vm1, %v1655_v5, %v1659_v7  ;;  %v5174_v0 = vld [vmem:[#allocation72_spill] sm:$0xff]  ;;  %v5176_v5 = vld [vmem:[#allocation74_spill] sm:$0xff]  ;;  %v5177_v7 = vld [vmem:[#allocation75_spill] sm:$0xff] }
  0xc3   :  { %1533 = vmatpush2.bf16.msra.mxu0 %v5110_v11  ;;  %1435 = vmatpush2.bf16.msra.mxu1 %v5111_v12  ;;  %v1805_v11 = vrot.slane %v1803_v3, 1  ;;  %v5136_v12 = vld [vmem:[#allocation34_spill] sm:$0xff]  ;;  %v5175_v3 = vld [vmem:[#allocation73_spill] sm:$0xff] }
  0xc4   :  { %1534 = vmatprep.subr.bf16.mxu0 %v5112_v13  ;;  %1436 = vmatprep.subr.bf16.mxu1 %v5113_v14  ;;  %v5137_v13 = vld [vmem:[#allocation35_spill] sm:$0xff] }
  0xc5   :  { %v1806_v14 = vsel %vm715_vm1, %v1801_v10, %v1805_v11  ;;  %v5179_v10 = vld [vmem:[#allocation77_spill] sm:$0xff]  ;;  %v1626_v11 = vshrl.u32 %v4385_v45, 16 }
  0xc7   :  { %1535 = vmatpush2.bf16.msra.mxu0 %v5114_v15  ;;  %1437 = vmatpush2.bf16.msra.mxu1 %v5115_v16  ;;  %v5138_v15 = vld [vmem:[#allocation36_spill] sm:$0xff]  ;;  %v5139_v16 = vld [vmem:[#allocation37_spill] sm:$0xff] }
  0xc8   :  { %1536 = vmatprep.subr.bf16.mxu0 %v5116_v18  ;;  %1438 = vmatprep.subr.bf16.mxu1 %v5117_v19  ;;  %v5140_v18 = vld [vmem:[#allocation38_spill] sm:$0xff]  ;;  %v5141_v19 = vld [vmem:[#allocation39_spill] sm:$0xff] }
  0xcb   :  { %1537 = vmatpush2.bf16.msra.mxu0 %v5118_v23  ;;  %1439 = vmatpush2.bf16.msra.mxu1 %v5119_v24  ;;  %v5144_v23 = vld [vmem:[#allocation42_spill] sm:$0xff]  ;;  %v5145_v24 = vld [vmem:[#allocation43_spill] sm:$0xff] }
  0xcc   :  { %1538 = vmatprep.subr.bf16.mxu0 %v5120_v25  ;;  %1569 = vmatprep.subr.bf16.mxu1 %v5121_v26  ;;  %v5146_v25 = vld [vmem:[#allocation44_spill] sm:$0xff]  ;;  %v5147_v26 = vld [vmem:[#allocation45_spill] sm:$0xff] }
  0xce   :  { %1441 = vmatmul.mubr.bf16.vlgmr.msra.gmra.mxu1 %v4349_v20 }
  0xcf   :  { %1539 = vmatpush2.bf16.msra.mxu0 %v5122_v30  ;;  %1570 = vmatpush1.bf16.msra.mxu1 %v5123_v31  ;;  %v5151_v30 = vld [vmem:[#allocation49_spill] sm:$0xff]  ;;  %v5152_v31 = vld [vmem:[#allocation50_spill] sm:$0xff] }
  0xd0   :  { %1540 = vmatprep.subr.bf16.mxu0 %v5124_v33  ;;  %1587 = vmatprep.mubr.bf16.mxu1 %v5047_v59  ;;  %v5154_v33 = vld [vmem:[#allocation52_spill] sm:$0xff] }
  0xd1   :  { %1666 = vmatprep.subr.bf16.mxu1 %v5125_v34  ;;  %v5155_v34 = vld [vmem:[#allocation53_spill] sm:$0xff] }
  0xd3   :  { %1541 = vmatpush2.bf16.msra.mxu0 %v5126_v38  ;;  %v5159_v38 = vld [vmem:[#allocation57_spill] sm:$0xff] }
  0xd4   :  { %1542 = vmatprep.subr.bf16.mxu0 %v5127_v42  ;;  %v5162_v42 = vld [vmem:[#allocation60_spill] sm:$0xff] }
  0xd6   :  { %2906 = vmatmul.mubr.msk.bf16.vlgmr.msra.gmra.mxu1 %vm289_vm0, %v3312_v35  ;;  %v5156_v35 = vld [vmem:[#allocation54_spill] sm:$0xff] }
  0xd7   :  { %1543 = vmatpush2.bf16.msra.mxu0 %v5128_v60  ;;  %1667 = vmatpush1.bf16.msra.mxu1 %v5129_v57  ;;  %v5166_v60 = vld [vmem:[#allocation64_spill] sm:$0xff]  ;;  %v5167_v57 = vld [vmem:[#allocation65_spill] sm:$0xff] }
  0xd8   :  { %1668 = vmatprep.subr.bf16.mxu1 %v5130_v43  ;;  %1723 = vmatprep.subr.bf16.mxu0 %v5131_v50  ;;  %v5171_v43 = vld [vmem:[#allocation69_spill] sm:$0xff]  ;;  %v5172_v50 = vld [vmem:[#allocation70_spill] sm:$0xff] }
  0xd9   :  { %1698 = vmatprep.mubr.bf16.mxu1 %v1648_v46  ;;  %v5163_v46 = vld [vmem:[#allocation61_spill] sm:$0xff] }
  0xda   :  { %1545 = vmatmul.mubr.bf16.vlgmr.msra.gmra.mxu0 %v4385_v45 }
  0xdb   :  { %1669 = vmatpush1.bf16.msra.mxu1 %v5132_v2  ;;  %1724 = vmatpush1.bf16.msra.mxu0 %v5133_v4  ;;  %v2916_v2 = vcombine.low %v4342_v17, %v4342_v17  ;;  %v1628_v4 = vshll.u32 %v4385_v45, 16  ;;  %v5181_v17 = vld [vmem:[#allocation79_spill] sm:$0xff] }
  0xdc   :  { %1670 = vmatprep.subr.bf16.mxu1 %v5134_v8  ;;  %1741 = vmatprep.mubr.bf16.mxu0 %v5047_v59  ;;  %v3320_v8 = vld [vmem:[%s4899_s1 + $0x2c] ss:$12 sps:$4 sm:$0xff]  }
  0xdd   :  { %1824 = vmatprep.subr.bf16.mxu0 %v5135_v9  ;;  %v5178_v9 = vld [vmem:[#allocation76_spill] sm:$0xff]  ;;  %v5185_v45 = vld [vmem:[#allocation83_spill] sm:$0xff] }
  0xdf   :  { %1671 = vmatpush1.bf16.msra.mxu1 %v5136_v12  ;;  %v1630_v12 = vrot.slane %v1628_v4, 1  ;;  %v4648_v4 = vld [vmem:[%s4901_s3 + $0xa0] sm:$0xff] }
  0xe0   :  { %1672 = vmatprep.subr.bf16.mxu1 %v5137_v13  ;;  %v5180_v13 = vld [vmem:[#allocation78_spill] sm:$0xff]  ;;  %5189 = vst [vmem:[#allocation3_spill] sm:$0xff] %v4648_v4 }
  0xe2   :  { %2919 = vmatmul.mubr.msk.bf16.vlgmr.msra.gmra.mxu0 %vm289_vm0, %v1660_v1  ;;  %v1633_v1 = vshll.u32 %v2916_v2, 16  ;;  %v4641_v2 = vld [vmem:[%s4901_s3 + $0x28] sm:$0xff] }
  0xe3   :  { %1825 = vmatpush1.bf16.msra.mxu0 %v5138_v15  ;;  %1673 = vmatpush1.bf16.msra.mxu1 %v5139_v16  ;;  %v5182_v15 = vld [vmem:[#allocation80_spill] sm:$0xff]  ;;  %v5183_v16 = vld [vmem:[#allocation81_spill] sm:$0xff]  ;;  %5188 = vst [vmem:[#allocation6_spill] sm:$0xff] %v4641_v2 }
  0xe4   :  { %1826 = vmatprep.subr.bf16.mxu0 %v5140_v18  ;;  %1674 = vmatprep.subr.bf16.mxu1 %v5141_v19  ;;  %v1631_v18 = vor.u32 %v1630_v12, %v1626_v11  ;;  %v1635_v19 = vrot.slane %v1633_v1, 1  ;;  %v4678_v11 = vld [vmem:[%s4901_s3 + $0x90] sm:$0xff] }
  0xe5   :  { %1856 = vmatprep.mubr.bf16.mxu0 %v1806_v14  ;;  %v1810_v14 = vshll.u32 %v3320_v8, 16  ;;  %5193 = vst [vmem:[#allocation5_spill] sm:$0xff] %v4678_v11 }
  0xe7   :  { %1827 = vmatpush1.bf16.msra.mxu0 %v5142_v21  ;;  %1675 = vmatpush1.bf16.msra.mxu1 %v5143_v22  ;;  %v3321_v21 = vld [vmem:[%s4899_s1 + $0x44] ss:$0 sps:$4 sm:$0x11]  }
  0xe8   :  { %1828 = vmatprep.subr.bf16.mxu0 %v5144_v23  ;;  %1676 = vmatprep.subr.bf16.mxu1 %v5145_v24  ;;  %v5184_v22 = vld [vmem:[#allocation82_spill] sm:$0xff]  ;;  %v1808_v23 = vshrl.u32 %v3320_v8, 16  ;;  %v1812_v24 = vrot.slane %v1810_v14, 1  ;;  %v4664_v8 = vld [vmem:[%s4901_s3 + $0x98] sm:$0xff]  ;;  %v4699_v14 = vld [vmem:[%s4901_s3 + $0x8] sm:$0xff] }
  0xe9   :  { %5191 = vst [vmem:[#allocation4_spill] sm:$0xff] %v4664_v8  ;;  %5196 = vst [vmem:[#allocation14_spill] sm:$0xff] %v4699_v14 }
  0xeb   :  { %1829 = vmatpush1.bf16.msra.mxu0 %v5146_v25  ;;  %1677 = vmatpush1.bf16.msra.mxu1 %v5147_v26  ;;  %v1636_v25 = vsel %vm715_vm1, %v1631_v18, %v1635_v19  ;;  %v1815_v26 = vshll.u32 %v3321_v21, 16  ;;  %v4713_v19 = vld [vmem:[%s4901_s3] sm:$0xff] }
  0xec   :  { %1830 = vmatprep.subr.bf16.mxu0 %v5148_v27  ;;  %1678 = vmatprep.subr.bf16.mxu1 %v5149_v28  ;;  %v2929_v27 = vcombine.low %v4378_v41, %v4378_v41  ;;  %v1786_v28 = vshll.u32 %v4349_v20, 16  ;;  %v4481_v41 = vld [vmem:[%s4901_s3 + $0xf8] sm:$0xff]  ;;  %5198 = vst [vmem:[#allocation17_spill] sm:$0xff] %v4713_v19 }
  0xed   :  { %5187 = vst [vmem:[#allocation2_spill] sm:$0xff] %v4481_v41 }
  0xef   :  { %1831 = vmatpush1.bf16.msra.mxu0 %v5150_v29  ;;  %1679 = vmatpush1.bf16.msra.mxu1 %v5151_v30  ;;  %v5186_v29 = vld [vmem:[#allocation84_spill] sm:$0xff]  ;;  %v1813_v30 = vor.u32 %v1812_v24, %v1808_v23 }
  0xf0   :  { %1832 = vmatprep.subr.bf16.mxu0 %v5152_v31  ;;  %1680 = vmatprep.subr.bf16.mxu1 %v5153_v32  ;;  %v1788_v31 = vrot.slane %v1786_v28, 1  ;;  %v1791_v32 = vshll.u32 %v2929_v27, 16 }
  0xf3   :  { %1833 = vmatpush1.bf16.msra.mxu0 %v5154_v33  ;;  %1681 = vmatpush1.bf16.msra.mxu1 %v5155_v34  ;;  %v4524_v33 = vld [vmem:[%s4901_s3 + $0xe0] sm:$0xff] }
  0xf4   :  { %1834 = vmatprep.subr.bf16.mxu0 %v5156_v35  ;;  %1682 = vmatprep.subr.bf16.mxu1 %v5157_v36  ;;  %v4533_v35 = vld [vmem:[%s4901_s3 + $0x60] sm:$0xff]  ;;  %v4540_v36 = vld [vmem:[%s4901_s3 + $0xd8] sm:$0xff] }
  0xf7   :  { %1835 = vmatpush1.bf16.msra.mxu0 %v5158_v37  ;;  %1683 = vmatpush2.bf16.msra.mxu1 %v5159_v38  ;;  %v4547_v37 = vld [vmem:[%s4901_s3 + $0x58] sm:$0xff]  ;;  %v4554_v38 = vld [vmem:[%s4901_s3 + $0xd0] sm:$0xff] }
  0xf8   :  { %1836 = vmatprep.subr.bf16.mxu0 %v5160_v39  ;;  %1684 = vmatprep.subr.bf16.mxu1 %v5161_v40  ;;  %v4563_v40 = vld [vmem:[%s4901_s3 + $0x50] sm:$0xff] }
  0xfb   :  { %1837 = vmatpush1.bf16.msra.mxu0 %v5162_v42  ;;  %1685 = vmatpush2.bf16.msra.mxu1 %v5163_v46  ;;  %v4570_v42 = vld [vmem:[%s4901_s3 + $0xc8] sm:$0xff]  ;;  %v4573_v46 = vpop.f32.mrf.mxu1 }
  0xfc   :  { %1838 = vmatprep.subr.bf16.mxu0 %v5164_v49  ;;  %1686 = vmatprep.subr.bf16.mxu1 %v5165_v61  ;;  %v4579_v49 = vld [vmem:[%s4901_s3 + $0x48] sm:$0xff]  ;;  %v4586_v61 = vld [vmem:[%s4901_s3 + $0xc0] sm:$0xff] }
  0xff   :  { %1839 = vmatpush1.bf16.msra.mxu0 %v5166_v60  ;;  %1687 = vmatpush2.bf16.msra.mxu1 %v5167_v57  ;;  %v4595_v57 = vld [vmem:[%s4901_s3 + $0x40] sm:$0xff] }
 0x100   :  { %1840 = vmatprep.subr.bf16.mxu0 %v5168_v51  ;;  %1688 = vmatprep.subr.bf16.mxu1 %v5169_v54  ;;  %v4602_v51 = vld [vmem:[%s4901_s3 + $0xb8] sm:$0xff]  ;;  %v4605_v54 = vpop.f32.mrf.mxu1 }
 0x102   :  { %v4527_v34 = vpop.f32.mrf.mxu0 }
 0x103   :  { %1841 = vmatpush2.bf16.msra.mxu0 %v5170_v58  ;;  %1689 = vmatpush2.bf16.msra.mxu1 %v5171_v43  ;;  %v4611_v58 = vld [vmem:[%s4901_s3 + $0x38] sm:$0xff]  ;;  %v4618_v43 = vld [vmem:[%s4901_s3 + $0xb0] sm:$0xff] }
 0x104   :  { %1842 = vmatprep.subr.bf16.mxu0 %v5172_v50  ;;  %1690 = vmatprep.subr.bf16.mxu1 %v5173_v62  ;;  %v4557_v39 = vpop.f32.mrf.mxu0  ;;  %v4627_v62 = vld [vmem:[%s4901_s3 + $0x30] sm:$0xff] }
 0x106   :  { %v4589_v60 = vpop.f32.mrf.mxu0 }
 0x107   :  { %1843 = vmatpush2.bf16.msra.mxu0 %v5174_v0  ;;  %1691 = vmatpush2.bf16.msra.mxu1 %v5175_v3  ;;  %v4634_v0 = vld [vmem:[%s4901_s3 + $0xa8] sm:$0xff]  ;;  %v374_v3 = vpop.f32.mrf.mxu1 }
 0x108   :  { %1844 = vmatprep.subr.bf16.mxu0 %v5176_v5  ;;  %1692 = vmatprep.subr.bf16.mxu1 %v5177_v7  ;;  %v4621_v50 = vpop.f32.mrf.mxu0  ;;  %v4657_v7 = vld [vmem:[%s4901_s3 + $0x20] sm:$0xff] }
 0x109   :  { %5190 = vst [vmem:[#allocation9_spill] sm:$0xff] %v4657_v7 }
 0x10a   :  { %v4651_v5 = vpop.f32.mrf.mxu0 }
 0x10b   :  { %1845 = vmatpush2.bf16.msra.mxu0 %v5178_v9  ;;  %1693 = vmatpush2.bf16.msra.mxu1 %v5179_v10  ;;  %v376_v9 = vpop.f32.mrf.mxu1  ;;  %v4671_v10 = vld [vmem:[%s4901_s3 + $0x18] sm:$0xff] }
 0x10c   :  { %1846 = vmatprep.subr.bf16.mxu0 %v5180_v13  ;;  %1694 = vmatprep.subr.bf16.mxu1 %v5181_v17  ;;  %5192 = vst [vmem:[#allocation10_spill] sm:$0xff] %v4671_v10  ;;  %v646_v1 = vpop.f32.mrf.mxu0  ;;  %v4685_v13 = vld [vmem:[%s4901_s3 + $0x10] sm:$0xff]  ;;  %v4692_v17 = vld [vmem:[%s4901_s3 + $0x88] sm:$0xff] }
 0x10d   :  { %v601_v12 = vpop.f32.mrf.mxu1  ;;  %5194 = vst [vmem:[#allocation13_spill] sm:$0xff] %v4685_v13  ;;  %5195 = vst [vmem:[#allocation7_spill] sm:$0xff] %v4692_v17 }
 0x10e   :  { %v648_v18 = vpop.f32.mrf.mxu0 }
 0x10f   :  { %1847 = vmatpush2.bf16.msra.mxu0 %v5182_v15  ;;  %1695 = vmatpush2.bf16.msra.mxu1 %v5183_v16  ;;  %v4706_v15 = vld [vmem:[%s4901_s3 + $0x80] sm:$0xff]  ;;  %v603_v16 = vpop.f32.mrf.mxu1 }
 0x110   :  { %1848 = vmatprep.subr.bf16.mxu0 %v5184_v22  ;;  %1696 = vmatprep.subr.bf16.mxu1 %v5185_v45  ;;  %5197 = vst [vmem:[#allocation8_spill] sm:$0xff] %v4706_v15  ;;  %v650_v22 = vpop.f32.mrf.mxu0 }
 0x111   :  { %v605_v21 = vpop.f32.mrf.mxu1 }
 0x112   :  { %v1004_v23 = vpop.f32.mrf.mxu0 }
 0x113   :  { %1849 = vmatpush2.bf16.msra.mxu0 %v4193_v55  ;;  %1697 = vmatpush2.bf16.msra.mxu1 %v4200_v44  ;;  %v1817_v55 = vrot.slane %v1815_v26, 1  ;;  %v1784_v44 = vshrl.u32 %v4349_v20, 16  ;;  %v4517_v20 = vld [vmem:[%s4901_s3 + $0x68] sm:$0xff]  ;;  %v607_v45 = vpop.f32.mrf.mxu1 }
 0x114   :  { %1850 = vmatprep.subr.bf16.mxu0 %v5186_v29  ;;  %1881 = vmatprep.subr.bf16.mxu1 %v4215_v56 }
 0x115   :  { %v1789_v56 = vor.u32 %v1788_v31, %v1784_v44  ;;  %v371_v31 = vadd.f32 %v4573_v46, %v4527_v34 }
 0x116   :  { %1699 = vmatmul.mubr.bf16.vlgmr.msra.gmra.mxu1 %v1636_v25  ;;  %v1006_v25 = vpop.f32.mrf.mxu0 }
 0x117   :  { %1851 = vmatpush2.bf16.msra.mxu0 %v4220_v52  ;;  %1882 = vmatpush1.bf16.msra.mxu1 %v4229_v6  ;;  %v1818_v6 = vsel %vm715_vm1, %v1813_v30, %v1817_v55  ;;  %v1793_v52 = vrot.slane %v1791_v32, 1  ;;  %v375_v32 = vadd.f32 %v374_v3, %v4589_v60 }
 0x118   :  { %1852 = vmatprep.subr.bf16.mxu0 %v4237_v48  ;;  %1899 = vmatprep.mubr.bf16.mxu1 %v5047_v59  ;;  %v4491_v59 = vld [vmem:[%s4901_s3 + $0x78] sm:$0xff]  ;;  %v1008_v28 = vpop.f32.mrf.mxu0 }
 0x119   :  { %2946 = vmatprep.subr.mxu1 %v4481_v41  ;;  %v1794_v48 = vsel %vm715_vm1, %v1789_v56, %v1793_v52  ;;  %v377_v56 = vadd.f32 %v376_v9, %v4621_v50 }
 0x11a   :  { %v1010_v55 = vpop.f32.mrf.mxu0 }
 0x11b   :  { %1853 = vmatpush2.bf16.msra.mxu0 %v4245_v53  ;;  %v4498_v53 = vld [vmem:[%s4901_s3 + $0xf0] sm:$0xff] }
 0x11c   :  { %1854 = vmatprep.subr.bf16.mxu0 %v4252_v47  ;;  %v4505_v47 = vld [vmem:[%s4901_s3 + $0x70] sm:$0xff] }
 0x11e   :  { %2932 = vmatmul.mubr.msk.bf16.vlgmr.msra.gmra.mxu1 %vm289_vm0, %v1818_v6  ;;  %v373_v6 = vadd.f32 %v4605_v54, %v4557_v39 }
 0x11f   :  { %1855 = vmatpush2.bf16.msra.mxu0 %v4260_v63  ;;  %2947 = vmatpush3.msra.mxu1 %v4491_v59  ;;  %v4511_v63 = vld [vmem:[%s4901_s3 + $0xe8] sm:$0xff] }
 0x120   :  { %2981 = vmatprep.subr.mxu0 %v4481_v41  ;;  %2948 = vmatprep.subr.mxu1 %v4498_v53 }
 0x121   :  { %2949 = vmatpush3.msra.mxu1 %v4505_v47 }
 0x122   :  { %1857 = vmatmul.mubr.bf16.vlgmr.msra.gmra.mxu0 %v1794_v48  ;;  %2950 = vmatprep.subr.mxu1 %v4511_v63  ;;  %v602_v48 = vadd.f32 %v601_v12, %v371_v31  ;;  %v5207_v31 = vld [vmem:[#allocation13_spill] sm:$0xff] }
 0x123   :  { %2982 = vmatpush3.msra.mxu0 %v4491_v59  ;;  %2951 = vmatpush3.msra.mxu1 %v4517_v20 }
 0x124   :  { %2983 = vmatprep.subr.mxu0 %v4498_v53  ;;  %2952 = vmatprep.subr.mxu1 %v4524_v33 }
 0x125   :  { %2984 = vmatpush3.msra.mxu0 %v4505_v47  ;;  %2953 = vmatpush3.msra.mxu1 %v4533_v35 }
 0x126   :  { %2985 = vmatprep.subr.mxu0 %v4511_v63  ;;  %2954 = vmatprep.subr.mxu1 %v4540_v36 }
 0x127   :  { %2986 = vmatpush3.msra.mxu0 %v4517_v20  ;;  %2955 = vmatpush3.msra.mxu1 %v4547_v37 }
 0x128   :  { %2987 = vmatprep.subr.mxu0 %v4524_v33  ;;  %2956 = vmatprep.subr.mxu1 %v4554_v38 }
 0x129   :  { %2988 = vmatpush3.msra.mxu0 %v4533_v35  ;;  %2957 = vmatpush3.msra.mxu1 %v4563_v40 }
 0x12a   :  { %2989 = vmatprep.subr.mxu0 %v4540_v36  ;;  %2958 = vmatprep.subr.mxu1 %v4570_v42 }
 0x12b   :  { %2990 = vmatpush3.msra.mxu0 %v4547_v37  ;;  %2959 = vmatpush3.msra.mxu1 %v4579_v49 }
 0x12c   :  { %2991 = vmatprep.subr.mxu0 %v4554_v38  ;;  %2960 = vmatprep.subr.mxu1 %v4586_v61 }
 0x12d   :  { %2992 = vmatpush3.msra.mxu0 %v4563_v40  ;;  %2961 = vmatpush3.msra.mxu1 %v4595_v57 }
 0x12e   :  { %2993 = vmatprep.subr.mxu0 %v4570_v42  ;;  %2962 = vmatprep.subr.mxu1 %v4602_v51 }
 0x12f   :  { %2994 = vmatpush3.msra.mxu0 %v4579_v49  ;;  %2963 = vmatpush3.msra.mxu1 %v4611_v58 }
 0x130   :  { %2995 = vmatprep.subr.mxu0 %v4586_v61  ;;  %2964 = vmatprep.subr.mxu1 %v4618_v43 }
 0x131   :  { %2996 = vmatpush3.msra.mxu0 %v4595_v57  ;;  %2965 = vmatpush3.msra.mxu1 %v4627_v62 }
 0x132   :  { %2997 = vmatprep.subr.mxu0 %v4602_v51  ;;  %2966 = vmatprep.subr.mxu1 %v4634_v0 }
 0x133   :  { %2998 = vmatpush3.msra.mxu0 %v4611_v58  ;;  %2967 = vmatpush3.msra.mxu1 %v4641_v2 }
 0x134   :  { %2999 = vmatprep.subr.mxu0 %v4618_v43  ;;  %2968 = vmatprep.subr.mxu1 %v4648_v4 }
 0x135   :  { %3000 = vmatpush3.msra.mxu0 %v4627_v62  ;;  %2969 = vmatpush3.msra.mxu1 %v4657_v7 }
 0x136   :  { %3001 = vmatprep.subr.mxu0 %v4634_v0  ;;  %2970 = vmatprep.subr.mxu1 %v4664_v8 }
 0x137   :  { %3002 = vmatpush3.msra.mxu0 %v4641_v2  ;;  %2971 = vmatpush3.msra.mxu1 %v4671_v10 }
 0x138   :  { %3003 = vmatprep.subr.mxu0 %v4648_v4  ;;  %2972 = vmatprep.subr.mxu1 %v4678_v11 }
 0x139   :  { %3004 = vmatpush3.msra.mxu0 %v4657_v7  ;;  %2973 = vmatpush3.msra.mxu1 %v4685_v13 }
 0x13a   :  { %3005 = vmatprep.subr.mxu0 %v4664_v8  ;;  %2974 = vmatprep.subr.mxu1 %v4692_v17  ;;  %v645_v8 = vadd.f32 %v4651_v5, %v602_v48 }
 0x13b   :  { %3006 = vmatpush3.msra.mxu0 %v4671_v10  ;;  %2975 = vmatpush3.msra.mxu1 %v4699_v14 }
 0x13c   :  { %3007 = vmatprep.subr.mxu0 %v4678_v11  ;;  %2976 = vmatprep.subr.mxu1 %v4706_v15 }
 0x13d   :  { %3008 = vmatpush3.msra.mxu0 %v4685_v13  ;;  %2977 = vmatpush3.msra.mxu1 %v4713_v19 }
 0x13e   :  { %3009 = vmatprep.subr.mxu0 %v4692_v17  ;;  %v608_v17 = vadd.f32 %v607_v45, %v377_v56  ;;  %v5210_v56 = vld [vmem:[#allocation8_spill] sm:$0xff] }
 0x13f   :  { %3010 = vmatpush3.msra.mxu0 %v4699_v14  ;;  %v604_v14 = vadd.f32 %v603_v16, %v373_v6  ;;  %v5209_v6 = vld [vmem:[#allocation14_spill] sm:$0xff] }
 0x140   :  { %3011 = vmatprep.subr.mxu0 %v4706_v15  ;;  %v651_v7 = vadd.f32 %v650_v22, %v608_v17 }
 0x141   :  { %3012 = vmatpush3.msra.mxu0 %v4713_v19  ;;  %v647_v3 = vadd.f32 %v646_v1, %v604_v14 }
 0x142   :  { %3016 = vmatprep.subr.mxu0 %v4481_v41  ;;  %v606_v41 = vadd.f32 %v605_v21, %v375_v32  ;;  %v5208_v32 = vld [vmem:[#allocation7_spill] sm:$0xff] }
 0x144   :  { %v649_v34 = vadd.f32 %v648_v18, %v606_v41 }
 0x146   :  { %v961_v24 = vpop.f32.mrf.mxu1 }
 0x147   :  { %v1005_v19 = vadd.f32 %v1004_v23, %v961_v24 }
 0x148   :  { %v963_v26 = vpop.f32.mrf.mxu1 }
 0x149   :  { %v1007_v13 = vadd.f32 %v1006_v25, %v963_v26  ;;  %v1013_v54 = vadd.f32 %v1005_v19, %v645_v8 }
 0x14a   :  { %v965_v27 = vpop.f32.mrf.mxu1 }
 0x14b   :  { %v1009_v15 = vadd.f32 %v1008_v28, %v965_v27  ;;  %v1014_v21 = vadd.f32 %v1007_v13, %v647_v3 }
 0x14c   :  { %v967_v29 = vpop.f32.mrf.mxu1 }
 0x14d   :  { %v1011_v46 = vadd.f32 %v1010_v55, %v967_v29  ;;  %v1015_v50 = vadd.f32 %v1009_v15, %v649_v34  ;;  %v5203_v29 = vld [vmem:[#allocation9_spill] sm:$0xff]  ;;  %v5205_v55 = vld [vmem:[#allocation10_spill] sm:$0xff] }
 0x14e   :  { %v1367_v30 = vpop.f32.mrf.mxu1 }
 0x14f   :  { %v1016_v16 = vadd.f32 %v1011_v46, %v651_v7 }
 0x150   :  { %v1369_v44 = vpop.f32.mrf.mxu1 }
 0x152   :  { %v1324_v52 = vpop.f32.mrf.mxu0  ;;  %v1371_v11 = vpop.f32.mrf.mxu1 }
 0x153   :  { %v1368_v60 = vadd.f32 %v1367_v30, %v1324_v52  ;;  %v5204_v30 = vld [vmem:[#allocation4_spill] sm:$0xff]  ;;  %v5211_v52 = vld [vmem:[#allocation17_spill] sm:$0xff] }
 0x154   :  { %v1326_v10 = vpop.f32.mrf.mxu0  ;;  %v1373_v23 = vpop.f32.mrf.mxu1 }
 0x155   :  { %v1370_v9 = vadd.f32 %v1369_v44, %v1326_v10  ;;  %v4730_v45 = vadd.f32 %v1368_v60, %v1013_v54  ;;  %v5206_v44 = vld [vmem:[#allocation5_spill] sm:$0xff] }
 0x156   :  { %v1328_v39 = vpop.f32.mrf.mxu0 }
 0x157   :  { %v1372_v12 = vadd.f32 %v1371_v11, %v1328_v39  ;;  %5199 = vst [vmem:[#allocation11_spill] sm:$0xff] %v4730_v45  ;;  %v4734_v5 = vadd.f32 %v1370_v9, %v1014_v21 }
 0x158   :  { %v1330_v24 = vpop.f32.mrf.mxu0 }
 0x159   :  { %v4732_v25 = vadd.f32 %v1372_v12, %v1015_v50  ;;  %v1374_v26 = vadd.f32 %v1373_v23, %v1330_v24  ;;  %5201 = vst [vmem:[#allocation12_spill] sm:$0xff] %v4734_v5 }
 0x15a   :  { %v1485_v48 = vpop.f32.mrf.mxu0 }
 0x15b   :  { %5200 = vst [vmem:[#allocation18_spill] sm:$0xff] %v4732_v25  ;;  %v1914_v41 = vadd.f32 %v4732_v25, %v4730_v45  ;;  %v4738_v1 = vadd.f32 %v1374_v26, %v1016_v16 }
 0x15c   :  { %v1487_v46 = vpop.f32.mrf.mxu0 }
 0x15d   :  { %5202 = vst [vmem:[#allocation21_spill] sm:$0xff] %v4738_v1  ;;  %v1915_v8 = vrot.slane %v1914_v41, 4  ;;  %v1921_v10 = vadd.f32 %v4738_v1, %v4734_v5 }
 0x15e   :  { %v1489_v3 = vpop.f32.mrf.mxu0 }
 0x15f   :  { %v1916_v11 = vadd.f32 %v1915_v8, %v1914_v41  ;;  %v1922_v13 = vrot.slane %v1921_v10, 4 }
 0x160   :  { %v1491_v54 = vpop.f32.mrf.mxu0 }
 0x161   :  { %v1917_v17 = vrot.slane %v1916_v11, 2  ;;  %v1923_v7 = vadd.f32 %v1922_v13, %v1921_v10 }
 0x163   :  { %v1924_v14 = vrot.slane %v1923_v7, 2  ;;  %v1918_v15 = vadd.f32 %v1917_v17, %v1916_v11 }
 0x165   :  { %v1925_v18 = vadd.f32 %v1924_v14, %v1923_v7  ;;  %v1919_v19 = vrot.slane %v1918_v15, 1 }
 0x167   :  { %v1926_v22 = vrot.slane %v1925_v18, 1  ;;  %v1920_v28 = vadd.f32 %v1919_v19, %v1918_v15 }
 0x169   :  { %v1927_v27 = vadd.f32 %v1926_v22, %v1925_v18 }
 0x16b   :  { %2108 = vmatprep.mubr.f32.mxu0 %v1927_v27 }
 0x16c   :  { %2109 = vmatmul.mubr.f32.vlgmr.msra.gmra.mxu0 %v1920_v28 }
 0x16d   :  { %3017 = vmatpush3.msra.mxu0 %v4491_v59 }
 0x16e   :  { %3018 = vmatprep.subr.mxu0 %v4498_v53 }
 0x16f   :  { %3019 = vmatpush3.msra.mxu0 %v4505_v47 }
 0x170   :  { %3020 = vmatprep.subr.mxu0 %v4511_v63 }
 0x171   :  { %3021 = vmatpush3.msra.mxu0 %v4517_v20 }
 0x172   :  { %3022 = vmatprep.subr.mxu0 %v4524_v33 }
 0x173   :  { %3023 = vmatpush3.msra.mxu0 %v4533_v35 }
 0x174   :  { %3024 = vmatprep.subr.mxu0 %v4540_v36 }
 0x175   :  { %3025 = vmatpush3.msra.mxu0 %v4547_v37 }
 0x176   :  { %3026 = vmatprep.subr.mxu0 %v4554_v38 }
 0x177   :  { %3027 = vmatpush3.msra.mxu0 %v4563_v40 }
 0x178   :  { %3028 = vmatprep.subr.mxu0 %v4570_v42 }
 0x179   :  { %3029 = vmatpush3.msra.mxu0 %v4579_v49 }
 0x17a   :  { %3030 = vmatprep.subr.mxu0 %v4586_v61 }
 0x17b   :  { %3031 = vmatpush3.msra.mxu0 %v4595_v57 }
 0x17c   :  { %3032 = vmatprep.subr.mxu0 %v4602_v51 }
 0x17d   :  { %3033 = vmatpush3.msra.mxu0 %v4611_v58 }
 0x17e   :  { %3034 = vmatprep.subr.mxu0 %v4618_v43 }
 0x17f   :  { %3035 = vmatpush3.msra.mxu0 %v4627_v62 }
 0x180   :  { %3036 = vmatprep.subr.mxu0 %v4634_v0 }
 0x181   :  { %3037 = vmatpush3.msra.mxu0 %v4641_v2 }
 0x182   :  { %3038 = vmatprep.subr.mxu0 %v4648_v4 }
 0x183   :  { %3039 = vmatpush3.msra.mxu0 %v5203_v29 }
 0x184   :  { %3040 = vmatprep.subr.mxu0 %v5204_v30 }
 0x185   :  { %3041 = vmatpush3.msra.mxu0 %v5205_v55 }
 0x186   :  { %3042 = vmatprep.subr.mxu0 %v5206_v44 }
 0x187   :  { %3043 = vmatpush3.msra.mxu0 %v5207_v31 }
 0x188   :  { %3044 = vmatprep.subr.mxu0 %v5208_v32 }
 0x189   :  { %3045 = vmatpush3.msra.mxu0 %v5209_v6 }
 0x18a   :  { %3046 = vmatprep.subr.mxu0 %v5210_v56 }
 0x18b   :  { %3047 = vmatpush3.msra.mxu0 %v5211_v52 }
 0x18e   :  { %v1442_v34 = vpop.f32.mrf.mxu1 }
 0x18f   :  { %v1486_v18 = vadd.f32 %v1485_v48, %v1442_v34 }
 0x190   :  { %v1444_v60 = vpop.f32.mrf.mxu1 }
 0x191   :  { %v1488_v22 = vadd.f32 %v1487_v46, %v1444_v60 }
 0x192   :  { %v1446_v39 = vpop.f32.mrf.mxu1 }
 0x193   :  { %v1490_v19 = vadd.f32 %v1489_v3, %v1446_v39 }
 0x194   :  { %v1448_v50 = vpop.f32.mrf.mxu1 }
 0x195   :  { %v1492_v27 = vadd.f32 %v1491_v54, %v1448_v50 }
 0x196   :  { %v1589_v12 = vpop.f32.mrf.mxu1 }
 0x198   :  { %v1591_v23 = vpop.f32.mrf.mxu1 }
 0x19a   :  { %v1546_v9 = vpop.f32.mrf.mxu0  ;;  %v1593_v16 = vpop.f32.mrf.mxu1 }
 0x19b   :  { %v1547_v5 = vadd.f32 %v1546_v9, %v1486_v18 }
 0x19c   :  { %v1548_v21 = vpop.f32.mrf.mxu0  ;;  %v1595_v41 = vpop.f32.mrf.mxu1 }
 0x19d   :  { %v1549_v45 = vadd.f32 %v1548_v21, %v1488_v22  ;;  %v1590_v30 = vadd.f32 %v1589_v12, %v1547_v5 }
 0x19e   :  { %v1550_v24 = vpop.f32.mrf.mxu0 }
 0x19f   :  { %v1551_v25 = vadd.f32 %v1550_v24, %v1490_v19  ;;  %v1592_v48 = vadd.f32 %v1591_v23, %v1549_v45  ;;  %v2119_v23 = vld [vmem:[%s4902_s4 + $0x18] sm:$0xff] }
 0x1a0   :  { %v1552_v26 = vpop.f32.mrf.mxu0  ;;  %2151 = vmatprep.subr.mxu1 %v2119_v23  ;;  %2425 = vmatprep.subr.mxu0 %v2119_v23 }
 0x1a1   :  { %v1553_v52 = vadd.f32 %v1552_v26, %v1492_v27  ;;  %v1594_v29 = vadd.f32 %v1593_v16, %v1551_v25  ;;  %v4791_v16 = vld [vmem:[%s4902_s4 + $0x10] sm:$0xff] }
 0x1a2   :  { %v1743_v8 = vpop.f32.mrf.mxu0 }
 0x1a3   :  { %v1596_v34 = vadd.f32 %v1595_v41, %v1553_v52  ;;  %v4797_v41 = vld [vmem:[%s4902_s4 + $0x8] sm:$0xff] }
 0x1a4   :  { %v1745_v11 = vpop.f32.mrf.mxu0 }
 0x1a6   :  { %v1747_v7 = vpop.f32.mrf.mxu0 }
 0x1a8   :  { %v1749_v28 = vpop.f32.mrf.mxu0 }
 0x1d6   :  { %v1700_v10 = vpop.f32.mrf.mxu1 }
 0x1d7   :  { %v1744_v6 = vadd.f32 %v1743_v8, %v1700_v10 }
 0x1d8   :  { %v1702_v13 = vpop.f32.mrf.mxu1 }
 0x1d9   :  { %v1746_v31 = vadd.f32 %v1745_v11, %v1702_v13  ;;  %v1752_v60 = vadd.f32 %v1744_v6, %v1590_v30  ;;  %v4803_v11 = vld [vmem:[%s4902_s4] sm:$0xff]  ;;  %v3327_v13 = vmov 0.0  }
 0x1da   :  { %v1704_v17 = vpop.f32.mrf.mxu1 }
 0x1db   :  { %v1748_v32 = vadd.f32 %v1747_v7, %v1704_v17  ;;  %v1753_v50 = vadd.f32 %v1746_v31, %v1592_v48  ;;  %v5212_v17 = vld [vmem:[#allocation2_spill] sm:$0xff] }
 0x1dc   :  { %v1706_v14 = vpop.f32.mrf.mxu1 }
 0x1dd   :  { %v1750_v4 = vadd.f32 %v1749_v28, %v1706_v14  ;;  %v1754_v3 = vadd.f32 %v1748_v32, %v1594_v29 }
 0x1de   :  { %v1901_v15 = vpop.f32.mrf.mxu1 }
 0x1df   :  { %v1755_v24 = vadd.f32 %v1750_v4, %v1596_v34 }
 0x1e0   :  { %v1903_v1 = vpop.f32.mrf.mxu1 }
 0x1e2   :  { %v1858_v56 = vpop.f32.mrf.mxu0  ;;  %v1905_v44 = vpop.f32.mrf.mxu1 }
 0x1e3   :  { %v1902_v2 = vadd.f32 %v1901_v15, %v1858_v56 }
 0x1e4   :  { %v1860_v55 = vpop.f32.mrf.mxu0  ;;  %v1907_v9 = vpop.f32.mrf.mxu1 }
 0x1e5   :  { %v1904_v39 = vadd.f32 %v1903_v1, %v1860_v55  ;;  %v4773_v26 = vadd.f32 %v1902_v2, %v1752_v60 }
 0x1e6   :  { %v1862_v46 = vpop.f32.mrf.mxu0 }
 0x1e7   :  { %v1906_v54 = vadd.f32 %v1905_v44, %v1862_v46  ;;  %v4777_v5 = vadd.f32 %v1904_v39, %v1753_v50 }
 0x1e8   :  { %v1864_v21 = vpop.f32.mrf.mxu0 }
 0x1e9   :  { %v4775_v8 = vadd.f32 %v1906_v54, %v1754_v3  ;;  %v1908_v10 = vadd.f32 %v1907_v9, %v1864_v21  ;;  %v5226_v9 = vld [vmem:[#allocation12_spill] sm:$0xff] }
 0x1eb   :  { %v1960_v45 = vadd.f32 %v4775_v8, %v4773_v26  ;;  %v4781_v25 = vadd.f32 %v1908_v10, %v1755_v24  ;;  %v5227_v24 = vld [vmem:[#allocation21_spill] sm:$0xff] }
 0x1ed   :  { %v1961_v30 = vrot.slane %v1960_v45, 4  ;;  %v1967_v1 = vadd.f32 %v4781_v25, %v4777_v5 }
 0x1ef   :  { %v1962_v29 = vadd.f32 %v1961_v30, %v1960_v45  ;;  %v1968_v55 = vrot.slane %v1967_v1, 4 }
 0x1f1   :  { %v1963_v44 = vrot.slane %v1962_v29, 2  ;;  %v1969_v4 = vadd.f32 %v1968_v55, %v1967_v1 }
 0x1f3   :  { %v1970_v2 = vrot.slane %v1969_v4, 2  ;;  %v1964_v31 = vadd.f32 %v1963_v44, %v1962_v29 }
 0x1f5   :  { %v1971_v32 = vadd.f32 %v1970_v2, %v1969_v4  ;;  %v1965_v6 = vrot.slane %v1964_v31, 1 }
 0x1f7   :  { %v1972_v56 = vrot.slane %v1971_v32, 1  ;;  %v1966_v12 = vadd.f32 %v1965_v6, %v1964_v31 }
 0x1f9   :  { %v1973_v52 = vadd.f32 %v1972_v56, %v1971_v32 }
 0x1fb   :  { %2038 = vmatprep.mubr.f32.mxu1 %v1973_v52 }
 0x1fc   :  { %2039 = vmatmul.mubr.f32.vlgmr.msra.gmra.mxu1 %v1966_v12 }
 0x1fd   :  { %2152 = vmatpush1.msra.mxu1 %v4791_v16  ;;  %2187 = vmatprep.mubr.f32.mxu1 %v3327_v13 }
 0x1fe   :  { %2153 = vmatprep.subr.mxu1 %v4797_v41 }
 0x1ff   :  { %2154 = vmatpush1.msra.mxu1 %v4803_v11 }
 0x200   :  { %3051 = vmatprep.subr.mxu1 %v5212_v17 }
 0x22c   :  { %v3013_v7 = vpop.f32.mrf.mxu0 }
 0x22e   :  { %v3014_v14 = vpop.f32.mrf.mxu0 }
 0x22f   :  { %v3015_v19 = vadd.f32 %v3014_v14, %v3013_v7 }
 0x2bc   :  { %v2978_v15 = vpop.f32.mrf.mxu1 }
 0x2be   :  { %v2979_v18 = vpop.f32.mrf.mxu1 }
 0x2bf   :  { %v2980_v22 = vadd.f32 %v2979_v18, %v2978_v15 }
 0x2c1   :  { %v2111_v27 = vadd.f32 %v3015_v19, %v2980_v22 }
 0x2c3   :  { %v4808_v28 = vmul.f32 0.001953125, %v2111_v27 }
 0x2c5   :  { %2933 = vmatmul.mubr.msk.f32.vlgmr.msra.gmra.mxu1 %vm289_vm0, %v4808_v28 }
 0x2c6   :  { %3052 = vmatpush3.msra.mxu1 %v4491_v59  ;;  %v5213_v59 = vld [vmem:[#allocation6_spill] sm:$0xff] }
 0x2c7   :  { %3053 = vmatprep.subr.mxu1 %v4498_v53  ;;  %v5214_v53 = vld [vmem:[#allocation3_spill] sm:$0xff] }
 0x2c8   :  { %3054 = vmatpush3.msra.mxu1 %v4505_v47  ;;  %v5215_v47 = vld [vmem:[#allocation9_spill] sm:$0xff] }
 0x2c9   :  { %3055 = vmatprep.subr.mxu1 %v4511_v63  ;;  %v5216_v63 = vld [vmem:[#allocation4_spill] sm:$0xff] }
 0x2ca   :  { %3056 = vmatpush3.msra.mxu1 %v4517_v20  ;;  %v5217_v20 = vld [vmem:[#allocation10_spill] sm:$0xff] }
 0x2cb   :  { %3057 = vmatprep.subr.mxu1 %v4524_v33  ;;  %v5218_v33 = vld [vmem:[#allocation5_spill] sm:$0xff] }
 0x2cc   :  { %3058 = vmatpush3.msra.mxu1 %v4533_v35  ;;  %v5219_v35 = vld [vmem:[#allocation13_spill] sm:$0xff] }
 0x2cd   :  { %3059 = vmatprep.subr.mxu1 %v4540_v36  ;;  %v5220_v36 = vld [vmem:[#allocation7_spill] sm:$0xff] }
 0x2ce   :  { %3060 = vmatpush3.msra.mxu1 %v4547_v37  ;;  %v5221_v37 = vld [vmem:[#allocation14_spill] sm:$0xff] }
 0x2cf   :  { %3061 = vmatprep.subr.mxu1 %v4554_v38  ;;  %v5222_v38 = vld [vmem:[#allocation8_spill] sm:$0xff] }
 0x2d0   :  { %3062 = vmatpush3.msra.mxu1 %v4563_v40  ;;  %v5223_v40 = vld [vmem:[#allocation17_spill] sm:$0xff] }
 0x2d1   :  { %3063 = vmatprep.subr.mxu1 %v4570_v42  ;;  %v2194_v42 = vlaneseq }
 0x2d2   :  { %3064 = vmatpush3.msra.mxu1 %v4579_v49 }
 0x2d3   :  { %3065 = vmatprep.subr.mxu1 %v4586_v61  ;;  %v2195_v49 = vshrl.u32 %v2194_v42, 7 }
 0x2d4   :  { %3066 = vmatpush3.msra.mxu1 %v4595_v57 }
 0x2d5   :  { %3067 = vmatprep.subr.mxu1 %v4602_v51  ;;  %v4843_v61 = vsub.s32 0, %v2195_v49 }
 0x2d6   :  { %3068 = vmatpush3.msra.mxu1 %v4611_v58 }
 0x2d7   :  { %3069 = vmatprep.subr.mxu1 %v4618_v43  ;;  %v5224_v43 = vld [vmem:[#allocation11_spill] sm:$0xff] }
 0x2d8   :  { %3070 = vmatpush3.msra.mxu1 %v4627_v62 }
 0x2d9   :  { %3071 = vmatprep.subr.mxu1 %v4634_v0  ;;  %v5225_v0 = vld [vmem:[#allocation18_spill] sm:$0xff] }
 0x2da   :  { %3072 = vmatpush3.msra.mxu1 %v5213_v59 }
 0x2db   :  { %3073 = vmatprep.subr.mxu1 %v5214_v53 }
 0x2dc   :  { %3074 = vmatpush3.msra.mxu1 %v5215_v47 }
 0x2dd   :  { %3075 = vmatprep.subr.mxu1 %v5216_v63 }
 0x2de   :  { %3076 = vmatpush3.msra.mxu1 %v5217_v20 }
 0x2df   :  { %3077 = vmatprep.subr.mxu1 %v5218_v33 }
 0x2e0   :  { %3078 = vmatpush3.msra.mxu1 %v5219_v35 }
 0x2e1   :  { %3079 = vmatprep.subr.mxu1 %v5220_v36 }
 0x2e2   :  { %3080 = vmatpush3.msra.mxu1 %v5221_v37 }
 0x2e3   :  { %3081 = vmatprep.subr.mxu1 %v5222_v38 }
 0x2e4   :  { %3082 = vmatpush3.msra.mxu1 %v5223_v40 }
 0x2e5   :  { %2499 = vmatprep.subr.mxu1 %v2119_v23 }
 0x385   :  { %v2189_v57 = vpop.f32.mrf.mxu1 }
 0x386   :  { %v2197_v51 = vrot.slane %v2189_v57, %v4843_v61 }
 0x387   :  { %v2191_v58 = vpop.f32.mrf.mxu1 }
 0x388   :  { %v2202_v62 = vsub.f32 %v5224_v43, %v2197_v51  ;;  %v2204_v48 = vsub.f32 %v5225_v0, %v2197_v51  ;;  %v2224_v34 = vsub.f32 %v4773_v26, %v2197_v51  ;;  %v2226_v46 = vsub.f32 %v4775_v8, %v2197_v51 }
 0x389   :  { %v2201_v60 = vrot.slane %v2191_v58, %v4843_v61 }
 0x38a   :  { %v2206_v3 = vmul.f32 %v2202_v62, %v2202_v62  ;;  %v2208_v39 = vmul.f32 %v2204_v48, %v2204_v48  ;;  %v2228_v54 = vmul.f32 %v2224_v34, %v2224_v34  ;;  %v2230_v50 = vmul.f32 %v2226_v46, %v2226_v46 }
 0x38b   :  { %v2203_v21 = vsub.f32 %v5226_v9, %v2201_v60  ;;  %v2205_v10 = vsub.f32 %v5227_v24, %v2201_v60  ;;  %v2225_v45 = vsub.f32 %v4777_v5, %v2201_v60  ;;  %v2227_v30 = vsub.f32 %v4781_v25, %v2201_v60 }
 0x38c   :  { %v2210_v1 = vadd.f32 %v2208_v39, %v2206_v3  ;;  %v2232_v29 = vadd.f32 %v2230_v50, %v2228_v54 }
 0x38d   :  { %v2207_v55 = vmul.f32 %v2203_v21, %v2203_v21  ;;  %v2209_v44 = vmul.f32 %v2205_v10, %v2205_v10  ;;  %v2229_v4 = vmul.f32 %v2225_v45, %v2225_v45  ;;  %v2231_v2 = vmul.f32 %v2227_v30, %v2227_v30 }
 0x38e   :  { %v2211_v31 = vrot.slane %v2210_v1, 4  ;;  %v2233_v32 = vrot.slane %v2232_v29, 4 }
 0x38f   :  { %v2239_v6 = vadd.f32 %v2231_v2, %v2229_v4  ;;  %v2217_v56 = vadd.f32 %v2209_v44, %v2207_v55 }
 0x390   :  { %v2234_v52 = vadd.f32 %v2233_v32, %v2232_v29  ;;  %v2212_v12 = vadd.f32 %v2211_v31, %v2210_v1 }
 0x391   :  { %v2240_v23 = vrot.slane %v2239_v6, 4  ;;  %v2218_v17 = vrot.slane %v2217_v56, 4 }
 0x392   :  { %v2235_v7 = vrot.slane %v2234_v52, 2  ;;  %v2213_v14 = vrot.slane %v2212_v12, 2 }
 0x393   :  { %v2241_v15 = vadd.f32 %v2240_v23, %v2239_v6  ;;  %v2219_v18 = vadd.f32 %v2218_v17, %v2217_v56 }
 0x394   :  { %v2236_v19 = vadd.f32 %v2235_v7, %v2234_v52  ;;  %v2214_v22 = vadd.f32 %v2213_v14, %v2212_v12 }
 0x395   :  { %v2242_v27 = vrot.slane %v2241_v15, 2  ;;  %v2220_v59 = vrot.slane %v2219_v18, 2 }
 0x396   :  { %v2237_v63 = vrot.slane %v2236_v19, 1  ;;  %v2215_v20 = vrot.slane %v2214_v22, 1 }
 0x397   :  { %v2243_v53 = vadd.f32 %v2242_v27, %v2241_v15  ;;  %v2221_v47 = vadd.f32 %v2220_v59, %v2219_v18 }
 0x398   :  { %v2238_v38 = vadd.f32 %v2237_v63, %v2236_v19  ;;  %v2216_v40 = vadd.f32 %v2215_v20, %v2214_v22 }
 0x399   :  { %v2244_v33 = vrot.slane %v2243_v53, 1  ;;  %v2222_v35 = vrot.slane %v2221_v47, 1 }
 0x39b   :  { %v2245_v36 = vadd.f32 %v2244_v33, %v2243_v53  ;;  %v2223_v37 = vadd.f32 %v2222_v35, %v2221_v47 }
 0x39d   :  { %2310 = vmatprep.mubr.f32.mxu0 %v2245_v36  ;;  %2380 = vmatprep.mubr.f32.mxu1 %v2223_v37 }
 0x39e   :  { %2311 = vmatmul.mubr.f32.vlgmr.msra.gmra.mxu0 %v2238_v38  ;;  %2381 = vmatmul.mubr.f32.vlgmr.msra.gmra.mxu1 %v2216_v40 }
 0x39f   :  { %2426 = vmatpush1.msra.mxu0 %v4791_v16  ;;  %2461 = vmatprep.mubr.f32.mxu0 %v3327_v13 }
 0x3a0   :  { %2427 = vmatprep.subr.mxu0 %v4797_v41  ;;  %2500 = vmatpush1.msra.mxu1 %v4791_v16  ;;  %v2387_v16 = vld [vmem:[%s4903_s5] sm:$0x1] }
 0x3a1   :  { %2428 = vmatpush1.msra.mxu0 %v4803_v11  ;;  %2501 = vmatprep.subr.mxu1 %v4797_v41 }
 0x3a2   :  { %2502 = vmatpush1.msra.mxu1 %v4803_v11  ;;  %2535 = vmatprep.mubr.f32.mxu1 %v3327_v13  ;;  %v2391_v11 = vld [vmem:[%s4904_s6] sm:$0x1] }
 0x45e   :  { %v3048_v42 = vpop.f32.mrf.mxu0  ;;  %v3083_v49 = vpop.f32.mrf.mxu1 }
 0x460   :  { %v3049_v57 = vpop.f32.mrf.mxu0  ;;  %v3084_v51 = vpop.f32.mrf.mxu1 }
 0x461   :  { %v3050_v58 = vadd.f32 %v3049_v57, %v3048_v42  ;;  %v3085_v62 = vadd.f32 %v3084_v51, %v3083_v49 }
 0x463   :  { %v2383_v48 = vadd.f32 %v3085_v62, %v3050_v58 }
 0x465   :  { %v2386_v34 = vmul.f32 0.001953125, %v2383_v48 }
 0x467   :  { %v2388_v46 = vadd.f32 1e-05, %v2386_v34 }
 0x469   :  { %3324 = vrsqrt.f32 %v2388_v46 }
 0x476   :  { %v3325_v60 = vpop.eup %3324 }
 0x477   :  { %v2390_v41 = vmul.f32 %v3325_v60, %v2387_v16 }
 0x479   :  { %2934 = vmatmul.mubr.msk.f32.vlgmr.msra.gmra.mxu0 %vm289_vm0, %v2390_v41  ;;  %v2392_v13 = vmul.f32 %v2390_v41, %v4808_v28 }
 0x47b   :  { %v2393_v3 = vsub.f32 %v2391_v11, %v2392_v13 }
 0x47d   :  { %2935 = vmatmul.mubr.msk.f32.vlgmr.msra.gmra.mxu1 %vm289_vm0, %v2393_v3 }
 0x539   :  { %v2463_v39 = vpop.f32.mrf.mxu0 }
 0x53a   :  { %v2545_v54 = vrot.slane %v2463_v39, %v4843_v61 }
 0x53b   :  { %v2465_v50 = vpop.f32.mrf.mxu0 }
 0x53c   :  { %v2550_v21 = vmul.f32 %v2545_v54, %v5224_v43  ;;  %v2549_v10 = vrot.slane %v2465_v50, %v4843_v61  ;;  %v2552_v30 = vmul.f32 %v2545_v54, %v5225_v0  ;;  %v2592_v1 = vmul.f32 %v2545_v54, %v4773_v26 }
 0x53d   :  { %v2537_v45 = vpop.f32.mrf.mxu1  ;;  %v2594_v29 = vmul.f32 %v2545_v54, %v4775_v8 }
 0x53e   :  { %v2557_v28 = vrot.slane %v2537_v45, %v4843_v61  ;;  %v2551_v32 = vmul.f32 %v2549_v10, %v5226_v9  ;;  %v2553_v43 = vmul.f32 %v2549_v10, %v5227_v24  ;;  %v2593_v26 = vmul.f32 %v2549_v10, %v4777_v5 }
 0x53f   :  { %v2539_v55 = vpop.f32.mrf.mxu1  ;;  %v2595_v8 = vmul.f32 %v2549_v10, %v4781_v25 }
 0x540   :  { %v2562_v44 = vadd.f32 %v2557_v28, %v2550_v21  ;;  %v2564_v4 = vadd.f32 %v2557_v28, %v2552_v30  ;;  %v2596_v2 = vadd.f32 %v2592_v1, %v2557_v28  ;;  %v2598_v31 = vadd.f32 %v2594_v29, %v2557_v28 }
 0x541   :  { %v2561_v6 = vrot.slane %v2539_v55, %v4843_v61 }
 0x542   :  { %vm2566_vm2 = vcmp.ge.f32.partialorder %v2562_v44, 0.0  ;;  %vm2568_vm3 = vcmp.ge.f32.partialorder %v2564_v4, 0.0  ;;  %v2570_v0 = vmul.f32 0.2, %v2562_v44  ;;  %v2572_v56 = vmul.f32 0.2, %v2564_v4 }
 0x543   :  { %vm2600_vm4 = vcmp.ge.f32.partialorder %v2596_v2, 0.0  ;;  %vm2602_vm5 = vcmp.ge.f32.partialorder %v2598_v31, 0.0  ;;  %v2604_v52 = vmul.f32 0.2, %v2596_v2  ;;  %v2606_v12 = vmul.f32 0.2, %v2598_v31 }
 0x544   :  { %v2563_v23 = vadd.f32 %v2561_v6, %v2551_v32  ;;  %v2565_v17 = vadd.f32 %v2561_v6, %v2553_v43  ;;  %v2574_v7 = vsel %vm2566_vm2, %v2562_v44, %v2570_v0  ;;  %v2576_v9 = vsel %vm2568_vm3, %v2564_v4, %v2572_v56 }
 0x545   :  { %v2597_v14 = vadd.f32 %v2593_v26, %v2561_v6  ;;  %v2599_v24 = vadd.f32 %v2595_v8, %v2561_v6  ;;  %v2608_v25 = vsel %vm2600_vm4, %v2596_v2, %v2604_v52  ;;  %v2610_v19 = vsel %vm2602_vm5, %v2598_v31, %v2606_v12 }
 0x546   :  { %vm2567_vm6 = vcmp.ge.f32.partialorder %v2563_v23, 0.0  ;;  %vm2569_vm7 = vcmp.ge.f32.partialorder %v2565_v17, 0.0  ;;  %v2571_v61 = vmul.f32 0.2, %v2563_v23  ;;  %v2573_v15 = vmul.f32 0.2, %v2565_v17 }
 0x547   :  { %vm2601_vm8 = vcmp.ge.f32.partialorder %v2597_v14, 0.0  ;;  %vm2603_vm9 = vcmp.ge.f32.partialorder %v2599_v24, 0.0  ;;  %v2605_v18 = vmul.f32 0.2, %v2597_v14  ;;  %v2607_v5 = vmul.f32 0.2, %v2599_v24 }
 0x548   :  { %v2575_v22 = vsel %vm2567_vm6, %v2563_v23, %v2571_v61  ;;  %v2577_v27 = vsel %vm2569_vm7, %v2565_v17, %v2573_v15 }
 0x549   :  { %v2942_v59 = vpack.c.bf16 %v2575_v22, %v2574_v7  ;;  %v2943_v53 = vpack.c.bf16 %v2577_v27, %v2576_v9  ;;  %v2609_v47 = vsel %vm2601_vm8, %v2597_v14, %v2605_v18  ;;  %v2611_v63 = vsel %vm2603_vm9, %v2599_v24, %v2607_v5 }
 0x54a   :  { %v2944_v20 = vpack.c.bf16 %v2609_v47, %v2608_v25  ;;  %v2945_v33 = vpack.c.bf16 %v2611_v63, %v2610_v19 }
 0x54b   :  { %2590 = vst [vmem:[%s4905_s7] sm:$0xff] %v2942_v59  ;;  %2591 = vst [vmem:[%s4905_s7 + $0x8] sm:$0xff] %v2943_v53 }
 0x54c   :  { %2940 = vst [vmem:[%s4905_s7 + $0x10] sm:$0xff] %v2944_v20  ;;  %2941 = vst [vmem:[%s4905_s7 + $0x18] sm:$0xff] %v2945_v33 }

// kernel: tile.24
= control target key start
LH: loop header
LB: loop body
LE: loop exit
PB: predicated region body
PF: predicated region fallthrough
CT: control target
= control target key end

     0   :  { %vm92_vm0 = vcmask 1047556   ;;  %s459_s14 = smov 96   ;;  %s460_s26 = smov 64   ;;  %vm3_vm1 = vcmask 261120   ;;  %vm96_vm2 = vcmask 1048320   ;;  %vm183_vm3 = vcmask 785920   ;;  %s904_s0 = inlined_call_operand.vmem [shape: f32[8,32,32], index: 0, kind: input, shape index: {}]   ;;  %s905_s1 = inlined_call_operand.vmem [shape: f32[256,32], index: 1, kind: output, shape index: {}]  }
   0x1   :  { %v392_v0 = vld [vmem:[%s904_s0 + $0x7] ss:$8 sm:$0xf]   ;;  %v387_v3 = vld [vmem:[%s904_s0 + $0x3] ss:$8 sm:$0xf]  }
   0x2   :  { %v393_v1 = vld [vmem:[%s904_s0 + $0x7] ss:$8 sm:$0xf0]   ;;  %v388_v4 = vld [vmem:[%s904_s0 + $0x3] ss:$8 sm:$0xf0]  }
   0x3   :  { %v114_v2 = vsel %vm92_vm0, %v393_v1, %v392_v0  ;;  %v93_v5 = vsel %vm92_vm0, %v388_v4, %v387_v3  ;;  %v395_v6 = vld [vmem:[%s904_s0 + $0x87] ss:$8 sm:$0xf]   ;;  %v389_v9 = vld [vmem:[%s904_s0 + $0x83] ss:$8 sm:$0xf]  }
   0x4   :  { %115 = vrot.lane.b32.xlu1 %v114_v2, %s459_s14  ;;  %v396_v7 = vld [vmem:[%s904_s0 + $0x87] ss:$8 sm:$0xf0]   ;;  %94 = vrot.lane.b32.xlu0 %v93_v5, %s459_s14  ;;  %v390_v10 = vld [vmem:[%s904_s0 + $0x83] ss:$8 sm:$0xf0]  }
   0x5   :  { %v125_v8 = vsel %vm92_vm0, %v396_v7, %v395_v6  ;;  %v103_v11 = vsel %vm92_vm0, %v390_v10, %v389_v9  ;;  %v401_v12 = vld [vmem:[%s904_s0 + $0xc3] ss:$8 sm:$0xf]   ;;  %v407_v18 = vld [vmem:[%s904_s0 + $0xc7] ss:$8 sm:$0xf]  }
   0x6   :  { %v402_v13 = vld [vmem:[%s904_s0 + $0xc3] ss:$8 sm:$0xf0]   ;;  %v408_v19 = vld [vmem:[%s904_s0 + $0xc7] ss:$8 sm:$0xf0]  }
   0x7   :  { %v398_v14 = vld [vmem:[%s904_s0 + $0x43] ss:$8 sm:$0xf]   ;;  %v147_v16 = vsel %vm92_vm0, %v402_v13, %v401_v12  ;;  %v404_v20 = vld [vmem:[%s904_s0 + $0x47] ss:$8 sm:$0xf]   ;;  %v169_v22 = vsel %vm92_vm0, %v408_v19, %v407_v18 }
   0x8   :  { %v399_v15 = vld [vmem:[%s904_s0 + $0x43] ss:$8 sm:$0xf0]   ;;  %126 = vrot.lane.b32.xlu1 %v125_v8, %s459_s14  ;;  %104 = vrot.lane.b32.xlu0 %v103_v11, %s459_s14  ;;  %v405_v21 = vld [vmem:[%s904_s0 + $0x47] ss:$8 sm:$0xf0]  }
   0x9   :  { %v136_v17 = vsel %vm92_vm0, %v399_v15, %v398_v14  ;;  %v158_v23 = vsel %vm92_vm0, %v405_v21, %v404_v20  ;;  %v412_v24 = vld [vmem:[%s904_s0 + $0x82] ss:$8 sm:$0xf]   ;;  %v418_v30 = vld [vmem:[%s904_s0 + $0x86] ss:$8 sm:$0xf]  }
   0xa   :  { %v413_v25 = vld [vmem:[%s904_s0 + $0x82] ss:$8 sm:$0xf0]   ;;  %v419_v31 = vld [vmem:[%s904_s0 + $0x86] ss:$8 sm:$0xf0]  }
   0xb   :  { %v410_v26 = vld [vmem:[%s904_s0 + $0x2] ss:$8 sm:$0xf]   ;;  %v190_v28 = vsel %vm92_vm0, %v413_v25, %v412_v24  ;;  %v415_v32 = vld [vmem:[%s904_s0 + $0x6] ss:$8 sm:$0xf]   ;;  %v212_v34 = vsel %vm92_vm0, %v419_v31, %v418_v30 }
   0xc   :  { %148 = vrot.lane.b32.xlu1 %v147_v16, %s459_s14  ;;  %137 = vrot.lane.b32.xlu0 %v136_v17, %s459_s14  ;;  %v411_v27 = vld [vmem:[%s904_s0 + $0x2] ss:$8 sm:$0xf0]   ;;  %v416_v33 = vld [vmem:[%s904_s0 + $0x6] ss:$8 sm:$0xf0]  }
   0xd   :  { %v180_v29 = vsel %vm92_vm0, %v411_v27, %v410_v26  ;;  %v201_v35 = vsel %vm92_vm0, %v416_v33, %v415_v32  ;;  %v424_v36 = vld [vmem:[%s904_s0 + $0xc2] ss:$8 sm:$0xf]   ;;  %v430_v40 = vld [vmem:[%s904_s0 + $0xc6] ss:$8 sm:$0xf]  }
   0xe   :  { %v425_v37 = vld [vmem:[%s904_s0 + $0xc2] ss:$8 sm:$0xf0]   ;;  %v431_v42 = vld [vmem:[%s904_s0 + $0xc6] ss:$8 sm:$0xf0]  }
   0xf   :  { %v421_v38 = vld [vmem:[%s904_s0 + $0x42] ss:$8 sm:$0xf]   ;;  %v234_v41 = vsel %vm92_vm0, %v425_v37, %v424_v36  ;;  %v427_v43 = vld [vmem:[%s904_s0 + $0x46] ss:$8 sm:$0xf]   ;;  %v256_v53 = vsel %vm92_vm0, %v431_v42, %v430_v40 }
  0x10   :  { %170 = vrot.lane.b32.xlu1 %v169_v22, %s459_s14  ;;  %159 = vrot.lane.b32.xlu0 %v158_v23, %s459_s14  ;;  %v422_v39 = vld [vmem:[%s904_s0 + $0x42] ss:$8 sm:$0xf0]   ;;  %v428_v45 = vld [vmem:[%s904_s0 + $0x46] ss:$8 sm:$0xf0]  }
  0x11   :  { %v223_v44 = vsel %vm92_vm0, %v422_v39, %v421_v38  ;;  %v367_v46 = vld [vmem:[%s904_s0 + $0x80] ss:$4 sm:$0xff]   ;;  %v245_v55 = vsel %vm92_vm0, %v428_v45, %v427_v43  ;;  %v435_v56 = vld [vmem:[%s904_s0 + $0x81] ss:$8 sm:$0xf]   ;;  %s461_s25 = smov 32  }
  0x12   :  { %368 = vst.msk [vmem:[%s905_s1 + $0x20] ss:$8 sm:$0x3] %vm3_vm1, %v367_v46   ;;  %369 = vst.msk [vmem:[%s905_s1 + $0x11] ss:$8 sm:$0xc] %vm3_vm1, %v367_v46  }
  0x13   :  { %370 = vst.msk [vmem:[%s905_s1 + $0x2] ss:$8 sm:$0x30] %vm3_vm1, %v367_v46   ;;  %371 = vst.msk [vmem:[%s905_s1 - $0xd] ss:$8 sm:$0xc0] %vm3_vm1, %v367_v46  }
  0x14   :  { %191 = vrot.lane.b32.xlu1 %v190_v28, %s460_s26  ;;  %181 = vrot.lane.b32.xlu0 %v180_v29, %s460_s26  ;;  %v372_v47 = vld [vmem:[%s904_s0 + $0xa0] ss:$4 sm:$0xff]   ;;  %v436_v57 = vld [vmem:[%s904_s0 + $0x81] ss:$8 sm:$0xf0]   ;;  %vm270_vm4 = vcmask 523520  }
  0x15   :  { %v2_v48 = vld [vmem:[%s904_s0] ss:$4 sm:$0xff]   ;;  %373 = vst.msk [vmem:[%s905_s1 + $0x24] ss:$8 sm:$0x3] %vm3_vm1, %v372_v47   ;;  %v277_v60 = vsel %vm92_vm0, %v436_v57, %v435_v56 }
  0x16   :  { %v352_v49 = vld [vmem:[%s904_s0 + $0x20] ss:$4 sm:$0xff]   ;;  %374 = vst.msk [vmem:[%s905_s1 + $0x15] ss:$8 sm:$0xc] %vm3_vm1, %v372_v47  }
  0x17   :  { %375 = vst.msk [vmem:[%s905_s1 + $0x6] ss:$8 sm:$0x30] %vm3_vm1, %v372_v47   ;;  %376 = vst.msk [vmem:[%s905_s1 - $0x9] ss:$8 sm:$0xc0] %vm3_vm1, %v372_v47  }
  0x18   :  { %213 = vrot.lane.b32.xlu1 %v212_v34, %s460_s26  ;;  %202 = vrot.lane.b32.xlu0 %v201_v35, %s460_s26  ;;  %4 = vst.msk [vmem:[%s905_s1] ss:$8 sm:$0x3] %vm3_vm1, %v2_v48   ;;  %349 = vst.msk [vmem:[%s905_s1 - $0xf] ss:$8 sm:$0xc] %vm3_vm1, %v2_v48  }
  0x19   :  { %350 = vst.msk [vmem:[%s905_s1 - $0x1e] ss:$8 sm:$0x30] %vm3_vm1, %v2_v48   ;;  %351 = vst.msk [vmem:[%s905_s1 - $0x2d] ss:$8 sm:$0xc0] %vm3_vm1, %v2_v48  }
  0x1a   :  { %353 = vst.msk [vmem:[%s905_s1 + $0x4] ss:$8 sm:$0x3] %vm3_vm1, %v352_v49   ;;  %354 = vst.msk [vmem:[%s905_s1 - $0xb] ss:$8 sm:$0xc] %vm3_vm1, %v352_v49  }
  0x1b   :  { %355 = vst.msk [vmem:[%s905_s1 - $0x1a] ss:$8 sm:$0x30] %vm3_vm1, %v352_v49   ;;  %356 = vst.msk [vmem:[%s905_s1 - $0x29] ss:$8 sm:$0xc0] %vm3_vm1, %v352_v49  }
  0x1c   :  { %235 = vrot.lane.b32.xlu1 %v234_v41, %s460_s26  ;;  %v377_v50 = vld [vmem:[%s904_s0 + $0xc0] ss:$4 sm:$0xff]   ;;  %224 = vrot.lane.b32.xlu0 %v223_v44, %s460_s26  ;;  %v433_v58 = vld [vmem:[%s904_s0 + $0x1] ss:$8 sm:$0xf]  }
  0x1d   :  { %v382_v51 = vld [vmem:[%s904_s0 + $0xe0] ss:$4 sm:$0xff]   ;;  %378 = vst.msk [vmem:[%s905_s1 + $0x30] ss:$8 sm:$0x3] %vm3_vm1, %v377_v50  }
  0x1e   :  { %v357_v52 = vld [vmem:[%s904_s0 + $0x40] ss:$4 sm:$0xff]   ;;  %379 = vst.msk [vmem:[%s905_s1 + $0x21] ss:$8 sm:$0xc] %vm3_vm1, %v377_v50  }
  0x1f   :  { %380 = vst.msk [vmem:[%s905_s1 + $0x12] ss:$8 sm:$0x30] %vm3_vm1, %v377_v50   ;;  %381 = vst.msk [vmem:[%s905_s1 + $0x3] ss:$8 sm:$0xc0] %vm3_vm1, %v377_v50  }
  0x20   :  { %383 = vst.msk [vmem:[%s905_s1 + $0x34] ss:$8 sm:$0x3] %vm3_vm1, %v382_v51   ;;  %384 = vst.msk [vmem:[%s905_s1 + $0x25] ss:$8 sm:$0xc] %vm3_vm1, %v382_v51   ;;  %257 = vrot.lane.b32.xlu1 %v256_v53, %s460_s26  ;;  %246 = vrot.lane.b32.xlu0 %v245_v55, %s460_s26 }
  0x21   :  { %385 = vst.msk [vmem:[%s905_s1 + $0x16] ss:$8 sm:$0x30] %vm3_vm1, %v382_v51   ;;  %386 = vst.msk [vmem:[%s905_s1 + $0x7] ss:$8 sm:$0xc0] %vm3_vm1, %v382_v51  }
  0x22   :  { %358 = vst.msk [vmem:[%s905_s1 + $0x10] ss:$8 sm:$0x3] %vm3_vm1, %v357_v52   ;;  %359 = vst.msk [vmem:[%s905_s1 + $0x1] ss:$8 sm:$0xc] %vm3_vm1, %v357_v52  }
  0x23   :  { %360 = vst.msk [vmem:[%s905_s1 - $0xe] ss:$8 sm:$0x30] %vm3_vm1, %v357_v52   ;;  %361 = vst.msk [vmem:[%s905_s1 - $0x1d] ss:$8 sm:$0xc0] %vm3_vm1, %v357_v52  }
  0x24   :  { %v362_v54 = vld [vmem:[%s904_s0 + $0x60] ss:$4 sm:$0xff]   ;;  %v434_v59 = vld [vmem:[%s904_s0 + $0x1] ss:$8 sm:$0xf0]   ;;  %278 = vrot.lane.b32.xlu1 %v277_v60, %s461_s25 }
  0x25   :  { %363 = vst.msk [vmem:[%s905_s1 + $0x14] ss:$8 sm:$0x3] %vm3_vm1, %v362_v54   ;;  %364 = vst.msk [vmem:[%s905_s1 + $0x5] ss:$8 sm:$0xc] %vm3_vm1, %v362_v54   ;;  %v267_v61 = vsel %vm92_vm0, %v434_v59, %v433_v58 }
  0x26   :  { %365 = vst.msk [vmem:[%s905_s1 - $0xa] ss:$8 sm:$0x30] %vm3_vm1, %v362_v54   ;;  %366 = vst.msk [vmem:[%s905_s1 - $0x19] ss:$8 sm:$0xc0] %vm3_vm1, %v362_v54   ;;  %268 = vrot.lane.b32.xlu0 %v267_v61, %s461_s25 }
  0x27   :  { %v441_v62 = vld [vmem:[%s904_s0 + $0x85] ss:$8 sm:$0xf]   ;;  %v447_v4 = vld [vmem:[%s904_s0 + $0xc1] ss:$8 sm:$0xf]  }
  0x28   :  { %v442_v63 = vld [vmem:[%s904_s0 + $0x85] ss:$8 sm:$0xf0]   ;;  %v448_v5 = vld [vmem:[%s904_s0 + $0xc1] ss:$8 sm:$0xf0]  }
  0x29   :  { %v438_v0 = vld [vmem:[%s904_s0 + $0x5] ss:$8 sm:$0xf]   ;;  %v299_v2 = vsel %vm92_vm0, %v442_v63, %v441_v62  ;;  %v444_v6 = vld [vmem:[%s904_s0 + $0x41] ss:$8 sm:$0xf]   ;;  %v321_v8 = vsel %vm92_vm0, %v448_v5, %v447_v4 }
  0x2a   :  { %v439_v1 = vld [vmem:[%s904_s0 + $0x5] ss:$8 sm:$0xf0]   ;;  %v445_v7 = vld [vmem:[%s904_s0 + $0x41] ss:$8 sm:$0xf0]   ;;  %300 = vrot.lane.b32.xlu1 %v299_v2, %s461_s25 }
  0x2b   :  { %v288_v3 = vsel %vm92_vm0, %v439_v1, %v438_v0  ;;  %v310_v9 = vsel %vm92_vm0, %v445_v7, %v444_v6  ;;  %v453_v10 = vld [vmem:[%s904_s0 + $0xc5] ss:$8 sm:$0xf]  }
  0x2c   :  { %289 = vrot.lane.b32.xlu0 %v288_v3, %s461_s25  ;;  %v454_v11 = vld [vmem:[%s904_s0 + $0xc5] ss:$8 sm:$0xf0]  }
  0x2d   :  { %v450_v12 = vld [vmem:[%s904_s0 + $0x45] ss:$8 sm:$0xf]   ;;  %v343_v14 = vsel %vm92_vm0, %v454_v11, %v453_v10 }
  0x2e   :  { %v451_v13 = vld [vmem:[%s904_s0 + $0x45] ss:$8 sm:$0xf0]   ;;  %322 = vrot.lane.b32.xlu1 %v321_v8, %s461_s25 }
  0x2f   :  { %v332_v15 = vsel %vm92_vm0, %v451_v13, %v450_v12 }
  0x30   :  { %311 = vrot.lane.b32.xlu0 %v310_v9, %s461_s25 }
  0x32   :  { %344 = vrot.lane.b32.xlu1 %v343_v14, %s461_s25 }
  0x34   :  { %333 = vrot.lane.b32.xlu0 %v332_v15, %s461_s25 }
  0x76   :  { %v116_v16 = vpop.permute.xlu1 %115   ;;  %v95_v17 = vpop.permute.xlu0 %94  }
  0x77   :  { %394 = vst.msk [vmem:[%s905_s1 + $0x8] sm:$0xff] %vm96_vm2, %v116_v16   ;;  %97 = vst.msk [vmem:[%s905_s1] sm:$0xff] %vm96_vm2, %v95_v17  }
  0x7a   :  { %v127_v18 = vpop.permute.xlu1 %126   ;;  %v105_v19 = vpop.permute.xlu0 %104  }
  0x7b   :  { %397 = vst.msk [vmem:[%s905_s1 + $0x28] sm:$0xff] %vm96_vm2, %v127_v18   ;;  %391 = vst.msk [vmem:[%s905_s1 + $0x20] sm:$0xff] %vm96_vm2, %v105_v19  }
  0x7e   :  { %v149_v20 = vpop.permute.xlu1 %148   ;;  %v138_v21 = vpop.permute.xlu0 %137  }
  0x7f   :  { %403 = vst.msk [vmem:[%s905_s1 + $0x30] sm:$0xff] %vm96_vm2, %v149_v20   ;;  %400 = vst.msk [vmem:[%s905_s1 + $0x10] sm:$0xff] %vm96_vm2, %v138_v21  }
  0x82   :  { %v171_v22 = vpop.permute.xlu1 %170   ;;  %v160_v23 = vpop.permute.xlu0 %159  }
  0x83   :  { %409 = vst.msk [vmem:[%s905_s1 + $0x38] sm:$0xff] %vm96_vm2, %v171_v22   ;;  %406 = vst.msk [vmem:[%s905_s1 + $0x18] sm:$0xff] %vm96_vm2, %v160_v23  }
  0x86   :  { %v192_v24 = vpop.permute.xlu1 %191   ;;  %v182_v25 = vpop.permute.xlu0 %181  }
  0x87   :  { %414 = vst.msk [vmem:[%s905_s1 + $0x20] sm:$0xff] %vm183_vm3, %v192_v24   ;;  %184 = vst.msk [vmem:[%s905_s1] sm:$0xff] %vm183_vm3, %v182_v25  }
  0x8a   :  { %v214_v26 = vpop.permute.xlu1 %213   ;;  %v203_v27 = vpop.permute.xlu0 %202  }
  0x8b   :  { %420 = vst.msk [vmem:[%s905_s1 + $0x28] sm:$0xff] %vm183_vm3, %v214_v26   ;;  %417 = vst.msk [vmem:[%s905_s1 + $0x8] sm:$0xff] %vm183_vm3, %v203_v27  }
  0x8e   :  { %v236_v28 = vpop.permute.xlu1 %235   ;;  %v225_v29 = vpop.permute.xlu0 %224  }
  0x8f   :  { %426 = vst.msk [vmem:[%s905_s1 + $0x30] sm:$0xff] %vm183_vm3, %v236_v28   ;;  %423 = vst.msk [vmem:[%s905_s1 + $0x10] sm:$0xff] %vm183_vm3, %v225_v29  }
  0x92   :  { %v258_v30 = vpop.permute.xlu1 %257   ;;  %v247_v31 = vpop.permute.xlu0 %246  }
  0x93   :  { %432 = vst.msk [vmem:[%s905_s1 + $0x38] sm:$0xff] %vm183_vm3, %v258_v30   ;;  %429 = vst.msk [vmem:[%s905_s1 + $0x18] sm:$0xff] %vm183_vm3, %v247_v31  }
  0x96   :  { %v279_v32 = vpop.permute.xlu1 %278  }
  0x97   :  { %437 = vst.msk [vmem:[%s905_s1 + $0x20] sm:$0xff] %vm270_vm4, %v279_v32  }
  0x98   :  { %v269_v33 = vpop.permute.xlu0 %268  }
  0x99   :  { %271 = vst.msk [vmem:[%s905_s1] sm:$0xff] %vm270_vm4, %v269_v33  }
  0x9c   :  { %v301_v34 = vpop.permute.xlu1 %300  }
  0x9d   :  { %443 = vst.msk [vmem:[%s905_s1 + $0x28] sm:$0xff] %vm270_vm4, %v301_v34  }
  0x9e   :  { %v290_v35 = vpop.permute.xlu0 %289  }
  0x9f   :  { %440 = vst.msk [vmem:[%s905_s1 + $0x8] sm:$0xff] %vm270_vm4, %v290_v35  }
  0xa0   :  { %v323_v36 = vpop.permute.xlu1 %322  }
  0xa1   :  { %449 = vst.msk [vmem:[%s905_s1 + $0x30] sm:$0xff] %vm270_vm4, %v323_v36  }
  0xa2   :  { %v312_v37 = vpop.permute.xlu0 %311  }
  0xa3   :  { %446 = vst.msk [vmem:[%s905_s1 + $0x10] sm:$0xff] %vm270_vm4, %v312_v37  }
  0xa4   :  { %v345_v38 = vpop.permute.xlu1 %344  }
  0xa5   :  { %455 = vst.msk [vmem:[%s905_s1 + $0x38] sm:$0xff] %vm270_vm4, %v345_v38  }
  0xa6   :  { %v334_v39 = vpop.permute.xlu0 %333  }
  0xa7   :  { %452 = vst.msk [vmem:[%s905_s1 + $0x18] sm:$0xff] %vm270_vm4, %v334_v39  }

// kernel: discriminator_forward.6
= control target key start
LH: loop header
LB: loop body
LE: loop exit
PB: predicated region body
PF: predicated region fallthrough
CT: control target
= control target key end

     0   :  { %v4745_v1 = vmov 0   ;;  %vm294_vm0 = vcmask 261120   ;;  %s4737_s2 = inlined_call_operand.vmem [shape: bf16[4,288,256], index: 2, kind: input, shape index: {}]   ;;  %s4738_s1 = inlined_call_operand.vmem [shape: bf16[2,9,288], index: 1, kind: input, shape index: {}]   ;;  %s4739_s0 = inlined_call_operand.vmem [shape: bf16[2,9,288], index: 0, kind: input, shape index: {}]   ;;  %s4740_s3 = inlined_call_operand.vmem [shape: f32[256,32], index: 3, kind: input, shape index: {}]   ;;  %s4741_s4 = inlined_call_operand.vmem [shape: f32[32,256], index: 4, kind: input, shape index: {}]   ;;  %s4742_s5 = inlined_call_operand.vmem [shape: f32[1,32], index: 5, kind: input, shape index: {}]   ;;  %s4743_s6 = inlined_call_operand.vmem [shape: f32[1,32], index: 6, kind: input, shape index: {}]   ;;  %s4744_s7 = inlined_call_operand.vmem [shape: bf16[2,8,256], index: 7, kind: output, shape index: {}]  }
   0x1   :  { %v3201_v0 = vld [vmem:[%s4737_s2 + $0x194] ss:$8 sps:$4 sm:$0xff]   ;;  %371 = vmatprep.mubr.bf16.mxu1 %v4745_v1  ;;  %v3213_v3 = vld [vmem:[%s4737_s2 + $0x190] ss:$8 sps:$4 sm:$0xff]   ;;  %v3224_v5 = vld [vmem:[%s4737_s2 + $0x184] ss:$8 sps:$4 sm:$0xff]  }
   0x2   :  { %v3207_v2 = vld [vmem:[%s4737_s2 + $0x234] ss:$8 sps:$4 sm:$0xff]   ;;  %298 = vmatprep.subr.bf16.mxu0 %v3201_v0  ;;  %v3218_v4 = vld [vmem:[%s4737_s2 + $0x230] ss:$8 sps:$4 sm:$0xff]   ;;  %v3231_v6 = vld [vmem:[%s4737_s2 + $0x224] ss:$8 sps:$4 sm:$0xff]  }
   0x3   :  { %351 = vmatprep.subr.bf16.mxu1 %v3207_v2  ;;  %299 = vmatpush1.bf16.msra.mxu0 %v3213_v3  ;;  %v3236_v7 = vld [vmem:[%s4737_s2 + $0x180] ss:$8 sps:$4 sm:$0xff]   ;;  %v3248_v9 = vld [vmem:[%s4737_s2 + $0x174] ss:$8 sps:$4 sm:$0xff]   ;;  %v3256_v11 = vld [vmem:[%s4737_s2 + $0x70] ss:$8 sps:$4 sm:$0xff]  }
   0x4   :  { %352 = vmatpush1.bf16.msra.mxu1 %v3218_v4  ;;  %300 = vmatprep.subr.bf16.mxu0 %v3224_v5  ;;  %v3242_v8 = vld [vmem:[%s4737_s2 + $0x220] ss:$8 sps:$4 sm:$0xff]   ;;  %v3263_v12 = vld [vmem:[%s4737_s2 + $0x74] ss:$8 sps:$4 sm:$0xff]   ;;  %v3268_v13 = vld [vmem:[%s4737_s2 + $0x170] ss:$8 sps:$4 sm:$0xff]  }
   0x5   :  { %353 = vmatprep.subr.bf16.mxu1 %v3231_v6  ;;  %v2928_v10 = vld [vmem:[%s4738_s1 + $0x8] ss:$0 sps:$4 sm:$0xff]   ;;  %v3274_v14 = vld [vmem:[%s4737_s2 + $0x164] ss:$8 sps:$4 sm:$0xff]   ;;  %v3300_v18 = vld [vmem:[%s4737_s2 + $0x154] ss:$8 sps:$4 sm:$0xff]  }
   0x6   :  { %v3280_v15 = vld [vmem:[%s4737_s2 + $0x64] ss:$8 sps:$4 sm:$0xff]   ;;  %v3286_v16 = vld [vmem:[%s4737_s2 + $0x60] ss:$8 sps:$4 sm:$0xff]   ;;  %v3305_v19 = vld [vmem:[%s4737_s2 + $0x54] ss:$8 sps:$4 sm:$0xff]  }
   0x7   :  { %301 = vmatpush1.bf16.msra.mxu0 %v3236_v7  ;;  %v3293_v17 = vld [vmem:[%s4737_s2 + $0x160] ss:$8 sps:$4 sm:$0xff]   ;;  %v3310_v20 = vld [vmem:[%s4737_s2 + $0x50] ss:$8 sps:$4 sm:$0xff]   ;;  %v3322_v22 = vld [vmem:[%s4737_s2 + $0x144] ss:$8 sps:$4 sm:$0xff]  }
   0x8   :  { %354 = vmatpush1.bf16.msra.mxu1 %v3242_v8  ;;  %302 = vmatprep.subr.bf16.mxu0 %v3248_v9  ;;  %v3317_v21 = vld [vmem:[%s4737_s2 + $0x150] ss:$8 sps:$4 sm:$0xff]   ;;  %v3329_v23 = vld [vmem:[%s4737_s2 + $0x44] ss:$8 sps:$4 sm:$0xff]   ;;  %v3334_v24 = vld [vmem:[%s4737_s2 + $0x40] ss:$8 sps:$4 sm:$0xff]  }
   0x9   :  { %573 = vmatprep.subr.bf16.mxu1 %v3263_v12  ;;  %v3341_v25 = vld [vmem:[%s4737_s2 + $0x140] ss:$8 sps:$4 sm:$0xff]   ;;  %v3348_v26 = vld [vmem:[%s4737_s2 + $0x134] ss:$8 sps:$4 sm:$0xff]   ;;  %v3358_v28 = vld [vmem:[%s4737_s2 + $0x30] ss:$8 sps:$4 sm:$0xff]  }
   0xa   :  { %v3353_v27 = vld [vmem:[%s4737_s2 + $0x34] ss:$8 sps:$4 sm:$0xff]   ;;  %v3365_v29 = vld [vmem:[%s4737_s2 + $0x130] ss:$8 sps:$4 sm:$0xff]   ;;  %v3370_v30 = vld [vmem:[%s4737_s2 + $0x124] ss:$8 sps:$4 sm:$0xff]  }
   0xb   :  { %2543 = vmatmul.mubr.msk.bf16.vlgmr.msra.gmra.mxu1 %vm294_vm0, %v2928_v10  ;;  %303 = vmatpush1.bf16.msra.mxu0 %v3268_v13  ;;  %v3377_v31 = vld [vmem:[%s4737_s2 + $0x24] ss:$8 sps:$4 sm:$0xff]   ;;  %v3382_v32 = vld [vmem:[%s4737_s2 + $0x20] ss:$8 sps:$4 sm:$0xff]   ;;  %v3396_v34 = vld [vmem:[%s4737_s2 + $0x214] ss:$8 sps:$4 sm:$0xff]  }
   0xc   :  { %574 = vmatpush1.bf16.msra.mxu1 %v3256_v11  ;;  %304 = vmatprep.subr.bf16.mxu0 %v3274_v14  ;;  %v3389_v33 = vld [vmem:[%s4737_s2 + $0x120] ss:$8 sps:$4 sm:$0xff]   ;;  %v3401_v35 = vld [vmem:[%s4737_s2 + $0x14] ss:$8 sps:$4 sm:$0xff]   ;;  %v3406_v36 = vld [vmem:[%s4737_s2 + $0x10] ss:$8 sps:$4 sm:$0xff]  }
   0xd   :  { %575 = vmatprep.subr.bf16.mxu1 %v3280_v15  ;;  %v3413_v37 = vld [vmem:[%s4737_s2 + $0x210] ss:$8 sps:$4 sm:$0xff]   ;;  %v3418_v38 = vld [vmem:[%s4737_s2 + $0x204] ss:$8 sps:$4 sm:$0xff]   ;;  %v3430_v40 = vld [vmem:[%s4737_s2] ss:$8 sps:$4 sm:$0xff]  }
   0xe   :  { %v3425_v39 = vld [vmem:[%s4737_s2 + $0x4] ss:$8 sps:$4 sm:$0xff]   ;;  %v3437_v41 = vld [vmem:[%s4737_s2 + $0x200] ss:$8 sps:$4 sm:$0xff]   ;;  %v3444_v42 = vld [vmem:[%s4737_s2 + $0x1f4] ss:$8 sps:$4 sm:$0xff]  }
   0xf   :  { %305 = vmatpush1.bf16.msra.mxu0 %v3293_v17  ;;  %v3449_v43 = vld [vmem:[%s4737_s2 + $0xf4] ss:$8 sps:$4 sm:$0xff]   ;;  %v3454_v44 = vld [vmem:[%s4737_s2 + $0xf0] ss:$8 sps:$4 sm:$0xff]   ;;  %v3466_v46 = vld [vmem:[%s4737_s2 + $0x1e4] ss:$8 sps:$4 sm:$0xff]  }
  0x10   :  { %576 = vmatpush1.bf16.msra.mxu1 %v3286_v16  ;;  %306 = vmatprep.subr.bf16.mxu0 %v3300_v18  ;;  %v3461_v45 = vld [vmem:[%s4737_s2 + $0x1f0] ss:$8 sps:$4 sm:$0xff]   ;;  %v3473_v47 = vld [vmem:[%s4737_s2 + $0xe4] ss:$8 sps:$4 sm:$0xff]   ;;  %v3478_v48 = vld [vmem:[%s4737_s2 + $0xe0] ss:$8 sps:$4 sm:$0xff]  }
  0x11   :  { %577 = vmatprep.subr.bf16.mxu1 %v3305_v19  ;;  %4837 = vst [vmem:[#allocation2_spill] sm:$0xff] %v3478_v48  ;;  %v3483_v49 = vld [vmem:[%s4738_s1] sm:$0xff]  ;;  %v3495_v51 = vld [vmem:[%s4737_s2 + $0x1d4] ss:$8 sps:$4 sm:$0xff]   ;;  %v3509_v54 = vld [vmem:[%s4737_s2 + $0xd0] ss:$8 sps:$4 sm:$0xff]  }
  0x12   :  { %v3490_v50 = vld [vmem:[%s4737_s2 + $0x1e0] ss:$8 sps:$4 sm:$0xff]   ;;  %4838 = vst [vmem:[#allocation3_spill] sm:$0xff] %v3495_v51  ;;  %v2505_v52 = vcombine.high %v3483_v49, %v3483_v49  ;;  %v3504_v53 = vld [vmem:[%s4737_s2 + $0xd4] ss:$8 sps:$4 sm:$0xff]   ;;  %4840 = vst [vmem:[#allocation5_spill] sm:$0xff] %v3509_v54 }
  0x13   :  { %307 = vmatpush1.bf16.msra.mxu0 %v3317_v21  ;;  %4839 = vst [vmem:[#allocation4_spill] sm:$0xff] %v3504_v53  ;;  %v3516_v55 = vld [vmem:[%s4737_s2 + $0x1d0] ss:$8 sps:$4 sm:$0xff]   ;;  %v3521_v56 = vld [vmem:[%s4737_s2 + $0x1c4] ss:$8 sps:$4 sm:$0xff]  }
  0x14   :  { %578 = vmatpush1.bf16.msra.mxu1 %v3310_v20  ;;  %308 = vmatprep.subr.bf16.mxu0 %v3322_v22  ;;  %4841 = vst [vmem:[#allocation6_spill] sm:$0xff] %v3516_v55  ;;  %4842 = vst [vmem:[#allocation7_spill] sm:$0xff] %v3521_v56  ;;  %v3528_v57 = vld [vmem:[%s4737_s2 + $0xc4] ss:$8 sps:$4 sm:$0xff]   ;;  %v3542_v60 = vld [vmem:[%s4737_s2 + $0xc0] ss:$8 sps:$4 sm:$0xff]  }
  0x15   :  { %579 = vmatprep.subr.bf16.mxu1 %v3329_v23  ;;  %330 = vmatprep.mubr.bf16.mxu0 %v2505_v52  ;;  %4843 = vst [vmem:[#allocation8_spill] sm:$0xff] %v3528_v57  ;;  %v3533_v58 = vld [vmem:[%s4739_s0] sm:$0xff]  ;;  %4844 = vst [vmem:[#allocation9_spill] sm:$0xff] %v3542_v60  ;;  %v3554_v62 = vld [vmem:[%s4737_s2 + $0x1b4] ss:$8 sps:$4 sm:$0xff]  }
  0x16   :  { %v2545_v59 = vcombine.high %v3533_v58, %v3533_v58  ;;  %v3547_v61 = vld [vmem:[%s4737_s2 + $0x1c0] ss:$8 sps:$4 sm:$0xff]   ;;  %4846 = vst [vmem:[#allocation11_spill] sm:$0xff] %v3554_v62  ;;  %v3559_v63 = vld [vmem:[%s4737_s2 + $0xb4] ss:$8 sps:$4 sm:$0xff]  }
  0x17   :  { %309 = vmatpush1.bf16.msra.mxu0 %v3341_v25  ;;  %4845 = vst [vmem:[#allocation10_spill] sm:$0xff] %v3547_v61  ;;  %4847 = vst [vmem:[#allocation12_spill] sm:$0xff] %v3559_v63  ;;  %v3564_v10 = vld [vmem:[%s4737_s2 + $0xb0] ss:$8 sps:$4 sm:$0xff]   ;;  %v3576_v1 = vld [vmem:[%s4737_s2 + $0x1a4] ss:$8 sps:$4 sm:$0xff]  }
  0x18   :  { %580 = vmatpush1.bf16.msra.mxu1 %v3334_v24  ;;  %310 = vmatprep.subr.bf16.mxu0 %v3348_v26  ;;  %4848 = vst [vmem:[#allocation13_spill] sm:$0xff] %v3564_v10  ;;  %v3571_v52 = vld [vmem:[%s4737_s2 + $0x1b0] ss:$8 sps:$4 sm:$0xff]   ;;  %4850 = vst [vmem:[#allocation15_spill] sm:$0xff] %v3576_v1 }
  0x19   :  { %581 = vmatprep.subr.bf16.mxu1 %v3353_v27  ;;  %605 = vmatprep.mubr.bf16.mxu1 %v2545_v59  ;;  %4849 = vst [vmem:[#allocation14_spill] sm:$0xff] %v3571_v52  ;;  %v3583_v59 = vld [vmem:[%s4737_s2 + $0xa4] ss:$8 sps:$4 sm:$0xff]  }
  0x1a   :  { %4851 = vst [vmem:[#allocation16_spill] sm:$0xff] %v3583_v59 }
  0x1b   :  { %311 = vmatpush1.bf16.msra.mxu0 %v3365_v29 }
  0x1c   :  { %582 = vmatpush1.bf16.msra.mxu1 %v3358_v28  ;;  %312 = vmatprep.subr.bf16.mxu0 %v3370_v30 }
  0x1d   :  { %583 = vmatprep.subr.bf16.mxu1 %v3377_v31 }
  0x1f   :  { %313 = vmatpush1.bf16.msra.mxu0 %v3389_v33 }
  0x20   :  { %584 = vmatpush1.bf16.msra.mxu1 %v3382_v32  ;;  %314 = vmatprep.subr.bf16.mxu0 %v3396_v34 }
  0x21   :  { %585 = vmatprep.subr.bf16.mxu1 %v3401_v35 }
  0x23   :  { %315 = vmatpush2.bf16.msra.mxu0 %v3413_v37 }
  0x24   :  { %586 = vmatpush1.bf16.msra.mxu1 %v3406_v36  ;;  %316 = vmatprep.subr.bf16.mxu0 %v3418_v38 }
  0x25   :  { %587 = vmatprep.subr.bf16.mxu1 %v3425_v39 }
  0x27   :  { %317 = vmatpush2.bf16.msra.mxu0 %v3437_v41 }
  0x28   :  { %588 = vmatpush1.bf16.msra.mxu1 %v3430_v40  ;;  %318 = vmatprep.subr.bf16.mxu0 %v3444_v42 }
  0x29   :  { %589 = vmatprep.subr.bf16.mxu1 %v3449_v43 }
  0x2b   :  { %319 = vmatpush2.bf16.msra.mxu0 %v3461_v45 }
  0x2c   :  { %590 = vmatpush2.bf16.msra.mxu1 %v3454_v44  ;;  %320 = vmatprep.subr.bf16.mxu0 %v3466_v46 }
  0x2d   :  { %591 = vmatprep.subr.bf16.mxu1 %v3473_v47 }
  0x2f   :  { %321 = vmatpush2.bf16.msra.mxu0 %v3490_v50 }
  0x30   :  { %592 = vmatpush2.bf16.msra.mxu1 %v3478_v48  ;;  %322 = vmatprep.subr.bf16.mxu0 %v3495_v51  ;;  %v3892_v51 = vld [vmem:[%s4737_s2 + $0x324] ss:$8 sps:$4 sm:$0xff]  }
  0x31   :  { %593 = vmatprep.subr.bf16.mxu1 %v3504_v53  ;;  %v3703_v53 = vld [vmem:[%s4737_s2 + $0x340] ss:$8 sps:$4 sm:$0xff]   ;;  %4898 = vst [vmem:[#allocation62_spill] sm:$0xff] %v3892_v51 }
  0x32   :  { %4870 = vst [vmem:[#allocation34_spill] sm:$0xff] %v3703_v53 }
  0x33   :  { %323 = vmatpush2.bf16.msra.mxu0 %v3516_v55  ;;  %v3685_v55 = vld [vmem:[%s4737_s2 + $0x2a4] ss:$8 sps:$4 sm:$0xff]  }
  0x34   :  { %594 = vmatpush2.bf16.msra.mxu1 %v3509_v54  ;;  %324 = vmatprep.subr.bf16.mxu0 %v3521_v56  ;;  %v3678_v54 = vld [vmem:[%s4737_s2 + $0x350] ss:$8 sps:$4 sm:$0xff]   ;;  %4867 = vst [vmem:[#allocation31_spill] sm:$0xff] %v3685_v55 }
  0x35   :  { %595 = vmatprep.subr.bf16.mxu1 %v3528_v57  ;;  %v3027_v57 = vld [vmem:[%s4739_s0 + $0x8] ss:$0 sps:$4 sm:$0xff]   ;;  %4866 = vst [vmem:[#allocation30_spill] sm:$0xff] %v3678_v54 }
  0x37   :  { %325 = vmatpush2.bf16.msra.mxu0 %v3547_v61  ;;  %v3614_v61 = vld [vmem:[%s4737_s2 + $0x90] ss:$8 sps:$4 sm:$0xff]  }
  0x38   :  { %596 = vmatpush2.bf16.msra.mxu1 %v3542_v60  ;;  %326 = vmatprep.subr.bf16.mxu0 %v3554_v62  ;;  %v3588_v60 = vld [vmem:[%s4737_s2 + $0xa0] ss:$8 sps:$4 sm:$0xff]   ;;  %4856 = vst [vmem:[#allocation21_spill] sm:$0xff] %v3614_v61 }
  0x39   :  { %597 = vmatprep.subr.bf16.mxu1 %v3559_v63  ;;  %4852 = vst [vmem:[#allocation17_spill] sm:$0xff] %v3588_v60  ;;  %v3595_v62 = vld [vmem:[%s4737_s2 + $0x1a0] ss:$8 sps:$4 sm:$0xff]   ;;  %v3602_v63 = vld [vmem:[%s4737_s2 + $0x94] ss:$8 sps:$4 sm:$0xff]  }
  0x3a   :  { %4853 = vst [vmem:[#allocation18_spill] sm:$0xff] %v3595_v62  ;;  %4854 = vst [vmem:[#allocation19_spill] sm:$0xff] %v3602_v63 }
  0x3b   :  { %327 = vmatpush2.bf16.msra.mxu0 %v3571_v52  ;;  %v3607_v52 = vld [vmem:[%s4737_s2 + $0x114] ss:$8 sps:$4 sm:$0xff]  }
  0x3c   :  { %598 = vmatpush2.bf16.msra.mxu1 %v3564_v10  ;;  %328 = vmatprep.subr.bf16.mxu0 %v3576_v1  ;;  %4855 = vst [vmem:[#allocation20_spill] sm:$0xff] %v3607_v52  ;;  %v2504_v10 = vcombine.low %v3483_v49, %v3483_v49  ;;  %v3628_v1 = vld [vmem:[%s4737_s2 + $0x84] ss:$8 sps:$4 sm:$0xff]  }
  0x3d   :  { %599 = vmatprep.subr.bf16.mxu1 %v3583_v59  ;;  %v3621_v59 = vld [vmem:[%s4737_s2 + $0x110] ss:$8 sps:$4 sm:$0xff]   ;;  %4858 = vst [vmem:[#allocation23_spill] sm:$0xff] %v3628_v1 }
  0x3e   :  { %4857 = vst [vmem:[#allocation22_spill] sm:$0xff] %v3621_v59 }
  0x3f   :  { %329 = vmatpush2.bf16.msra.mxu0 %v3595_v62  ;;  %v3633_v62 = vld [vmem:[%s4737_s2 + $0x104] ss:$8 sps:$4 sm:$0xff]  }
  0x40   :  { %600 = vmatpush2.bf16.msra.mxu1 %v3588_v60  ;;  %626 = vmatprep.subr.bf16.mxu0 %v3607_v52  ;;  %4859 = vst [vmem:[#allocation24_spill] sm:$0xff] %v3633_v62  ;;  %v3638_v60 = vld [vmem:[%s4737_s2 + $0x80] ss:$8 sps:$4 sm:$0xff]  }
  0x41   :  { %601 = vmatprep.subr.bf16.mxu1 %v3602_v63  ;;  %4860 = vst [vmem:[#allocation25_spill] sm:$0xff] %v3638_v60  ;;  %v3043_v52 = vld [vmem:[%s4739_s0 + $0x8] ss:$12 sps:$4 sm:$0x1f]  }
  0x42   :  { %331 = vmatmul.mubr.bf16.vlgmr.msra.gmra.mxu0 %v2504_v10  ;;  %v3648_v63 = vld [vmem:[%s4737_s2 + $0x100] ss:$8 sps:$4 sm:$0xff]   ;;  %v3655_v10 = vld [vmem:[%s4737_s2 + $0x2b4] ss:$8 sps:$4 sm:$0xff]   ;;  %v726_v56 = vshll.u32 %v3043_v52, 16 }
  0x43   :  { %627 = vmatpush1.bf16.msra.mxu0 %v3621_v59  ;;  %4861 = vst [vmem:[#allocation26_spill] sm:$0xff] %v3648_v63  ;;  %4862 = vst [vmem:[#allocation27_spill] sm:$0xff] %v3655_v10  ;;  %v4864_v59 = vmov 0  }
  0x44   :  { %602 = vmatpush2.bf16.msra.mxu1 %v3614_v61  ;;  %628 = vmatprep.subr.bf16.mxu0 %v3633_v62  ;;  %v3660_v61 = vld [vmem:[%s4737_s2 + $0x354] ss:$8 sps:$4 sm:$0xff]   ;;  %v3671_v62 = vld [vmem:[%s4737_s2 + $0x2b0] ss:$8 sps:$4 sm:$0xff]  }
  0x45   :  { %603 = vmatprep.subr.bf16.mxu1 %v3628_v1  ;;  %4863 = vst [vmem:[#allocation28_spill] sm:$0xff] %v3660_v61  ;;  %646 = vmatprep.mubr.bf16.mxu0 %v4864_v59  ;;  %v2544_v1 = vcombine.low %v3533_v58, %v3533_v58  ;;  %4865 = vst [vmem:[#allocation29_spill] sm:$0xff] %v3671_v62 }
  0x47   :  { %629 = vmatpush1.bf16.msra.mxu0 %v3648_v63  ;;  %v3696_v63 = vld [vmem:[%s4737_s2 + $0x2a0] ss:$8 sps:$4 sm:$0xff]  }
  0x48   :  { %604 = vmatpush2.bf16.msra.mxu1 %v3638_v60  ;;  %915 = vmatprep.subr.bf16.mxu0 %v3655_v10  ;;  %v3690_v60 = vld [vmem:[%s4737_s2 + $0x344] ss:$8 sps:$4 sm:$0xff]   ;;  %4869 = vst [vmem:[#allocation33_spill] sm:$0xff] %v3696_v63  ;;  %v724_v10 = vshrl.u32 %v3043_v52, 16 }
  0x49   :  { %968 = vmatprep.subr.bf16.mxu1 %v3660_v61  ;;  %4868 = vst [vmem:[#allocation32_spill] sm:$0xff] %v3690_v60  ;;  %v728_v61 = vrot.slane %v726_v56, 1  ;;  %v3715_v56 = vld [vmem:[%s4737_s2 + $0x3d4] ss:$8 sps:$4 sm:$0xff]  }
  0x4a   :  { %2583 = vmatmul.mubr.msk.bf16.vlgmr.msra.gmra.mxu0 %vm294_vm0, %v3027_v57  ;;  %4872 = vst [vmem:[#allocation36_spill] sm:$0xff] %v3715_v56  ;;  %v3721_v57 = vld [vmem:[%s4737_s2 + $0x290] ss:$8 sps:$4 sm:$0xff]  }
  0x4b   :  { %606 = vmatmul.mubr.bf16.vlgmr.msra.gmra.mxu1 %v2544_v1  ;;  %916 = vmatpush1.bf16.msra.mxu0 %v3671_v62  ;;  %v3710_v1 = vld [vmem:[%s4737_s2 + $0x294] ss:$8 sps:$4 sm:$0xff]   ;;  %4873 = vst [vmem:[#allocation37_spill] sm:$0xff] %v3721_v57  ;;  %v729_v52 = vor.u32 %v728_v61, %v724_v10  ;;  %v3740_v61 = vld [vmem:[%s4737_s2 + $0x3c4] ss:$8 sps:$4 sm:$0xff]  }
  0x4c   :  { %969 = vmatpush1.bf16.msra.mxu1 %v3678_v54  ;;  %917 = vmatprep.subr.bf16.mxu0 %v3685_v55  ;;  %4871 = vst [vmem:[#allocation35_spill] sm:$0xff] %v3710_v1  ;;  %v3735_v55 = vld [vmem:[%s4737_s2 + $0x284] ss:$8 sps:$4 sm:$0xff]   ;;  %4876 = vst [vmem:[#allocation40_spill] sm:$0xff] %v3740_v61  ;;  %v3746_v10 = vld [vmem:[%s4737_s2 + $0x280] ss:$8 sps:$4 sm:$0xff]  }
  0x4d   :  { %970 = vmatprep.subr.bf16.mxu1 %v3690_v60  ;;  %988 = vmatprep.mubr.bf16.mxu1 %v4864_v59  ;;  %v3728_v60 = vld [vmem:[%s4737_s2 + $0x3d0] ss:$8 sps:$4 sm:$0xff]   ;;  %4875 = vst [vmem:[#allocation39_spill] sm:$0xff] %v3735_v55  ;;  %4877 = vst [vmem:[#allocation41_spill] sm:$0xff] %v3746_v10  ;;  %v3849_v62 = vld [vmem:[%s4737_s2 + $0x240] ss:$8 sps:$4 sm:$0xff]  }
  0x4e   :  { %4874 = vst [vmem:[#allocation38_spill] sm:$0xff] %v3728_v60  ;;  %4893 = vst [vmem:[#allocation57_spill] sm:$0xff] %v3849_v62 }
  0x4f   :  { %918 = vmatpush1.bf16.msra.mxu0 %v3696_v63 }
  0x50   :  { %971 = vmatpush1.bf16.msra.mxu1 %v3703_v53  ;;  %919 = vmatprep.subr.bf16.mxu0 %v3710_v1  ;;  %v3832_v1 = vld [vmem:[%s4737_s2 + $0x390] ss:$8 sps:$4 sm:$0xff]   ;;  %v3837_v53 = vld [vmem:[%s4737_s2 + $0x244] ss:$8 sps:$4 sm:$0xff]  }
  0x51   :  { %1259 = vmatprep.subr.bf16.mxu1 %v3715_v56  ;;  %v3753_v56 = vld [vmem:[%s4737_s2 + $0x3c0] ss:$8 sps:$4 sm:$0xff]   ;;  %4890 = vst [vmem:[#allocation54_spill] sm:$0xff] %v3832_v1  ;;  %4891 = vst [vmem:[#allocation55_spill] sm:$0xff] %v3837_v53 }
  0x52   :  { %4878 = vst [vmem:[#allocation42_spill] sm:$0xff] %v3753_v56 }
  0x53   :  { %2659 = vmatmul.mubr.msk.bf16.vlgmr.msra.gmra.mxu1 %vm294_vm0, %v729_v52  ;;  %920 = vmatpush1.bf16.msra.mxu0 %v3721_v57  ;;  %v3760_v52 = vld [vmem:[%s4737_s2 + $0x274] ss:$8 sps:$4 sm:$0xff]  }
  0x54   :  { %1260 = vmatpush1.bf16.msra.mxu1 %v3728_v60  ;;  %921 = vmatprep.subr.bf16.mxu0 %v3735_v55  ;;  %4879 = vst [vmem:[#allocation43_spill] sm:$0xff] %v3760_v52  ;;  %v3765_v57 = vld [vmem:[%s4737_s2 + $0x3b4] ss:$8 sps:$4 sm:$0xff]   ;;  %v3770_v60 = vld [vmem:[%s4737_s2 + $0x270] ss:$8 sps:$4 sm:$0xff]  }
  0x55   :  { %1261 = vmatprep.subr.bf16.mxu1 %v3740_v61  ;;  %4880 = vst [vmem:[#allocation44_spill] sm:$0xff] %v3765_v57  ;;  %4881 = vst [vmem:[#allocation45_spill] sm:$0xff] %v3770_v60  ;;  %v3777_v61 = vld [vmem:[%s4737_s2 + $0x3b0] ss:$8 sps:$4 sm:$0xff]   ;;  %v3784_v55 = vld [vmem:[%s4737_s2 + $0x264] ss:$8 sps:$4 sm:$0xff]  }
  0x56   :  { %4882 = vst [vmem:[#allocation46_spill] sm:$0xff] %v3777_v61  ;;  %4883 = vst [vmem:[#allocation47_spill] sm:$0xff] %v3784_v55 }
  0x57   :  { %922 = vmatpush1.bf16.msra.mxu0 %v3746_v10  ;;  %v3789_v10 = vld [vmem:[%s4737_s2 + $0x3a4] ss:$8 sps:$4 sm:$0xff]  }
  0x58   :  { %1262 = vmatpush1.bf16.msra.mxu1 %v3753_v56  ;;  %923 = vmatprep.subr.bf16.mxu0 %v3760_v52  ;;  %4884 = vst [vmem:[#allocation48_spill] sm:$0xff] %v3789_v10  ;;  %v3794_v56 = vld [vmem:[%s4737_s2 + $0x260] ss:$8 sps:$4 sm:$0xff]   ;;  %v3808_v52 = vld [vmem:[%s4737_s2 + $0x254] ss:$8 sps:$4 sm:$0xff]  }
  0x59   :  { %1263 = vmatprep.subr.bf16.mxu1 %v3765_v57  ;;  %4885 = vst [vmem:[#allocation49_spill] sm:$0xff] %v3794_v56  ;;  %v3801_v57 = vld [vmem:[%s4737_s2 + $0x3a0] ss:$8 sps:$4 sm:$0xff]   ;;  %4887 = vst [vmem:[#allocation51_spill] sm:$0xff] %v3808_v52 }
  0x5a   :  { %4886 = vst [vmem:[#allocation50_spill] sm:$0xff] %v3801_v57 }
  0x5b   :  { %924 = vmatpush1.bf16.msra.mxu0 %v3770_v60  ;;  %v3813_v60 = vld [vmem:[%s4737_s2 + $0x394] ss:$8 sps:$4 sm:$0xff]  }
  0x5c   :  { %1264 = vmatpush1.bf16.msra.mxu1 %v3777_v61  ;;  %925 = vmatprep.subr.bf16.mxu0 %v3784_v55  ;;  %4888 = vst [vmem:[#allocation52_spill] sm:$0xff] %v3813_v60  ;;  %v3818_v61 = vld [vmem:[%s4739_s0 + $0xc] sm:$0x11] }
  0x5d   :  { %1265 = vmatprep.subr.bf16.mxu1 %v3789_v10  ;;  %v2621_v55 = vcombine.high %v3533_v58, %v3818_v61  ;;  %v3825_v10 = vld [vmem:[%s4737_s2 + $0x250] ss:$8 sps:$4 sm:$0xff]  }
  0x5e   :  { %4889 = vst [vmem:[#allocation53_spill] sm:$0xff] %v3825_v10 }
  0x5f   :  { %926 = vmatpush1.bf16.msra.mxu0 %v3794_v56  ;;  %v717_v63 = vshrl.u32 %v2621_v55, 16  ;;  %v719_v54 = vshll.u32 %v2621_v55, 16  ;;  %v3856_v55 = vld [vmem:[%s4737_s2 + $0x380] ss:$8 sps:$4 sm:$0xff]  }
  0x60   :  { %1266 = vmatpush1.bf16.msra.mxu1 %v3801_v57  ;;  %927 = vmatprep.subr.bf16.mxu0 %v3808_v52  ;;  %v3844_v57 = vld [vmem:[%s4737_s2 + $0x384] ss:$8 sps:$4 sm:$0xff]   ;;  %4894 = vst [vmem:[#allocation58_spill] sm:$0xff] %v3856_v55 }
  0x61   :  { %1267 = vmatprep.subr.bf16.mxu1 %v3813_v60  ;;  %4892 = vst [vmem:[#allocation56_spill] sm:$0xff] %v3844_v57  ;;  %v721_v56 = vrot.slane %v719_v54, 1  ;;  %v3861_v52 = vld [vmem:[%s4738_s1 + $0xc] sm:$0x11]  ;;  %v3868_v54 = vld [vmem:[%s4737_s2 + $0x334] ss:$8 sps:$4 sm:$0xff]  }
  0x63   :  { %928 = vmatpush1.bf16.msra.mxu0 %v3825_v10  ;;  %v722_v60 = vor.u32 %v721_v56, %v717_v63  ;;  %v2697_v63 = vcombine.high %v3483_v49, %v3861_v52  ;;  %v3880_v56 = vld [vmem:[%s4737_s2 + $0x330] ss:$8 sps:$4 sm:$0xff]  }
  0x64   :  { %1268 = vmatpush1.bf16.msra.mxu1 %v3832_v1  ;;  %929 = vmatprep.subr.bf16.mxu0 %v3837_v53  ;;  %v3873_v1 = vld [vmem:[%s4737_s2 + $0x374] ss:$8 sps:$4 sm:$0xff]   ;;  %4896 = vst [vmem:[#allocation60_spill] sm:$0xff] %v3880_v56 }
  0x65   :  { %1269 = vmatprep.subr.bf16.mxu1 %v3844_v57  ;;  %4895 = vst [vmem:[#allocation59_spill] sm:$0xff] %v3873_v1  ;;  %947 = vmatprep.mubr.bf16.mxu0 %v722_v60  ;;  %v3885_v57 = vld [vmem:[%s4737_s2 + $0x370] ss:$8 sps:$4 sm:$0xff]   ;;  %v1061_v53 = vshrl.u32 %v2697_v63, 16  ;;  %v1063_v10 = vshll.u32 %v2697_v63, 16 }
  0x66   :  { %4897 = vst [vmem:[#allocation61_spill] sm:$0xff] %v3885_v57  ;;  %v3897_v60 = vld [vmem:[%s4737_s2 + $0x364] ss:$8 sps:$4 sm:$0xff]  }
  0x67   :  { %930 = vmatpush1.bf16.msra.mxu0 %v3849_v62  ;;  %4899 = vst [vmem:[#allocation63_spill] sm:$0xff] %v3897_v60  ;;  %v1065_v48 = vrot.slane %v1063_v10, 1  ;;  %v3911_v62 = vld [vmem:[%s4737_s2 + $0x360] ss:$8 sps:$4 sm:$0xff]   ;;  %v3930_v10 = vld [vmem:[%s4737_s2 + $0x310] ss:$8 sps:$4 sm:$0xff]  }
  0x68   :  { %1270 = vmatpush1.bf16.msra.mxu1 %v3856_v55  ;;  %931 = vmatprep.subr.bf16.mxu0 %v3868_v54  ;;  %v3906_v55 = vld [vmem:[%s4737_s2 + $0x320] ss:$8 sps:$4 sm:$0xff]   ;;  %4901 = vst [vmem:[#allocation65_spill] sm:$0xff] %v3911_v62  ;;  %4904 = vst [vmem:[#allocation68_spill] sm:$0xff] %v3930_v10 }
  0x69   :  { %1271 = vmatprep.subr.bf16.mxu1 %v3873_v1  ;;  %v1066_v63 = vor.u32 %v1065_v48, %v1061_v53  ;;  %4900 = vst [vmem:[#allocation64_spill] sm:$0xff] %v3906_v55  ;;  %v3918_v48 = vld [vmem:[%s4737_s2 + $0x314] ss:$8 sps:$4 sm:$0xff]  }
  0x6a   :  { %4902 = vst [vmem:[#allocation66_spill] sm:$0xff] %v3918_v48  ;;  %v3923_v53 = vld [vmem:[%s4737_s2 + $0x454] ss:$8 sps:$4 sm:$0xff]  }
  0x6b   :  { %932 = vmatpush2.bf16.msra.mxu0 %v3880_v56  ;;  %4903 = vst [vmem:[#allocation67_spill] sm:$0xff] %v3923_v53  ;;  %1291 = vmatprep.mubr.bf16.mxu1 %v1066_v63  ;;  %v3942_v63 = vld [vmem:[%s4737_s2 + $0x304] ss:$8 sps:$4 sm:$0xff]  }
  0x6c   :  { %1272 = vmatpush1.bf16.msra.mxu1 %v3885_v57  ;;  %933 = vmatprep.subr.bf16.mxu0 %v3892_v51  ;;  %4906 = vst [vmem:[#allocation70_spill] sm:$0xff] %v3942_v63  ;;  %v2696_v57 = vcombine.low %v3483_v49, %v3861_v52  ;;  %v4069_v49 = vld [vmem:[%s4737_s2 + $0x3f4] ss:$8 sps:$4 sm:$0xff]  }
  0x6d   :  { %1273 = vmatprep.subr.bf16.mxu1 %v3897_v60  ;;  %v3935_v60 = vld [vmem:[%s4737_s2 + $0x450] ss:$8 sps:$4 sm:$0xff]   ;;  %4926 = vst [vmem:[#allocation90_spill] sm:$0xff] %v4069_v49  ;;  %v4074_v52 = vld [vmem:[%s4737_s2 + $0x474] ss:$8 sps:$4 sm:$0xff]  }
  0x6e   :  { %4905 = vst [vmem:[#allocation69_spill] sm:$0xff] %v3935_v60  ;;  %4927 = vst [vmem:[#allocation91_spill] sm:$0xff] %v4074_v52 }
  0x6f   :  { %934 = vmatpush2.bf16.msra.mxu0 %v3906_v55  ;;  %v2620_v55 = vcombine.low %v3533_v58, %v3818_v61  ;;  %v4016_v58 = vld [vmem:[%s4737_s2 + $0x2d4] ss:$8 sps:$4 sm:$0xff]  }
  0x70   :  { %1274 = vmatpush1.bf16.msra.mxu1 %v3911_v62  ;;  %935 = vmatprep.subr.bf16.mxu0 %v3918_v48  ;;  %v3947_v62 = vld [vmem:[%s4737_s2 + $0x444] ss:$8 sps:$4 sm:$0xff]   ;;  %v3954_v48 = vld [vmem:[%s4737_s2 + $0x300] ss:$8 sps:$4 sm:$0xff]   ;;  %4918 = vst [vmem:[#allocation82_spill] sm:$0xff] %v4016_v58 }
  0x71   :  { %1275 = vmatprep.subr.bf16.mxu1 %v3923_v53  ;;  %4907 = vst [vmem:[#allocation71_spill] sm:$0xff] %v3947_v62  ;;  %4908 = vst [vmem:[#allocation72_spill] sm:$0xff] %v3954_v48  ;;  %v3959_v53 = vld [vmem:[%s4737_s2 + $0x440] ss:$8 sps:$4 sm:$0xff]   ;;  %v4021_v61 = vld [vmem:[%s4737_s2 + $0x414] ss:$8 sps:$4 sm:$0xff]  }
  0x72   :  { %4909 = vst [vmem:[#allocation73_spill] sm:$0xff] %v3959_v53  ;;  %4919 = vst [vmem:[#allocation83_spill] sm:$0xff] %v4021_v61 }
  0x73   :  { %936 = vmatpush2.bf16.msra.mxu0 %v3930_v10  ;;  %v3966_v10 = vld [vmem:[%s4737_s2 + $0x2f4] ss:$8 sps:$4 sm:$0xff]  }
  0x74   :  { %1276 = vmatpush2.bf16.msra.mxu1 %v3935_v60  ;;  %937 = vmatprep.subr.bf16.mxu0 %v3942_v63  ;;  %4910 = vst [vmem:[#allocation74_spill] sm:$0xff] %v3966_v10  ;;  %v3971_v60 = vld [vmem:[%s4737_s2 + $0x434] ss:$8 sps:$4 sm:$0xff]   ;;  %v3978_v63 = vld [vmem:[%s4737_s2 + $0x2f0] ss:$8 sps:$4 sm:$0xff]  }
  0x75   :  { %1277 = vmatprep.subr.bf16.mxu1 %v3947_v62  ;;  %4911 = vst [vmem:[#allocation75_spill] sm:$0xff] %v3971_v60  ;;  %4912 = vst [vmem:[#allocation76_spill] sm:$0xff] %v3978_v63  ;;  %v3983_v62 = vld [vmem:[%s4737_s2 + $0x430] ss:$8 sps:$4 sm:$0xff]  }
  0x76   :  { %4913 = vst [vmem:[#allocation77_spill] sm:$0xff] %v3983_v62 }
  0x77   :  { %938 = vmatpush2.bf16.msra.mxu0 %v3954_v48  ;;  %v3990_v48 = vld [vmem:[%s4737_s2 + $0x2e4] ss:$8 sps:$4 sm:$0xff]  }
  0x78   :  { %1278 = vmatpush2.bf16.msra.mxu1 %v3959_v53  ;;  %939 = vmatprep.subr.bf16.mxu0 %v3966_v10  ;;  %4914 = vst [vmem:[#allocation78_spill] sm:$0xff] %v3990_v48  ;;  %v3995_v53 = vld [vmem:[%s4737_s2 + $0x424] ss:$8 sps:$4 sm:$0xff]   ;;  %v4009_v10 = vld [vmem:[%s4737_s2 + $0x420] ss:$8 sps:$4 sm:$0xff]  }
  0x79   :  { %1279 = vmatprep.subr.bf16.mxu1 %v3971_v60  ;;  %4915 = vst [vmem:[#allocation79_spill] sm:$0xff] %v3995_v53  ;;  %v4004_v60 = vld [vmem:[%s4737_s2 + $0x2e0] ss:$8 sps:$4 sm:$0xff]   ;;  %4917 = vst [vmem:[#allocation81_spill] sm:$0xff] %v4009_v10 }
  0x7a   :  { %4916 = vst [vmem:[#allocation80_spill] sm:$0xff] %v4004_v60 }
  0x7b   :  { %940 = vmatpush2.bf16.msra.mxu0 %v3978_v63  ;;  %v710_v63 = vshrl.u32 %v2620_v55, 16 }
  0x7c   :  { %1280 = vmatpush2.bf16.msra.mxu1 %v3983_v62  ;;  %941 = vmatprep.subr.bf16.mxu0 %v3990_v48  ;;  %v712_v62 = vshll.u32 %v2620_v55, 16  ;;  %v4028_v48 = vld [vmem:[%s4737_s2 + $0x2d0] ss:$8 sps:$4 sm:$0xff]  }
  0x7d   :  { %1281 = vmatprep.subr.bf16.mxu1 %v3995_v53  ;;  %4920 = vst [vmem:[#allocation84_spill] sm:$0xff] %v4028_v48  ;;  %v4033_v53 = vld [vmem:[%s4737_s2 + $0x410] ss:$8 sps:$4 sm:$0xff]  }
  0x7e   :  { %4921 = vst [vmem:[#allocation85_spill] sm:$0xff] %v4033_v53  ;;  %v714_v51 = vrot.slane %v712_v62, 1  ;;  %v4062_v62 = vld [vmem:[%s4737_s2 + $0x400] ss:$8 sps:$4 sm:$0xff]  }
  0x7f   :  { %942 = vmatpush2.bf16.msra.mxu0 %v4004_v60  ;;  %v4040_v60 = vld [vmem:[%s4737_s2 + $0x2c4] ss:$8 sps:$4 sm:$0xff]   ;;  %4925 = vst [vmem:[#allocation89_spill] sm:$0xff] %v4062_v62 }
  0x80   :  { %1282 = vmatpush2.bf16.msra.mxu1 %v4009_v10  ;;  %943 = vmatprep.subr.bf16.mxu0 %v4016_v58  ;;  %4922 = vst [vmem:[#allocation86_spill] sm:$0xff] %v4040_v60  ;;  %v4045_v10 = vld [vmem:[%s4737_s2 + $0x404] ss:$8 sps:$4 sm:$0xff]   ;;  %v3141_v58 = vld [vmem:[%s4738_s1 + $0x8] ss:$12 sps:$4 sm:$0x1f]   ;;  %v715_v55 = vor.u32 %v714_v51, %v710_v63 }
  0x81   :  { %1283 = vmatprep.subr.bf16.mxu1 %v4021_v61  ;;  %4923 = vst [vmem:[#allocation87_spill] sm:$0xff] %v4045_v10  ;;  %v4057_v61 = vld [vmem:[%s4737_s2 + $0x2c0] ss:$8 sps:$4 sm:$0xff]   ;;  %v4093_v51 = vld [vmem:[%s4737_s2 + $0x3e4] ss:$8 sps:$4 sm:$0xff]   ;;  %v1068_v56 = vshrl.u32 %v3141_v58, 16 }
  0x82   :  { %4924 = vst [vmem:[#allocation88_spill] sm:$0xff] %v4057_v61  ;;  %v4098_v63 = vld [vmem:[%s4737_s2 + $0x464] ss:$8 sps:$4 sm:$0xff]  }
  0x83   :  { %944 = vmatpush2.bf16.msra.mxu0 %v4028_v48  ;;  %v1070_v48 = vshll.u32 %v3141_v58, 16 }
  0x84   :  { %1284 = vmatpush2.bf16.msra.mxu1 %v4033_v53  ;;  %945 = vmatprep.subr.bf16.mxu0 %v4040_v60  ;;  %v1056_v53 = vshll.u32 %v2696_v57, 16  ;;  %v4086_v60 = vld [vmem:[%s4737_s2 + $0x470] ss:$8 sps:$4 sm:$0xff]  }
  0x85   :  { %1285 = vmatprep.subr.bf16.mxu1 %v4045_v10  ;;  %v4081_v10 = vld [vmem:[%s4737_s2 + $0x3f0] ss:$8 sps:$4 sm:$0xff]   ;;  %v1072_v1 = vrot.slane %v1070_v48, 1 }
  0x87   :  { %946 = vmatpush2.bf16.msra.mxu0 %v4057_v61  ;;  %v1058_v61 = vrot.slane %v1056_v53, 1  ;;  %v1073_v48 = vor.u32 %v1072_v1, %v1068_v56  ;;  %v4118_v53 = vld [vmem:[%s4738_s1 + $0x18] sm:$0xff] }
  0x88   :  { %1286 = vmatpush2.bf16.msra.mxu1 %v4062_v62  ;;  %1312 = vmatprep.subr.bf16.mxu0 %v4074_v52  ;;  %v1054_v62 = vshrl.u32 %v2696_v57, 16  ;;  %v4105_v52 = vld [vmem:[%s4737_s2 + $0x3e0] ss:$8 sps:$4 sm:$0xff]   ;;  %v2741_v58 = vcombine.high %v4118_v53, %v4118_v53 }
  0x89   :  { %1287 = vmatprep.subr.bf16.mxu1 %v4069_v49  ;;  %v4110_v49 = vld [vmem:[%s4737_s2 + $0x460] ss:$8 sps:$4 sm:$0xff]  }
  0x8a   :  { %948 = vmatmul.mubr.bf16.vlgmr.msra.gmra.mxu0 %v715_v55  ;;  %v1059_v57 = vor.u32 %v1058_v61, %v1054_v62  ;;  %v4955_v62 = vld [vmem:[#allocation29_spill] sm:$0xff]  ;;  %v4956_v55 = vld [vmem:[#allocation30_spill] sm:$0xff] }
  0x8b   :  { %1313 = vmatpush1.bf16.msra.mxu0 %v4086_v60  ;;  %1332 = vmatprep.mubr.bf16.mxu0 %v4864_v59 }
  0x8c   :  { %1288 = vmatpush2.bf16.msra.mxu1 %v4081_v10  ;;  %1314 = vmatprep.subr.bf16.mxu0 %v4098_v63 }
  0x8d   :  { %1289 = vmatprep.subr.bf16.mxu1 %v4093_v51 }
  0x8f   :  { %1315 = vmatpush1.bf16.msra.mxu0 %v4110_v49 }
  0x90   :  { %1290 = vmatpush2.bf16.msra.mxu1 %v4105_v52  ;;  %1362 = vmatprep.subr.bf16.mxu0 %v3201_v0  ;;  %v3142_v0 = vld [vmem:[%s4738_s1 + $0x20] ss:$0 sps:$4 sm:$0xff]  }
  0x91   :  { %1415 = vmatprep.subr.bf16.mxu1 %v3207_v2  ;;  %v4138_v2 = vld [vmem:[%s4739_s0 + $0x18] sm:$0xff] }
  0x92   :  { %2735 = vmatmul.mubr.msk.bf16.vlgmr.msra.gmra.mxu0 %vm294_vm0, %v1073_v48  ;;  %v4958_v48 = vld [vmem:[#allocation32_spill] sm:$0xff] }
  0x93   :  { %1292 = vmatmul.mubr.bf16.vlgmr.msra.gmra.mxu1 %v1059_v57  ;;  %1363 = vmatpush1.bf16.msra.mxu0 %v3213_v3  ;;  %v2745_v3 = vcombine.high %v4138_v2, %v4138_v2  ;;  %v4957_v57 = vld [vmem:[#allocation31_spill] sm:$0xff] }
  0x94   :  { %1416 = vmatpush1.bf16.msra.mxu1 %v3218_v4  ;;  %1364 = vmatprep.subr.bf16.mxu0 %v3224_v5  ;;  %v4928_v4 = vld [vmem:[#allocation2_spill] sm:$0xff]  ;;  %v4929_v5 = vld [vmem:[#allocation3_spill] sm:$0xff] }
  0x95   :  { %1417 = vmatprep.subr.bf16.mxu1 %v3231_v6  ;;  %1435 = vmatprep.mubr.bf16.mxu1 %v4864_v59  ;;  %v4930_v6 = vld [vmem:[#allocation4_spill] sm:$0xff] }
  0x96   :  { %1394 = vmatprep.mubr.bf16.mxu0 %v2741_v58 }
  0x97   :  { %1365 = vmatpush1.bf16.msra.mxu0 %v3236_v7  ;;  %v4931_v7 = vld [vmem:[#allocation6_spill] sm:$0xff] }
  0x98   :  { %1418 = vmatpush1.bf16.msra.mxu1 %v3242_v8  ;;  %1366 = vmatprep.subr.bf16.mxu0 %v3248_v9  ;;  %v4932_v8 = vld [vmem:[#allocation5_spill] sm:$0xff]  ;;  %v4933_v9 = vld [vmem:[#allocation7_spill] sm:$0xff] }
  0x99   :  { %1457 = vmatprep.subr.bf16.mxu1 %v3263_v12  ;;  %v4935_v12 = vld [vmem:[#allocation10_spill] sm:$0xff] }
  0x9b   :  { %2743 = vmatmul.mubr.msk.bf16.vlgmr.msra.gmra.mxu1 %vm294_vm0, %v3142_v0  ;;  %1367 = vmatpush1.bf16.msra.mxu0 %v3268_v13  ;;  %v4936_v13 = vld [vmem:[#allocation9_spill] sm:$0xff] }
  0x9c   :  { %1458 = vmatpush1.bf16.msra.mxu1 %v3256_v11  ;;  %1368 = vmatprep.subr.bf16.mxu0 %v3274_v14  ;;  %v4934_v11 = vld [vmem:[#allocation8_spill] sm:$0xff]  ;;  %v4937_v14 = vld [vmem:[#allocation11_spill] sm:$0xff] }
  0x9d   :  { %1459 = vmatprep.subr.bf16.mxu1 %v3280_v15  ;;  %1489 = vmatprep.mubr.bf16.mxu1 %v2745_v3  ;;  %v4938_v15 = vld [vmem:[#allocation12_spill] sm:$0xff] }
  0x9f   :  { %1369 = vmatpush1.bf16.msra.mxu0 %v3293_v17  ;;  %v4200_v17 = vld [vmem:[%s4739_s0 + $0x24] sm:$0x11] }
  0xa0   :  { %1460 = vmatpush1.bf16.msra.mxu1 %v3286_v16  ;;  %1370 = vmatprep.subr.bf16.mxu0 %v3300_v18  ;;  %v4939_v18 = vld [vmem:[#allocation14_spill] sm:$0xff] }
  0xa1   :  { %1461 = vmatprep.subr.bf16.mxu1 %v3305_v19  ;;  %v4940_v19 = vld [vmem:[#allocation13_spill] sm:$0xff] }
  0xa3   :  { %1371 = vmatpush1.bf16.msra.mxu0 %v3317_v21  ;;  %v4941_v21 = vld [vmem:[#allocation15_spill] sm:$0xff] }
  0xa4   :  { %1462 = vmatpush1.bf16.msra.mxu1 %v3310_v20  ;;  %1372 = vmatprep.subr.bf16.mxu0 %v3322_v22  ;;  %v4942_v22 = vld [vmem:[#allocation16_spill] sm:$0xff] }
  0xa5   :  { %1463 = vmatprep.subr.bf16.mxu1 %v3329_v23  ;;  %v2753_v23 = vcombine.high %v4138_v2, %v4200_v17 }
  0xa7   :  { %1373 = vmatpush1.bf16.msra.mxu0 %v3341_v25  ;;  %v2740_v25 = vcombine.low %v4118_v53, %v4118_v53 }
  0xa8   :  { %1464 = vmatpush1.bf16.msra.mxu1 %v3334_v24  ;;  %1374 = vmatprep.subr.bf16.mxu0 %v3348_v26  ;;  %v4943_v26 = vld [vmem:[#allocation18_spill] sm:$0xff] }
  0xa9   :  { %1465 = vmatprep.subr.bf16.mxu1 %v3353_v27  ;;  %v4944_v27 = vld [vmem:[#allocation17_spill] sm:$0xff] }
  0xab   :  { %1375 = vmatpush1.bf16.msra.mxu0 %v3365_v29  ;;  %v4945_v29 = vld [vmem:[#allocation19_spill] sm:$0xff] }
  0xac   :  { %1466 = vmatpush1.bf16.msra.mxu1 %v3358_v28  ;;  %1376 = vmatprep.subr.bf16.mxu0 %v3370_v30  ;;  %v4946_v30 = vld [vmem:[#allocation20_spill] sm:$0xff] }
  0xad   :  { %1467 = vmatprep.subr.bf16.mxu1 %v3377_v31  ;;  %v1566_v31 = vshll.u32 %v2753_v23, 16 }
  0xaf   :  { %1377 = vmatpush1.bf16.msra.mxu0 %v3389_v33  ;;  %v4222_v33 = vld [vmem:[%s4738_s1 + $0x24] sm:$0x11] }
  0xb0   :  { %1468 = vmatpush1.bf16.msra.mxu1 %v3382_v32  ;;  %1378 = vmatprep.subr.bf16.mxu0 %v3396_v34  ;;  %v3148_v32 = vld [vmem:[%s4739_s0 + $0x20] ss:$12 sps:$4 sm:$0x1f]   ;;  %v4947_v34 = vld [vmem:[#allocation21_spill] sm:$0xff] }
  0xb1   :  { %1469 = vmatprep.subr.bf16.mxu1 %v3401_v35  ;;  %v4948_v35 = vld [vmem:[#allocation22_spill] sm:$0xff]  ;;  %v1571_v56 = vshrl.u32 %v3148_v32, 16 }
  0xb3   :  { %1379 = vmatpush2.bf16.msra.mxu0 %v3413_v37  ;;  %v4950_v37 = vld [vmem:[#allocation24_spill] sm:$0xff] }
  0xb4   :  { %1470 = vmatpush1.bf16.msra.mxu1 %v3406_v36  ;;  %1380 = vmatprep.subr.bf16.mxu0 %v3418_v38  ;;  %v4949_v36 = vld [vmem:[#allocation23_spill] sm:$0xff]  ;;  %v1564_v38 = vshrl.u32 %v2753_v23, 16 }
  0xb5   :  { %1471 = vmatprep.subr.bf16.mxu1 %v3425_v39  ;;  %v1568_v39 = vrot.slane %v1566_v31, 1  ;;  %v4973_v23 = vld [vmem:[#allocation47_spill] sm:$0xff] }
  0xb6   :  { %v4981_v31 = vld [vmem:[#allocation55_spill] sm:$0xff] }
  0xb7   :  { %1381 = vmatpush2.bf16.msra.mxu0 %v3437_v41  ;;  %v2744_v41 = vcombine.low %v4138_v2, %v4138_v2 }
  0xb8   :  { %1472 = vmatpush1.bf16.msra.mxu1 %v3430_v40  ;;  %1382 = vmatprep.subr.bf16.mxu0 %v3444_v42  ;;  %v2761_v40 = vcombine.high %v4118_v53, %v4222_v33  ;;  %v3147_v42 = vld [vmem:[%s4739_s0 + $0x20] ss:$0 sps:$4 sm:$0xff]  }
  0xb9   :  { %1473 = vmatprep.subr.bf16.mxu1 %v3449_v43  ;;  %v1573_v43 = vshll.u32 %v3148_v32, 16  ;;  %v4982_v32 = vld [vmem:[#allocation56_spill] sm:$0xff] }
  0xba   :  { %v1693_v1 = vshll.u32 %v2761_v40, 16  ;;  %v1691_v58 = vshrl.u32 %v2761_v40, 16  ;;  %v4989_v40 = vld [vmem:[#allocation63_spill] sm:$0xff] }
  0xbb   :  { %1383 = vmatpush2.bf16.msra.mxu0 %v3461_v45  ;;  %v4952_v45 = vld [vmem:[#allocation26_spill] sm:$0xff]  ;;  %v1575_v61 = vrot.slane %v1573_v43, 1 }
  0xbc   :  { %1474 = vmatpush2.bf16.msra.mxu1 %v3454_v44  ;;  %1384 = vmatprep.subr.bf16.mxu0 %v3466_v46  ;;  %v4951_v44 = vld [vmem:[#allocation25_spill] sm:$0xff]  ;;  %v4953_v46 = vld [vmem:[#allocation27_spill] sm:$0xff]  ;;  %v1695_v0 = vrot.slane %v1693_v1, 1  ;;  %v4992_v43 = vld [vmem:[#allocation66_spill] sm:$0xff] }
  0xbd   :  { %1475 = vmatprep.subr.bf16.mxu1 %v3473_v47  ;;  %v4954_v47 = vld [vmem:[#allocation28_spill] sm:$0xff]  ;;  %v1576_v3 = vor.u32 %v1575_v61, %v1571_v56  ;;  %v4996_v1 = vld [vmem:[#allocation70_spill] sm:$0xff]  ;;  %v4997_v56 = vld [vmem:[#allocation71_spill] sm:$0xff] }
  0xbf   :  { %1385 = vmatpush2.bf16.msra.mxu0 %v3490_v50  ;;  %v1569_v50 = vor.u32 %v1568_v39, %v1564_v38  ;;  %v4987_v38 = vld [vmem:[#allocation61_spill] sm:$0xff]  ;;  %v4988_v39 = vld [vmem:[#allocation62_spill] sm:$0xff] }
  0xc0   :  { %1476 = vmatpush2.bf16.msra.mxu1 %v4928_v4  ;;  %1386 = vmatprep.subr.bf16.mxu0 %v4929_v5  ;;  %v4959_v4 = vld [vmem:[#allocation33_spill] sm:$0xff]  ;;  %v4960_v5 = vld [vmem:[#allocation34_spill] sm:$0xff] }
  0xc1   :  { %1477 = vmatprep.subr.bf16.mxu1 %v4930_v6  ;;  %v4961_v6 = vld [vmem:[#allocation35_spill] sm:$0xff] }
  0xc3   :  { %1387 = vmatpush2.bf16.msra.mxu0 %v4931_v7  ;;  %v4962_v7 = vld [vmem:[#allocation36_spill] sm:$0xff] }
  0xc4   :  { %1478 = vmatpush2.bf16.msra.mxu1 %v4932_v8  ;;  %1388 = vmatprep.subr.bf16.mxu0 %v4933_v9  ;;  %v1696_v8 = vor.u32 %v1695_v0, %v1691_v58  ;;  %v4963_v9 = vld [vmem:[#allocation37_spill] sm:$0xff]  ;;  %v5000_v58 = vld [vmem:[#allocation74_spill] sm:$0xff] }
  0xc5   :  { %1479 = vmatprep.subr.bf16.mxu1 %v4934_v11  ;;  %v4964_v11 = vld [vmem:[#allocation38_spill] sm:$0xff] }
  0xc7   :  { %1389 = vmatpush2.bf16.msra.mxu0 %v4935_v12  ;;  %v4965_v12 = vld [vmem:[#allocation39_spill] sm:$0xff] }
  0xc8   :  { %1480 = vmatpush2.bf16.msra.mxu1 %v4936_v13  ;;  %1390 = vmatprep.subr.bf16.mxu0 %v4937_v14  ;;  %v4966_v13 = vld [vmem:[#allocation40_spill] sm:$0xff]  ;;  %v4967_v14 = vld [vmem:[#allocation41_spill] sm:$0xff] }
  0xc9   :  { %1481 = vmatprep.subr.bf16.mxu1 %v4938_v15  ;;  %v4968_v15 = vld [vmem:[#allocation42_spill] sm:$0xff] }
  0xcb   :  { %v4195_v16 = vpop.f32.mrf.mxu1  ;;  %1391 = vmatpush2.bf16.msra.mxu0 %v4939_v18  ;;  %v4969_v18 = vld [vmem:[#allocation43_spill] sm:$0xff] }
  0xcc   :  { %1482 = vmatpush2.bf16.msra.mxu1 %v4940_v19  ;;  %1392 = vmatprep.subr.bf16.mxu0 %v4941_v21  ;;  %v4970_v19 = vld [vmem:[#allocation44_spill] sm:$0xff]  ;;  %v4971_v21 = vld [vmem:[#allocation45_spill] sm:$0xff] }
  0xcd   :  { %v4204_v20 = vpop.f32.mrf.mxu1  ;;  %1483 = vmatprep.subr.bf16.mxu1 %v4942_v22  ;;  %v4972_v22 = vld [vmem:[#allocation46_spill] sm:$0xff] }
  0xcf   :  { %v377_v24 = vpop.f32.mrf.mxu1  ;;  %1393 = vmatpush2.bf16.msra.mxu0 %v4943_v26  ;;  %v4976_v26 = vld [vmem:[#allocation50_spill] sm:$0xff] }
  0xd0   :  { %1484 = vmatpush2.bf16.msra.mxu1 %v4944_v27  ;;  %1510 = vmatprep.subr.bf16.mxu0 %v4946_v30  ;;  %v4974_v24 = vld [vmem:[#allocation48_spill] sm:$0xff]  ;;  %v4977_v27 = vld [vmem:[#allocation51_spill] sm:$0xff]  ;;  %v4980_v30 = vld [vmem:[#allocation54_spill] sm:$0xff] }
  0xd1   :  { %v378_v28 = vpop.f32.mrf.mxu1  ;;  %1485 = vmatprep.subr.bf16.mxu1 %v4945_v29  ;;  %v4979_v29 = vld [vmem:[#allocation53_spill] sm:$0xff] }
  0xd2   :  { %1395 = vmatmul.mubr.bf16.vlgmr.msra.gmra.mxu0 %v2740_v25  ;;  %v4975_v25 = vld [vmem:[#allocation49_spill] sm:$0xff]  ;;  %v4978_v28 = vld [vmem:[#allocation52_spill] sm:$0xff] }
  0xd3   :  { %1511 = vmatpush1.bf16.msra.mxu0 %v4948_v35  ;;  %1530 = vmatprep.mubr.bf16.mxu0 %v4864_v59  ;;  %v4984_v35 = vld [vmem:[#allocation58_spill] sm:$0xff] }
  0xd4   :  { %1486 = vmatpush2.bf16.msra.mxu1 %v4947_v34  ;;  %1512 = vmatprep.subr.bf16.mxu0 %v4950_v37  ;;  %v4983_v34 = vld [vmem:[#allocation57_spill] sm:$0xff]  ;;  %v4986_v37 = vld [vmem:[#allocation60_spill] sm:$0xff] }
  0xd5   :  { %1487 = vmatprep.subr.bf16.mxu1 %v4949_v36  ;;  %v4985_v36 = vld [vmem:[#allocation59_spill] sm:$0xff] }
  0xd7   :  { %1513 = vmatpush1.bf16.msra.mxu0 %v4952_v45 }
  0xd8   :  { %1488 = vmatpush2.bf16.msra.mxu1 %v4951_v44  ;;  %1582 = vmatprep.subr.bf16.mxu0 %v4953_v46  ;;  %v4993_v44 = vld [vmem:[#allocation67_spill] sm:$0xff]  ;;  %v4994_v46 = vld [vmem:[#allocation68_spill] sm:$0xff] }
  0xd9   :  { %1635 = vmatprep.subr.bf16.mxu1 %v4954_v47  ;;  %v4995_v47 = vld [vmem:[#allocation69_spill] sm:$0xff] }
  0xda   :  { %2747 = vmatmul.mubr.msk.bf16.vlgmr.msra.gmra.mxu0 %vm294_vm0, %v3147_v42  ;;  %v4991_v42 = vld [vmem:[#allocation65_spill] sm:$0xff] }
  0xdb   :  { %1490 = vmatmul.mubr.bf16.vlgmr.msra.gmra.mxu1 %v2744_v41  ;;  %1583 = vmatpush1.bf16.msra.mxu0 %v4955_v62  ;;  %v4990_v41 = vld [vmem:[#allocation64_spill] sm:$0xff] }
  0xdc   :  { %1636 = vmatpush1.bf16.msra.mxu1 %v4956_v55  ;;  %1584 = vmatprep.subr.bf16.mxu0 %v4957_v57  ;;  %v4998_v55 = vld [vmem:[#allocation72_spill] sm:$0xff]  ;;  %v4999_v57 = vld [vmem:[#allocation73_spill] sm:$0xff] }
  0xdd   :  { %1637 = vmatprep.subr.bf16.mxu1 %v4958_v48  ;;  %1655 = vmatprep.mubr.bf16.mxu1 %v4864_v59 }
  0xde   :  { %1614 = vmatprep.mubr.bf16.mxu0 %v1569_v50 }
  0xdf   :  { %1585 = vmatpush1.bf16.msra.mxu0 %v4959_v4  ;;  %v2752_v4 = vcombine.low %v4138_v2, %v4200_v17  ;;  %v5006_v2 = vld [vmem:[#allocation80_spill] sm:$0xff]  ;;  %v5007_v17 = vld [vmem:[#allocation81_spill] sm:$0xff] }
  0xe0   :  { %1638 = vmatpush1.bf16.msra.mxu1 %v4960_v5  ;;  %1586 = vmatprep.subr.bf16.mxu0 %v4961_v6  ;;  %v5002_v6 = vld [vmem:[#allocation76_spill] sm:$0xff] }
  0xe1   :  { %1709 = vmatprep.subr.bf16.mxu1 %v4962_v7  ;;  %v5003_v7 = vld [vmem:[#allocation77_spill] sm:$0xff] }
  0xe3   :  { %2755 = vmatmul.mubr.msk.bf16.vlgmr.msra.gmra.mxu1 %vm294_vm0, %v1576_v3  ;;  %1587 = vmatpush1.bf16.msra.mxu0 %v4963_v9  ;;  %v5004_v9 = vld [vmem:[#allocation78_spill] sm:$0xff] }
  0xe4   :  { %1710 = vmatpush1.bf16.msra.mxu1 %v4964_v11  ;;  %1588 = vmatprep.subr.bf16.mxu0 %v4965_v12  ;;  %v5005_v11 = vld [vmem:[#allocation79_spill] sm:$0xff] }
  0xe5   :  { %1711 = vmatprep.subr.bf16.mxu1 %v4966_v13  ;;  %1741 = vmatprep.mubr.bf16.mxu1 %v1696_v8 }
  0xe7   :  { %1589 = vmatpush1.bf16.msra.mxu0 %v4967_v14 }
  0xe8   :  { %1712 = vmatpush1.bf16.msra.mxu1 %v4968_v15  ;;  %1590 = vmatprep.subr.bf16.mxu0 %v4969_v18  ;;  %v1559_v18 = vshll.u32 %v2752_v4, 16 }
  0xe9   :  { %1713 = vmatprep.subr.bf16.mxu1 %v4970_v19 }
  0xeb   :  { %1591 = vmatpush1.bf16.msra.mxu0 %v4971_v21 }
  0xec   :  { %1714 = vmatpush1.bf16.msra.mxu1 %v4972_v22  ;;  %1592 = vmatprep.subr.bf16.mxu0 %v4973_v23  ;;  %v5008_v23 = vld [vmem:[#allocation82_spill] sm:$0xff] }
  0xed   :  { %1715 = vmatprep.subr.bf16.mxu1 %v4974_v24  ;;  %v5009_v24 = vld [vmem:[#allocation83_spill] sm:$0xff] }
  0xef   :  { %1593 = vmatpush1.bf16.msra.mxu0 %v4975_v25 }
  0xf0   :  { %1716 = vmatpush1.bf16.msra.mxu1 %v4976_v26  ;;  %1594 = vmatprep.subr.bf16.mxu0 %v4977_v27  ;;  %v1557_v26 = vshrl.u32 %v2752_v4, 16  ;;  %v1561_v27 = vrot.slane %v1559_v18, 1  ;;  %v4463_v4 = vld [vmem:[%s4740_s3 + $0x30] sm:$0xff]  ;;  %v4540_v18 = vld [vmem:[%s4740_s3 + $0x80] sm:$0xff] }
  0xf1   :  { %1717 = vmatprep.subr.bf16.mxu1 %v4978_v28  ;;  %v2760_v28 = vcombine.low %v4118_v53, %v4222_v33  ;;  %v5015_v53 = vld [vmem:[#allocation89_spill] sm:$0xff] }
  0xf3   :  { %1595 = vmatpush1.bf16.msra.mxu0 %v4979_v29  ;;  %v3153_v29 = vld [vmem:[%s4738_s1 + $0x20] ss:$12 sps:$4 sm:$0x1f]  }
  0xf4   :  { %1718 = vmatpush1.bf16.msra.mxu1 %v4980_v30  ;;  %1596 = vmatprep.subr.bf16.mxu0 %v4981_v31  ;;  %v5010_v30 = vld [vmem:[#allocation84_spill] sm:$0xff]  ;;  %v5011_v31 = vld [vmem:[#allocation85_spill] sm:$0xff] }
  0xf5   :  { %1719 = vmatprep.subr.bf16.mxu1 %v4982_v32 }
  0xf7   :  { %1597 = vmatpush1.bf16.msra.mxu0 %v4983_v34  ;;  %v5012_v34 = vld [vmem:[#allocation86_spill] sm:$0xff] }
  0xf8   :  { %1720 = vmatpush1.bf16.msra.mxu1 %v4984_v35  ;;  %1598 = vmatprep.subr.bf16.mxu0 %v3868_v54  ;;  %v5013_v35 = vld [vmem:[#allocation87_spill] sm:$0xff] }
  0xf9   :  { %1721 = vmatprep.subr.bf16.mxu1 %v4985_v36 }
  0xfb   :  { %1599 = vmatpush2.bf16.msra.mxu0 %v4986_v37  ;;  %v1562_v37 = vor.u32 %v1561_v27, %v1557_v26 }
  0xfc   :  { %1722 = vmatpush1.bf16.msra.mxu1 %v4987_v38  ;;  %1600 = vmatprep.subr.bf16.mxu0 %v4988_v39  ;;  %v1686_v38 = vshll.u32 %v2760_v28, 16  ;;  %v1700_v39 = vshll.u32 %v3153_v29, 16 }
  0xfd   :  { %1723 = vmatprep.subr.bf16.mxu1 %v4989_v40  ;;  %v5014_v40 = vld [vmem:[#allocation88_spill] sm:$0xff] }
  0xff   :  { %1601 = vmatpush2.bf16.msra.mxu0 %v4990_v41  ;;  %v5016_v41 = vld [vmem:[#allocation90_spill] sm:$0xff] }
 0x100   :  { %1724 = vmatpush1.bf16.msra.mxu1 %v4991_v42  ;;  %1602 = vmatprep.subr.bf16.mxu0 %v4992_v43  ;;  %v5017_v42 = vld [vmem:[#allocation91_spill] sm:$0xff]  ;;  %v1684_v43 = vshrl.u32 %v2760_v28, 16 }
 0x101   :  { %1725 = vmatprep.subr.bf16.mxu1 %v4993_v44  ;;  %v1688_v44 = vrot.slane %v1686_v38, 1 }
 0x102   :  { %v332_v45 = vpop.f32.mrf.mxu0 }
 0x103   :  { %v374_v54 = vadd.f32 %v4195_v16, %v332_v45  ;;  %1603 = vmatpush2.bf16.msra.mxu0 %v4994_v46  ;;  %v5001_v16 = vld [vmem:[#allocation75_spill] sm:$0xff]  ;;  %v1698_v45 = vshrl.u32 %v3153_v29, 16  ;;  %v4332_v46 = vld [vmem:[%s4740_s3 + $0xf8] sm:$0xff] }
 0x104   :  { %1726 = vmatpush2.bf16.msra.mxu1 %v4995_v47  ;;  %v334_v50 = vpop.f32.mrf.mxu0  ;;  %1604 = vmatprep.subr.bf16.mxu0 %v4996_v1  ;;  %v1689_v47 = vor.u32 %v1688_v44, %v1684_v43  ;;  %v4386_v1 = vld [vmem:[%s4740_s3 + $0xd8] sm:$0xff] }
 0x105   :  { %1727 = vmatprep.subr.bf16.mxu1 %v4997_v56  ;;  %v376_v61 = vadd.f32 %v4204_v20, %v334_v50  ;;  %v4393_v56 = vld [vmem:[%s4740_s3 + $0x58] sm:$0xff] }
 0x106   :  { %v336_v62 = vpop.f32.mrf.mxu0 }
 0x107   :  { %1605 = vmatpush2.bf16.msra.mxu0 %v4998_v55  ;;  %v4407_v62 = vld [vmem:[%s4740_s3 + $0x50] sm:$0xff]  ;;  %v4414_v55 = vld [vmem:[%s4740_s3 + $0xc8] sm:$0xff] }
 0x108   :  { %1728 = vmatpush2.bf16.msra.mxu1 %v4999_v57  ;;  %v337_v48 = vpop.f32.mrf.mxu0  ;;  %1606 = vmatprep.subr.bf16.mxu0 %v5000_v58  ;;  %v4421_v57 = vld [vmem:[%s4740_s3 + $0x48] sm:$0xff]  ;;  %v4435_v58 = vld [vmem:[%s4740_s3 + $0x40] sm:$0xff] }
 0x109   :  { %1729 = vmatprep.subr.bf16.mxu1 %v5001_v16  ;;  %v4428_v48 = vld [vmem:[%s4740_s3 + $0xc0] sm:$0xff]  ;;  %v4442_v16 = vld [vmem:[%s4740_s3 + $0xb8] sm:$0xff] }
 0x10a   :  { %v648_v3 = vpop.f32.mrf.mxu0 }
 0x10b   :  { %v607_v0 = vpop.f32.mrf.mxu1  ;;  %1607 = vmatpush2.bf16.msra.mxu0 %v5002_v6  ;;  %v4477_v6 = vld [vmem:[%s4740_s3 + $0x28] sm:$0xff] }
 0x10c   :  { %v608_v5 = vadd.f32 %v607_v0, %v374_v54  ;;  %1730 = vmatpush2.bf16.msra.mxu1 %v5003_v7  ;;  %v650_v8 = vpop.f32.mrf.mxu0  ;;  %1608 = vmatprep.subr.bf16.mxu0 %v5004_v9  ;;  %v1702_v54 = vrot.slane %v1700_v39, 1  ;;  %v4449_v0 = vld [vmem:[%s4740_s3 + $0x38] sm:$0xff]  ;;  %v4484_v7 = vld [vmem:[%s4740_s3 + $0xa0] sm:$0xff] }
 0x10d   :  { %v609_v20 = vpop.f32.mrf.mxu1  ;;  %1731 = vmatprep.subr.bf16.mxu1 %v5005_v11  ;;  %v4505_v9 = vld [vmem:[%s4740_s3 + $0x18] sm:$0xff]  ;;  %v4512_v11 = vld [vmem:[%s4740_s3 + $0x90] sm:$0xff] }
 0x10e   :  { %v4299_v12 = vadd.f32 %v648_v3, %v608_v5  ;;  %v610_v13 = vadd.f32 %v609_v20, %v376_v61  ;;  %v652_v15 = vpop.f32.mrf.mxu0  ;;  %v1703_v50 = vor.u32 %v1702_v54, %v1698_v45  ;;  %v4400_v61 = vld [vmem:[%s4740_s3 + $0xd0] sm:$0xff]  ;;  %v4470_v5 = vld [vmem:[%s4740_s3 + $0xa8] sm:$0xff]  ;;  %v4491_v20 = vld [vmem:[%s4740_s3 + $0x20] sm:$0xff] }
 0x10f   :  { %v611_v14 = vpop.f32.mrf.mxu1  ;;  %1609 = vmatpush2.bf16.msra.mxu0 %v5006_v2  ;;  %v4456_v3 = vld [vmem:[%s4740_s3 + $0xb0] sm:$0xff]  ;;  %v4533_v15 = vld [vmem:[%s4740_s3 + $0x8] sm:$0xff]  ;;  %v4547_v2 = vld [vmem:[%s4740_s3] sm:$0xff] }
 0x110   :  { %v4301_v19 = vadd.f32 %v650_v8, %v610_v13  ;;  %1732 = vmatpush2.bf16.msra.mxu1 %v5007_v17  ;;  %v653_v22 = vpop.f32.mrf.mxu0  ;;  %1610 = vmatprep.subr.bf16.mxu0 %v5008_v23  ;;  %v4498_v8 = vld [vmem:[%s4740_s3 + $0x98] sm:$0xff]  ;;  %v4519_v13 = vld [vmem:[%s4740_s3 + $0x10] sm:$0xff]  ;;  %v4526_v14 = vld [vmem:[%s4740_s3 + $0x88] sm:$0xff] }
 0x111   :  { %v612_v21 = vpop.f32.mrf.mxu1  ;;  %1733 = vmatprep.subr.bf16.mxu1 %v5009_v24 }
 0x113   :  { %v4307_v25 = vpop.f32.mrf.mxu1  ;;  %1611 = vmatpush2.bf16.msra.mxu0 %v5010_v30 }
 0x114   :  { %1734 = vmatpush2.bf16.msra.mxu1 %v5011_v31  ;;  %1612 = vmatprep.subr.bf16.mxu0 %v5012_v34 }
 0x115   :  { %v4316_v32 = vpop.f32.mrf.mxu1  ;;  %1735 = vmatprep.subr.bf16.mxu1 %v5013_v35 }
 0x117   :  { %v994_v36 = vpop.f32.mrf.mxu1  ;;  %1613 = vmatpush2.bf16.msra.mxu0 %v5014_v40 }
 0x118   :  { %1736 = vmatpush2.bf16.msra.mxu1 %v5015_v53  ;;  %1762 = vmatprep.subr.bf16.mxu0 %v5017_v42 }
 0x119   :  { %v995_v33 = vpop.f32.mrf.mxu1  ;;  %1737 = vmatprep.subr.bf16.mxu1 %v5016_v41 }
 0x11a   :  { %1615 = vmatmul.mubr.bf16.vlgmr.msra.gmra.mxu0 %v1562_v37 }
 0x11b   :  { %1763 = vmatpush1.bf16.msra.mxu0 %v4086_v60  ;;  %1782 = vmatprep.mubr.bf16.mxu0 %v4864_v59  ;;  %v4340_v60 = vld [vmem:[%s4740_s3 + $0x78] sm:$0xff]  ;;  %v4346_v59 = vld [vmem:[%s4740_s3 + $0xf0] sm:$0xff] }
 0x11c   :  { %1738 = vmatpush2.bf16.msra.mxu1 %v4081_v10  ;;  %1764 = vmatprep.subr.bf16.mxu0 %v4098_v63  ;;  %v4352_v10 = vld [vmem:[%s4740_s3 + $0x70] sm:$0xff]  ;;  %v4379_v63 = vld [vmem:[%s4740_s3 + $0x60] sm:$0xff] }
 0x11d   :  { %1739 = vmatprep.subr.bf16.mxu1 %v4093_v51  ;;  %v4372_v51 = vld [vmem:[%s4740_s3 + $0xe0] sm:$0xff] }
 0x11f   :  { %1765 = vmatpush1.bf16.msra.mxu0 %v4110_v49  ;;  %v4358_v49 = vld [vmem:[%s4740_s3 + $0xe8] sm:$0xff] }
 0x120   :  { %1740 = vmatpush2.bf16.msra.mxu1 %v4105_v52  ;;  %2772 = vmatprep.subr.mxu0 %v4332_v46  ;;  %v4365_v52 = vld [vmem:[%s4740_s3 + $0x68] sm:$0xff] }
 0x121   :  { %2807 = vmatprep.subr.mxu1 %v4332_v46 }
 0x122   :  { %2763 = vmatmul.mubr.msk.bf16.vlgmr.msra.gmra.mxu0 %vm294_vm0, %v1703_v50 }
 0x123   :  { %1742 = vmatmul.mubr.bf16.vlgmr.msra.gmra.mxu1 %v1689_v47  ;;  %2773 = vmatpush3.msra.mxu0 %v4340_v60 }
 0x124   :  { %2808 = vmatpush3.msra.mxu1 %v4340_v60  ;;  %2774 = vmatprep.subr.mxu0 %v4346_v59 }
 0x125   :  { %2809 = vmatprep.subr.mxu1 %v4346_v59  ;;  %2775 = vmatpush3.msra.mxu0 %v4352_v10 }
 0x126   :  { %2810 = vmatpush3.msra.mxu1 %v4352_v10  ;;  %2776 = vmatprep.subr.mxu0 %v4358_v49 }
 0x127   :  { %2811 = vmatprep.subr.mxu1 %v4358_v49  ;;  %2777 = vmatpush3.msra.mxu0 %v4365_v52 }
 0x128   :  { %2812 = vmatpush3.msra.mxu1 %v4365_v52  ;;  %2778 = vmatprep.subr.mxu0 %v4372_v51 }
 0x129   :  { %2813 = vmatprep.subr.mxu1 %v4372_v51  ;;  %2779 = vmatpush3.msra.mxu0 %v4379_v63 }
 0x12a   :  { %2814 = vmatpush3.msra.mxu1 %v4379_v63  ;;  %2780 = vmatprep.subr.mxu0 %v4386_v1 }
 0x12b   :  { %2815 = vmatprep.subr.mxu1 %v4386_v1  ;;  %2781 = vmatpush3.msra.mxu0 %v4393_v56 }
 0x12c   :  { %2816 = vmatpush3.msra.mxu1 %v4393_v56  ;;  %2782 = vmatprep.subr.mxu0 %v4400_v61 }
 0x12d   :  { %2817 = vmatprep.subr.mxu1 %v4400_v61  ;;  %2783 = vmatpush3.msra.mxu0 %v4407_v62 }
 0x12e   :  { %2818 = vmatpush3.msra.mxu1 %v4407_v62  ;;  %2784 = vmatprep.subr.mxu0 %v4414_v55 }
 0x12f   :  { %2819 = vmatprep.subr.mxu1 %v4414_v55  ;;  %2785 = vmatpush3.msra.mxu0 %v4421_v57 }
 0x130   :  { %2820 = vmatpush3.msra.mxu1 %v4421_v57  ;;  %2786 = vmatprep.subr.mxu0 %v4428_v48 }
 0x131   :  { %2821 = vmatprep.subr.mxu1 %v4428_v48  ;;  %2787 = vmatpush3.msra.mxu0 %v4435_v58 }
 0x132   :  { %2822 = vmatpush3.msra.mxu1 %v4435_v58  ;;  %2788 = vmatprep.subr.mxu0 %v4442_v16 }
 0x133   :  { %2823 = vmatprep.subr.mxu1 %v4442_v16  ;;  %2789 = vmatpush3.msra.mxu0 %v4449_v0 }
 0x134   :  { %2824 = vmatpush3.msra.mxu1 %v4449_v0  ;;  %2790 = vmatprep.subr.mxu0 %v4456_v3 }
 0x135   :  { %2825 = vmatprep.subr.mxu1 %v4456_v3  ;;  %2791 = vmatpush3.msra.mxu0 %v4463_v4 }
 0x136   :  { %2826 = vmatpush3.msra.mxu1 %v4463_v4  ;;  %2792 = vmatprep.subr.mxu0 %v4470_v5 }
 0x137   :  { %2827 = vmatprep.subr.mxu1 %v4470_v5  ;;  %2793 = vmatpush3.msra.mxu0 %v4477_v6 }
 0x138   :  { %2828 = vmatpush3.msra.mxu1 %v4477_v6  ;;  %2794 = vmatprep.subr.mxu0 %v4484_v7 }
 0x139   :  { %2829 = vmatprep.subr.mxu1 %v4484_v7  ;;  %2795 = vmatpush3.msra.mxu0 %v4491_v20 }
 0x13a   :  { %2830 = vmatpush3.msra.mxu1 %v4491_v20  ;;  %2796 = vmatprep.subr.mxu0 %v4498_v8 }
 0x13b   :  { %2831 = vmatprep.subr.mxu1 %v4498_v8  ;;  %2797 = vmatpush3.msra.mxu0 %v4505_v9 }
 0x13c   :  { %2832 = vmatpush3.msra.mxu1 %v4505_v9  ;;  %2798 = vmatprep.subr.mxu0 %v4512_v11 }
 0x13d   :  { %2833 = vmatprep.subr.mxu1 %v4512_v11  ;;  %2799 = vmatpush3.msra.mxu0 %v4519_v13 }
 0x13e   :  { %2834 = vmatpush3.msra.mxu1 %v4519_v13  ;;  %2800 = vmatprep.subr.mxu0 %v4526_v14 }
 0x13f   :  { %2835 = vmatprep.subr.mxu1 %v4526_v14  ;;  %2801 = vmatpush3.msra.mxu0 %v4533_v15 }
 0x140   :  { %2836 = vmatpush3.msra.mxu1 %v4533_v15  ;;  %2802 = vmatprep.subr.mxu0 %v4540_v18 }
 0x141   :  { %2837 = vmatprep.subr.mxu1 %v4540_v18  ;;  %2803 = vmatpush3.msra.mxu0 %v4547_v2 }
 0x142   :  { %2838 = vmatpush3.msra.mxu1 %v4547_v2 }
 0x143   :  { %2842 = vmatprep.subr.mxu1 %v4332_v46 }
 0x14a   :  { %v949_v17 = vpop.f32.mrf.mxu0 }
 0x14b   :  { %v991_v21 = vadd.f32 %v4307_v25, %v949_v17 }
 0x14c   :  { %v951_v22 = vpop.f32.mrf.mxu0 }
 0x14d   :  { %v997_v23 = vadd.f32 %v991_v21, %v4299_v12  ;;  %v993_v27 = vadd.f32 %v4316_v32, %v951_v22 }
 0x14e   :  { %v953_v24 = vpop.f32.mrf.mxu0 }
 0x14f   :  { %v998_v35 = vadd.f32 %v993_v27, %v4301_v19 }
 0x150   :  { %v954_v26 = vpop.f32.mrf.mxu0 }
 0x152   :  { %v1334_v29 = vpop.f32.mrf.mxu0 }
 0x153   :  { %v1293_v28 = vpop.f32.mrf.mxu1 }
 0x154   :  { %v1335_v30 = vadd.f32 %v1334_v29, %v1293_v28  ;;  %v1336_v34 = vpop.f32.mrf.mxu0 }
 0x155   :  { %v1295_v31 = vpop.f32.mrf.mxu1 }
 0x156   :  { %v4561_v36 = vadd.f32 %v1335_v30, %v997_v23  ;;  %v1337_v37 = vadd.f32 %v1336_v34, %v1295_v31  ;;  %v1338_v39 = vpop.f32.mrf.mxu0 }
 0x157   :  { %v1297_v38 = vpop.f32.mrf.mxu1 }
 0x158   :  { %v1793_v25 = vrot.slane %v4561_v36, 4  ;;  %v4564_v40 = vadd.f32 %v1337_v37, %v998_v35  ;;  %v1339_v53 = vpop.f32.mrf.mxu0 }
 0x159   :  { %v1298_v12 = vpop.f32.mrf.mxu1 }
 0x15a   :  { %v1794_v32 = vadd.f32 %v1793_v25, %v4561_v36  ;;  %v1799_v33 = vrot.slane %v4564_v40, 4 }
 0x15b   :  { %v1437_v41 = vpop.f32.mrf.mxu1 }
 0x15c   :  { %v1800_v42 = vadd.f32 %v1799_v33, %v4564_v40  ;;  %v1795_v43 = vrot.slane %v1794_v32, 2 }
 0x15d   :  { %v1439_v19 = vpop.f32.mrf.mxu1 }
 0x15e   :  { %v1801_v44 = vrot.slane %v1800_v42, 2  ;;  %v1796_v45 = vadd.f32 %v1795_v43, %v1794_v32 }
 0x15f   :  { %v1441_v54 = vpop.f32.mrf.mxu1 }
 0x160   :  { %v1802_v47 = vadd.f32 %v1801_v44, %v1800_v42  ;;  %v1797_v17 = vrot.slane %v1796_v45, 1 }
 0x161   :  { %v1442_v50 = vpop.f32.mrf.mxu1 }
 0x162   :  { %v1803_v21 = vrot.slane %v1802_v47, 1  ;;  %v1798_v23 = vadd.f32 %v1797_v17, %v1796_v45 }
 0x164   :  { %v1804_v22 = vadd.f32 %v1803_v21, %v1802_v47 }
 0x166   :  { %1983 = vmatprep.mubr.f32.mxu1 %v1804_v22 }
 0x167   :  { %1984 = vmatmul.mubr.f32.vlgmr.msra.gmra.mxu1 %v1798_v23 }
 0x168   :  { %2843 = vmatpush3.msra.mxu1 %v4340_v60 }
 0x169   :  { %2844 = vmatprep.subr.mxu1 %v4346_v59 }
 0x16a   :  { %2845 = vmatpush3.msra.mxu1 %v4352_v10 }
 0x16b   :  { %2846 = vmatprep.subr.mxu1 %v4358_v49 }
 0x16c   :  { %2847 = vmatpush3.msra.mxu1 %v4365_v52 }
 0x16d   :  { %2848 = vmatprep.subr.mxu1 %v4372_v51 }
 0x16e   :  { %2849 = vmatpush3.msra.mxu1 %v4379_v63 }
 0x16f   :  { %2850 = vmatprep.subr.mxu1 %v4386_v1 }
 0x170   :  { %2851 = vmatpush3.msra.mxu1 %v4393_v56 }
 0x171   :  { %2852 = vmatprep.subr.mxu1 %v4400_v61 }
 0x172   :  { %2853 = vmatpush3.msra.mxu1 %v4407_v62 }
 0x173   :  { %2854 = vmatprep.subr.mxu1 %v4414_v55 }
 0x174   :  { %2855 = vmatpush3.msra.mxu1 %v4421_v57 }
 0x175   :  { %2856 = vmatprep.subr.mxu1 %v4428_v48 }
 0x176   :  { %2857 = vmatpush3.msra.mxu1 %v4435_v58 }
 0x177   :  { %2858 = vmatprep.subr.mxu1 %v4442_v16 }
 0x178   :  { %2859 = vmatpush3.msra.mxu1 %v4449_v0 }
 0x179   :  { %2860 = vmatprep.subr.mxu1 %v4456_v3 }
 0x17a   :  { %2861 = vmatpush3.msra.mxu1 %v4463_v4 }
 0x17b   :  { %2862 = vmatprep.subr.mxu1 %v4470_v5 }
 0x17c   :  { %2863 = vmatpush3.msra.mxu1 %v4477_v6 }
 0x17d   :  { %2864 = vmatprep.subr.mxu1 %v4484_v7 }
 0x17e   :  { %2865 = vmatpush3.msra.mxu1 %v4491_v20 }
 0x17f   :  { %2866 = vmatprep.subr.mxu1 %v4498_v8 }
 0x180   :  { %2867 = vmatpush3.msra.mxu1 %v4505_v9 }
 0x181   :  { %2868 = vmatprep.subr.mxu1 %v4512_v11 }
 0x182   :  { %2869 = vmatpush3.msra.mxu1 %v4519_v13 }
 0x183   :  { %2870 = vmatprep.subr.mxu1 %v4526_v14 }
 0x184   :  { %2871 = vmatpush3.msra.mxu1 %v4533_v15 }
 0x185   :  { %2872 = vmatprep.subr.mxu1 %v4540_v18 }
 0x186   :  { %2873 = vmatpush3.msra.mxu1 %v4547_v2 }
 0x192   :  { %v1396_v24 = vpop.f32.mrf.mxu0 }
 0x193   :  { %v1438_v26 = vadd.f32 %v1437_v41, %v1396_v24 }
 0x194   :  { %v1398_v27 = vpop.f32.mrf.mxu0 }
 0x195   :  { %v1440_v28 = vadd.f32 %v1439_v19, %v1398_v27 }
 0x196   :  { %v1400_v29 = vpop.f32.mrf.mxu0 }
 0x198   :  { %v1401_v30 = vpop.f32.mrf.mxu0 }
 0x19a   :  { %v1532_v34 = vpop.f32.mrf.mxu0 }
 0x19b   :  { %v1491_v31 = vpop.f32.mrf.mxu1 }
 0x19c   :  { %v1492_v35 = vadd.f32 %v1491_v31, %v1438_v26  ;;  %v1534_v38 = vpop.f32.mrf.mxu0 }
 0x19d   :  { %v1493_v37 = vpop.f32.mrf.mxu1 }
 0x19e   :  { %v1533_v39 = vadd.f32 %v1532_v34, %v1492_v35  ;;  %v1494_v25 = vadd.f32 %v1493_v37, %v1440_v28  ;;  %v1536_v53 = vpop.f32.mrf.mxu0 }
 0x19f   :  { %v1495_v12 = vpop.f32.mrf.mxu1 }
 0x1a0   :  { %v1535_v32 = vadd.f32 %v1534_v38, %v1494_v25  ;;  %v1537_v42 = vpop.f32.mrf.mxu0 }
 0x1a1   :  { %v1496_v33 = vpop.f32.mrf.mxu1 }
 0x1a3   :  { %v1657_v43 = vpop.f32.mrf.mxu1 }
 0x1a5   :  { %v1659_v44 = vpop.f32.mrf.mxu1 }
 0x1a7   :  { %v1661_v45 = vpop.f32.mrf.mxu1 }
 0x1a9   :  { %v1662_v41 = vpop.f32.mrf.mxu1 }
 0x1da   :  { %v1616_v54 = vpop.f32.mrf.mxu0 }
 0x1db   :  { %v1658_v19 = vadd.f32 %v1657_v43, %v1616_v54 }
 0x1dc   :  { %v1618_v47 = vpop.f32.mrf.mxu0 }
 0x1dd   :  { %v1664_v50 = vadd.f32 %v1658_v19, %v1533_v39  ;;  %v1660_v22 = vadd.f32 %v1659_v44, %v1618_v47  ;;  %v1998_v47 = vld [vmem:[%s4741_s4 + $0x38] sm:$0xff] }
 0x1de   :  { %v1620_v17 = vpop.f32.mrf.mxu0  ;;  %2026 = vmatprep.subr.mxu0 %v1998_v47  ;;  %2288 = vmatprep.subr.mxu1 %v1998_v47 }
 0x1df   :  { %v1665_v29 = vadd.f32 %v1660_v22, %v1535_v32  ;;  %v4620_v17 = vld [vmem:[%s4741_s4 + $0x28] sm:$0xff]  ;;  %v4632_v22 = vld [vmem:[%s4741_s4 + $0x18] sm:$0xff] }
 0x1e0   :  { %v1621_v21 = vpop.f32.mrf.mxu0 }
 0x1e1   :  { %v4626_v21 = vld [vmem:[%s4741_s4 + $0x20] sm:$0xff] }
 0x1e2   :  { %v1784_v24 = vpop.f32.mrf.mxu0 }
 0x1e3   :  { %v1743_v23 = vpop.f32.mrf.mxu1 }
 0x1e4   :  { %v1785_v26 = vadd.f32 %v1784_v24, %v1743_v23  ;;  %v1786_v28 = vpop.f32.mrf.mxu0  ;;  %v4638_v23 = vld [vmem:[%s4741_s4 + $0x10] sm:$0xff]  ;;  %v4644_v24 = vld [vmem:[%s4741_s4 + $0x8] sm:$0xff] }
 0x1e5   :  { %v1745_v27 = vpop.f32.mrf.mxu1 }
 0x1e6   :  { %v4600_v30 = vadd.f32 %v1785_v26, %v1664_v50  ;;  %v1787_v31 = vadd.f32 %v1786_v28, %v1745_v27  ;;  %v1788_v35 = vpop.f32.mrf.mxu0  ;;  %v4614_v50 = vld [vmem:[%s4741_s4 + $0x30] sm:$0xff]  ;;  %v4650_v26 = vld [vmem:[%s4741_s4] sm:$0xff]  ;;  %v3157_v27 = vmov 0.0  }
 0x1e7   :  { %v1747_v34 = vpop.f32.mrf.mxu1 }
 0x1e8   :  { %v1837_v37 = vrot.slane %v4600_v30, 4  ;;  %v4603_v38 = vadd.f32 %v1787_v31, %v1665_v29  ;;  %v1789_v39 = vpop.f32.mrf.mxu0 }
 0x1e9   :  { %v1748_v25 = vpop.f32.mrf.mxu1 }
 0x1ea   :  { %v1838_v12 = vadd.f32 %v1837_v37, %v4600_v30  ;;  %v1843_v53 = vrot.slane %v4603_v38, 4 }
 0x1ec   :  { %v1844_v33 = vadd.f32 %v1843_v53, %v4603_v38  ;;  %v1839_v42 = vrot.slane %v1838_v12, 2 }
 0x1ee   :  { %v1845_v43 = vrot.slane %v1844_v33, 2  ;;  %v1840_v32 = vadd.f32 %v1839_v42, %v1838_v12 }
 0x1f0   :  { %v1846_v44 = vadd.f32 %v1845_v43, %v1844_v33  ;;  %v1841_v45 = vrot.slane %v1840_v32, 1 }
 0x1f2   :  { %v1847_v41 = vrot.slane %v1846_v44, 1  ;;  %v1842_v19 = vadd.f32 %v1841_v45, %v1840_v32 }
 0x1f4   :  { %v1848_v54 = vadd.f32 %v1847_v41, %v1846_v44 }
 0x1f6   :  { %1913 = vmatprep.mubr.f32.mxu0 %v1848_v54 }
 0x1f7   :  { %1914 = vmatmul.mubr.f32.vlgmr.msra.gmra.mxu0 %v1842_v19 }
 0x1f8   :  { %2027 = vmatpush1.msra.mxu0 %v4614_v50  ;;  %2066 = vmatprep.mubr.f32.mxu0 %v3157_v27 }
 0x1f9   :  { %2028 = vmatprep.subr.mxu0 %v4620_v17 }
 0x1fa   :  { %2029 = vmatpush1.msra.mxu0 %v4626_v21 }
 0x1fb   :  { %2030 = vmatprep.subr.mxu0 %v4632_v22 }
 0x1fc   :  { %2031 = vmatpush1.msra.mxu0 %v4638_v23 }
 0x1fd   :  { %2032 = vmatprep.subr.mxu0 %v4644_v24 }
 0x1fe   :  { %2033 = vmatpush1.msra.mxu0 %v4650_v26 }
 0x1ff   :  { %2877 = vmatprep.subr.mxu0 %v4332_v46  ;;  %v2073_v46 = vlaneseq }
 0x227   :  { %v2839_v28 = vpop.f32.mrf.mxu1 }
 0x229   :  { %v2840_v29 = vpop.f32.mrf.mxu1 }
 0x22a   :  { %v2841_v35 = vadd.f32 %v2840_v29, %v2839_v28 }
 0x2b7   :  { %v2804_v31 = vpop.f32.mrf.mxu0 }
 0x2b9   :  { %v2805_v34 = vpop.f32.mrf.mxu0 }
 0x2ba   :  { %v2806_v37 = vadd.f32 %v2805_v34, %v2804_v31 }
 0x2bc   :  { %v1986_v25 = vadd.f32 %v2841_v35, %v2806_v37 }
 0x2be   :  { %v4655_v39 = vmul.f32 0.0078125, %v1986_v25 }
 0x2c0   :  { %2764 = vmatmul.mubr.msk.f32.vlgmr.msra.gmra.mxu0 %vm294_vm0, %v4655_v39 }
 0x2c1   :  { %2878 = vmatpush3.msra.mxu0 %v4340_v60  ;;  %v2074_v60 = vshrl.u32 %v2073_v46, 7 }
 0x2c2   :  { %2879 = vmatprep.subr.mxu0 %v4346_v59 }
 0x2c3   :  { %2880 = vmatpush3.msra.mxu0 %v4352_v10  ;;  %v4690_v59 = vsub.s32 0, %v2074_v60 }
 0x2c4   :  { %2881 = vmatprep.subr.mxu0 %v4358_v49 }
 0x2c5   :  { %2882 = vmatpush3.msra.mxu0 %v4365_v52 }
 0x2c6   :  { %2883 = vmatprep.subr.mxu0 %v4372_v51 }
 0x2c7   :  { %2884 = vmatpush3.msra.mxu0 %v4379_v63 }
 0x2c8   :  { %2885 = vmatprep.subr.mxu0 %v4386_v1 }
 0x2c9   :  { %2886 = vmatpush3.msra.mxu0 %v4393_v56 }
 0x2ca   :  { %2887 = vmatprep.subr.mxu0 %v4400_v61 }
 0x2cb   :  { %2888 = vmatpush3.msra.mxu0 %v4407_v62 }
 0x2cc   :  { %2889 = vmatprep.subr.mxu0 %v4414_v55 }
 0x2cd   :  { %2890 = vmatpush3.msra.mxu0 %v4421_v57 }
 0x2ce   :  { %2891 = vmatprep.subr.mxu0 %v4428_v48 }
 0x2cf   :  { %2892 = vmatpush3.msra.mxu0 %v4435_v58 }
 0x2d0   :  { %2893 = vmatprep.subr.mxu0 %v4442_v16 }
 0x2d1   :  { %2894 = vmatpush3.msra.mxu0 %v4449_v0 }
 0x2d2   :  { %2895 = vmatprep.subr.mxu0 %v4456_v3 }
 0x2d3   :  { %2896 = vmatpush3.msra.mxu0 %v4463_v4 }
 0x2d4   :  { %2897 = vmatprep.subr.mxu0 %v4470_v5 }
 0x2d5   :  { %2898 = vmatpush3.msra.mxu0 %v4477_v6 }
 0x2d6   :  { %2899 = vmatprep.subr.mxu0 %v4484_v7 }
 0x2d7   :  { %2900 = vmatpush3.msra.mxu0 %v4491_v20 }
 0x2d8   :  { %2901 = vmatprep.subr.mxu0 %v4498_v8 }
 0x2d9   :  { %2902 = vmatpush3.msra.mxu0 %v4505_v9 }
 0x2da   :  { %2903 = vmatprep.subr.mxu0 %v4512_v11 }
 0x2db   :  { %2904 = vmatpush3.msra.mxu0 %v4519_v13 }
 0x2dc   :  { %2905 = vmatprep.subr.mxu0 %v4526_v14 }
 0x2dd   :  { %2906 = vmatpush3.msra.mxu0 %v4533_v15 }
 0x2de   :  { %2907 = vmatprep.subr.mxu0 %v4540_v18 }
 0x2df   :  { %2908 = vmatpush3.msra.mxu0 %v4547_v2 }
 0x2e0   :  { %2362 = vmatprep.subr.mxu0 %v1998_v47 }
 0x380   :  { %v2068_v10 = vpop.f32.mrf.mxu0 }
 0x381   :  { %v2076_v49 = vrot.slane %v2068_v10, %v4690_v59 }
 0x382   :  { %v2070_v52 = vpop.f32.mrf.mxu0 }
 0x383   :  { %v2081_v51 = vsub.f32 %v4561_v36, %v2076_v49  ;;  %v2097_v63 = vsub.f32 %v4600_v30, %v2076_v49  ;;  %v2080_v1 = vrot.slane %v2070_v52, %v4690_v59 }
 0x385   :  { %v2083_v56 = vmul.f32 %v2081_v51, %v2081_v51  ;;  %v2099_v61 = vmul.f32 %v2097_v63, %v2097_v63  ;;  %v2082_v62 = vsub.f32 %v4564_v40, %v2080_v1  ;;  %v2098_v55 = vsub.f32 %v4603_v38, %v2080_v1 }
 0x387   :  { %v2085_v57 = vrot.slane %v2083_v56, 4  ;;  %v2101_v48 = vrot.slane %v2099_v61, 4  ;;  %v2084_v58 = vmul.f32 %v2082_v62, %v2082_v62  ;;  %v2100_v16 = vmul.f32 %v2098_v55, %v2098_v55 }
 0x389   :  { %v2086_v0 = vadd.f32 %v2085_v57, %v2083_v56  ;;  %v2102_v3 = vadd.f32 %v2101_v48, %v2099_v61  ;;  %v2091_v4 = vrot.slane %v2084_v58, 4  ;;  %v2107_v5 = vrot.slane %v2100_v16, 4 }
 0x38b   :  { %v2087_v6 = vrot.slane %v2086_v0, 2  ;;  %v2103_v7 = vrot.slane %v2102_v3, 2  ;;  %v2092_v20 = vadd.f32 %v2091_v4, %v2084_v58  ;;  %v2108_v8 = vadd.f32 %v2107_v5, %v2100_v16 }
 0x38d   :  { %v2088_v9 = vadd.f32 %v2087_v6, %v2086_v0  ;;  %v2104_v11 = vadd.f32 %v2103_v7, %v2102_v3  ;;  %v2093_v13 = vrot.slane %v2092_v20, 2  ;;  %v2109_v14 = vrot.slane %v2108_v8, 2 }
 0x38f   :  { %v2110_v15 = vadd.f32 %v2109_v14, %v2108_v8  ;;  %v2094_v18 = vadd.f32 %v2093_v13, %v2092_v20  ;;  %v2089_v2 = vrot.slane %v2088_v9, 1  ;;  %v2105_v12 = vrot.slane %v2104_v11, 1 }
 0x391   :  { %v2111_v53 = vrot.slane %v2110_v15, 1  ;;  %v2095_v33 = vrot.slane %v2094_v18, 1  ;;  %v2106_v32 = vadd.f32 %v2105_v12, %v2104_v11  ;;  %v2090_v44 = vadd.f32 %v2089_v2, %v2088_v9 }
 0x393   :  { %v2112_v42 = vadd.f32 %v2111_v53, %v2110_v15  ;;  %v2096_v43 = vadd.f32 %v2095_v33, %v2094_v18 }
 0x395   :  { %2177 = vmatprep.mubr.f32.mxu1 %v2112_v42  ;;  %2247 = vmatprep.mubr.f32.mxu0 %v2096_v43 }
 0x396   :  { %2178 = vmatmul.mubr.f32.vlgmr.msra.gmra.mxu1 %v2106_v32  ;;  %2248 = vmatmul.mubr.f32.vlgmr.msra.gmra.mxu0 %v2090_v44 }
 0x397   :  { %2289 = vmatpush1.msra.mxu1 %v4614_v50  ;;  %2363 = vmatpush1.msra.mxu0 %v4614_v50 }
 0x398   :  { %2290 = vmatprep.subr.mxu1 %v4620_v17  ;;  %2364 = vmatprep.subr.mxu0 %v4620_v17 }
 0x399   :  { %2291 = vmatpush1.msra.mxu1 %v4626_v21  ;;  %2328 = vmatprep.mubr.f32.mxu1 %v3157_v27 }
 0x39a   :  { %2292 = vmatprep.subr.mxu1 %v4632_v22  ;;  %2365 = vmatpush1.msra.mxu0 %v4626_v21 }
 0x39b   :  { %2293 = vmatpush1.msra.mxu1 %v4638_v23  ;;  %2366 = vmatprep.subr.mxu0 %v4632_v22 }
 0x39c   :  { %2294 = vmatprep.subr.mxu1 %v4644_v24  ;;  %2367 = vmatpush1.msra.mxu0 %v4638_v23  ;;  %v2254_v23 = vld [vmem:[%s4742_s5] sm:$0x1] }
 0x39d   :  { %2295 = vmatpush1.msra.mxu1 %v4650_v26  ;;  %2368 = vmatprep.subr.mxu0 %v4644_v24 }
 0x39e   :  { %2369 = vmatpush1.msra.mxu0 %v4650_v26  ;;  %2402 = vmatprep.mubr.f32.mxu0 %v3157_v27  ;;  %v2258_v26 = vld [vmem:[%s4743_s6] sm:$0x1] }
 0x456   :  { %v2874_v45 = vpop.f32.mrf.mxu1  ;;  %v2909_v41 = vpop.f32.mrf.mxu0 }
 0x458   :  { %v2875_v54 = vpop.f32.mrf.mxu1  ;;  %v2910_v19 = vpop.f32.mrf.mxu0 }
 0x459   :  { %v2876_v47 = vadd.f32 %v2875_v54, %v2874_v45  ;;  %v2911_v50 = vadd.f32 %v2910_v19, %v2909_v41 }
 0x45b   :  { %v2250_v17 = vadd.f32 %v2911_v50, %v2876_v47 }
 0x45d   :  { %v2253_v21 = vmul.f32 0.0078125, %v2250_v17 }
 0x45f   :  { %v2255_v22 = vadd.f32 1e-05, %v2253_v21 }
 0x461   :  { %3154 = vrsqrt.f32 %v2255_v22 }
 0x46e   :  { %v3155_v28 = vpop.eup %3154 }
 0x46f   :  { %v2257_v24 = vmul.f32 %v3155_v28, %v2254_v23 }
 0x471   :  { %2765 = vmatmul.mubr.msk.f32.vlgmr.msra.gmra.mxu1 %vm294_vm0, %v2257_v24  ;;  %v2259_v27 = vmul.f32 %v2257_v24, %v4655_v39 }
 0x473   :  { %v2260_v29 = vsub.f32 %v2258_v26, %v2259_v27 }
 0x475   :  { %2766 = vmatmul.mubr.msk.f32.vlgmr.msra.gmra.mxu0 %vm294_vm0, %v2260_v29 }
 0x531   :  { %v2330_v31 = vpop.f32.mrf.mxu1 }
 0x532   :  { %v2412_v34 = vrot.slane %v2330_v31, %v4690_v59 }
 0x533   :  { %v2332_v35 = vpop.f32.mrf.mxu1 }
 0x534   :  { %v2416_v37 = vrot.slane %v2332_v35, %v4690_v59  ;;  %v2417_v46 = vmul.f32 %v2412_v34, %v4561_v36  ;;  %v2444_v60 = vmul.f32 %v2412_v34, %v4600_v30 }
 0x535   :  { %v2404_v25 = vpop.f32.mrf.mxu0 }
 0x536   :  { %v2422_v10 = vrot.slane %v2404_v25, %v4690_v59  ;;  %v2418_v63 = vmul.f32 %v2416_v37, %v4564_v40  ;;  %v2445_v1 = vmul.f32 %v2416_v37, %v4603_v38 }
 0x537   :  { %v2406_v49 = vpop.f32.mrf.mxu0 }
 0x538   :  { %v2427_v52 = vadd.f32 %v2422_v10, %v2417_v46  ;;  %v2446_v51 = vadd.f32 %v2444_v60, %v2422_v10  ;;  %v2426_v39 = vrot.slane %v2406_v49, %v4690_v59 }
 0x53a   :  { %v2431_v56 = vmul.f32 0.2, %v2427_v52  ;;  %v2450_v61 = vmul.f32 0.2, %v2446_v51  ;;  %v2428_v62 = vadd.f32 %v2426_v39, %v2418_v63  ;;  %v2447_v55 = vadd.f32 %v2445_v1, %v2426_v39 }
 0x53b   :  { %vm2429_vm1 = vcmp.ge.f32.partialorder %v2427_v52, 0.0  ;;  %vm2448_vm2 = vcmp.ge.f32.partialorder %v2446_v51, 0.0 }
 0x53c   :  { %vm2430_vm3 = vcmp.ge.f32.partialorder %v2428_v62, 0.0  ;;  %v2432_v36 = vmul.f32 0.2, %v2428_v62  ;;  %vm2449_vm4 = vcmp.ge.f32.partialorder %v2447_v55, 0.0  ;;  %v2451_v30 = vmul.f32 0.2, %v2447_v55 }
 0x53d   :  { %v2433_v57 = vsel %vm2429_vm1, %v2427_v52, %v2431_v56  ;;  %v2452_v48 = vsel %vm2448_vm2, %v2446_v51, %v2450_v61 }
 0x53e   :  { %v2434_v58 = vsel %vm2430_vm3, %v2428_v62, %v2432_v36  ;;  %v2453_v16 = vsel %vm2449_vm4, %v2447_v55, %v2451_v30 }
 0x53f   :  { %v2770_v0 = vpack.c.bf16 %v2434_v58, %v2433_v57  ;;  %v2771_v59 = vpack.c.bf16 %v2453_v16, %v2452_v48 }
 0x541   :  { %2443 = vst [vmem:[%s4744_s7] sm:$0xff] %v2770_v0  ;;  %2769 = vst [vmem:[%s4744_s7 + $0x8] sm:$0xff] %v2771_v59 }

// kernel: tile.29
= control target key start
LH: loop header
LB: loop body
LE: loop exit
PB: predicated region body
PF: predicated region fallthrough
CT: control target
= control target key end

     0   :  { %s1117_s22 = smov 3  ;;  %vm323_vm0 = vcmask 523264   ;;  %s1119_s23 = smov 3  ;;  %vm707_vm1 = vcmask 1047556   ;;  %vm711_vm2 = vcmask 1048064   ;;  %s1703_s0 = inlined_call_operand.vmem [shape: f32[4,64,64], index: 0, kind: input, shape index: {}]   ;;  %s1704_s1 = inlined_call_operand.vmem [shape: f32[256,64], index: 1, kind: output, shape index: {}]  }
   0x1   :  { %v996_v0 = vld [vmem:[%s1703_s0 + $0x1c] sm:$0xf]  ;;  %v997_v1 = vld [vmem:[%s1703_s0 + $0x18] sm:$0xf]  ;;  %v998_v2 = vld [vmem:[%s1703_s0 + $0x14] sm:$0xf] }
   0x2   :  { %289 = vst [vmem:[#allocation0 + $0x38] sm:$0xf] %v996_v0  ;;  %294 = vst [vmem:[#allocation0 + $0x30] sm:$0xf] %v997_v1  ;;  %v999_v3 = vld [vmem:[%s1703_s0 + $0x10] sm:$0xf] }
   0x3   :  { %299 = vst [vmem:[#allocation0 + $0x28] sm:$0xf] %v998_v2  ;;  %v1000_v4 = vld [vmem:[%s1703_s0 + $0xc] sm:$0xf]  ;;  %v1001_v5 = vld [vmem:[%s1703_s0 + $0x8] sm:$0xf] }
   0x4   :  { %304 = vst [vmem:[#allocation0 + $0x20] sm:$0xf] %v999_v3  ;;  %309 = vst [vmem:[#allocation0 + $0x18] sm:$0xf] %v1000_v4  ;;  %v1002_v6 = vld [vmem:[%s1703_s0 + $0x4] sm:$0xf] }
   0x5   :  { %314 = vst [vmem:[#allocation0 + $0x10] sm:$0xf] %v1001_v5  ;;  %v319_v7 = vld [vmem:[%s1703_s0] sm:$0xf]  ;;  %318 = vst [vmem:[#allocation0 + $0x8] sm:$0xf] %v1002_v6 }
   0x6   :  { %320 = vst [vmem:[#allocation0] sm:$0xf] %v319_v7  ;;  %s1121_s24 = smov 3  ;;  %v995_v8 = vld [vmem:[%s1703_s0 + $0x20] sm:$0xf]  ;;  %s338_s27 = smov 3 }
   0x7   :  { %s344_s28 = smov 3  ;;  %284 = vst [vmem:[#allocation0 + $0x40] sm:$0xf] %v995_v8  ;;  %v964_v9 = vld [vmem:[%s1703_s0 + $0x9c] sm:$0xf]  ;;  %s350_s4 = smov 3 }
   0x8   :  { %v965_v10 = vld [vmem:[%s1703_s0 + $0x98] sm:$0xf]  ;;  %s356_s5 = smov 3  ;;  %129 = vst [vmem:[#allocation0 + $0x138] sm:$0xf] %v964_v9  ;;  %s1138_s10 = smov 3 }
   0x9   :  { %134 = vst [vmem:[#allocation0 + $0x130] sm:$0xf] %v965_v10  ;;  %v966_v11 = vld [vmem:[%s1703_s0 + $0x94] sm:$0xf]  ;;  %v967_v12 = vld [vmem:[%s1703_s0 + $0x90] sm:$0xf] }
   0xa   :  { %139 = vst [vmem:[#allocation0 + $0x128] sm:$0xf] %v966_v11  ;;  %144 = vst [vmem:[#allocation0 + $0x120] sm:$0xf] %v967_v12  ;;  %v968_v13 = vld [vmem:[%s1703_s0 + $0x8c] sm:$0xf] }
   0xb   :  { %v969_v14 = vld [vmem:[%s1703_s0 + $0x88] sm:$0xf]  ;;  %149 = vst [vmem:[#allocation0 + $0x118] sm:$0xf] %v968_v13  ;;  %v970_v15 = vld [vmem:[%s1703_s0 + $0x84] sm:$0xf] }
   0xc   :  { %154 = vst [vmem:[#allocation0 + $0x110] sm:$0xf] %v969_v14  ;;  %v971_v16 = vld [vmem:[%s1703_s0 + $0x80] sm:$0xf]  ;;  %v972_v17 = vld [vmem:[%s1703_s0 + $0x7c] sm:$0xf] }
   0xd   :  { %v351_v18 = vld [vmem:[#allocation0 + $0x28] ss:$2 sm:%s350_s4]   ;;  %159 = vst [vmem:[#allocation0 + $0x108] sm:$0xf] %v970_v15  ;;  %164 = vst [vmem:[#allocation0 + $0x100] sm:$0xf] %v971_v16 }
   0xe   :  { %v357_v19 = vld [vmem:[#allocation0 + $0x30] ss:$2 sm:%s356_s5]   ;;  %169 = vst [vmem:[#allocation0 + $0xf8] sm:$0xf] %v972_v17  ;;  %s1155_s21 = smov 3  ;;  %s1157_s25 = smov 3 }
   0xf   :  { %v333_v20 = vld [vmem:[#allocation0 + $0x10] ss:$2 sm:%s1121_s24]   ;;  %v345_v22 = vld [vmem:[#allocation0 + $0x20] ss:$2 sm:%s344_s28]   ;;  %s518_s4 = smov 3  ;;  %s524_s5 = smov 3 }
  0x10   :  { %v339_v21 = vld [vmem:[#allocation0 + $0x18] ss:$2 sm:%s338_s27]   ;;  %1007 = vst.msk [vmem:[%s1704_s1 + $0x5] ss:$8 sm:$0x3] %vm323_vm0, %v351_v18   ;;  %s536_s11 = smov 3 }
  0x11   :  { %1008 = vst.msk [vmem:[%s1704_s1 + $0x6] ss:$8 sm:$0x3] %vm323_vm0, %v357_v19   ;;  %v322_v23 = vld [vmem:[#allocation0] ss:$2 sm:%s1117_s22]   ;;  %s1082_s14 = smov 64  }
  0x12   :  { %v327_v24 = vld [vmem:[#allocation0 + $0x8] ss:$2 sm:%s1119_s23]   ;;  %1004 = vst.msk [vmem:[%s1704_s1 + $0x2] ss:$8 sm:$0x3] %vm323_vm0, %v333_v20   ;;  %s542_s17 = smov 3 }
  0x13   :  { %1005 = vst.msk [vmem:[%s1704_s1 + $0x3] ss:$8 sm:$0x3] %vm323_vm0, %v339_v21   ;;  %1006 = vst.msk [vmem:[%s1704_s1 + $0x4] ss:$8 sm:$0x3] %vm323_vm0, %v345_v22  }
  0x14   :  { %324 = vst.msk [vmem:[%s1704_s1] ss:$8 sm:$0x3] %vm323_vm0, %v322_v23   ;;  %1003 = vst.msk [vmem:[%s1704_s1 + $0x1] ss:$8 sm:$0x3] %vm323_vm0, %v327_v24  }
  0x15   :  { %v704_v25 = vld [vmem:[#allocation0 + $0x1] ss:$8 sm:$0xf]   ;;  %v363_v28 = vld [vmem:[#allocation0 + $0x38] ss:$2 sm:%s1138_s10]   ;;  %s530_s10 = smov 3 }
  0x16   :  { %v706_v26 = vld [vmem:[#allocation0 + $0x1] ss:$8 sm:$0xf0]   ;;  %1009 = vst.msk [vmem:[%s1704_s1 + $0x7] ss:$8 sm:$0x3] %vm323_vm0, %v363_v28  }
  0x17   :  { %v708_v27 = vsel %vm707_vm1, %v706_v26, %v704_v25  ;;  %v963_v29 = vld [vmem:[%s1703_s0 + $0xa0] sm:$0xf]  ;;  %s548_s18 = smov 3  ;;  %v980_v31 = vld [vmem:[%s1703_s0 + $0x5c] sm:$0xf]  ;;  %s554_s6 = smov 3 }
  0x18   :  { %709 = vrot.lane.b32.xlu0 %v708_v27, %s1082_s14  ;;  %v537_v30 = vld [vmem:[#allocation0 + $0x120] ss:$2 sm:%s536_s11]   ;;  %124 = vst [vmem:[#allocation0 + $0x140] sm:$0xf] %v963_v29  ;;  %v525_v32 = vld [vmem:[#allocation0 + $0x110] ss:$2 sm:%s524_s5]  }
  0x19   :  { %v531_v33 = vld [vmem:[#allocation0 + $0x118] ss:$2 sm:%s530_s10]   ;;  %1038 = vst.msk [vmem:[%s1704_s1 + $0x44] ss:$8 sm:$0x3] %vm323_vm0, %v537_v30   ;;  %s1240_s11 = smov 3 }
  0x1a   :  { %v543_v34 = vld [vmem:[#allocation0 + $0x128] ss:$2 sm:%s542_s17]   ;;  %209 = vst [vmem:[#allocation0 + $0xb8] sm:$0xf] %v980_v31  ;;  %v507_v35 = vld [vmem:[#allocation0 + $0xf8] ss:$2 sm:%s1155_s21]  }
  0x1b   :  { %v513_v36 = vld [vmem:[#allocation0 + $0x100] ss:$2 sm:%s1157_s25]   ;;  %1036 = vst.msk [vmem:[%s1704_s1 + $0x42] ss:$8 sm:$0x3] %vm323_vm0, %v525_v32   ;;  %s1262_s27 = smov 3 }
  0x1c   :  { %v519_v37 = vld [vmem:[#allocation0 + $0x108] ss:$2 sm:%s518_s4]   ;;  %1037 = vst.msk [vmem:[%s1704_s1 + $0x43] ss:$8 sm:$0x3] %vm323_vm0, %v531_v33   ;;  %s1264_s28 = smov 3 }
  0x1d   :  { %1039 = vst.msk [vmem:[%s1704_s1 + $0x45] ss:$8 sm:$0x3] %vm323_vm0, %v543_v34   ;;  %1033 = vst.msk [vmem:[%s1704_s1 + $0x37] ss:$8 sm:$0x3] %vm323_vm0, %v507_v35  }
  0x1e   :  { %1034 = vst.msk [vmem:[%s1704_s1 + $0x40] ss:$8 sm:$0x3] %vm323_vm0, %v513_v36   ;;  %1035 = vst.msk [vmem:[%s1704_s1 + $0x41] ss:$8 sm:$0x3] %vm323_vm0, %v519_v37  }
  0x1f   :  { %v725_v38 = vld [vmem:[#allocation0 + $0x101] ss:$8 sm:$0xf]   ;;  %v549_v39 = vld [vmem:[#allocation0 + $0x130] ss:$2 sm:%s548_s18]   ;;  %s434_s2 = smov 3 }
  0x20   :  { %v727_v40 = vld [vmem:[#allocation0 + $0x101] ss:$8 sm:$0xf0]   ;;  %1040 = vst.msk [vmem:[%s1704_s1 + $0x46] ss:$8 sm:$0x3] %vm323_vm0, %v549_v39  }
  0x21   :  { %v981_v41 = vld [vmem:[%s1703_s0 + $0x58] sm:$0xf]  ;;  %v729_v42 = vsel %vm707_vm1, %v727_v40, %v725_v38  ;;  %v982_v43 = vld [vmem:[%s1703_s0 + $0x54] sm:$0xf]  ;;  %v983_v44 = vld [vmem:[%s1703_s0 + $0x50] sm:$0xf] }
  0x22   :  { %214 = vst [vmem:[#allocation0 + $0xb0] sm:$0xf] %v981_v41  ;;  %v984_v45 = vld [vmem:[%s1703_s0 + $0x4c] sm:$0xf]  ;;  %730 = vrot.lane.b32.xlu1 %v729_v42, %s1082_s14  ;;  %219 = vst [vmem:[#allocation0 + $0xa8] sm:$0xf] %v982_v43 }
  0x23   :  { %224 = vst [vmem:[#allocation0 + $0xa0] sm:$0xf] %v983_v44  ;;  %229 = vst [vmem:[#allocation0 + $0x98] sm:$0xf] %v984_v45  ;;  %v985_v46 = vld [vmem:[%s1703_s0 + $0x48] sm:$0xf] }
  0x24   :  { %v986_v47 = vld [vmem:[%s1703_s0 + $0x44] sm:$0xf]  ;;  %v987_v48 = vld [vmem:[%s1703_s0 + $0x40] sm:$0xf]  ;;  %234 = vst [vmem:[#allocation0 + $0x90] sm:$0xf] %v985_v46 }
  0x25   :  { %v555_v49 = vld [vmem:[#allocation0 + $0x138] ss:$2 sm:%s554_s6]   ;;  %239 = vst [vmem:[#allocation0 + $0x88] sm:$0xf] %v986_v47  ;;  %244 = vst [vmem:[#allocation0 + $0x80] sm:$0xf] %v987_v48 }
  0x26   :  { %v979_v50 = vld [vmem:[%s1703_s0 + $0x60] sm:$0xf]  ;;  %1041 = vst.msk [vmem:[%s1704_s1 + $0x47] ss:$8 sm:$0x3] %vm323_vm0, %v555_v49   ;;  %s440_s3 = smov 3 }
  0x27   :  { %204 = vst [vmem:[#allocation0 + $0xc0] sm:$0xf] %v979_v50  ;;  %v948_v51 = vld [vmem:[%s1703_s0 + $0xdc] sm:$0xf]  ;;  %v949_v52 = vld [vmem:[%s1703_s0 + $0xd8] sm:$0xf] }
  0x28   :  { %s446_s8 = smov 3  ;;  %s452_s9 = smov 3  ;;  %49 = vst [vmem:[#allocation0 + $0x1b8] sm:$0xf] %v948_v51  ;;  %54 = vst [vmem:[#allocation0 + $0x1b0] sm:$0xf] %v949_v52 }
  0x29   :  { %v950_v53 = vld [vmem:[%s1703_s0 + $0xd4] sm:$0xf]  ;;  %v951_v54 = vld [vmem:[%s1703_s0 + $0xd0] sm:$0xf]  ;;  %s1285_s16 = smov 3  ;;  %s1293_s24 = smov 3 }
  0x2a   :  { %59 = vst [vmem:[#allocation0 + $0x1a8] sm:$0xf] %v950_v53  ;;  %64 = vst [vmem:[#allocation0 + $0x1a0] sm:$0xf] %v951_v54  ;;  %v952_v55 = vld [vmem:[%s1703_s0 + $0xcc] sm:$0xf] }
  0x2b   :  { %v953_v56 = vld [vmem:[%s1703_s0 + $0xc8] sm:$0xf]  ;;  %69 = vst [vmem:[#allocation0 + $0x198] sm:$0xf] %v952_v55  ;;  %v954_v57 = vld [vmem:[%s1703_s0 + $0xc4] sm:$0xf] }
  0x2c   :  { %74 = vst [vmem:[#allocation0 + $0x190] sm:$0xf] %v953_v56  ;;  %v955_v58 = vld [vmem:[%s1703_s0 + $0xc0] sm:$0xf]  ;;  %v956_v59 = vld [vmem:[%s1703_s0 + $0xbc] sm:$0xf] }
  0x2d   :  { %v453_v60 = vld [vmem:[#allocation0 + $0xb0] ss:$2 sm:%s452_s9]   ;;  %79 = vst [vmem:[#allocation0 + $0x188] sm:$0xf] %v954_v57  ;;  %84 = vst [vmem:[#allocation0 + $0x180] sm:$0xf] %v955_v58 }
  0x2e   :  { %89 = vst [vmem:[#allocation0 + $0x178] sm:$0xf] %v956_v59  ;;  %s1304_s30 = smov 3  ;;  %s1306_s4 = smov 3  ;;  %v947_v61 = vld [vmem:[%s1703_s0 + $0xe0] sm:$0xf] }
  0x2f   :  { %v435_v62 = vld [vmem:[#allocation0 + $0x98] ss:$2 sm:%s434_s2]   ;;  %v447_v0 = vld [vmem:[#allocation0 + $0xa8] ss:$2 sm:%s446_s8]   ;;  %44 = vst [vmem:[#allocation0 + $0x1c0] sm:$0xf] %v947_v61 }
  0x30   :  { %v441_v63 = vld [vmem:[#allocation0 + $0xa0] ss:$2 sm:%s440_s3]   ;;  %1024 = vst.msk [vmem:[%s1704_s1 + $0x26] ss:$8 sm:$0x3] %vm323_vm0, %v453_v60   ;;  %s626_s19 = smov 3 }
  0x31   :  { %v417_v1 = vld [vmem:[#allocation0 + $0x80] ss:$2 sm:%s1240_s11]   ;;  %v429_v3 = vld [vmem:[#allocation0 + $0x90] ss:$2 sm:%s1264_s28]   ;;  %s632_s22 = smov 3  ;;  %s638_s23 = smov 3 }
  0x32   :  { %v423_v2 = vld [vmem:[#allocation0 + $0x88] ss:$2 sm:%s1262_s27]   ;;  %1021 = vst.msk [vmem:[%s1704_s1 + $0x23] ss:$8 sm:$0x3] %vm323_vm0, %v435_v62   ;;  %s644_s8 = smov 3 }
  0x33   :  { %1022 = vst.msk [vmem:[%s1704_s1 + $0x24] ss:$8 sm:$0x3] %vm323_vm0, %v441_v63   ;;  %1023 = vst.msk [vmem:[%s1704_s1 + $0x25] ss:$8 sm:$0x3] %vm323_vm0, %v447_v0  }
  0x34   :  { %1018 = vst.msk [vmem:[%s1704_s1 + $0x20] ss:$8 sm:$0x3] %vm323_vm0, %v417_v1   ;;  %1019 = vst.msk [vmem:[%s1704_s1 + $0x21] ss:$8 sm:$0x3] %vm323_vm0, %v423_v2  }
  0x35   :  { %1020 = vst.msk [vmem:[%s1704_s1 + $0x22] ss:$8 sm:$0x3] %vm323_vm0, %v429_v3   ;;  %v714_v4 = vld [vmem:[#allocation0 + $0x81] ss:$8 sm:$0xf]  }
  0x36   :  { %v716_v5 = vld [vmem:[#allocation0 + $0x81] ss:$8 sm:$0xf0]   ;;  %v459_v7 = vld [vmem:[#allocation0 + $0xb8] ss:$2 sm:%s1285_s16]   ;;  %s620_s16 = smov 3 }
  0x37   :  { %v718_v6 = vsel %vm707_vm1, %v716_v5, %v714_v4  ;;  %v988_v8 = vld [vmem:[%s1703_s0 + $0x3c] sm:$0xf]  ;;  %1025 = vst.msk [vmem:[%s1704_s1 + $0x27] ss:$8 sm:$0x3] %vm323_vm0, %v459_v7   ;;  %s650_s9 = smov 3 }
  0x38   :  { %719 = vrot.lane.b32.xlu0 %v718_v6, %s1082_s14  ;;  %v738_v9 = vld [vmem:[#allocation0 + $0x181] ss:$8 sm:$0xf0]   ;;  %249 = vst [vmem:[#allocation0 + $0x78] sm:$0xf] %v988_v8  ;;  %s1386_s17 = smov 3 }
  0x39   :  { %v621_v10 = vld [vmem:[#allocation0 + $0x190] ss:$2 sm:%s620_s16]   ;;  %v633_v12 = vld [vmem:[#allocation0 + $0x1a0] ss:$2 sm:%s632_s22]   ;;  %s1407_s22 = smov 3  ;;  %s1423_s3 = smov 3 }
  0x3a   :  { %v627_v11 = vld [vmem:[#allocation0 + $0x198] ss:$2 sm:%s626_s19]   ;;  %v615_v15 = vld [vmem:[#allocation0 + $0x188] ss:$2 sm:%s1306_s4]   ;;  %s1393_s19 = smov 3  ;;  %s1425_s11 = smov 3 }
  0x3b   :  { %v603_v13 = vld [vmem:[#allocation0 + $0x178] ss:$2 sm:%s1293_s24]   ;;  %1052 = vst.msk [vmem:[%s1704_s1 + $0x62] ss:$8 sm:$0x3] %vm323_vm0, %v621_v10   ;;  %s1431_s7 = smov 3 }
  0x3c   :  { %v609_v14 = vld [vmem:[#allocation0 + $0x180] ss:$2 sm:%s1304_s30]   ;;  %1053 = vst.msk [vmem:[%s1704_s1 + $0x63] ss:$8 sm:$0x3] %vm323_vm0, %v627_v11   ;;  %s410_s15 = smov 3 }
  0x3d   :  { %1054 = vst.msk [vmem:[%s1704_s1 + $0x64] ss:$8 sm:$0x3] %vm323_vm0, %v633_v12   ;;  %1049 = vst.msk [vmem:[%s1704_s1 + $0x57] ss:$8 sm:$0x3] %vm323_vm0, %v603_v13  }
  0x3e   :  { %1050 = vst.msk [vmem:[%s1704_s1 + $0x60] ss:$8 sm:$0x3] %vm323_vm0, %v609_v14   ;;  %1051 = vst.msk [vmem:[%s1704_s1 + $0x61] ss:$8 sm:$0x3] %vm323_vm0, %v615_v15  }
  0x3f   :  { %v639_v16 = vld [vmem:[#allocation0 + $0x1a8] ss:$2 sm:%s638_s23]   ;;  %v989_v17 = vld [vmem:[%s1703_s0 + $0x38] sm:$0xf]  ;;  %v994_v38 = vld [vmem:[%s1703_s0 + $0x24] sm:$0xf] }
  0x40   :  { %1055 = vst.msk [vmem:[%s1704_s1 + $0x65] ss:$8 sm:$0x3] %vm323_vm0, %v639_v16   ;;  %v736_v18 = vld [vmem:[#allocation0 + $0x181] ss:$8 sm:$0xf]  }
  0x41   :  { %v645_v19 = vld [vmem:[#allocation0 + $0x1b0] ss:$2 sm:%s644_s8]   ;;  %254 = vst [vmem:[#allocation0 + $0x70] sm:$0xf] %v989_v17  ;;  %v740_v20 = vsel %vm707_vm1, %v738_v9, %v736_v18  ;;  %v992_v35 = vld [vmem:[%s1703_s0 + $0x2c] sm:$0xf] }
  0x42   :  { %1056 = vst.msk [vmem:[%s1704_s1 + $0x66] ss:$8 sm:$0x3] %vm323_vm0, %v645_v19   ;;  %v651_v21 = vld [vmem:[#allocation0 + $0x1b8] ss:$2 sm:%s650_s9]   ;;  %741 = vrot.lane.b32.xlu1 %v740_v20, %s1082_s14  ;;  %s404_s8 = smov 3 }
  0x43   :  { %v747_v22 = vld [vmem:[#allocation0 + $0x3] ss:$8 sm:$0xf]   ;;  %1057 = vst.msk [vmem:[%s1704_s1 + $0x67] ss:$8 sm:$0x3] %vm323_vm0, %v651_v21  }
  0x44   :  { %v749_v23 = vld [vmem:[#allocation0 + $0x3] ss:$8 sm:$0xf0]   ;;  %v990_v33 = vld [vmem:[%s1703_s0 + $0x34] sm:$0xf]  ;;  %s1442_s20 = smov 3 }
  0x45   :  { %v758_v24 = vld [vmem:[#allocation0 + $0x83] ss:$8 sm:$0xf]   ;;  %v751_v25 = vsel %vm707_vm1, %v749_v23, %v747_v22  ;;  %259 = vst [vmem:[#allocation0 + $0x68] sm:$0xf] %v990_v33  ;;  %s1459_s5 = smov 3 }
  0x46   :  { %v760_v26 = vld [vmem:[#allocation0 + $0x83] ss:$8 sm:$0xf0]   ;;  %752 = vrot.lane.b32.xlu0 %v751_v25, %s1082_s14  ;;  %269 = vst [vmem:[#allocation0 + $0x58] sm:$0xf] %v992_v35  ;;  %s1461_s6 = smov 3 }
  0x47   :  { %v769_v27 = vld [vmem:[#allocation0 + $0x103] ss:$8 sm:$0xf]   ;;  %v762_v28 = vsel %vm707_vm1, %v760_v26, %v758_v24  ;;  %279 = vst [vmem:[#allocation0 + $0x48] sm:$0xf] %v994_v38  ;;  %s482_s9 = smov 3 }
  0x48   :  { %v771_v29 = vld [vmem:[#allocation0 + $0x103] ss:$8 sm:$0xf0]   ;;  %763 = vrot.lane.b32.xlu1 %v762_v28, %s1082_s14  ;;  %v974_v40 = vld [vmem:[%s1703_s0 + $0x74] sm:$0xf]  ;;  %s488_s10 = smov 3 }
  0x49   :  { %v780_v30 = vld [vmem:[#allocation0 + $0x183] ss:$8 sm:$0xf]   ;;  %v773_v31 = vsel %vm707_vm1, %v771_v29, %v769_v27  ;;  %v405_v42 = vld [vmem:[#allocation0 + $0x70] ss:$2 sm:%s404_s8]   ;;  %s500_s16 = smov 3 }
  0x4a   :  { %v782_v32 = vld [vmem:[#allocation0 + $0x183] ss:$8 sm:$0xf0]   ;;  %774 = vrot.lane.b32.xlu0 %v773_v31, %s1082_s14  ;;  %179 = vst [vmem:[#allocation0 + $0xe8] sm:$0xf] %v974_v40  ;;  %s566_s18 = smov 3 }
  0x4b   :  { %v991_v34 = vld [vmem:[%s1703_s0 + $0x30] sm:$0xf]  ;;  %v993_v36 = vld [vmem:[%s1703_s0 + $0x28] sm:$0xf]  ;;  %v784_v37 = vsel %vm707_vm1, %v782_v32, %v780_v30  ;;  %v973_v39 = vld [vmem:[%s1703_s0 + $0x78] sm:$0xf] }
  0x4c   :  { %264 = vst [vmem:[#allocation0 + $0x60] sm:$0xf] %v991_v34  ;;  %274 = vst [vmem:[#allocation0 + $0x50] sm:$0xf] %v993_v36  ;;  %v975_v41 = vld [vmem:[%s1703_s0 + $0x70] sm:$0xf]  ;;  %785 = vrot.lane.b32.xlu1 %v784_v37, %s1082_s14 }
  0x4d   :  { %174 = vst [vmem:[#allocation0 + $0xf0] sm:$0xf] %v973_v39  ;;  %184 = vst [vmem:[#allocation0 + $0xe0] sm:$0xf] %v975_v41  ;;  %v976_v43 = vld [vmem:[%s1703_s0 + $0x6c] sm:$0xf] }
  0x4e   :  { %1016 = vst.msk [vmem:[%s1704_s1 + $0x16] ss:$8 sm:$0x3] %vm323_vm0, %v405_v42   ;;  %v411_v44 = vld [vmem:[#allocation0 + $0x78] ss:$2 sm:%s410_s15]   ;;  %s656_s26 = smov 3 }
  0x4f   :  { %189 = vst [vmem:[#allocation0 + $0xd8] sm:$0xf] %v976_v43  ;;  %v977_v45 = vld [vmem:[%s1703_s0 + $0x68] sm:$0xf]  ;;  %v978_v46 = vld [vmem:[%s1703_s0 + $0x64] sm:$0xf] }
  0x50   :  { %1017 = vst.msk [vmem:[%s1704_s1 + $0x17] ss:$8 sm:$0x3] %vm323_vm0, %v411_v44   ;;  %194 = vst [vmem:[#allocation0 + $0xd0] sm:$0xf] %v977_v45  ;;  %s662_s24 = smov 3 }
  0x51   :  { %199 = vst [vmem:[#allocation0 + $0xc8] sm:$0xf] %v978_v46  ;;  %v957_v47 = vld [vmem:[%s1703_s0 + $0xb8] sm:$0xf]  ;;  %v958_v48 = vld [vmem:[%s1703_s0 + $0xb4] sm:$0xf] }
  0x52   :  { %94 = vst [vmem:[#allocation0 + $0x170] sm:$0xf] %v957_v47  ;;  %99 = vst [vmem:[#allocation0 + $0x168] sm:$0xf] %v958_v48  ;;  %v959_v49 = vld [vmem:[%s1703_s0 + $0xb0] sm:$0xf] }
  0x53   :  { %v960_v50 = vld [vmem:[%s1703_s0 + $0xac] sm:$0xf]  ;;  %104 = vst [vmem:[#allocation0 + $0x160] sm:$0xf] %v959_v49  ;;  %v961_v52 = vld [vmem:[%s1703_s0 + $0xa8] sm:$0xf] }
  0x54   :  { %v399_v51 = vld [vmem:[#allocation0 + $0x68] ss:$2 sm:%s1431_s7]   ;;  %s494_s7 = smov 3  ;;  %109 = vst [vmem:[#allocation0 + $0x158] sm:$0xf] %v960_v50  ;;  %s668_s29 = smov 3 }
  0x55   :  { %v381_v53 = vld [vmem:[#allocation0 + $0x50] ss:$2 sm:%s1407_s22]   ;;  %v393_v55 = vld [vmem:[#allocation0 + $0x60] ss:$2 sm:%s1425_s11]   ;;  %114 = vst [vmem:[#allocation0 + $0x150] sm:$0xf] %v961_v52 }
  0x56   :  { %v387_v54 = vld [vmem:[#allocation0 + $0x58] ss:$2 sm:%s1423_s3]   ;;  %1015 = vst.msk [vmem:[%s1704_s1 + $0x15] ss:$8 sm:$0x3] %vm323_vm0, %v399_v51   ;;  %s584_s22 = smov 3 }
  0x57   :  { %v369_v56 = vld [vmem:[#allocation0 + $0x40] ss:$2 sm:%s1386_s17]   ;;  %1012 = vst.msk [vmem:[%s1704_s1 + $0x12] ss:$8 sm:$0x3] %vm323_vm0, %v381_v53   ;;  %s590_s3 = smov 3 }
  0x58   :  { %v375_v57 = vld [vmem:[#allocation0 + $0x48] ss:$2 sm:%s1393_s19]   ;;  %1013 = vst.msk [vmem:[%s1704_s1 + $0x13] ss:$8 sm:$0x3] %vm323_vm0, %v387_v54   ;;  %s596_s11 = smov 3 }
  0x59   :  { %1014 = vst.msk [vmem:[%s1704_s1 + $0x14] ss:$8 sm:$0x3] %vm323_vm0, %v393_v55   ;;  %v501_v58 = vld [vmem:[#allocation0 + $0xf0] ss:$2 sm:%s500_s16]   ;;  %s578_s16 = smov 3 }
  0x5a   :  { %1010 = vst.msk [vmem:[%s1704_s1 + $0x10] ss:$8 sm:$0x3] %vm323_vm0, %v369_v56   ;;  %1011 = vst.msk [vmem:[%s1704_s1 + $0x11] ss:$8 sm:$0x3] %vm323_vm0, %v375_v57  }
  0x5b   :  { %v791_v59 = vld [vmem:[#allocation0 + $0x41] ss:$8 sm:$0xf]   ;;  %1032 = vst.msk [vmem:[%s1704_s1 + $0x36] ss:$8 sm:$0x3] %vm323_vm0, %v501_v58  }
  0x5c   :  { %v793_v60 = vld [vmem:[#allocation0 + $0x41] ss:$8 sm:$0xf0]   ;;  %v483_v62 = vld [vmem:[#allocation0 + $0xd8] ss:$2 sm:%s482_s9]   ;;  %s674_s30 = smov 3 }
  0x5d   :  { %v795_v61 = vsel %vm707_vm1, %v793_v60, %v791_v59  ;;  %v489_v63 = vld [vmem:[#allocation0 + $0xe0] ss:$2 sm:%s488_s10]   ;;  %v477_v3 = vld [vmem:[#allocation0 + $0xd0] ss:$2 sm:%s1461_s6]   ;;  %s680_s4 = smov 3  ;;  %s686_s2 = smov 3 }
  0x5e   :  { %v495_v0 = vld [vmem:[#allocation0 + $0xe8] ss:$2 sm:%s494_s7]   ;;  %796 = vrot.lane.b32.xlu0 %v795_v61, %s1082_s14  ;;  %1029 = vst.msk [vmem:[%s1704_s1 + $0x33] ss:$8 sm:$0x3] %vm323_vm0, %v483_v62   ;;  %s572_s7 = smov 3 }
  0x5f   :  { %v465_v1 = vld [vmem:[#allocation0 + $0xc0] ss:$2 sm:%s1442_s20]   ;;  %1030 = vst.msk [vmem:[%s1704_s1 + $0x34] ss:$8 sm:$0x3] %vm323_vm0, %v489_v63   ;;  %s692_s12 = smov 3 }
  0x60   :  { %v471_v2 = vld [vmem:[#allocation0 + $0xc8] ss:$2 sm:%s1459_s5]   ;;  %1031 = vst.msk [vmem:[%s1704_s1 + $0x35] ss:$8 sm:$0x3] %vm323_vm0, %v495_v0   ;;  %s698_s13 = smov 3 }
  0x61   :  { %1026 = vst.msk [vmem:[%s1704_s1 + $0x30] ss:$8 sm:$0x3] %vm323_vm0, %v465_v1   ;;  %1027 = vst.msk [vmem:[%s1704_s1 + $0x31] ss:$8 sm:$0x3] %vm323_vm0, %v471_v2  }
  0x62   :  { %1028 = vst.msk [vmem:[%s1704_s1 + $0x32] ss:$8 sm:$0x3] %vm323_vm0, %v477_v3   ;;  %v802_v4 = vld [vmem:[#allocation0 + $0xc1] ss:$8 sm:$0xf]  }
  0x63   :  { %v804_v5 = vld [vmem:[#allocation0 + $0xc1] ss:$8 sm:$0xf0]   ;;  %v962_v7 = vld [vmem:[%s1703_s0 + $0xa4] sm:$0xf] }
  0x64   :  { %v806_v6 = vsel %vm707_vm1, %v804_v5, %v802_v4  ;;  %v940_v8 = vld [vmem:[%s1703_s0 + $0xfc] sm:$0xf]  ;;  %119 = vst [vmem:[#allocation0 + $0x148] sm:$0xf] %v962_v7  ;;  %v585_v9 = vld [vmem:[#allocation0 + $0x160] ss:$2 sm:%s584_s22]  }
  0x65   :  { %807 = vrot.lane.b32.xlu1 %v806_v6, %s1082_s14  ;;  %v591_v10 = vld [vmem:[#allocation0 + $0x168] ss:$2 sm:%s590_s3]   ;;  %9 = vst [vmem:[#allocation0 + $0x1f8] sm:$0xf] %v940_v8  ;;  %v941_v12 = vld [vmem:[%s1703_s0 + $0xf8] sm:$0xf] }
  0x66   :  { %1046 = vst.msk [vmem:[%s1704_s1 + $0x54] ss:$8 sm:$0x3] %vm323_vm0, %v585_v9   ;;  %1047 = vst.msk [vmem:[%s1704_s1 + $0x55] ss:$8 sm:$0x3] %vm323_vm0, %v591_v10  }
  0x67   :  { %v597_v11 = vld [vmem:[#allocation0 + $0x170] ss:$2 sm:%s596_s11]   ;;  %14 = vst [vmem:[#allocation0 + $0x1f0] sm:$0xf] %v941_v12  ;;  %v944_v15 = vld [vmem:[%s1703_s0 + $0xec] sm:$0xf] }
  0x68   :  { %1048 = vst.msk [vmem:[%s1704_s1 + $0x56] ss:$8 sm:$0x3] %vm323_vm0, %v597_v11   ;;  %v942_v13 = vld [vmem:[%s1703_s0 + $0xf4] sm:$0xf] }
  0x69   :  { %v943_v14 = vld [vmem:[%s1703_s0 + $0xf0] sm:$0xf]  ;;  %19 = vst [vmem:[#allocation0 + $0x1e8] sm:$0xf] %v942_v13  ;;  %v945_v16 = vld [vmem:[%s1703_s0 + $0xe8] sm:$0xf] }
  0x6a   :  { %24 = vst [vmem:[#allocation0 + $0x1e0] sm:$0xf] %v943_v14  ;;  %v946_v17 = vld [vmem:[%s1703_s0 + $0xe4] sm:$0xf]  ;;  %29 = vst [vmem:[#allocation0 + $0x1d8] sm:$0xf] %v944_v15 }
  0x6b   :  { %v815_v18 = vld [vmem:[#allocation0 + $0x141] ss:$8 sm:$0xf0]   ;;  %34 = vst [vmem:[#allocation0 + $0x1d0] sm:$0xf] %v945_v16  ;;  %s560_s0 = smov 3 }
  0x6c   :  { %39 = vst [vmem:[#allocation0 + $0x1c8] sm:$0xf] %v946_v17  ;;  %v835_v19 = vld [vmem:[#allocation0 + $0x43] ss:$8 sm:$0xf]  }
  0x6d   :  { %v837_v20 = vld [vmem:[#allocation0 + $0x43] ss:$8 sm:$0xf0]   ;;  %v813_v21 = vld [vmem:[#allocation0 + $0x141] ss:$8 sm:$0xf]  }
  0x6e   :  { %v561_v22 = vld [vmem:[#allocation0 + $0x140] ss:$2 sm:%s560_s0]   ;;  %v817_v23 = vsel %vm707_vm1, %v815_v18, %v813_v21  ;;  %v573_v25 = vld [vmem:[#allocation0 + $0x150] ss:$2 sm:%s572_s7]   ;;  %v839_v32 = vsel %vm707_vm1, %v837_v20, %v835_v19 }
  0x6f   :  { %1042 = vst.msk [vmem:[%s1704_s1 + $0x50] ss:$8 sm:$0x3] %vm323_vm0, %v561_v22   ;;  %v567_v24 = vld [vmem:[#allocation0 + $0x148] ss:$2 sm:%s566_s18]   ;;  %818 = vrot.lane.b32.xlu0 %v817_v23, %s1082_s14 }
  0x70   :  { %v579_v26 = vld [vmem:[#allocation0 + $0x158] ss:$2 sm:%s578_s16]   ;;  %v846_v27 = vld [vmem:[#allocation0 + $0xc3] ss:$8 sm:$0xf]  }
  0x71   :  { %v848_v28 = vld [vmem:[#allocation0 + $0xc3] ss:$8 sm:$0xf0]   ;;  %1043 = vst.msk [vmem:[%s1704_s1 + $0x51] ss:$8 sm:$0x3] %vm323_vm0, %v567_v24  }
  0x72   :  { %1044 = vst.msk [vmem:[%s1704_s1 + $0x52] ss:$8 sm:$0x3] %vm323_vm0, %v573_v25   ;;  %1045 = vst.msk [vmem:[%s1704_s1 + $0x53] ss:$8 sm:$0x3] %vm323_vm0, %v579_v26   ;;  %v850_v41 = vsel %vm707_vm1, %v848_v28, %v846_v27 }
  0x73   :  { %v857_v29 = vld [vmem:[#allocation0 + $0x143] ss:$8 sm:$0xf]   ;;  %v826_v31 = vld [vmem:[#allocation0 + $0x1c1] ss:$8 sm:$0xf0]   ;;  %840 = vrot.lane.b32.xlu0 %v839_v32, %s1082_s14 }
  0x74   :  { %v859_v30 = vld [vmem:[#allocation0 + $0x143] ss:$8 sm:$0xf0]   ;;  %v824_v33 = vld [vmem:[#allocation0 + $0x1c1] ss:$8 sm:$0xf]  }
  0x75   :  { %v657_v34 = vld [vmem:[#allocation0 + $0x1c0] ss:$2 sm:%s656_s26]   ;;  %v828_v35 = vsel %vm707_vm1, %v826_v31, %v824_v33  ;;  %v669_v37 = vld [vmem:[#allocation0 + $0x1d0] ss:$2 sm:%s668_s29]   ;;  %v861_v42 = vsel %vm707_vm1, %v859_v30, %v857_v29 }
  0x76   :  { %1058 = vst.msk [vmem:[%s1704_s1 + $0x70] ss:$8 sm:$0x3] %vm323_vm0, %v657_v34   ;;  %v663_v36 = vld [vmem:[#allocation0 + $0x1c8] ss:$2 sm:%s662_s24]   ;;  %829 = vrot.lane.b32.xlu1 %v828_v35, %s1082_s14 }
  0x77   :  { %v675_v38 = vld [vmem:[#allocation0 + $0x1d8] ss:$2 sm:%s674_s30]   ;;  %1059 = vst.msk [vmem:[%s1704_s1 + $0x71] ss:$8 sm:$0x3] %vm323_vm0, %v663_v36   ;;  %862 = vrot.lane.b32.xlu0 %v861_v42, %s1082_s14 }
  0x78   :  { %1060 = vst.msk [vmem:[%s1704_s1 + $0x72] ss:$8 sm:$0x3] %vm323_vm0, %v669_v37   ;;  %1061 = vst.msk [vmem:[%s1704_s1 + $0x73] ss:$8 sm:$0x3] %vm323_vm0, %v675_v38  }
  0x79   :  { %v681_v39 = vld [vmem:[#allocation0 + $0x1e0] ss:$2 sm:%s680_s4]   ;;  %v868_v43 = vld [vmem:[#allocation0 + $0x1c3] ss:$8 sm:$0xf]  }
  0x7a   :  { %v687_v40 = vld [vmem:[#allocation0 + $0x1e8] ss:$2 sm:%s686_s2]   ;;  %1062 = vst.msk [vmem:[%s1704_s1 + $0x74] ss:$8 sm:$0x3] %vm323_vm0, %v681_v39   ;;  %851 = vrot.lane.b32.xlu1 %v850_v41, %s1082_s14 }
  0x7b   :  { %1063 = vst.msk [vmem:[%s1704_s1 + $0x75] ss:$8 sm:$0x3] %vm323_vm0, %v687_v40   ;;  %v870_v44 = vld [vmem:[#allocation0 + $0x1c3] ss:$8 sm:$0xf0]  }
  0x7c   :  { %v693_v45 = vld [vmem:[#allocation0 + $0x1f0] ss:$2 sm:%s692_s12]   ;;  %v872_v47 = vsel %vm707_vm1, %v870_v44, %v868_v43 }
  0x7d   :  { %v699_v46 = vld [vmem:[#allocation0 + $0x1f8] ss:$2 sm:%s698_s13]   ;;  %1064 = vst.msk [vmem:[%s1704_s1 + $0x76] ss:$8 sm:$0x3] %vm323_vm0, %v693_v45  }
  0x7e   :  { %1065 = vst.msk [vmem:[%s1704_s1 + $0x77] ss:$8 sm:$0x3] %vm323_vm0, %v699_v46   ;;  %873 = vrot.lane.b32.xlu1 %v872_v47, %s1082_s14 }
  0x8a   :  { %v710_v48 = vpop.permute.xlu0 %709  }
  0x8b   :  { %712 = vst.msk [vmem:[%s1704_s1] sm:$0xff] %vm711_vm2, %v710_v48  }
  0x94   :  { %v731_v49 = vpop.permute.xlu1 %730  }
  0x95   :  { %1067 = vst.msk [vmem:[%s1704_s1 + $0x40] sm:$0xff] %vm711_vm2, %v731_v49  }
  0xaa   :  { %v720_v50 = vpop.permute.xlu0 %719  }
  0xab   :  { %1066 = vst.msk [vmem:[%s1704_s1 + $0x20] sm:$0xff] %vm711_vm2, %v720_v50  }
  0xb4   :  { %v742_v51 = vpop.permute.xlu1 %741  }
  0xb5   :  { %1068 = vst.msk [vmem:[%s1704_s1 + $0x60] sm:$0xff] %vm711_vm2, %v742_v51  }
  0xb8   :  { %v753_v52 = vpop.permute.xlu0 %752  }
  0xb9   :  { %1069 = vst.msk [vmem:[%s1704_s1 + $0x8] sm:$0xff] %vm711_vm2, %v753_v52  }
  0xba   :  { %v764_v53 = vpop.permute.xlu1 %763  }
  0xbb   :  { %1070 = vst.msk [vmem:[%s1704_s1 + $0x28] sm:$0xff] %vm711_vm2, %v764_v53  }
  0xbc   :  { %v775_v54 = vpop.permute.xlu0 %774  }
  0xbd   :  { %1071 = vst.msk [vmem:[%s1704_s1 + $0x48] sm:$0xff] %vm711_vm2, %v775_v54  }
  0xbe   :  { %v786_v55 = vpop.permute.xlu1 %785  }
  0xbf   :  { %1072 = vst.msk [vmem:[%s1704_s1 + $0x68] sm:$0xff] %vm711_vm2, %v786_v55  }
  0xd0   :  { %v797_v56 = vpop.permute.xlu0 %796  }
  0xd1   :  { %1073 = vst.msk [vmem:[%s1704_s1 + $0x10] sm:$0xff] %vm711_vm2, %v797_v56  }
  0xd7   :  { %v808_v57 = vpop.permute.xlu1 %807  }
  0xd8   :  { %1074 = vst.msk [vmem:[%s1704_s1 + $0x30] sm:$0xff] %vm711_vm2, %v808_v57  }
  0xe1   :  { %v819_v58 = vpop.permute.xlu0 %818  }
  0xe2   :  { %1075 = vst.msk [vmem:[%s1704_s1 + $0x50] sm:$0xff] %vm711_vm2, %v819_v58  }
  0xe5   :  { %v841_v60 = vpop.permute.xlu0 %840  }
  0xe6   :  { %1077 = vst.msk [vmem:[%s1704_s1 + $0x18] sm:$0xff] %vm711_vm2, %v841_v60  }
  0xe8   :  { %v830_v59 = vpop.permute.xlu1 %829  }
  0xe9   :  { %1076 = vst.msk [vmem:[%s1704_s1 + $0x70] sm:$0xff] %vm711_vm2, %v830_v59   ;;  %v863_v62 = vpop.permute.xlu0 %862  }
  0xea   :  { %1079 = vst.msk [vmem:[%s1704_s1 + $0x58] sm:$0xff] %vm711_vm2, %v863_v62  }
  0xec   :  { %v852_v61 = vpop.permute.xlu1 %851  }
  0xed   :  { %1078 = vst.msk [vmem:[%s1704_s1 + $0x38] sm:$0xff] %vm711_vm2, %v852_v61  }
  0xf0   :  { %v874_v63 = vpop.permute.xlu1 %873  }
  0xf1   :  { %1080 = vst.msk [vmem:[%s1704_s1 + $0x78] sm:$0xff] %vm711_vm2, %v874_v63  }

// kernel: discriminator_forward.7
= control target key start
LH: loop header
LB: loop body
LE: loop exit
PB: predicated region body
PF: predicated region fallthrough
CT: control target
= control target key end

     0   :  { %v5111_v1 = vmov 0   ;;  %vm325_vm0 = vcmask 523264   ;;  %vm1864_vm1 = vcmask 1043456   ;;  %vm2547_vm6 = vcmask 0   ;;  %s5102_s2 = inlined_call_operand.vmem [shape: bf16[4,320,256], index: 2, kind: input, shape index: {}]   ;;  %s5103_s1 = inlined_call_operand.vmem [shape: bf16[2,5,320], index: 1, kind: input, shape index: {}]   ;;  %s5104_s0 = inlined_call_operand.vmem [shape: bf16[2,5,320], index: 0, kind: input, shape index: {}]   ;;  %s5105_s3 = inlined_call_operand.vmem [shape: f32[256,64], index: 3, kind: input, shape index: {}]   ;;  %s5106_s4 = inlined_call_operand.vmem [shape: f32[64,256], index: 4, kind: input, shape index: {}]   ;;  %s5107_s5 = inlined_call_operand.vmem [shape: f32[1,64], index: 5, kind: input, shape index: {}]   ;;  %s5108_s6 = inlined_call_operand.vmem [shape: f32[1,64], index: 6, kind: input, shape index: {}]   ;;  %s5109_s7 = inlined_call_operand.vmem [shape: f32[4,256], index: 7, kind: input, shape index: {}]   ;;  %s5110_s8 = inlined_call_operand.vmem [shape: f32[2,1], index: 8, kind: output, shape index: {}]  }
   0x1   :  { %v3053_v0 = vld [vmem:[%s5102_s2 + $0x1b4] ss:$8 sps:$4 sm:$0xff]   ;;  %402 = vmatprep.mubr.bf16.mxu1 %v5111_v1  ;;  %v3057_v3 = vld [vmem:[%s5102_s2 + $0x1b0] ss:$8 sps:$4 sm:$0xff]   ;;  %v3059_v5 = vld [vmem:[%s5102_s2 + $0x1a4] ss:$8 sps:$4 sm:$0xff]  }
   0x2   :  { %v3055_v2 = vld [vmem:[%s5102_s2 + $0x274] ss:$8 sps:$4 sm:$0xff]   ;;  %329 = vmatprep.subr.bf16.mxu0 %v3053_v0  ;;  %v3058_v4 = vld [vmem:[%s5102_s2 + $0x270] ss:$8 sps:$4 sm:$0xff]   ;;  %v3061_v6 = vld [vmem:[%s5102_s2 + $0x264] ss:$8 sps:$4 sm:$0xff]  }
   0x3   :  { %378 = vmatprep.subr.bf16.mxu1 %v3055_v2  ;;  %330 = vmatpush1.bf16.msra.mxu0 %v3057_v3  ;;  %v3063_v7 = vld [vmem:[%s5102_s2 + $0x1a0] ss:$8 sps:$4 sm:$0xff]   ;;  %v3065_v9 = vld [vmem:[%s5102_s2 + $0x194] ss:$8 sps:$4 sm:$0xff]   ;;  %v3069_v11 = vld [vmem:[%s5102_s2 + $0x190] ss:$8 sps:$4 sm:$0xff]  }
   0x4   :  { %379 = vmatpush1.bf16.msra.mxu1 %v3058_v4  ;;  %331 = vmatprep.subr.bf16.mxu0 %v3059_v5  ;;  %v3064_v8 = vld [vmem:[%s5102_s2 + $0x260] ss:$8 sps:$4 sm:$0xff]   ;;  %v3067_v10 = vld [vmem:[%s5102_s2 + $0x254] ss:$8 sps:$4 sm:$0xff]   ;;  %v3070_v12 = vld [vmem:[%s5102_s2 + $0x250] ss:$8 sps:$4 sm:$0xff]  }
   0x5   :  { %380 = vmatprep.subr.bf16.mxu1 %v3061_v6  ;;  %v3071_v13 = vld [vmem:[%s5102_s2 + $0x184] ss:$8 sps:$4 sm:$0xff]   ;;  %v3075_v15 = vld [vmem:[%s5102_s2 + $0x180] ss:$8 sps:$4 sm:$0xff]   ;;  %v3077_v17 = vld [vmem:[%s5102_s2 + $0x174] ss:$8 sps:$4 sm:$0xff]  }
   0x6   :  { %v3073_v14 = vld [vmem:[%s5102_s2 + $0x244] ss:$8 sps:$4 sm:$0xff]   ;;  %v3076_v16 = vld [vmem:[%s5102_s2 + $0x240] ss:$8 sps:$4 sm:$0xff]   ;;  %v3082_v18 = vld [vmem:[%s5102_s2 + $0x74] ss:$8 sps:$4 sm:$0xff]  }
   0x7   :  { %332 = vmatpush1.bf16.msra.mxu0 %v3063_v7  ;;  %v3079_v19 = vld [vmem:[%s5103_s1 + $0x8] ss:$0 sps:$4 sm:$0x33]   ;;  %v3080_v20 = vld [vmem:[%s5102_s2 + $0x70] ss:$8 sps:$4 sm:$0xff]  }
   0x8   :  { %381 = vmatpush1.bf16.msra.mxu1 %v3064_v8  ;;  %333 = vmatprep.subr.bf16.mxu0 %v3065_v9  ;;  %v3458_v21 = vld [vmem:[%s5102_s2 + $0x170] ss:$8 sps:$4 sm:$0xff]   ;;  %v3463_v22 = vld [vmem:[%s5102_s2 + $0x164] ss:$8 sps:$4 sm:$0xff]   ;;  %v3474_v24 = vld [vmem:[%s5102_s2 + $0x60] ss:$8 sps:$4 sm:$0xff]  }
   0x9   :  { %382 = vmatprep.subr.bf16.mxu1 %v3067_v10  ;;  %v3468_v23 = vld [vmem:[%s5102_s2 + $0x64] ss:$8 sps:$4 sm:$0xff]   ;;  %v3480_v25 = vld [vmem:[%s5102_s2 + $0x160] ss:$8 sps:$4 sm:$0xff]   ;;  %v3487_v26 = vld [vmem:[%s5102_s2 + $0x154] ss:$8 sps:$4 sm:$0xff]  }
   0xa   :  { %v3492_v27 = vld [vmem:[%s5102_s2 + $0x54] ss:$8 sps:$4 sm:$0xff]   ;;  %v3497_v28 = vld [vmem:[%s5102_s2 + $0x50] ss:$8 sps:$4 sm:$0xff]   ;;  %v3509_v30 = vld [vmem:[%s5102_s2 + $0x144] ss:$8 sps:$4 sm:$0xff]  }
   0xb   :  { %334 = vmatpush1.bf16.msra.mxu0 %v3069_v11  ;;  %v3504_v29 = vld [vmem:[%s5102_s2 + $0x150] ss:$8 sps:$4 sm:$0xff]   ;;  %v3516_v31 = vld [vmem:[%s5102_s2 + $0x44] ss:$8 sps:$4 sm:$0xff]   ;;  %v3521_v32 = vld [vmem:[%s5102_s2 + $0x40] ss:$8 sps:$4 sm:$0xff]  }
   0xc   :  { %383 = vmatpush1.bf16.msra.mxu1 %v3070_v12  ;;  %335 = vmatprep.subr.bf16.mxu0 %v3071_v13  ;;  %v3528_v33 = vld [vmem:[%s5102_s2 + $0x140] ss:$8 sps:$4 sm:$0xff]   ;;  %v3535_v34 = vld [vmem:[%s5102_s2 + $0x234] ss:$8 sps:$4 sm:$0xff]   ;;  %v3545_v36 = vld [vmem:[%s5102_s2 + $0x30] ss:$8 sps:$4 sm:$0xff]  }
   0xd   :  { %384 = vmatprep.subr.bf16.mxu1 %v3073_v14  ;;  %v3540_v35 = vld [vmem:[%s5102_s2 + $0x34] ss:$8 sps:$4 sm:$0xff]   ;;  %v3552_v37 = vld [vmem:[%s5102_s2 + $0x230] ss:$8 sps:$4 sm:$0xff]   ;;  %v3557_v38 = vld [vmem:[%s5102_s2 + $0x224] ss:$8 sps:$4 sm:$0xff]  }
   0xe   :  { %v3564_v39 = vld [vmem:[%s5102_s2 + $0x24] ss:$8 sps:$4 sm:$0xff]   ;;  %v3569_v40 = vld [vmem:[%s5102_s2 + $0x20] ss:$8 sps:$4 sm:$0xff]   ;;  %v3583_v42 = vld [vmem:[%s5102_s2 + $0x214] ss:$8 sps:$4 sm:$0xff]  }
   0xf   :  { %336 = vmatpush1.bf16.msra.mxu0 %v3075_v15  ;;  %v3576_v41 = vld [vmem:[%s5102_s2 + $0x220] ss:$8 sps:$4 sm:$0xff]   ;;  %v3588_v43 = vld [vmem:[%s5102_s2 + $0x14] ss:$8 sps:$4 sm:$0xff]   ;;  %v3593_v44 = vld [vmem:[%s5102_s2 + $0x10] ss:$8 sps:$4 sm:$0xff]  }
  0x10   :  { %385 = vmatpush1.bf16.msra.mxu1 %v3076_v16  ;;  %337 = vmatprep.subr.bf16.mxu0 %v3077_v17  ;;  %v3600_v45 = vld [vmem:[%s5102_s2 + $0x210] ss:$8 sps:$4 sm:$0xff]   ;;  %v3605_v46 = vld [vmem:[%s5102_s2 + $0x204] ss:$8 sps:$4 sm:$0xff]   ;;  %v3617_v48 = vld [vmem:[%s5102_s2] ss:$8 sps:$4 sm:$0xff]  }
  0x11   :  { %624 = vmatprep.subr.bf16.mxu1 %v3082_v18  ;;  %v3612_v47 = vld [vmem:[%s5102_s2 + $0x4] ss:$8 sps:$4 sm:$0xff]   ;;  %v3627_v50 = vld [vmem:[%s5102_s2 + $0x200] ss:$8 sps:$4 sm:$0xff]   ;;  %v3632_v51 = vld [vmem:[%s5102_s2 + $0x1f4] ss:$8 sps:$4 sm:$0xff]  }
  0x12   :  { %v72_v49 = vld [vmem:[%s5103_s1] sm:$0x33]  ;;  %v3639_v53 = vld [vmem:[%s5102_s2 + $0xf4] ss:$8 sps:$4 sm:$0xff]   ;;  %v3644_v54 = vld [vmem:[%s5102_s2 + $0xf0] ss:$8 sps:$4 sm:$0xff]  }
  0x13   :  { %2671 = vmatmul.mubr.msk.bf16.vlgmr.msra.gmra.mxu1 %vm325_vm0, %v3079_v19  ;;  %338 = vmatpush1.bf16.msra.mxu0 %v3458_v21  ;;  %v2629_v52 = vcombine.high %v72_v49, %v72_v49  ;;  %v3651_v55 = vld [vmem:[%s5102_s2 + $0x1f0] ss:$8 sps:$4 sm:$0xff]   ;;  %v3656_v56 = vld [vmem:[%s5102_s2 + $0x1e4] ss:$8 sps:$4 sm:$0xff]   ;;  %v3668_v58 = vld [vmem:[%s5102_s2 + $0xe0] ss:$8 sps:$4 sm:$0xff]   ;;  %v2628_v9 = vcombine.low %v72_v49, %v72_v49 }
  0x14   :  { %625 = vmatpush1.bf16.msra.mxu1 %v3080_v20  ;;  %339 = vmatprep.subr.bf16.mxu0 %v3463_v22  ;;  %v3663_v57 = vld [vmem:[%s5102_s2 + $0xe4] ss:$8 sps:$4 sm:$0xff]   ;;  %v3675_v59 = vld [vmem:[%s5102_s2 + $0x1e0] ss:$8 sps:$4 sm:$0xff]   ;;  %v3680_v60 = vld [vmem:[%s5102_s2 + $0x1d4] ss:$8 sps:$4 sm:$0xff]  }
  0x15   :  { %626 = vmatprep.subr.bf16.mxu1 %v3468_v23  ;;  %361 = vmatprep.mubr.bf16.mxu0 %v2629_v52  ;;  %v3687_v61 = vld [vmem:[%s5102_s2 + $0xd4] ss:$8 sps:$4 sm:$0xff]   ;;  %v3692_v62 = vld [vmem:[%s5104_s0] sm:$0x33]  ;;  %v3701_v0 = vld [vmem:[%s5102_s2 + $0xd0] ss:$8 sps:$4 sm:$0xff]  }
  0x16   :  { %v2673_v63 = vcombine.high %v3692_v62, %v3692_v62  ;;  %v3706_v2 = vld [vmem:[%s5102_s2 + $0x1d0] ss:$8 sps:$4 sm:$0xff]   ;;  %v3713_v3 = vld [vmem:[%s5102_s2 + $0x1c4] ss:$8 sps:$4 sm:$0xff]   ;;  %v3725_v5 = vld [vmem:[%s5102_s2 + $0xc0] ss:$8 sps:$4 sm:$0xff]  }
  0x17   :  { %340 = vmatpush1.bf16.msra.mxu0 %v3480_v25  ;;  %v3718_v4 = vld [vmem:[%s5102_s2 + $0xc4] ss:$8 sps:$4 sm:$0xff]   ;;  %v3730_v6 = vld [vmem:[%s5102_s2 + $0x1c0] ss:$8 sps:$4 sm:$0xff]   ;;  %v3737_v7 = vld [vmem:[%s5102_s2 + $0xb4] ss:$8 sps:$4 sm:$0xff]  }
  0x18   :  { %627 = vmatpush1.bf16.msra.mxu1 %v3474_v24  ;;  %341 = vmatprep.subr.bf16.mxu0 %v3487_v26  ;;  %v3742_v8 = vld [vmem:[%s5102_s2 + $0x134] ss:$8 sps:$4 sm:$0xff]   ;;  %v3749_v10 = vld [vmem:[%s5102_s2 + $0xb0] ss:$8 sps:$4 sm:$0xff]   ;;  %v3761_v12 = vld [vmem:[%s5102_s2 + $0xa4] ss:$8 sps:$4 sm:$0xff]  }
  0x19   :  { %628 = vmatprep.subr.bf16.mxu1 %v3492_v27  ;;  %656 = vmatprep.mubr.bf16.mxu1 %v2673_v63  ;;  %v3754_v11 = vld [vmem:[%s5102_s2 + $0x130] ss:$8 sps:$4 sm:$0xff]   ;;  %5200 = vst [vmem:[#allocation2_spill] sm:$0xff] %v3761_v12  ;;  %v3766_v13 = vld [vmem:[%s5102_s2 + $0x124] ss:$8 sps:$4 sm:$0xff]  }
  0x1a   :  { %5201 = vst [vmem:[#allocation3_spill] sm:$0xff] %v3766_v13  ;;  %v3771_v14 = vld [vmem:[%s5102_s2 + $0xa0] ss:$8 sps:$4 sm:$0xff]   ;;  %v3783_v16 = vld [vmem:[%s5102_s2 + $0x94] ss:$8 sps:$4 sm:$0xff]  }
  0x1b   :  { %342 = vmatpush1.bf16.msra.mxu0 %v3504_v29  ;;  %5202 = vst [vmem:[#allocation4_spill] sm:$0xff] %v3771_v14  ;;  %v3778_v15 = vld [vmem:[%s5102_s2 + $0x120] ss:$8 sps:$4 sm:$0xff]   ;;  %5204 = vst [vmem:[#allocation6_spill] sm:$0xff] %v3783_v16  ;;  %v3790_v17 = vld [vmem:[%s5102_s2 + $0x114] ss:$8 sps:$4 sm:$0xff]  }
  0x1c   :  { %629 = vmatpush1.bf16.msra.mxu1 %v3497_v28  ;;  %343 = vmatprep.subr.bf16.mxu0 %v3509_v30  ;;  %5203 = vst [vmem:[#allocation5_spill] sm:$0xff] %v3778_v15  ;;  %5205 = vst [vmem:[#allocation7_spill] sm:$0xff] %v3790_v17  ;;  %v3796_v18 = vld [vmem:[%s5102_s2 + $0x90] ss:$8 sps:$4 sm:$0xff]   ;;  %v3810_v20 = vld [vmem:[%s5102_s2 + $0x84] ss:$8 sps:$4 sm:$0xff]  }
  0x1d   :  { %630 = vmatprep.subr.bf16.mxu1 %v3516_v31  ;;  %5206 = vst [vmem:[#allocation8_spill] sm:$0xff] %v3796_v18  ;;  %v3803_v19 = vld [vmem:[%s5102_s2 + $0x110] ss:$8 sps:$4 sm:$0xff]   ;;  %5208 = vst [vmem:[#allocation10_spill] sm:$0xff] %v3810_v20  ;;  %v3815_v49 = vld [vmem:[%s5102_s2 + $0x104] ss:$8 sps:$4 sm:$0xff]  }
  0x1e   :  { %5207 = vst [vmem:[#allocation9_spill] sm:$0xff] %v3803_v19  ;;  %5209 = vst [vmem:[#allocation11_spill] sm:$0xff] %v3815_v49  ;;  %v3820_v52 = vld [vmem:[%s5102_s2 + $0x80] ss:$8 sps:$4 sm:$0xff]  }
  0x1f   :  { %344 = vmatpush1.bf16.msra.mxu0 %v3528_v33  ;;  %5210 = vst [vmem:[#allocation12_spill] sm:$0xff] %v3820_v52  ;;  %v3827_v63 = vld [vmem:[%s5102_s2 + $0x100] ss:$8 sps:$4 sm:$0xff]  }
  0x20   :  { %631 = vmatpush1.bf16.msra.mxu1 %v3521_v32  ;;  %345 = vmatprep.subr.bf16.mxu0 %v3535_v34  ;;  %5211 = vst [vmem:[#allocation13_spill] sm:$0xff] %v3827_v63 }
  0x21   :  { %632 = vmatprep.subr.bf16.mxu1 %v3540_v35 }
  0x23   :  { %346 = vmatpush2.bf16.msra.mxu0 %v3552_v37 }
  0x24   :  { %633 = vmatpush1.bf16.msra.mxu1 %v3545_v36  ;;  %347 = vmatprep.subr.bf16.mxu0 %v3557_v38 }
  0x25   :  { %634 = vmatprep.subr.bf16.mxu1 %v3564_v39 }
  0x27   :  { %348 = vmatpush2.bf16.msra.mxu0 %v3576_v41 }
  0x28   :  { %635 = vmatpush1.bf16.msra.mxu1 %v3569_v40  ;;  %349 = vmatprep.subr.bf16.mxu0 %v3583_v42 }
  0x29   :  { %636 = vmatprep.subr.bf16.mxu1 %v3588_v43 }
  0x2b   :  { %350 = vmatpush2.bf16.msra.mxu0 %v3600_v45 }
  0x2c   :  { %637 = vmatpush1.bf16.msra.mxu1 %v3593_v44  ;;  %351 = vmatprep.subr.bf16.mxu0 %v3605_v46 }
  0x2d   :  { %638 = vmatprep.subr.bf16.mxu1 %v3612_v47 }
  0x2f   :  { %352 = vmatpush2.bf16.msra.mxu0 %v3627_v50 }
  0x30   :  { %639 = vmatpush1.bf16.msra.mxu1 %v3617_v48  ;;  %353 = vmatprep.subr.bf16.mxu0 %v3632_v51 }
  0x31   :  { %640 = vmatprep.subr.bf16.mxu1 %v3639_v53 }
  0x33   :  { %354 = vmatpush2.bf16.msra.mxu0 %v3651_v55 }
  0x34   :  { %641 = vmatpush2.bf16.msra.mxu1 %v3644_v54  ;;  %355 = vmatprep.subr.bf16.mxu0 %v3656_v56 }
  0x35   :  { %642 = vmatprep.subr.bf16.mxu1 %v3663_v57 }
  0x37   :  { %356 = vmatpush2.bf16.msra.mxu0 %v3675_v59 }
  0x38   :  { %643 = vmatpush2.bf16.msra.mxu1 %v3668_v58  ;;  %357 = vmatprep.subr.bf16.mxu0 %v3680_v60 }
  0x39   :  { %644 = vmatprep.subr.bf16.mxu1 %v3687_v61 }
  0x3b   :  { %358 = vmatpush2.bf16.msra.mxu0 %v3706_v2 }
  0x3c   :  { %645 = vmatpush2.bf16.msra.mxu1 %v3701_v0  ;;  %359 = vmatprep.subr.bf16.mxu0 %v3713_v3 }
  0x3d   :  { %646 = vmatprep.subr.bf16.mxu1 %v3718_v4 }
  0x3f   :  { %360 = vmatpush2.bf16.msra.mxu0 %v3730_v6 }
  0x40   :  { %647 = vmatpush2.bf16.msra.mxu1 %v3725_v5  ;;  %673 = vmatprep.subr.bf16.mxu0 %v3742_v8 }
  0x41   :  { %648 = vmatprep.subr.bf16.mxu1 %v3737_v7 }
  0x42   :  { %362 = vmatmul.mubr.bf16.vlgmr.msra.gmra.mxu0 %v2628_v9  ;;  %v3834_v9 = vld [vmem:[%s5102_s2 + $0x2f4] ss:$8 sps:$4 sm:$0xff]  }
  0x43   :  { %674 = vmatpush1.bf16.msra.mxu0 %v3754_v11  ;;  %697 = vmatprep.mubr.bf16.mxu0 %v5111_v1  ;;  %5212 = vst [vmem:[#allocation14_spill] sm:$0xff] %v3834_v9  ;;  %v3839_v1 = vld [vmem:[%s5102_s2 + $0x3b4] ss:$8 sps:$4 sm:$0xff]  }
  0x44   :  { %649 = vmatpush2.bf16.msra.mxu1 %v3749_v10  ;;  %675 = vmatprep.subr.bf16.mxu0 %v3766_v13  ;;  %5213 = vst [vmem:[#allocation15_spill] sm:$0xff] %v3839_v1 }
  0x45   :  { %650 = vmatprep.subr.bf16.mxu1 %v3761_v12 }
  0x47   :  { %676 = vmatpush1.bf16.msra.mxu0 %v3778_v15 }
  0x48   :  { %651 = vmatpush2.bf16.msra.mxu1 %v3771_v14  ;;  %677 = vmatprep.subr.bf16.mxu0 %v3790_v17  ;;  %v3916_v17 = vld [vmem:[%s5102_s2 + $0x2c4] ss:$8 sps:$4 sm:$0xff]   ;;  %v4030_v14 = vld [vmem:[%s5102_s2 + $0x280] ss:$8 sps:$4 sm:$0xff]  }
  0x49   :  { %652 = vmatprep.subr.bf16.mxu1 %v3783_v16  ;;  %5225 = vst [vmem:[#allocation26_spill] sm:$0xff] %v3916_v17  ;;  %5243 = vst [vmem:[#allocation44_spill] sm:$0xff] %v4030_v14 }
  0x4b   :  { %678 = vmatpush1.bf16.msra.mxu0 %v3803_v19  ;;  %v3178_v19 = vld [vmem:[%s5104_s0 + $0x8] ss:$0 sps:$4 sm:$0x33]  }
  0x4c   :  { %653 = vmatpush2.bf16.msra.mxu1 %v3796_v18  ;;  %679 = vmatprep.subr.bf16.mxu0 %v3815_v49  ;;  %v2672_v18 = vcombine.low %v3692_v62, %v3692_v62  ;;  %v3849_v49 = vld [vmem:[%s5102_s2 + $0x2f0] ss:$8 sps:$4 sm:$0xff]   ;;  %v3863_v62 = vld [vmem:[%s5102_s2 + $0x2e4] ss:$8 sps:$4 sm:$0xff]  }
  0x4d   :  { %654 = vmatprep.subr.bf16.mxu1 %v3810_v20  ;;  %5214 = vst [vmem:[#allocation16_spill] sm:$0xff] %v3849_v49  ;;  %v3856_v20 = vld [vmem:[%s5102_s2 + $0x3b0] ss:$8 sps:$4 sm:$0xff]   ;;  %5216 = vst [vmem:[#allocation18_spill] sm:$0xff] %v3863_v62 }
  0x4e   :  { %5215 = vst [vmem:[#allocation17_spill] sm:$0xff] %v3856_v20 }
  0x4f   :  { %680 = vmatpush1.bf16.msra.mxu0 %v3827_v63  ;;  %v3873_v63 = vld [vmem:[%s5102_s2 + $0x2e0] ss:$8 sps:$4 sm:$0xff]  }
  0x50   :  { %655 = vmatpush2.bf16.msra.mxu1 %v3820_v52  ;;  %983 = vmatprep.subr.bf16.mxu0 %v3834_v9  ;;  %v3868_v52 = vld [vmem:[%s5102_s2 + $0x3a4] ss:$8 sps:$4 sm:$0xff]   ;;  %5218 = vst [vmem:[#allocation20_spill] sm:$0xff] %v3873_v63  ;;  %v3884_v9 = vld [vmem:[%s5102_s2 + $0x3a0] ss:$8 sps:$4 sm:$0xff]  }
  0x51   :  { %1032 = vmatprep.subr.bf16.mxu1 %v3839_v1  ;;  %5217 = vst [vmem:[#allocation19_spill] sm:$0xff] %v3868_v52  ;;  %v3206_v1 = vld [vmem:[%s5104_s0 + $0x8] ss:$0 sps:$4 sm:$0x77]   ;;  %5219 = vst [vmem:[#allocation21_spill] sm:$0xff] %v3884_v9 }
  0x52   :  { %2715 = vmatmul.mubr.msk.bf16.vlgmr.msra.gmra.mxu0 %vm325_vm0, %v3178_v19  ;;  %v3896_v19 = vld [vmem:[%s5102_s2 + $0x394] ss:$8 sps:$4 sm:$0xff]   ;;  %v772_v16 = vshrl.u32 %v3206_v1, 16 }
  0x53   :  { %657 = vmatmul.mubr.bf16.vlgmr.msra.gmra.mxu1 %v2672_v18  ;;  %984 = vmatpush1.bf16.msra.mxu0 %v3849_v49  ;;  %v3891_v18 = vld [vmem:[%s5102_s2 + $0x2d4] ss:$8 sps:$4 sm:$0xff]   ;;  %5221 = vst [vmem:[#allocation23_spill] sm:$0xff] %v3896_v19  ;;  %v3902_v49 = vld [vmem:[%s5102_s2 + $0x2d0] ss:$8 sps:$4 sm:$0xff]  }
  0x54   :  { %1033 = vmatpush1.bf16.msra.mxu1 %v3856_v20  ;;  %985 = vmatprep.subr.bf16.mxu0 %v3863_v62  ;;  %5220 = vst [vmem:[#allocation22_spill] sm:$0xff] %v3891_v18  ;;  %v5222_v20 = vmov 0   ;;  %5223 = vst [vmem:[#allocation24_spill] sm:$0xff] %v3902_v49  ;;  %v774_v62 = vshll.u32 %v3206_v1, 16  ;;  %v3945_v1 = vld [vmem:[%s5102_s2 + $0x434] ss:$8 sps:$4 sm:$0xff]  }
  0x55   :  { %1034 = vmatprep.subr.bf16.mxu1 %v3868_v52  ;;  %1056 = vmatprep.mubr.bf16.mxu1 %v5222_v20  ;;  %v3909_v52 = vld [vmem:[%s5102_s2 + $0x390] ss:$8 sps:$4 sm:$0xff]   ;;  %5230 = vst [vmem:[#allocation31_spill] sm:$0xff] %v3945_v1 }
  0x56   :  { %5224 = vst [vmem:[#allocation25_spill] sm:$0xff] %v3909_v52  ;;  %v776_v15 = vrot.slane %v774_v62, 1  ;;  %v3950_v62 = vld [vmem:[%s5102_s2 + $0x2b0] ss:$8 sps:$4 sm:$0xff]  }
  0x57   :  { %986 = vmatpush1.bf16.msra.mxu0 %v3873_v63  ;;  %v3921_v63 = vld [vmem:[%s5102_s2 + $0x384] ss:$8 sps:$4 sm:$0xff]   ;;  %5231 = vst [vmem:[#allocation32_spill] sm:$0xff] %v3950_v62 }
  0x58   :  { %1035 = vmatpush1.bf16.msra.mxu1 %v3884_v9  ;;  %987 = vmatprep.subr.bf16.mxu0 %v3891_v18  ;;  %5226 = vst [vmem:[#allocation27_spill] sm:$0xff] %v3921_v63  ;;  %v3926_v9 = vld [vmem:[%s5102_s2 + $0x2c0] ss:$8 sps:$4 sm:$0xff]   ;;  %v3940_v18 = vld [vmem:[%s5102_s2 + $0x2b4] ss:$8 sps:$4 sm:$0xff]  }
  0x59   :  { %1036 = vmatprep.subr.bf16.mxu1 %v3896_v19  ;;  %5227 = vst [vmem:[#allocation28_spill] sm:$0xff] %v3926_v9  ;;  %v3933_v19 = vld [vmem:[%s5102_s2 + $0x380] ss:$8 sps:$4 sm:$0xff]   ;;  %5229 = vst [vmem:[#allocation30_spill] sm:$0xff] %v3940_v18 }
  0x5a   :  { %5228 = vst [vmem:[#allocation29_spill] sm:$0xff] %v3933_v19 }
  0x5b   :  { %988 = vmatpush1.bf16.msra.mxu0 %v3902_v49  ;;  %v4006_v49 = vld [vmem:[%s5102_s2 + $0x290] ss:$8 sps:$4 sm:$0xff]  }
  0x5c   :  { %1037 = vmatpush1.bf16.msra.mxu1 %v3909_v52  ;;  %989 = vmatprep.subr.bf16.mxu0 %v3916_v17  ;;  %v777_v52 = vor.u32 %v776_v15, %v772_v16  ;;  %v3964_v17 = vld [vmem:[%s5102_s2 + $0x2a4] ss:$8 sps:$4 sm:$0xff]   ;;  %5239 = vst [vmem:[#allocation40_spill] sm:$0xff] %v4006_v49 }
  0x5d   :  { %1038 = vmatprep.subr.bf16.mxu1 %v3921_v63  ;;  %v3957_v63 = vld [vmem:[%s5102_s2 + $0x430] ss:$8 sps:$4 sm:$0xff]   ;;  %5233 = vst [vmem:[#allocation34_spill] sm:$0xff] %v3964_v17  ;;  %v3969_v15 = vld [vmem:[%s5102_s2 + $0x424] ss:$8 sps:$4 sm:$0xff]  }
  0x5e   :  { %5232 = vst [vmem:[#allocation33_spill] sm:$0xff] %v3957_v63  ;;  %5234 = vst [vmem:[#allocation35_spill] sm:$0xff] %v3969_v15  ;;  %v3975_v16 = vld [vmem:[%s5104_s0] sm:$0x77] }
  0x5f   :  { %990 = vmatpush1.bf16.msra.mxu0 %v3926_v9 }
  0x60   :  { %1039 = vmatpush1.bf16.msra.mxu1 %v3933_v19  ;;  %991 = vmatprep.subr.bf16.mxu0 %v3940_v18  ;;  %v3987_v18 = vld [vmem:[%s5102_s2 + $0x420] ss:$8 sps:$4 sm:$0xff]  }
  0x61   :  { %1344 = vmatprep.subr.bf16.mxu1 %v3945_v1  ;;  %v3982_v1 = vld [vmem:[%s5102_s2 + $0x2a0] ss:$8 sps:$4 sm:$0xff]   ;;  %5236 = vst [vmem:[#allocation37_spill] sm:$0xff] %v3987_v18 }
  0x62   :  { %5235 = vst [vmem:[#allocation36_spill] sm:$0xff] %v3982_v1 }
  0x63   :  { %2799 = vmatmul.mubr.msk.bf16.vlgmr.msra.gmra.mxu1 %vm325_vm0, %v777_v52  ;;  %992 = vmatpush1.bf16.msra.mxu0 %v3950_v62  ;;  %v2757_v52 = vcombine.high %v3975_v16, %v3975_v16  ;;  %v4001_v62 = vld [vmem:[%s5102_s2 + $0x414] ss:$8 sps:$4 sm:$0xff]  }
  0x64   :  { %1345 = vmatpush1.bf16.msra.mxu1 %v3957_v63  ;;  %993 = vmatprep.subr.bf16.mxu0 %v3964_v17  ;;  %v3996_v63 = vld [vmem:[%s5102_s2 + $0x294] ss:$8 sps:$4 sm:$0xff]   ;;  %5238 = vst [vmem:[#allocation39_spill] sm:$0xff] %v4001_v62 }
  0x65   :  { %1346 = vmatprep.subr.bf16.mxu1 %v3969_v15  ;;  %5237 = vst [vmem:[#allocation38_spill] sm:$0xff] %v3996_v63  ;;  %v765_v19 = vshrl.u32 %v2757_v52, 16  ;;  %v767_v9 = vshll.u32 %v2757_v52, 16  ;;  %v4013_v15 = vld [vmem:[%s5102_s2 + $0x410] ss:$8 sps:$4 sm:$0xff]  }
  0x66   :  { %5240 = vst [vmem:[#allocation41_spill] sm:$0xff] %v4013_v15  ;;  %v4020_v52 = vld [vmem:[%s5102_s2 + $0x284] ss:$8 sps:$4 sm:$0xff]  }
  0x67   :  { %994 = vmatpush1.bf16.msra.mxu0 %v3982_v1  ;;  %v769_v17 = vrot.slane %v767_v9, 1  ;;  %5241 = vst [vmem:[#allocation42_spill] sm:$0xff] %v4020_v52  ;;  %v4025_v1 = vld [vmem:[%s5102_s2 + $0x404] ss:$8 sps:$4 sm:$0xff]   ;;  %v4037_v9 = vld [vmem:[%s5102_s2 + $0x400] ss:$8 sps:$4 sm:$0xff]  }
  0x68   :  { %1347 = vmatpush1.bf16.msra.mxu1 %v3987_v18  ;;  %995 = vmatprep.subr.bf16.mxu0 %v3996_v63  ;;  %5242 = vst [vmem:[#allocation43_spill] sm:$0xff] %v4025_v1  ;;  %5244 = vst [vmem:[#allocation45_spill] sm:$0xff] %v4037_v9 }
  0x69   :  { %1348 = vmatprep.subr.bf16.mxu1 %v4001_v62  ;;  %v770_v18 = vor.u32 %v769_v17, %v765_v19  ;;  %v4042_v62 = vld [vmem:[%s5102_s2 + $0x374] ss:$8 sps:$4 sm:$0xff]   ;;  %v4054_v19 = vld [vmem:[%s5103_s1] sm:$0x77] }
  0x6a   :  { %5245 = vst [vmem:[#allocation46_spill] sm:$0xff] %v4042_v62  ;;  %v4049_v17 = vld [vmem:[%s5102_s2 + $0x3f4] ss:$8 sps:$4 sm:$0xff]  }
  0x6b   :  { %996 = vmatpush1.bf16.msra.mxu0 %v4006_v49  ;;  %5246 = vst [vmem:[#allocation47_spill] sm:$0xff] %v4049_v17  ;;  %1015 = vmatprep.mubr.bf16.mxu0 %v770_v18  ;;  %v4068_v18 = vld [vmem:[%s5102_s2 + $0x3f0] ss:$8 sps:$4 sm:$0xff]  }
  0x6c   :  { %1349 = vmatpush1.bf16.msra.mxu1 %v4013_v15  ;;  %997 = vmatprep.subr.bf16.mxu0 %v4020_v52  ;;  %v2841_v15 = vcombine.high %v4054_v19, %v4054_v19  ;;  %5248 = vst [vmem:[#allocation49_spill] sm:$0xff] %v4068_v18 }
  0x6d   :  { %1350 = vmatprep.subr.bf16.mxu1 %v4025_v1  ;;  %v4063_v1 = vld [vmem:[%s5102_s2 + $0x370] ss:$8 sps:$4 sm:$0xff]  }
  0x6e   :  { %5247 = vst [vmem:[#allocation48_spill] sm:$0xff] %v4063_v1  ;;  %v1126_v52 = vshrl.u32 %v2841_v15, 16  ;;  %v1128_v49 = vshll.u32 %v2841_v15, 16  ;;  %v4104_v15 = vld [vmem:[%s5102_s2 + $0x3d4] ss:$8 sps:$4 sm:$0xff]  }
  0x6f   :  { %998 = vmatpush1.bf16.msra.mxu0 %v4030_v14  ;;  %v4075_v14 = vld [vmem:[%s5102_s2 + $0x364] ss:$8 sps:$4 sm:$0xff]   ;;  %5254 = vst [vmem:[#allocation55_spill] sm:$0xff] %v4104_v15 }
  0x70   :  { %1351 = vmatpush1.bf16.msra.mxu1 %v4037_v9  ;;  %999 = vmatprep.subr.bf16.mxu0 %v4042_v62  ;;  %5249 = vst [vmem:[#allocation50_spill] sm:$0xff] %v4075_v14  ;;  %v4080_v9 = vld [vmem:[%s5102_s2 + $0x3e4] ss:$8 sps:$4 sm:$0xff]   ;;  %v1130_v63 = vrot.slane %v1128_v49, 1  ;;  %v4092_v62 = vld [vmem:[%s5102_s2 + $0x3e0] ss:$8 sps:$4 sm:$0xff]  }
  0x71   :  { %1352 = vmatprep.subr.bf16.mxu1 %v4049_v17  ;;  %5250 = vst [vmem:[#allocation51_spill] sm:$0xff] %v4080_v9  ;;  %v4087_v17 = vld [vmem:[%s5102_s2 + $0x360] ss:$8 sps:$4 sm:$0xff]   ;;  %5252 = vst [vmem:[#allocation53_spill] sm:$0xff] %v4092_v62  ;;  %v4099_v49 = vld [vmem:[%s5102_s2 + $0x354] ss:$8 sps:$4 sm:$0xff]  }
  0x72   :  { %5251 = vst [vmem:[#allocation52_spill] sm:$0xff] %v4087_v17  ;;  %5253 = vst [vmem:[#allocation54_spill] sm:$0xff] %v4099_v49 }
  0x73   :  { %1000 = vmatpush2.bf16.msra.mxu0 %v4063_v1 }
  0x74   :  { %1353 = vmatpush1.bf16.msra.mxu1 %v4068_v18  ;;  %1001 = vmatprep.subr.bf16.mxu0 %v4075_v14  ;;  %v1131_v18 = vor.u32 %v1130_v63, %v1126_v52  ;;  %v4116_v14 = vld [vmem:[%s5102_s2 + $0x3d0] ss:$8 sps:$4 sm:$0xff]   ;;  %v4123_v63 = vld [vmem:[%s5102_s2 + $0x344] ss:$8 sps:$4 sm:$0xff]  }
  0x75   :  { %1354 = vmatprep.subr.bf16.mxu1 %v4080_v9  ;;  %v4111_v9 = vld [vmem:[%s5102_s2 + $0x350] ss:$8 sps:$4 sm:$0xff]   ;;  %5256 = vst [vmem:[#allocation57_spill] sm:$0xff] %v4116_v14  ;;  %5257 = vst [vmem:[#allocation58_spill] sm:$0xff] %v4123_v63  ;;  %v4128_v52 = vld [vmem:[%s5102_s2 + $0x3c4] ss:$8 sps:$4 sm:$0xff]  }
  0x76   :  { %1376 = vmatprep.mubr.bf16.mxu1 %v1131_v18  ;;  %5255 = vst [vmem:[#allocation56_spill] sm:$0xff] %v4111_v9  ;;  %5258 = vst [vmem:[#allocation59_spill] sm:$0xff] %v4128_v52  ;;  %v4135_v18 = vld [vmem:[%s5102_s2 + $0x340] ss:$8 sps:$4 sm:$0xff]  }
  0x77   :  { %1002 = vmatpush2.bf16.msra.mxu0 %v4087_v17  ;;  %5259 = vst [vmem:[#allocation60_spill] sm:$0xff] %v4135_v18 }
  0x78   :  { %1355 = vmatpush1.bf16.msra.mxu1 %v4092_v62  ;;  %1003 = vmatprep.subr.bf16.mxu0 %v4099_v49  ;;  %v2756_v49 = vcombine.low %v3975_v16, %v3975_v16  ;;  %v4197_v16 = vld [vmem:[%s5102_s2 + $0x314] ss:$8 sps:$4 sm:$0xff]  }
  0x79   :  { %1356 = vmatprep.subr.bf16.mxu1 %v4104_v15  ;;  %v4140_v15 = vld [vmem:[%s5102_s2 + $0x3c0] ss:$8 sps:$4 sm:$0xff]   ;;  %5269 = vst [vmem:[#allocation70_spill] sm:$0xff] %v4197_v16 }
  0x7a   :  { %5260 = vst [vmem:[#allocation61_spill] sm:$0xff] %v4140_v15  ;;  %v758_v62 = vshrl.u32 %v2756_v49, 16 }
  0x7b   :  { %1004 = vmatpush2.bf16.msra.mxu0 %v4111_v9  ;;  %v4147_v9 = vld [vmem:[%s5102_s2 + $0x334] ss:$8 sps:$4 sm:$0xff]  }
  0x7c   :  { %1357 = vmatpush1.bf16.msra.mxu1 %v4116_v14  ;;  %1005 = vmatprep.subr.bf16.mxu0 %v4123_v63  ;;  %5261 = vst [vmem:[#allocation62_spill] sm:$0xff] %v4147_v9  ;;  %v4152_v14 = vld [vmem:[%s5102_s2 + $0x4b4] ss:$8 sps:$4 sm:$0xff]   ;;  %v4159_v63 = vld [vmem:[%s5102_s2 + $0x330] ss:$8 sps:$4 sm:$0xff]  }
  0x7d   :  { %1358 = vmatprep.subr.bf16.mxu1 %v4128_v52  ;;  %5262 = vst [vmem:[#allocation63_spill] sm:$0xff] %v4152_v14  ;;  %5263 = vst [vmem:[#allocation64_spill] sm:$0xff] %v4159_v63  ;;  %v4164_v52 = vld [vmem:[%s5102_s2 + $0x4b0] ss:$8 sps:$4 sm:$0xff]  }
  0x7e   :  { %5264 = vst [vmem:[#allocation65_spill] sm:$0xff] %v4164_v52 }
  0x7f   :  { %1006 = vmatpush2.bf16.msra.mxu0 %v4135_v18  ;;  %v4171_v18 = vld [vmem:[%s5102_s2 + $0x324] ss:$8 sps:$4 sm:$0xff]  }
  0x80   :  { %1359 = vmatpush1.bf16.msra.mxu1 %v4140_v15  ;;  %1007 = vmatprep.subr.bf16.mxu0 %v4147_v9  ;;  %5265 = vst [vmem:[#allocation66_spill] sm:$0xff] %v4171_v18  ;;  %v4176_v15 = vld [vmem:[%s5102_s2 + $0x4a4] ss:$8 sps:$4 sm:$0xff]   ;;  %v4190_v9 = vld [vmem:[%s5102_s2 + $0x4a0] ss:$8 sps:$4 sm:$0xff]  }
  0x81   :  { %1360 = vmatprep.subr.bf16.mxu1 %v4152_v14  ;;  %5266 = vst [vmem:[#allocation67_spill] sm:$0xff] %v4176_v15  ;;  %v4185_v14 = vld [vmem:[%s5102_s2 + $0x320] ss:$8 sps:$4 sm:$0xff]   ;;  %5268 = vst [vmem:[#allocation69_spill] sm:$0xff] %v4190_v9 }
  0x82   :  { %5267 = vst [vmem:[#allocation68_spill] sm:$0xff] %v4185_v14 }
  0x83   :  { %1008 = vmatpush2.bf16.msra.mxu0 %v4159_v63  ;;  %v760_v63 = vshll.u32 %v2756_v49, 16  ;;  %v4245_v49 = vld [vmem:[%s5102_s2 + $0x474] ss:$8 sps:$4 sm:$0xff]  }
  0x84   :  { %1361 = vmatpush2.bf16.msra.mxu1 %v4164_v52  ;;  %1009 = vmatprep.subr.bf16.mxu0 %v4171_v18  ;;  %v4202_v52 = vld [vmem:[%s5102_s2 + $0x494] ss:$8 sps:$4 sm:$0xff]   ;;  %v4209_v18 = vld [vmem:[%s5102_s2 + $0x310] ss:$8 sps:$4 sm:$0xff]   ;;  %5277 = vst [vmem:[#allocation78_spill] sm:$0xff] %v4245_v49 }
  0x85   :  { %1362 = vmatprep.subr.bf16.mxu1 %v4176_v15  ;;  %5270 = vst [vmem:[#allocation71_spill] sm:$0xff] %v4202_v52  ;;  %5271 = vst [vmem:[#allocation72_spill] sm:$0xff] %v4209_v18  ;;  %v4214_v15 = vld [vmem:[%s5102_s2 + $0x490] ss:$8 sps:$4 sm:$0xff]   ;;  %v762_v17 = vrot.slane %v760_v63, 1 }
  0x86   :  { %5272 = vst [vmem:[#allocation73_spill] sm:$0xff] %v4214_v15  ;;  %v4250_v63 = vld [vmem:[%s5102_s2 + $0x4f4] ss:$8 sps:$4 sm:$0xff]  }
  0x87   :  { %1010 = vmatpush2.bf16.msra.mxu0 %v4185_v14  ;;  %v4221_v14 = vld [vmem:[%s5102_s2 + $0x304] ss:$8 sps:$4 sm:$0xff]   ;;  %5278 = vst [vmem:[#allocation79_spill] sm:$0xff] %v4250_v63 }
  0x88   :  { %1363 = vmatpush2.bf16.msra.mxu1 %v4190_v9  ;;  %1011 = vmatprep.subr.bf16.mxu0 %v4197_v16  ;;  %5273 = vst [vmem:[#allocation74_spill] sm:$0xff] %v4221_v14  ;;  %v4226_v9 = vld [vmem:[%s5102_s2 + $0x484] ss:$8 sps:$4 sm:$0xff]   ;;  %v4238_v16 = vld [vmem:[%s5102_s2 + $0x480] ss:$8 sps:$4 sm:$0xff]  }
  0x89   :  { %1364 = vmatprep.subr.bf16.mxu1 %v4202_v52  ;;  %5274 = vst [vmem:[#allocation75_spill] sm:$0xff] %v4226_v9  ;;  %v4233_v52 = vld [vmem:[%s5102_s2 + $0x300] ss:$8 sps:$4 sm:$0xff]   ;;  %5276 = vst [vmem:[#allocation77_spill] sm:$0xff] %v4238_v16 }
  0x8a   :  { %5275 = vst [vmem:[#allocation76_spill] sm:$0xff] %v4233_v52 }
  0x8b   :  { %1012 = vmatpush2.bf16.msra.mxu0 %v4209_v18 }
  0x8c   :  { %1365 = vmatpush2.bf16.msra.mxu1 %v4214_v15  ;;  %1013 = vmatprep.subr.bf16.mxu0 %v4221_v14  ;;  %v763_v15 = vor.u32 %v762_v17, %v758_v62  ;;  %v4257_v14 = vld [vmem:[%s5102_s2 + $0x470] ss:$8 sps:$4 sm:$0xff]   ;;  %v4269_v62 = vld [vmem:[%s5102_s2 + $0x464] ss:$8 sps:$4 sm:$0xff]  }
  0x8d   :  { %1366 = vmatprep.subr.bf16.mxu1 %v4226_v9  ;;  %5279 = vst [vmem:[#allocation80_spill] sm:$0xff] %v4257_v14  ;;  %v4262_v9 = vld [vmem:[%s5102_s2 + $0x4f0] ss:$8 sps:$4 sm:$0xff]   ;;  %5281 = vst [vmem:[#allocation82_spill] sm:$0xff] %v4269_v62  ;;  %v4274_v17 = vld [vmem:[%s5102_s2 + $0x4e4] ss:$8 sps:$4 sm:$0xff]  }
  0x8e   :  { %5280 = vst [vmem:[#allocation81_spill] sm:$0xff] %v4262_v9  ;;  %5282 = vst [vmem:[#allocation83_spill] sm:$0xff] %v4274_v17 }
  0x8f   :  { %1014 = vmatpush2.bf16.msra.mxu0 %v4233_v52 }
  0x90   :  { %1367 = vmatpush2.bf16.msra.mxu1 %v4238_v16  ;;  %1393 = vmatprep.subr.bf16.mxu0 %v4250_v63  ;;  %v2840_v16 = vcombine.low %v4054_v19, %v4054_v19  ;;  %v4286_v63 = vld [vmem:[%s5102_s2 + $0x460] ss:$8 sps:$4 sm:$0xff]   ;;  %v4298_v19 = vld [vmem:[%s5102_s2 + $0x454] ss:$8 sps:$4 sm:$0xff]  }
  0x91   :  { %1368 = vmatprep.subr.bf16.mxu1 %v4245_v49  ;;  %v3304_v49 = vld [vmem:[%s5103_s1 + $0x8] ss:$0 sps:$4 sm:$0x77]   ;;  %5283 = vst [vmem:[#allocation84_spill] sm:$0xff] %v4286_v63  ;;  %5285 = vst [vmem:[#allocation86_spill] sm:$0xff] %v4298_v19 }
  0x92   :  { %1016 = vmatmul.mubr.bf16.vlgmr.msra.gmra.mxu0 %v763_v15  ;;  %v4291_v15 = vld [vmem:[%s5102_s2 + $0x4e0] ss:$8 sps:$4 sm:$0xff]   ;;  %v1135_v52 = vshll.u32 %v3304_v49, 16  ;;  %v1119_v18 = vshrl.u32 %v2840_v16, 16  ;;  %v1133_v13 = vshrl.u32 %v3304_v49, 16 }
  0x93   :  { %1394 = vmatpush1.bf16.msra.mxu0 %v4262_v9  ;;  %5284 = vst [vmem:[#allocation85_spill] sm:$0xff] %v4291_v15  ;;  %v4303_v9 = vld [vmem:[%s5102_s2 + $0x4d4] ss:$8 sps:$4 sm:$0xff]   ;;  %1417 = vmatprep.mubr.bf16.mxu0 %v5222_v20 }
  0x94   :  { %1369 = vmatpush2.bf16.msra.mxu1 %v4257_v14  ;;  %1395 = vmatprep.subr.bf16.mxu0 %v4274_v17  ;;  %5286 = vst [vmem:[#allocation87_spill] sm:$0xff] %v4303_v9  ;;  %v1121_v14 = vshll.u32 %v2840_v16, 16  ;;  %v4311_v17 = vld [vmem:[%s5102_s2 + $0x450] ss:$8 sps:$4 sm:$0xff]   ;;  %v1137_v12 = vrot.slane %v1135_v52, 1 }
  0x95   :  { %1370 = vmatprep.subr.bf16.mxu1 %v4269_v62  ;;  %v4316_v62 = vld [vmem:[%s5102_s2 + $0x4d0] ss:$8 sps:$4 sm:$0xff]   ;;  %v3328_v49 = vld [vmem:[%s5102_s2 + $0x1b4] ss:$8 sps:$4 sm:$0xff]  }
  0x96   :  { %v1123_v1 = vrot.slane %v1121_v14, 1  ;;  %v1138_v52 = vor.u32 %v1137_v12, %v1133_v13  ;;  %v4347_v16 = vld [vmem:[%s5103_s1 + $0xc] sm:$0x33] }
  0x97   :  { %1396 = vmatpush1.bf16.msra.mxu0 %v4291_v15  ;;  %v4328_v15 = vld [vmem:[%s5102_s2 + $0x4c4] ss:$8 sps:$4 sm:$0xff]   ;;  %v2889_v12 = vcombine.high %v4347_v16, %v4347_v16  ;;  %v3330_v13 = vld [vmem:[%s5102_s2 + $0x1b0] ss:$8 sps:$4 sm:$0xff]  }
  0x98   :  { %1371 = vmatpush2.bf16.msra.mxu1 %v4286_v63  ;;  %1397 = vmatprep.subr.bf16.mxu0 %v4303_v9  ;;  %v4323_v63 = vld [vmem:[%s5102_s2 + $0x444] ss:$8 sps:$4 sm:$0xff]   ;;  %5287 = vst [vmem:[#allocation88_spill] sm:$0xff] %v4328_v15  ;;  %v4335_v9 = vld [vmem:[%s5102_s2 + $0x440] ss:$8 sps:$4 sm:$0xff]   ;;  %v1124_v14 = vor.u32 %v1123_v1, %v1119_v18 }
  0x99   :  { %1372 = vmatprep.subr.bf16.mxu1 %v4298_v19  ;;  %v4340_v19 = vld [vmem:[%s5102_s2 + $0x4c0] ss:$8 sps:$4 sm:$0xff]   ;;  %v3331_v1 = vld [vmem:[%s5102_s2 + $0x270] ss:$8 sps:$4 sm:$0xff]   ;;  %v3332_v18 = vld [vmem:[%s5102_s2 + $0x1a4] ss:$8 sps:$4 sm:$0xff]  }
  0x9b   :  { %1398 = vmatpush1.bf16.msra.mxu0 %v4316_v62 }
  0x9c   :  { %1373 = vmatpush2.bf16.msra.mxu1 %v4311_v17  ;;  %1399 = vmatprep.subr.bf16.mxu0 %v4328_v15  ;;  %v3329_v15 = vld [vmem:[%s5102_s2 + $0x274] ss:$8 sps:$4 sm:$0xff]  }
  0x9d   :  { %1374 = vmatprep.subr.bf16.mxu1 %v4323_v63 }
  0x9f   :  { %1400 = vmatpush1.bf16.msra.mxu0 %v4340_v19 }
  0xa0   :  { %1375 = vmatpush2.bf16.msra.mxu1 %v4335_v9  ;;  %1447 = vmatprep.subr.bf16.mxu0 %v3328_v49  ;;  %v3336_v49 = vld [vmem:[%s5102_s2 + $0x194] ss:$8 sps:$4 sm:$0xff]  }
  0xa1   :  { %1496 = vmatprep.subr.bf16.mxu1 %v3329_v15  ;;  %v3333_v15 = vld [vmem:[%s5102_s2 + $0x264] ss:$8 sps:$4 sm:$0xff]  }
  0xa2   :  { %2883 = vmatmul.mubr.msk.bf16.vlgmr.msra.gmra.mxu0 %vm325_vm0, %v1138_v52  ;;  %v3335_v52 = vld [vmem:[%s5102_s2 + $0x260] ss:$8 sps:$4 sm:$0xff]  }
  0xa3   :  { %1377 = vmatmul.mubr.bf16.vlgmr.msra.gmra.mxu1 %v1124_v14  ;;  %1448 = vmatpush1.bf16.msra.mxu0 %v3330_v13  ;;  %v3334_v14 = vld [vmem:[%s5102_s2 + $0x1a0] ss:$8 sps:$4 sm:$0xff]   ;;  %v3337_v13 = vld [vmem:[%s5102_s2 + $0x254] ss:$8 sps:$4 sm:$0xff]  }
  0xa4   :  { %1497 = vmatpush1.bf16.msra.mxu1 %v3331_v1  ;;  %1449 = vmatprep.subr.bf16.mxu0 %v3332_v18  ;;  %v3339_v1 = vld [vmem:[%s5102_s2 + $0x250] ss:$8 sps:$4 sm:$0xff]   ;;  %v3340_v18 = vld [vmem:[%s5102_s2 + $0x184] ss:$8 sps:$4 sm:$0xff]  }
  0xa5   :  { %1498 = vmatprep.subr.bf16.mxu1 %v3333_v15  ;;  %1520 = vmatprep.mubr.bf16.mxu1 %v5222_v20  ;;  %v3341_v15 = vld [vmem:[%s5102_s2 + $0x244] ss:$8 sps:$4 sm:$0xff]  }
  0xa6   :  { %1479 = vmatprep.mubr.bf16.mxu0 %v2889_v12  ;;  %v3338_v12 = vld [vmem:[%s5102_s2 + $0x190] ss:$8 sps:$4 sm:$0xff]  }
  0xa7   :  { %1450 = vmatpush1.bf16.msra.mxu0 %v3334_v14  ;;  %v3305_v14 = vld [vmem:[%s5103_s1 + $0x14] ss:$0 sps:$4 sm:$0x33]  }
  0xa8   :  { %1499 = vmatpush1.bf16.msra.mxu1 %v3335_v52  ;;  %1451 = vmatprep.subr.bf16.mxu0 %v3336_v49  ;;  %v4403_v52 = vld [vmem:[%s5104_s0 + $0xc] sm:$0x33]  ;;  %v3342_v49 = vld [vmem:[%s5102_s2 + $0x180] ss:$8 sps:$4 sm:$0xff]  }
  0xa9   :  { %1500 = vmatprep.subr.bf16.mxu1 %v3337_v13  ;;  %v3343_v13 = vld [vmem:[%s5102_s2 + $0x240] ss:$8 sps:$4 sm:$0xff]  }
  0xab   :  { %1452 = vmatpush1.bf16.msra.mxu0 %v3338_v12  ;;  %v3344_v12 = vld [vmem:[%s5102_s2 + $0x174] ss:$8 sps:$4 sm:$0xff]  }
  0xac   :  { %1501 = vmatpush1.bf16.msra.mxu1 %v3339_v1  ;;  %1453 = vmatprep.subr.bf16.mxu0 %v3340_v18  ;;  %v3345_v1 = vld [vmem:[%s5102_s2 + $0x74] ss:$8 sps:$4 sm:$0xff]   ;;  %v2893_v18 = vcombine.high %v4403_v52, %v4403_v52 }
  0xad   :  { %1502 = vmatprep.subr.bf16.mxu1 %v3341_v15  ;;  %v3346_v15 = vld [vmem:[%s5102_s2 + $0x70] ss:$8 sps:$4 sm:$0xff]  }
  0xaf   :  { %1454 = vmatpush1.bf16.msra.mxu0 %v3342_v49  ;;  %v5317_v49 = vld [vmem:[#allocation31_spill] sm:$0xff] }
  0xb0   :  { %1503 = vmatpush1.bf16.msra.mxu1 %v3343_v13  ;;  %1455 = vmatprep.subr.bf16.mxu0 %v3344_v12 }
  0xb1   :  { %1542 = vmatprep.subr.bf16.mxu1 %v3345_v1 }
  0xb3   :  { %2891 = vmatmul.mubr.msk.bf16.vlgmr.msra.gmra.mxu1 %vm325_vm0, %v3305_v14  ;;  %1456 = vmatpush1.bf16.msra.mxu0 %v3458_v21  ;;  %v5315_v14 = vld [vmem:[#allocation29_spill] sm:$0xff] }
  0xb4   :  { %1543 = vmatpush1.bf16.msra.mxu1 %v3346_v15  ;;  %1457 = vmatprep.subr.bf16.mxu0 %v3463_v22  ;;  %v5319_v15 = vld [vmem:[#allocation33_spill] sm:$0xff] }
  0xb5   :  { %1544 = vmatprep.subr.bf16.mxu1 %v3468_v23  ;;  %1574 = vmatprep.mubr.bf16.mxu1 %v2893_v18  ;;  %v5318_v18 = vld [vmem:[#allocation32_spill] sm:$0xff] }
  0xb7   :  { %1458 = vmatpush1.bf16.msra.mxu0 %v3480_v25  ;;  %v2888_v25 = vcombine.low %v4347_v16, %v4347_v16  ;;  %v5314_v16 = vld [vmem:[#allocation28_spill] sm:$0xff] }
  0xb8   :  { %1545 = vmatpush1.bf16.msra.mxu1 %v3474_v24  ;;  %1459 = vmatprep.subr.bf16.mxu0 %v3487_v26  ;;  %v4479_v26 = vld [vmem:[%s5104_s0 + $0xc] sm:$0x77] }
  0xb9   :  { %1546 = vmatprep.subr.bf16.mxu1 %v3492_v27  ;;  %v5288_v27 = vld [vmem:[#allocation2_spill] sm:$0xff] }
  0xbb   :  { %1460 = vmatpush1.bf16.msra.mxu0 %v3504_v29  ;;  %v2899_v29 = vcombine.high %v4479_v26, %v4479_v26 }
  0xbc   :  { %1547 = vmatpush1.bf16.msra.mxu1 %v3497_v28  ;;  %1461 = vmatprep.subr.bf16.mxu0 %v3509_v30  ;;  %v5289_v28 = vld [vmem:[#allocation3_spill] sm:$0xff]  ;;  %v5290_v30 = vld [vmem:[#allocation4_spill] sm:$0xff] }
  0xbd   :  { %1548 = vmatprep.subr.bf16.mxu1 %v3516_v31  ;;  %v5291_v31 = vld [vmem:[#allocation5_spill] sm:$0xff] }
  0xbf   :  { %1462 = vmatpush1.bf16.msra.mxu0 %v3528_v33  ;;  %v5293_v33 = vld [vmem:[#allocation7_spill] sm:$0xff] }
  0xc0   :  { %1549 = vmatpush1.bf16.msra.mxu1 %v3521_v32  ;;  %1463 = vmatprep.subr.bf16.mxu0 %v3535_v34  ;;  %v5292_v32 = vld [vmem:[#allocation6_spill] sm:$0xff]  ;;  %v1644_v34 = vshll.u32 %v2899_v29, 16 }
  0xc1   :  { %1550 = vmatprep.subr.bf16.mxu1 %v3540_v35  ;;  %v5294_v35 = vld [vmem:[#allocation8_spill] sm:$0xff] }
  0xc3   :  { %1464 = vmatpush2.bf16.msra.mxu0 %v3552_v37  ;;  %v5296_v37 = vld [vmem:[#allocation10_spill] sm:$0xff] }
  0xc4   :  { %1551 = vmatpush1.bf16.msra.mxu1 %v3545_v36  ;;  %1465 = vmatprep.subr.bf16.mxu0 %v3557_v38  ;;  %v5295_v36 = vld [vmem:[#allocation9_spill] sm:$0xff]  ;;  %v5297_v38 = vld [vmem:[#allocation11_spill] sm:$0xff] }
  0xc5   :  { %1552 = vmatprep.subr.bf16.mxu1 %v3564_v39  ;;  %v1642_v39 = vshrl.u32 %v2899_v29, 16  ;;  %v5322_v29 = vld [vmem:[#allocation36_spill] sm:$0xff] }
  0xc7   :  { %1466 = vmatpush2.bf16.msra.mxu0 %v3576_v41  ;;  %v2892_v41 = vcombine.low %v4403_v52, %v4403_v52  ;;  %v5316_v52 = vld [vmem:[#allocation30_spill] sm:$0xff] }
  0xc8   :  { %1553 = vmatpush1.bf16.msra.mxu1 %v3569_v40  ;;  %1467 = vmatprep.subr.bf16.mxu0 %v3583_v42  ;;  %v1646_v40 = vrot.slane %v1644_v34, 1  ;;  %v3310_v42 = vld [vmem:[%s5104_s0 + $0x14] ss:$0 sps:$4 sm:$0x33]   ;;  %v5327_v34 = vld [vmem:[#allocation41_spill] sm:$0xff] }
  0xc9   :  { %1554 = vmatprep.subr.bf16.mxu1 %v3588_v43  ;;  %v5298_v43 = vld [vmem:[#allocation12_spill] sm:$0xff] }
  0xcb   :  { %1468 = vmatpush2.bf16.msra.mxu0 %v3600_v45  ;;  %v5300_v45 = vld [vmem:[#allocation14_spill] sm:$0xff] }
  0xcc   :  { %1555 = vmatpush1.bf16.msra.mxu1 %v3593_v44  ;;  %1469 = vmatprep.subr.bf16.mxu0 %v3605_v46  ;;  %v5299_v44 = vld [vmem:[#allocation13_spill] sm:$0xff]  ;;  %v5301_v46 = vld [vmem:[#allocation15_spill] sm:$0xff] }
  0xcd   :  { %1556 = vmatprep.subr.bf16.mxu1 %v3612_v47  ;;  %v1647_v47 = vor.u32 %v1646_v40, %v1642_v39  ;;  %v5333_v39 = vld [vmem:[#allocation47_spill] sm:$0xff] }
  0xcf   :  { %1470 = vmatpush2.bf16.msra.mxu0 %v3627_v50  ;;  %v4512_v50 = vld [vmem:[%s5103_s1 + $0xc] sm:$0x77] }
  0xd0   :  { %1557 = vmatpush1.bf16.msra.mxu1 %v3617_v48  ;;  %1471 = vmatprep.subr.bf16.mxu0 %v3632_v51  ;;  %v3311_v48 = vld [vmem:[%s5104_s0 + $0x14] ss:$0 sps:$4 sm:$0x77]  }
  0xd1   :  { %1558 = vmatprep.subr.bf16.mxu1 %v3639_v53  ;;  %v5302_v51 = vld [vmem:[#allocation16_spill] sm:$0xff]  ;;  %v5303_v53 = vld [vmem:[#allocation17_spill] sm:$0xff] }
  0xd3   :  { %v4454_v21 = vpop.f32.mrf.mxu1  ;;  %1472 = vmatpush2.bf16.msra.mxu0 %v3651_v55  ;;  %v5305_v55 = vld [vmem:[#allocation19_spill] sm:$0xff] }
  0xd4   :  { %1559 = vmatpush2.bf16.msra.mxu1 %v3644_v54  ;;  %1473 = vmatprep.subr.bf16.mxu0 %v3656_v56  ;;  %v5304_v54 = vld [vmem:[#allocation18_spill] sm:$0xff]  ;;  %v2905_v56 = vcombine.high %v4512_v50, %v4512_v50 }
  0xd5   :  { %v4458_v22 = vpop.f32.mrf.mxu1  ;;  %1560 = vmatprep.subr.bf16.mxu1 %v3663_v57  ;;  %v1651_v57 = vshll.u32 %v3311_v48, 16 }
  0xd7   :  { %v408_v23 = vpop.f32.mrf.mxu1  ;;  %1474 = vmatpush2.bf16.msra.mxu0 %v3675_v59  ;;  %v5307_v59 = vld [vmem:[#allocation21_spill] sm:$0xff] }
  0xd8   :  { %1561 = vmatpush2.bf16.msra.mxu1 %v3668_v58  ;;  %1475 = vmatprep.subr.bf16.mxu0 %v3680_v60  ;;  %v5306_v58 = vld [vmem:[#allocation20_spill] sm:$0xff]  ;;  %v5308_v60 = vld [vmem:[#allocation22_spill] sm:$0xff] }
  0xd9   :  { %v409_v24 = vpop.f32.mrf.mxu1  ;;  %1562 = vmatprep.subr.bf16.mxu1 %v3687_v61  ;;  %v5309_v61 = vld [vmem:[#allocation23_spill] sm:$0xff] }
  0xda   :  { %v5320_v24 = vld [vmem:[#allocation34_spill] sm:$0xff] }
  0xdb   :  { %1476 = vmatpush2.bf16.msra.mxu0 %v3706_v2  ;;  %v1649_v2 = vshrl.u32 %v3311_v48, 16  ;;  %v5337_v48 = vld [vmem:[#allocation51_spill] sm:$0xff] }
  0xdc   :  { %1563 = vmatpush2.bf16.msra.mxu1 %v3701_v0  ;;  %1477 = vmatprep.subr.bf16.mxu0 %v3713_v3  ;;  %v1764_v0 = vshll.u32 %v2905_v56, 16  ;;  %v1653_v3 = vrot.slane %v1651_v57, 1  ;;  %v5338_v57 = vld [vmem:[#allocation52_spill] sm:$0xff] }
  0xdd   :  { %1564 = vmatprep.subr.bf16.mxu1 %v3718_v4  ;;  %v5310_v4 = vld [vmem:[#allocation24_spill] sm:$0xff] }
  0xdf   :  { %1478 = vmatpush2.bf16.msra.mxu0 %v3730_v6  ;;  %v5312_v6 = vld [vmem:[#allocation26_spill] sm:$0xff] }
  0xe0   :  { %1565 = vmatpush2.bf16.msra.mxu1 %v3725_v5  ;;  %1591 = vmatprep.subr.bf16.mxu0 %v3742_v8  ;;  %v5311_v5 = vld [vmem:[#allocation25_spill] sm:$0xff]  ;;  %v1762_v8 = vshrl.u32 %v2905_v56, 16 }
  0xe1   :  { %1566 = vmatprep.subr.bf16.mxu1 %v3737_v7  ;;  %v5313_v7 = vld [vmem:[#allocation27_spill] sm:$0xff] }
  0xe2   :  { %1480 = vmatmul.mubr.bf16.vlgmr.msra.gmra.mxu0 %v2888_v25  ;;  %v5321_v25 = vld [vmem:[#allocation35_spill] sm:$0xff] }
  0xe3   :  { %1592 = vmatpush1.bf16.msra.mxu0 %v3754_v11  ;;  %1615 = vmatprep.mubr.bf16.mxu0 %v5222_v20  ;;  %v1654_v11 = vor.u32 %v1653_v3, %v1649_v2  ;;  %v5342_v2 = vld [vmem:[#allocation56_spill] sm:$0xff]  ;;  %v5343_v3 = vld [vmem:[#allocation57_spill] sm:$0xff] }
  0xe4   :  { %1567 = vmatpush2.bf16.msra.mxu1 %v3749_v10  ;;  %1593 = vmatprep.subr.bf16.mxu0 %v5289_v28  ;;  %v1766_v10 = vrot.slane %v1764_v0, 1  ;;  %v5341_v0 = vld [vmem:[#allocation55_spill] sm:$0xff] }
  0xe5   :  { %1568 = vmatprep.subr.bf16.mxu1 %v5288_v27 }
  0xe6   :  { %v1767_v13 = vor.u32 %v1766_v10, %v1762_v8  ;;  %v5348_v8 = vld [vmem:[#allocation62_spill] sm:$0xff]  ;;  %v5349_v10 = vld [vmem:[#allocation63_spill] sm:$0xff] }
  0xe7   :  { %1594 = vmatpush1.bf16.msra.mxu0 %v5291_v31 }
  0xe8   :  { %1569 = vmatpush2.bf16.msra.mxu1 %v5290_v30  ;;  %1595 = vmatprep.subr.bf16.mxu0 %v5293_v33  ;;  %v5323_v30 = vld [vmem:[#allocation37_spill] sm:$0xff]  ;;  %v5326_v33 = vld [vmem:[#allocation40_spill] sm:$0xff] }
  0xe9   :  { %1570 = vmatprep.subr.bf16.mxu1 %v5292_v32  ;;  %v5324_v32 = vld [vmem:[#allocation38_spill] sm:$0xff] }
  0xeb   :  { %1596 = vmatpush1.bf16.msra.mxu0 %v5295_v36  ;;  %v5329_v36 = vld [vmem:[#allocation43_spill] sm:$0xff] }
  0xec   :  { %1571 = vmatpush2.bf16.msra.mxu1 %v5294_v35  ;;  %1597 = vmatprep.subr.bf16.mxu0 %v5297_v38  ;;  %v5328_v35 = vld [vmem:[#allocation42_spill] sm:$0xff] }
  0xed   :  { %1572 = vmatprep.subr.bf16.mxu1 %v5296_v37  ;;  %v5331_v37 = vld [vmem:[#allocation45_spill] sm:$0xff]  ;;  %v5332_v38 = vld [vmem:[#allocation46_spill] sm:$0xff] }
  0xef   :  { %1598 = vmatpush1.bf16.msra.mxu0 %v5299_v44  ;;  %v5335_v44 = vld [vmem:[#allocation49_spill] sm:$0xff] }
  0xf0   :  { %1573 = vmatpush2.bf16.msra.mxu1 %v5298_v43  ;;  %1660 = vmatprep.subr.bf16.mxu0 %v5300_v45  ;;  %v5334_v43 = vld [vmem:[#allocation48_spill] sm:$0xff] }
  0xf1   :  { %1709 = vmatprep.subr.bf16.mxu1 %v5301_v46 }
  0xf2   :  { %2895 = vmatmul.mubr.msk.bf16.vlgmr.msra.gmra.mxu0 %vm325_vm0, %v3310_v42 }
  0xf3   :  { %1575 = vmatmul.mubr.bf16.vlgmr.msra.gmra.mxu1 %v2892_v41  ;;  %1661 = vmatpush1.bf16.msra.mxu0 %v5302_v51 }
  0xf4   :  { %1710 = vmatpush1.bf16.msra.mxu1 %v5303_v53  ;;  %1662 = vmatprep.subr.bf16.mxu0 %v5304_v54 }
  0xf5   :  { %1711 = vmatprep.subr.bf16.mxu1 %v5305_v55  ;;  %1733 = vmatprep.mubr.bf16.mxu1 %v5222_v20 }
  0xf6   :  { %1692 = vmatprep.mubr.bf16.mxu0 %v1647_v47  ;;  %v5336_v47 = vld [vmem:[#allocation50_spill] sm:$0xff] }
  0xf7   :  { %1663 = vmatpush1.bf16.msra.mxu0 %v5306_v58  ;;  %v5339_v58 = vld [vmem:[#allocation53_spill] sm:$0xff] }
  0xf8   :  { %1712 = vmatpush1.bf16.msra.mxu1 %v5307_v59  ;;  %1664 = vmatprep.subr.bf16.mxu0 %v5308_v60 }
  0xf9   :  { %1713 = vmatprep.subr.bf16.mxu1 %v5309_v61  ;;  %v5340_v61 = vld [vmem:[#allocation54_spill] sm:$0xff] }
  0xfb   :  { %1665 = vmatpush1.bf16.msra.mxu0 %v5310_v4  ;;  %v5344_v4 = vld [vmem:[#allocation58_spill] sm:$0xff] }
  0xfc   :  { %1714 = vmatpush1.bf16.msra.mxu1 %v5311_v5  ;;  %1666 = vmatprep.subr.bf16.mxu0 %v5312_v6  ;;  %v5345_v5 = vld [vmem:[#allocation59_spill] sm:$0xff]  ;;  %v5346_v6 = vld [vmem:[#allocation60_spill] sm:$0xff] }
  0xfd   :  { %1715 = vmatprep.subr.bf16.mxu1 %v5313_v7  ;;  %v5347_v7 = vld [vmem:[#allocation61_spill] sm:$0xff] }
  0xff   :  { %1667 = vmatpush1.bf16.msra.mxu0 %v5314_v16  ;;  %v2898_v16 = vcombine.low %v4479_v26, %v4479_v26  ;;  %v5357_v26 = vld [vmem:[#allocation71_spill] sm:$0xff] }
 0x100   :  { %1716 = vmatpush1.bf16.msra.mxu1 %v5315_v14  ;;  %1668 = vmatprep.subr.bf16.mxu0 %v5316_v52  ;;  %v5350_v14 = vld [vmem:[#allocation64_spill] sm:$0xff]  ;;  %v5351_v52 = vld [vmem:[#allocation65_spill] sm:$0xff] }
 0x101   :  { %1780 = vmatprep.subr.bf16.mxu1 %v5317_v49 }
 0x102   :  { %v363_v12 = vpop.f32.mrf.mxu0 }
 0x103   :  { %2901 = vmatmul.mubr.msk.bf16.vlgmr.msra.gmra.mxu1 %vm325_vm0, %v1654_v11  ;;  %v405_v1 = vadd.f32 %v4454_v21, %v363_v12  ;;  %1669 = vmatpush1.bf16.msra.mxu0 %v5318_v18  ;;  %v5325_v21 = vld [vmem:[#allocation39_spill] sm:$0xff]  ;;  %v1637_v18 = vshll.u32 %v2898_v16, 16 }
 0x104   :  { %1781 = vmatpush1.bf16.msra.mxu1 %v5319_v15  ;;  %v365_v23 = vpop.f32.mrf.mxu0  ;;  %1670 = vmatprep.subr.bf16.mxu0 %v5320_v24  ;;  %v5353_v12 = vld [vmem:[#allocation67_spill] sm:$0xff]  ;;  %v5354_v15 = vld [vmem:[#allocation68_spill] sm:$0xff] }
 0x105   :  { %1782 = vmatprep.subr.bf16.mxu1 %v5321_v25  ;;  %v407_v27 = vadd.f32 %v4458_v22, %v365_v23  ;;  %1812 = vmatprep.mubr.bf16.mxu1 %v1767_v13  ;;  %v5330_v22 = vld [vmem:[#allocation44_spill] sm:$0xff]  ;;  %v5352_v13 = vld [vmem:[#allocation66_spill] sm:$0xff]  ;;  %v5355_v23 = vld [vmem:[#allocation69_spill] sm:$0xff] }
 0x106   :  { %v367_v28 = vpop.f32.mrf.mxu0  ;;  %v5356_v25 = vld [vmem:[#allocation70_spill] sm:$0xff] }
 0x107   :  { %1671 = vmatpush1.bf16.msra.mxu0 %v5322_v29  ;;  %v1639_v28 = vrot.slane %v1637_v18, 1  ;;  %v5358_v29 = vld [vmem:[#allocation72_spill] sm:$0xff]  ;;  %v4761_v18 = vld [vmem:[%s5105_s3 + $0x28] sm:$0xff] }
 0x108   :  { %1783 = vmatpush1.bf16.msra.mxu1 %v5323_v30  ;;  %v368_v31 = vpop.f32.mrf.mxu0  ;;  %1672 = vmatprep.subr.bf16.mxu0 %v5324_v32  ;;  %v5359_v30 = vld [vmem:[#allocation73_spill] sm:$0xff]  ;;  %v5361_v32 = vld [vmem:[#allocation75_spill] sm:$0xff] }
 0x109   :  { %1784 = vmatprep.subr.bf16.mxu1 %v5325_v21  ;;  %v5360_v31 = vld [vmem:[#allocation74_spill] sm:$0xff] }
 0x10b   :  { %1673 = vmatpush1.bf16.msra.mxu0 %v5326_v33  ;;  %v5362_v33 = vld [vmem:[#allocation76_spill] sm:$0xff] }
 0x10c   :  { %1785 = vmatpush1.bf16.msra.mxu1 %v5327_v34  ;;  %1674 = vmatprep.subr.bf16.mxu0 %v5328_v35  ;;  %v5363_v34 = vld [vmem:[#allocation77_spill] sm:$0xff]  ;;  %v5364_v35 = vld [vmem:[#allocation78_spill] sm:$0xff] }
 0x10d   :  { %1786 = vmatprep.subr.bf16.mxu1 %v5329_v36  ;;  %v5365_v36 = vld [vmem:[#allocation79_spill] sm:$0xff] }
 0x10f   :  { %1675 = vmatpush1.bf16.msra.mxu0 %v5330_v22  ;;  %v2904_v22 = vcombine.low %v4512_v50, %v4512_v50  ;;  %v5372_v50 = vld [vmem:[#allocation86_spill] sm:$0xff] }
 0x110   :  { %1787 = vmatpush1.bf16.msra.mxu1 %v5331_v37  ;;  %1676 = vmatprep.subr.bf16.mxu0 %v5332_v38  ;;  %v3316_v37 = vld [vmem:[%s5103_s1 + $0x14] ss:$0 sps:$4 sm:$0x77]  }
 0x111   :  { %1788 = vmatprep.subr.bf16.mxu1 %v5333_v39  ;;  %v5366_v38 = vld [vmem:[#allocation80_spill] sm:$0xff]  ;;  %v5367_v39 = vld [vmem:[#allocation81_spill] sm:$0xff] }
 0x112   :  { %v699_v41 = vpop.f32.mrf.mxu0 }
 0x113   :  { %v658_v40 = vpop.f32.mrf.mxu1  ;;  %1677 = vmatpush2.bf16.msra.mxu0 %v5334_v43  ;;  %v1771_v43 = vshll.u32 %v3316_v37, 16 }
 0x114   :  { %v659_v42 = vadd.f32 %v658_v40, %v405_v1  ;;  %1789 = vmatpush1.bf16.msra.mxu1 %v5335_v44  ;;  %v701_v46 = vpop.f32.mrf.mxu0  ;;  %1678 = vmatprep.subr.bf16.mxu0 %v5336_v47  ;;  %v5368_v40 = vld [vmem:[#allocation82_spill] sm:$0xff]  ;;  %v5370_v44 = vld [vmem:[#allocation84_spill] sm:$0xff]  ;;  %v1755_v47 = vshrl.u32 %v2904_v22, 16 }
 0x115   :  { %v660_v45 = vpop.f32.mrf.mxu1  ;;  %1790 = vmatprep.subr.bf16.mxu1 %v5337_v48 }
 0x116   :  { %v4556_v51 = vadd.f32 %v699_v41, %v659_v42  ;;  %v661_v53 = vadd.f32 %v660_v45, %v407_v27  ;;  %v703_v55 = vpop.f32.mrf.mxu0  ;;  %v1635_v27 = vshrl.u32 %v2898_v16, 16  ;;  %v5369_v41 = vld [vmem:[#allocation83_spill] sm:$0xff]  ;;  %v1757_v42 = vshll.u32 %v2904_v22, 16  ;;  %v5371_v45 = vld [vmem:[#allocation85_spill] sm:$0xff]  ;;  %v4739_v16 = vld [vmem:[%s5105_s3 + $0xb0] sm:$0xff] }
 0x117   :  { %v662_v54 = vpop.f32.mrf.mxu1  ;;  %1679 = vmatpush2.bf16.msra.mxu0 %v5338_v57  ;;  %v4615_v55 = vld [vmem:[%s5105_s3 + $0xf8] sm:$0xff] }
 0x118   :  { %v4558_v56 = vadd.f32 %v701_v46, %v661_v53  ;;  %1791 = vmatpush1.bf16.msra.mxu1 %v5339_v58  ;;  %v704_v60 = vpop.f32.mrf.mxu0  ;;  %1680 = vmatprep.subr.bf16.mxu0 %v5340_v61  ;;  %v1640_v21 = vor.u32 %v1639_v28, %v1635_v27  ;;  %v5373_v46 = vld [vmem:[#allocation87_spill] sm:$0xff]  ;;  %v1759_v48 = vrot.slane %v1757_v42, 1  ;;  %v1769_v53 = vshrl.u32 %v3316_v37, 16  ;;  %v4669_v61 = vld [vmem:[%s5105_s3 + $0xd8] sm:$0xff]  ;;  %v4797_v27 = vld [vmem:[%s5105_s3 + $0x90] sm:$0xff] }
 0x119   :  { %v663_v59 = vpop.f32.mrf.mxu1  ;;  %1792 = vmatprep.subr.bf16.mxu1 %v5341_v0  ;;  %v1773_v54 = vrot.slane %v1771_v43, 1  ;;  %v4662_v60 = vld [vmem:[%s5105_s3 + $0x60] sm:$0xff]  ;;  %v4676_v0 = vld [vmem:[%s5105_s3 + $0x58] sm:$0xff]  ;;  %v4804_v28 = vld [vmem:[%s5105_s3 + $0x10] sm:$0xff] }
 0x11a   :  { %v1760_v57 = vor.u32 %v1759_v48, %v1755_v47  ;;  %v4655_v59 = vld [vmem:[%s5105_s3 + $0xe0] sm:$0xff] }
 0x11b   :  { %1681 = vmatpush2.bf16.msra.mxu0 %v5342_v2  ;;  %v1774_v58 = vor.u32 %v1773_v54, %v1769_v53  ;;  %v4683_v2 = vld [vmem:[%s5105_s3 + $0xd0] sm:$0xff] }
 0x11c   :  { %1793 = vmatpush1.bf16.msra.mxu1 %v5343_v3  ;;  %1682 = vmatprep.subr.bf16.mxu0 %v5344_v4  ;;  %v4690_v3 = vld [vmem:[%s5105_s3 + $0x50] sm:$0xff]  ;;  %v4697_v4 = vld [vmem:[%s5105_s3 + $0xc8] sm:$0xff] }
 0x11d   :  { %1794 = vmatprep.subr.bf16.mxu1 %v5345_v5  ;;  %v4704_v5 = vld [vmem:[%s5105_s3 + $0x48] sm:$0xff] }
 0x11f   :  { %1683 = vmatpush2.bf16.msra.mxu0 %v5346_v6  ;;  %v4711_v6 = vld [vmem:[%s5105_s3 + $0xc0] sm:$0xff] }
 0x120   :  { %1795 = vmatpush1.bf16.msra.mxu1 %v5347_v7  ;;  %1684 = vmatprep.subr.bf16.mxu0 %v5348_v8  ;;  %v4718_v7 = vld [vmem:[%s5105_s3 + $0x40] sm:$0xff]  ;;  %v4725_v8 = vld [vmem:[%s5105_s3 + $0xb8] sm:$0xff] }
 0x121   :  { %1796 = vmatprep.subr.bf16.mxu1 %v5349_v10  ;;  %v4732_v10 = vld [vmem:[%s5105_s3 + $0x38] sm:$0xff] }
 0x123   :  { %v4572_v11 = vpop.f32.mrf.mxu1  ;;  %1685 = vmatpush2.bf16.msra.mxu0 %v5350_v14 }
 0x124   :  { %1797 = vmatpush2.bf16.msra.mxu1 %v5351_v52  ;;  %1686 = vmatprep.subr.bf16.mxu0 %v5352_v13  ;;  %v4746_v52 = vld [vmem:[%s5105_s3 + $0x30] sm:$0xff] }
 0x125   :  { %v4578_v49 = vpop.f32.mrf.mxu1  ;;  %1798 = vmatprep.subr.bf16.mxu1 %v5353_v12  ;;  %v4754_v12 = vld [vmem:[%s5105_s3 + $0xa8] sm:$0xff] }
 0x127   :  { %v1062_v1 = vpop.f32.mrf.mxu1  ;;  %1687 = vmatpush2.bf16.msra.mxu0 %v5354_v15  ;;  %v4769_v15 = vld [vmem:[%s5105_s3 + $0xa0] sm:$0xff] }
 0x128   :  { %1799 = vmatpush2.bf16.msra.mxu1 %v5355_v23  ;;  %1688 = vmatprep.subr.bf16.mxu0 %v5356_v25 }
 0x129   :  { %v1063_v24 = vpop.f32.mrf.mxu1  ;;  %1800 = vmatprep.subr.bf16.mxu1 %v5357_v26  ;;  %v4790_v26 = vld [vmem:[%s5105_s3 + $0x18] sm:$0xff] }
 0x12a   :  { %v4776_v24 = vld [vmem:[%s5105_s3 + $0x20] sm:$0xff] }
 0x12b   :  { %1689 = vmatpush2.bf16.msra.mxu0 %v5358_v29  ;;  %v4811_v29 = vld [vmem:[%s5105_s3 + $0x88] sm:$0xff] }
 0x12c   :  { %1801 = vmatpush2.bf16.msra.mxu1 %v5359_v30  ;;  %1690 = vmatprep.subr.bf16.mxu0 %v5360_v31  ;;  %v4818_v30 = vld [vmem:[%s5105_s3 + $0x8] sm:$0xff]  ;;  %v4825_v31 = vld [vmem:[%s5105_s3 + $0x80] sm:$0xff] }
 0x12d   :  { %1802 = vmatprep.subr.bf16.mxu1 %v5361_v32  ;;  %v4832_v32 = vld [vmem:[%s5105_s3] sm:$0xff] }
 0x12f   :  { %1691 = vmatpush2.bf16.msra.mxu0 %v5362_v33 }
 0x130   :  { %1803 = vmatpush2.bf16.msra.mxu1 %v5363_v34  ;;  %1829 = vmatprep.subr.bf16.mxu0 %v5365_v36 }
 0x131   :  { %1804 = vmatprep.subr.bf16.mxu1 %v5364_v35 }
 0x132   :  { %1693 = vmatmul.mubr.bf16.vlgmr.msra.gmra.mxu0 %v1640_v21 }
 0x133   :  { %1830 = vmatpush1.bf16.msra.mxu0 %v5367_v39  ;;  %1853 = vmatprep.mubr.bf16.mxu0 %v5222_v20  ;;  %v5374_v20 = vld [vmem:[#allocation88_spill] sm:$0xff] }
 0x134   :  { %1805 = vmatpush2.bf16.msra.mxu1 %v5366_v38  ;;  %1831 = vmatprep.subr.bf16.mxu0 %v5369_v41 }
 0x135   :  { %1806 = vmatprep.subr.bf16.mxu1 %v5368_v40 }
 0x137   :  { %1832 = vmatpush1.bf16.msra.mxu0 %v5371_v45 }
 0x138   :  { %1807 = vmatpush2.bf16.msra.mxu1 %v5370_v44  ;;  %1833 = vmatprep.subr.bf16.mxu0 %v5373_v46 }
 0x139   :  { %1808 = vmatprep.subr.bf16.mxu1 %v5372_v50 }
 0x13b   :  { %1834 = vmatpush1.bf16.msra.mxu0 %v4316_v62  ;;  %v4623_v62 = vld [vmem:[%s5105_s3 + $0x78] sm:$0xff] }
 0x13c   :  { %1809 = vmatpush2.bf16.msra.mxu1 %v4311_v17  ;;  %1835 = vmatprep.subr.bf16.mxu0 %v5374_v20  ;;  %v4641_v17 = vld [vmem:[%s5105_s3 + $0xe8] sm:$0xff] }
 0x13d   :  { %1810 = vmatprep.subr.bf16.mxu1 %v4323_v63  ;;  %v4629_v63 = vld [vmem:[%s5105_s3 + $0xf0] sm:$0xff] }
 0x13f   :  { %1836 = vmatpush1.bf16.msra.mxu0 %v4340_v19  ;;  %v4648_v19 = vld [vmem:[%s5105_s3 + $0x68] sm:$0xff] }
 0x140   :  { %1811 = vmatpush2.bf16.msra.mxu1 %v4335_v9  ;;  %2911 = vmatprep.subr.mxu0 %v4615_v55  ;;  %v4635_v9 = vld [vmem:[%s5105_s3 + $0x70] sm:$0xff] }
 0x141   :  { %2946 = vmatprep.subr.mxu1 %v4615_v55 }
 0x142   :  { %2907 = vmatmul.mubr.msk.bf16.vlgmr.msra.gmra.mxu0 %vm325_vm0, %v1774_v58 }
 0x143   :  { %1813 = vmatmul.mubr.bf16.vlgmr.msra.gmra.mxu1 %v1760_v57  ;;  %2912 = vmatpush3.msra.mxu0 %v4623_v62 }
 0x144   :  { %2947 = vmatpush3.msra.mxu1 %v4623_v62  ;;  %2913 = vmatprep.subr.mxu0 %v4629_v63 }
 0x145   :  { %2948 = vmatprep.subr.mxu1 %v4629_v63  ;;  %2914 = vmatpush3.msra.mxu0 %v4635_v9 }
 0x146   :  { %2949 = vmatpush3.msra.mxu1 %v4635_v9  ;;  %2915 = vmatprep.subr.mxu0 %v4641_v17 }
 0x147   :  { %2950 = vmatprep.subr.mxu1 %v4641_v17  ;;  %2916 = vmatpush3.msra.mxu0 %v4648_v19 }
 0x148   :  { %2951 = vmatpush3.msra.mxu1 %v4648_v19  ;;  %2917 = vmatprep.subr.mxu0 %v4655_v59 }
 0x149   :  { %2952 = vmatprep.subr.mxu1 %v4655_v59  ;;  %2918 = vmatpush3.msra.mxu0 %v4662_v60 }
 0x14a   :  { %2953 = vmatpush3.msra.mxu1 %v4662_v60  ;;  %2919 = vmatprep.subr.mxu0 %v4669_v61 }
 0x14b   :  { %2954 = vmatprep.subr.mxu1 %v4669_v61  ;;  %2920 = vmatpush3.msra.mxu0 %v4676_v0 }
 0x14c   :  { %2955 = vmatpush3.msra.mxu1 %v4676_v0  ;;  %2921 = vmatprep.subr.mxu0 %v4683_v2 }
 0x14d   :  { %2956 = vmatprep.subr.mxu1 %v4683_v2  ;;  %2922 = vmatpush3.msra.mxu0 %v4690_v3 }
 0x14e   :  { %2957 = vmatpush3.msra.mxu1 %v4690_v3  ;;  %2923 = vmatprep.subr.mxu0 %v4697_v4 }
 0x14f   :  { %2958 = vmatprep.subr.mxu1 %v4697_v4  ;;  %2924 = vmatpush3.msra.mxu0 %v4704_v5 }
 0x150   :  { %2959 = vmatpush3.msra.mxu1 %v4704_v5  ;;  %2925 = vmatprep.subr.mxu0 %v4711_v6 }
 0x151   :  { %2960 = vmatprep.subr.mxu1 %v4711_v6  ;;  %2926 = vmatpush3.msra.mxu0 %v4718_v7 }
 0x152   :  { %2961 = vmatpush3.msra.mxu1 %v4718_v7  ;;  %v1017_v14 = vpop.f32.mrf.mxu0  ;;  %2927 = vmatprep.subr.mxu0 %v4725_v8 }
 0x153   :  { %2962 = vmatprep.subr.mxu1 %v4725_v8  ;;  %v1059_v13 = vadd.f32 %v4572_v11, %v1017_v14  ;;  %2928 = vmatpush3.msra.mxu0 %v4732_v10 }
 0x154   :  { %2963 = vmatpush3.msra.mxu1 %v4732_v10  ;;  %v1019_v1 = vpop.f32.mrf.mxu0  ;;  %2929 = vmatprep.subr.mxu0 %v4739_v16 }
 0x155   :  { %2964 = vmatprep.subr.mxu1 %v4739_v16  ;;  %v1065_v11 = vadd.f32 %v1059_v13, %v4556_v51  ;;  %2930 = vmatpush3.msra.mxu0 %v4746_v52  ;;  %v4783_v51 = vld [vmem:[%s5105_s3 + $0x98] sm:$0xff]  ;;  %v1061_v21 = vadd.f32 %v4578_v49, %v1019_v1 }
 0x156   :  { %2965 = vmatpush3.msra.mxu1 %v4746_v52  ;;  %v1021_v23 = vpop.f32.mrf.mxu0  ;;  %2931 = vmatprep.subr.mxu0 %v4754_v12 }
 0x157   :  { %2966 = vmatprep.subr.mxu1 %v4754_v12  ;;  %2932 = vmatpush3.msra.mxu0 %v4761_v18  ;;  %v1066_v37 = vadd.f32 %v1061_v21, %v4558_v56 }
 0x158   :  { %2967 = vmatpush3.msra.mxu1 %v4761_v18  ;;  %v1022_v25 = vpop.f32.mrf.mxu0  ;;  %2933 = vmatprep.subr.mxu0 %v4769_v15 }
 0x159   :  { %2968 = vmatprep.subr.mxu1 %v4769_v15  ;;  %2934 = vmatpush3.msra.mxu0 %v4776_v24 }
 0x15a   :  { %2969 = vmatpush3.msra.mxu1 %v4776_v24  ;;  %2935 = vmatprep.subr.mxu0 %v4783_v51 }
 0x15b   :  { %2970 = vmatprep.subr.mxu1 %v4783_v51  ;;  %2936 = vmatpush3.msra.mxu0 %v4790_v26 }
 0x15c   :  { %2971 = vmatpush3.msra.mxu1 %v4790_v26  ;;  %2937 = vmatprep.subr.mxu0 %v4797_v27 }
 0x15d   :  { %2972 = vmatprep.subr.mxu1 %v4797_v27  ;;  %2938 = vmatpush3.msra.mxu0 %v4804_v28 }
 0x15e   :  { %2973 = vmatpush3.msra.mxu1 %v4804_v28  ;;  %2939 = vmatprep.subr.mxu0 %v4811_v29 }
 0x15f   :  { %2974 = vmatprep.subr.mxu1 %v4811_v29  ;;  %2940 = vmatpush3.msra.mxu0 %v4818_v30 }
 0x160   :  { %2975 = vmatpush3.msra.mxu1 %v4818_v30  ;;  %2941 = vmatprep.subr.mxu0 %v4825_v31 }
 0x161   :  { %2976 = vmatprep.subr.mxu1 %v4825_v31  ;;  %2942 = vmatpush3.msra.mxu0 %v4832_v32 }
 0x162   :  { %2977 = vmatpush3.msra.mxu1 %v4832_v32  ;;  %v1419_v34 = vpop.f32.mrf.mxu0 }
 0x163   :  { %v1378_v33 = vpop.f32.mrf.mxu1  ;;  %2981 = vmatprep.subr.mxu1 %v4615_v55 }
 0x164   :  { %v1420_v35 = vadd.f32 %v1419_v34, %v1378_v33  ;;  %v1421_v22 = vpop.f32.mrf.mxu0 }
 0x165   :  { %v1380_v36 = vpop.f32.mrf.mxu1 }
 0x166   :  { %v4844_v38 = vadd.f32 %v1420_v35, %v1065_v11  ;;  %v1422_v39 = vadd.f32 %v1421_v22, %v1380_v36  ;;  %v1423_v41 = vpop.f32.mrf.mxu0 }
 0x167   :  { %v1382_v40 = vpop.f32.mrf.mxu1 }
 0x168   :  { %v1865_v49 = vsel %vm1864_vm1, %v4844_v38, 0.0  ;;  %v4848_v42 = vadd.f32 %v1422_v39, %v1066_v37  ;;  %v1424_v45 = vpop.f32.mrf.mxu0 }
 0x169   :  { %v1866_v43 = vrot.slane %v1865_v49, 4  ;;  %v1383_v44 = vpop.f32.mrf.mxu1 }
 0x16a   :  { %v1872_v50 = vsel %vm1864_vm1, %v4848_v42, 0.0 }
 0x16b   :  { %v1867_v46 = vadd.f32 %v1866_v43, %v1865_v49  ;;  %v1873_v47 = vrot.slane %v1872_v50, 4 }
 0x16d   :  { %v1868_v48 = vrot.slane %v1867_v46, 2  ;;  %v1874_v56 = vadd.f32 %v1873_v47, %v1872_v50 }
 0x16f   :  { %v1875_v53 = vrot.slane %v1874_v56, 2  ;;  %v1869_v54 = vadd.f32 %v1868_v48, %v1867_v46 }
 0x171   :  { %v1876_v20 = vadd.f32 %v1875_v53, %v1874_v56  ;;  %v1870_v57 = vrot.slane %v1869_v54, 1  ;;  %v4886_v56 = vld [vmem:[%s5106_s4 + $0x78] sm:$0xff] }
 0x172   :  { %2102 = vmatprep.subr.mxu0 %v4886_v56 }
 0x173   :  { %v1522_v58 = vpop.f32.mrf.mxu1  ;;  %v1877_v14 = vrot.slane %v1876_v20, 1  ;;  %v1871_v11 = vadd.f32 %v1870_v57, %v1869_v54 }
 0x175   :  { %v1524_v13 = vpop.f32.mrf.mxu1  ;;  %v1878_v1 = vadd.f32 %v1877_v14, %v1876_v20 }
 0x177   :  { %v1526_v23 = vpop.f32.mrf.mxu1  ;;  %2059 = vmatprep.mubr.f32.mxu1 %v1878_v1 }
 0x178   :  { %2060 = vmatmul.mubr.f32.vlgmr.msra.gmra.mxu1 %v1871_v11 }
 0x179   :  { %v1527_v25 = vpop.f32.mrf.mxu1  ;;  %2982 = vmatpush3.msra.mxu1 %v4623_v62 }
 0x17a   :  { %2983 = vmatprep.subr.mxu1 %v4629_v63 }
 0x17b   :  { %2984 = vmatpush3.msra.mxu1 %v4635_v9 }
 0x17c   :  { %2985 = vmatprep.subr.mxu1 %v4641_v17 }
 0x17d   :  { %2986 = vmatpush3.msra.mxu1 %v4648_v19 }
 0x17e   :  { %2987 = vmatprep.subr.mxu1 %v4655_v59 }
 0x17f   :  { %2988 = vmatpush3.msra.mxu1 %v4662_v60 }
 0x180   :  { %2989 = vmatprep.subr.mxu1 %v4669_v61 }
 0x181   :  { %2990 = vmatpush3.msra.mxu1 %v4676_v0 }
 0x182   :  { %2991 = vmatprep.subr.mxu1 %v4683_v2 }
 0x183   :  { %2992 = vmatpush3.msra.mxu1 %v4690_v3 }
 0x184   :  { %2993 = vmatprep.subr.mxu1 %v4697_v4 }
 0x185   :  { %2994 = vmatpush3.msra.mxu1 %v4704_v5 }
 0x186   :  { %2995 = vmatprep.subr.mxu1 %v4711_v6 }
 0x187   :  { %2996 = vmatpush3.msra.mxu1 %v4718_v7 }
 0x188   :  { %2997 = vmatprep.subr.mxu1 %v4725_v8 }
 0x189   :  { %2998 = vmatpush3.msra.mxu1 %v4732_v10 }
 0x18a   :  { %2999 = vmatprep.subr.mxu1 %v4739_v16 }
 0x18b   :  { %3000 = vmatpush3.msra.mxu1 %v4746_v52 }
 0x18c   :  { %3001 = vmatprep.subr.mxu1 %v4754_v12 }
 0x18d   :  { %3002 = vmatpush3.msra.mxu1 %v4761_v18 }
 0x18e   :  { %3003 = vmatprep.subr.mxu1 %v4769_v15 }
 0x18f   :  { %3004 = vmatpush3.msra.mxu1 %v4776_v24 }
 0x190   :  { %3005 = vmatprep.subr.mxu1 %v4783_v51 }
 0x191   :  { %3006 = vmatpush3.msra.mxu1 %v4790_v26 }
 0x192   :  { %3007 = vmatprep.subr.mxu1 %v4797_v27 }
 0x193   :  { %3008 = vmatpush3.msra.mxu1 %v4804_v28 }
 0x194   :  { %3009 = vmatprep.subr.mxu1 %v4811_v29 }
 0x195   :  { %3010 = vmatpush3.msra.mxu1 %v4818_v30 }
 0x196   :  { %3011 = vmatprep.subr.mxu1 %v4825_v31 }
 0x197   :  { %3012 = vmatpush3.msra.mxu1 %v4832_v32 }
 0x198   :  { %2368 = vmatprep.subr.mxu1 %v4886_v56 }
 0x1a2   :  { %v1481_v21 = vpop.f32.mrf.mxu0 }
 0x1a3   :  { %v1523_v33 = vadd.f32 %v1522_v58, %v1481_v21 }
 0x1a4   :  { %v1483_v34 = vpop.f32.mrf.mxu0 }
 0x1a5   :  { %v1525_v35 = vadd.f32 %v1524_v13, %v1483_v34 }
 0x1a6   :  { %v1485_v36 = vpop.f32.mrf.mxu0 }
 0x1a8   :  { %v1486_v22 = vpop.f32.mrf.mxu0 }
 0x1b2   :  { %v1617_v39 = vpop.f32.mrf.mxu0 }
 0x1b3   :  { %v1576_v37 = vpop.f32.mrf.mxu1 }
 0x1b4   :  { %v1577_v40 = vadd.f32 %v1576_v37, %v1523_v33  ;;  %v1619_v49 = vpop.f32.mrf.mxu0 }
 0x1b5   :  { %v1578_v41 = vpop.f32.mrf.mxu1 }
 0x1b6   :  { %v1618_v43 = vadd.f32 %v1617_v39, %v1577_v40  ;;  %v1579_v44 = vadd.f32 %v1578_v41, %v1525_v35  ;;  %v1621_v50 = vpop.f32.mrf.mxu0 }
 0x1b7   :  { %v1580_v45 = vpop.f32.mrf.mxu1 }
 0x1b8   :  { %v1620_v46 = vadd.f32 %v1619_v49, %v1579_v44  ;;  %v1622_v48 = vpop.f32.mrf.mxu0 }
 0x1b9   :  { %v1581_v47 = vpop.f32.mrf.mxu1 }
 0x1c3   :  { %v1735_v53 = vpop.f32.mrf.mxu1 }
 0x1c5   :  { %v1737_v54 = vpop.f32.mrf.mxu1 }
 0x1c7   :  { %v1739_v20 = vpop.f32.mrf.mxu1 }
 0x1c9   :  { %v1740_v57 = vpop.f32.mrf.mxu1 }
 0x1f2   :  { %v1694_v58 = vpop.f32.mrf.mxu0 }
 0x1f3   :  { %v1736_v14 = vadd.f32 %v1735_v53, %v1694_v58 }
 0x1f4   :  { %v1696_v13 = vpop.f32.mrf.mxu0 }
 0x1f5   :  { %v1742_v1 = vadd.f32 %v1736_v14, %v1618_v43  ;;  %v1738_v25 = vadd.f32 %v1737_v54, %v1696_v13 }
 0x1f6   :  { %v1698_v11 = vpop.f32.mrf.mxu0 }
 0x1f7   :  { %v1743_v22 = vadd.f32 %v1738_v25, %v1620_v46  ;;  %v4906_v25 = vld [vmem:[%s5106_s4 + $0x68] sm:$0xff] }
 0x1f8   :  { %v1699_v23 = vpop.f32.mrf.mxu0 }
 0x1f9   :  { %v4901_v23 = vld [vmem:[%s5106_s4 + $0x70] sm:$0xff] }
 0x202   :  { %v1855_v33 = vpop.f32.mrf.mxu0 }
 0x203   :  { %v1814_v21 = vpop.f32.mrf.mxu1 }
 0x204   :  { %v1856_v34 = vadd.f32 %v1855_v33, %v1814_v21  ;;  %v1857_v36 = vpop.f32.mrf.mxu0  ;;  %v4911_v21 = vld [vmem:[%s5106_s4 + $0x60] sm:$0xff]  ;;  %v4917_v33 = vld [vmem:[%s5106_s4 + $0x58] sm:$0xff] }
 0x205   :  { %v1816_v35 = vpop.f32.mrf.mxu1 }
 0x206   :  { %v4890_v37 = vadd.f32 %v1856_v34, %v1742_v1  ;;  %v1858_v39 = vadd.f32 %v1857_v36, %v1816_v35  ;;  %v1859_v41 = vpop.f32.mrf.mxu0  ;;  %v4923_v34 = vld [vmem:[%s5106_s4 + $0x50] sm:$0xff]  ;;  %v4929_v35 = vld [vmem:[%s5106_s4 + $0x48] sm:$0xff]  ;;  %v4937_v36 = vld [vmem:[%s5106_s4 + $0x40] sm:$0xff] }
 0x207   :  { %v1818_v40 = vpop.f32.mrf.mxu1  ;;  %v4961_v41 = vld [vmem:[%s5106_s4 + $0x20] sm:$0xff] }
 0x208   :  { %v1911_v49 = vsel %vm1864_vm1, %v4890_v37, 0.0  ;;  %v4894_v44 = vadd.f32 %v1858_v39, %v1743_v22  ;;  %v1860_v50 = vpop.f32.mrf.mxu0  ;;  %v4943_v22 = vld [vmem:[%s5106_s4 + $0x38] sm:$0xff]  ;;  %v4949_v39 = vld [vmem:[%s5106_s4 + $0x30] sm:$0xff]  ;;  %v4955_v40 = vld [vmem:[%s5106_s4 + $0x28] sm:$0xff] }
 0x209   :  { %v1912_v43 = vrot.slane %v1911_v49, 4  ;;  %v1819_v45 = vpop.f32.mrf.mxu1  ;;  %v4985_v50 = vld [vmem:[%s5106_s4] sm:$0xff] }
 0x20a   :  { %v1918_v47 = vsel %vm1864_vm1, %v4894_v44, 0.0  ;;  %v4979_v45 = vld [vmem:[%s5106_s4 + $0x8] sm:$0xff] }
 0x20b   :  { %v1913_v48 = vadd.f32 %v1912_v43, %v1911_v49  ;;  %v1919_v53 = vrot.slane %v1918_v47, 4  ;;  %v4967_v49 = vld [vmem:[%s5106_s4 + $0x18] sm:$0xff]  ;;  %v4973_v43 = vld [vmem:[%s5106_s4 + $0x10] sm:$0xff] }
 0x20d   :  { %v1914_v54 = vrot.slane %v1913_v48, 2  ;;  %v1920_v46 = vadd.f32 %v1919_v53, %v1918_v47  ;;  %v3348_v47 = vmov 0.0  }
 0x20f   :  { %v1921_v20 = vrot.slane %v1920_v46, 2  ;;  %v1915_v57 = vadd.f32 %v1914_v54, %v1913_v48 }
 0x211   :  { %v1922_v58 = vadd.f32 %v1921_v20, %v1920_v46  ;;  %v1916_v14 = vrot.slane %v1915_v57, 1 }
 0x213   :  { %v1923_v13 = vrot.slane %v1922_v58, 1  ;;  %v1917_v11 = vadd.f32 %v1916_v14, %v1915_v57 }
 0x215   :  { %v1924_v1 = vadd.f32 %v1923_v13, %v1922_v58 }
 0x217   :  { %1989 = vmatprep.mubr.f32.mxu0 %v1924_v1 }
 0x218   :  { %1990 = vmatmul.mubr.f32.vlgmr.msra.gmra.mxu0 %v1917_v11 }
 0x219   :  { %2103 = vmatpush1.msra.mxu0 %v4901_v23  ;;  %2150 = vmatprep.mubr.f32.mxu0 %v3348_v47 }
 0x21a   :  { %2104 = vmatprep.subr.mxu0 %v4906_v25 }
 0x21b   :  { %2105 = vmatpush1.msra.mxu0 %v4911_v21 }
 0x21c   :  { %2106 = vmatprep.subr.mxu0 %v4917_v33 }
 0x21d   :  { %2107 = vmatpush1.msra.mxu0 %v4923_v34 }
 0x21e   :  { %2108 = vmatprep.subr.mxu0 %v4929_v35 }
 0x21f   :  { %2109 = vmatpush1.msra.mxu0 %v4937_v36 }
 0x220   :  { %2110 = vmatprep.subr.mxu0 %v4943_v22 }
 0x221   :  { %2111 = vmatpush1.msra.mxu0 %v4949_v39 }
 0x222   :  { %2112 = vmatprep.subr.mxu0 %v4955_v40 }
 0x223   :  { %2113 = vmatpush1.msra.mxu0 %v4961_v41 }
 0x224   :  { %2114 = vmatprep.subr.mxu0 %v4967_v49 }
 0x225   :  { %2115 = vmatpush1.msra.mxu0 %v4973_v43 }
 0x226   :  { %2116 = vmatprep.subr.mxu0 %v4979_v45 }
 0x227   :  { %2117 = vmatpush1.msra.mxu0 %v4985_v50 }
 0x228   :  { %3016 = vmatprep.subr.mxu0 %v4615_v55  ;;  %v2157_v55 = vlaneseq }
 0x238   :  { %v2978_v48 = vpop.f32.mrf.mxu1 }
 0x23a   :  { %v2979_v53 = vpop.f32.mrf.mxu1 }
 0x23b   :  { %v2980_v20 = vadd.f32 %v2979_v53, %v2978_v48 }
 0x2d8   :  { %v2943_v54 = vpop.f32.mrf.mxu0 }
 0x2da   :  { %v2944_v46 = vpop.f32.mrf.mxu0 }
 0x2db   :  { %v2945_v57 = vadd.f32 %v2944_v46, %v2943_v54 }
 0x2dd   :  { %v2062_v58 = vadd.f32 %v2980_v20, %v2945_v57 }
 0x2df   :  { %v4990_v14 = vmul.f32 0.03125, %v2062_v58 }
 0x2e1   :  { %2908 = vmatmul.mubr.msk.f32.vlgmr.msra.gmra.mxu0 %vm325_vm0, %v4990_v14 }
 0x2e2   :  { %3017 = vmatpush3.msra.mxu0 %v4623_v62  ;;  %v2158_v62 = vshrl.u32 %v2157_v55, 7 }
 0x2e3   :  { %3018 = vmatprep.subr.mxu0 %v4629_v63 }
 0x2e4   :  { %3019 = vmatpush3.msra.mxu0 %v4635_v9  ;;  %v5026_v63 = vsub.s32 0, %v2158_v62 }
 0x2e5   :  { %3020 = vmatprep.subr.mxu0 %v4641_v17 }
 0x2e6   :  { %3021 = vmatpush3.msra.mxu0 %v4648_v19 }
 0x2e7   :  { %3022 = vmatprep.subr.mxu0 %v4655_v59 }
 0x2e8   :  { %3023 = vmatpush3.msra.mxu0 %v4662_v60 }
 0x2e9   :  { %3024 = vmatprep.subr.mxu0 %v4669_v61 }
 0x2ea   :  { %3025 = vmatpush3.msra.mxu0 %v4676_v0 }
 0x2eb   :  { %3026 = vmatprep.subr.mxu0 %v4683_v2 }
 0x2ec   :  { %3027 = vmatpush3.msra.mxu0 %v4690_v3 }
 0x2ed   :  { %3028 = vmatprep.subr.mxu0 %v4697_v4 }
 0x2ee   :  { %3029 = vmatpush3.msra.mxu0 %v4704_v5 }
 0x2ef   :  { %3030 = vmatprep.subr.mxu0 %v4711_v6 }
 0x2f0   :  { %3031 = vmatpush3.msra.mxu0 %v4718_v7 }
 0x2f1   :  { %3032 = vmatprep.subr.mxu0 %v4725_v8 }
 0x2f2   :  { %3033 = vmatpush3.msra.mxu0 %v4732_v10 }
 0x2f3   :  { %3034 = vmatprep.subr.mxu0 %v4739_v16 }
 0x2f4   :  { %3035 = vmatpush3.msra.mxu0 %v4746_v52 }
 0x2f5   :  { %3036 = vmatprep.subr.mxu0 %v4754_v12 }
 0x2f6   :  { %3037 = vmatpush3.msra.mxu0 %v4761_v18 }
 0x2f7   :  { %3038 = vmatprep.subr.mxu0 %v4769_v15 }
 0x2f8   :  { %3039 = vmatpush3.msra.mxu0 %v4776_v24 }
 0x2f9   :  { %3040 = vmatprep.subr.mxu0 %v4783_v51 }
 0x2fa   :  { %3041 = vmatpush3.msra.mxu0 %v4790_v26 }
 0x2fb   :  { %3042 = vmatprep.subr.mxu0 %v4797_v27 }
 0x2fc   :  { %3043 = vmatpush3.msra.mxu0 %v4804_v28 }
 0x2fd   :  { %3044 = vmatprep.subr.mxu0 %v4811_v29 }
 0x2fe   :  { %3045 = vmatpush3.msra.mxu0 %v4818_v30 }
 0x2ff   :  { %3046 = vmatprep.subr.mxu0 %v4825_v31 }
 0x300   :  { %3047 = vmatpush3.msra.mxu0 %v4832_v32 }
 0x301   :  { %2442 = vmatprep.subr.mxu0 %v4886_v56 }
 0x3a1   :  { %v2152_v9 = vpop.f32.mrf.mxu0 }
 0x3a2   :  { %v2160_v17 = vrot.slane %v2152_v9, %v5026_v63 }
 0x3a3   :  { %v2154_v19 = vpop.f32.mrf.mxu0 }
 0x3a4   :  { %v2165_v59 = vsub.f32 %v4844_v38, %v2160_v17  ;;  %v2183_v60 = vsub.f32 %v4890_v37, %v2160_v17  ;;  %v2164_v61 = vrot.slane %v2154_v19, %v5026_v63 }
 0x3a6   :  { %v2167_v0 = vmul.f32 %v2165_v59, %v2165_v59  ;;  %v2185_v2 = vmul.f32 %v2183_v60, %v2183_v60  ;;  %v2166_v3 = vsub.f32 %v4848_v42, %v2164_v61  ;;  %v2184_v4 = vsub.f32 %v4894_v44, %v2164_v61 }
 0x3a8   :  { %v2169_v5 = vsel %vm1864_vm1, %v2167_v0, 0.0  ;;  %v2187_v6 = vsel %vm1864_vm1, %v2185_v2, 0.0  ;;  %v2168_v7 = vmul.f32 %v2166_v3, %v2166_v3  ;;  %v2186_v8 = vmul.f32 %v2184_v4, %v2184_v4  ;;  %v2523_v4 = vld [vmem:[%s5109_s7] sm:$0xff] }
 0x3a9   :  { %v2170_v10 = vrot.slane %v2169_v5, 4  ;;  %v2188_v16 = vrot.slane %v2187_v6, 4 }
 0x3aa   :  { %v2176_v52 = vsel %vm1864_vm1, %v2168_v7, 0.0  ;;  %v2194_v12 = vsel %vm1864_vm1, %v2186_v8, 0.0  ;;  %v2525_v8 = vcombine.high %v2523_v4, %v2523_v4 }
 0x3ab   :  { %v2171_v18 = vadd.f32 %v2170_v10, %v2169_v5  ;;  %v2189_v15 = vadd.f32 %v2188_v16, %v2187_v6  ;;  %v2177_v24 = vrot.slane %v2176_v52, 4  ;;  %v2195_v51 = vrot.slane %v2194_v12, 4 }
 0x3ad   :  { %v2172_v26 = vrot.slane %v2171_v18, 2  ;;  %v2190_v27 = vrot.slane %v2189_v15, 2  ;;  %v2178_v28 = vadd.f32 %v2177_v24, %v2176_v52  ;;  %v2196_v29 = vadd.f32 %v2195_v51, %v2194_v12 }
 0x3af   :  { %v2173_v30 = vadd.f32 %v2172_v26, %v2171_v18  ;;  %v2191_v31 = vadd.f32 %v2190_v27, %v2189_v15  ;;  %v2197_v32 = vrot.slane %v2196_v29, 2  ;;  %v2179_v56 = vrot.slane %v2178_v28, 2 }
 0x3b1   :  { %v2198_v13 = vadd.f32 %v2197_v32, %v2196_v29  ;;  %v2180_v1 = vadd.f32 %v2179_v56, %v2178_v28  ;;  %v2192_v11 = vrot.slane %v2191_v31, 1  ;;  %v2174_v48 = vrot.slane %v2173_v30, 1 }
 0x3b3   :  { %v2199_v53 = vrot.slane %v2198_v13, 1  ;;  %v2181_v54 = vrot.slane %v2180_v1, 1  ;;  %v2193_v57 = vadd.f32 %v2192_v11, %v2191_v31  ;;  %v2175_v58 = vadd.f32 %v2174_v48, %v2173_v30 }
 0x3b5   :  { %v2200_v46 = vadd.f32 %v2199_v53, %v2198_v13  ;;  %v2182_v20 = vadd.f32 %v2181_v54, %v2180_v1 }
 0x3b7   :  { %2265 = vmatprep.mubr.f32.mxu1 %v2200_v46  ;;  %2335 = vmatprep.mubr.f32.mxu0 %v2182_v20 }
 0x3b8   :  { %2266 = vmatmul.mubr.f32.vlgmr.msra.gmra.mxu1 %v2193_v57  ;;  %2336 = vmatmul.mubr.f32.vlgmr.msra.gmra.mxu0 %v2175_v58 }
 0x3b9   :  { %2369 = vmatpush1.msra.mxu1 %v4901_v23  ;;  %2443 = vmatpush1.msra.mxu0 %v4901_v23 }
 0x3ba   :  { %2370 = vmatprep.subr.mxu1 %v4906_v25  ;;  %2444 = vmatprep.subr.mxu0 %v4906_v25 }
 0x3bb   :  { %2371 = vmatpush1.msra.mxu1 %v4911_v21  ;;  %2445 = vmatpush1.msra.mxu0 %v4911_v21 }
 0x3bc   :  { %2372 = vmatprep.subr.mxu1 %v4917_v33  ;;  %2446 = vmatprep.subr.mxu0 %v4917_v33 }
 0x3bd   :  { %2373 = vmatpush1.msra.mxu1 %v4923_v34  ;;  %2447 = vmatpush1.msra.mxu0 %v4923_v34 }
 0x3be   :  { %2374 = vmatprep.subr.mxu1 %v4929_v35  ;;  %2448 = vmatprep.subr.mxu0 %v4929_v35 }
 0x3bf   :  { %2375 = vmatpush1.msra.mxu1 %v4937_v36  ;;  %2449 = vmatpush1.msra.mxu0 %v4937_v36 }
 0x3c0   :  { %2376 = vmatprep.subr.mxu1 %v4943_v22  ;;  %2450 = vmatprep.subr.mxu0 %v4943_v22 }
 0x3c1   :  { %2377 = vmatpush1.msra.mxu1 %v4949_v39  ;;  %2451 = vmatpush1.msra.mxu0 %v4949_v39 }
 0x3c2   :  { %2378 = vmatprep.subr.mxu1 %v4955_v40  ;;  %2452 = vmatprep.subr.mxu0 %v4955_v40  ;;  %v2342_v40 = vld [vmem:[%s5107_s5] sm:$0x1] }
 0x3c3   :  { %2379 = vmatpush1.msra.mxu1 %v4961_v41  ;;  %2416 = vmatprep.mubr.f32.mxu1 %v3348_v47 }
 0x3c4   :  { %2380 = vmatprep.subr.mxu1 %v4967_v49  ;;  %2453 = vmatpush1.msra.mxu0 %v4961_v41 }
 0x3c5   :  { %2381 = vmatpush1.msra.mxu1 %v4973_v43  ;;  %2454 = vmatprep.subr.mxu0 %v4967_v49 }
 0x3c6   :  { %2382 = vmatprep.subr.mxu1 %v4979_v45  ;;  %2455 = vmatpush1.msra.mxu0 %v4973_v43  ;;  %v2346_v43 = vld [vmem:[%s5108_s6] sm:$0x1] }
 0x3c7   :  { %2383 = vmatpush1.msra.mxu1 %v4985_v50  ;;  %2456 = vmatprep.subr.mxu0 %v4979_v45 }
 0x3c8   :  { %2457 = vmatpush1.msra.mxu0 %v4985_v50  ;;  %2490 = vmatprep.mubr.f32.mxu0 %v3348_v47 }
 0x478   :  { %v3013_v23 = vpop.f32.mrf.mxu1  ;;  %v3048_v25 = vpop.f32.mrf.mxu0 }
 0x47a   :  { %v3014_v21 = vpop.f32.mrf.mxu1  ;;  %v3049_v33 = vpop.f32.mrf.mxu0 }
 0x47b   :  { %v3015_v34 = vadd.f32 %v3014_v21, %v3013_v23  ;;  %v3050_v35 = vadd.f32 %v3049_v33, %v3048_v25 }
 0x47d   :  { %v2338_v36 = vadd.f32 %v3050_v35, %v3015_v34 }
 0x47f   :  { %v2341_v22 = vmul.f32 0.03125, %v2338_v36 }
 0x481   :  { %v2343_v39 = vadd.f32 1e-05, %v2341_v22 }
 0x483   :  { %3318 = vrsqrt.f32 %v2343_v39 }
 0x490   :  { %v3319_v41 = vpop.eup %3318 }
 0x491   :  { %v2345_v49 = vmul.f32 %v3319_v41, %v2342_v40 }
 0x493   :  { %2909 = vmatmul.mubr.msk.f32.vlgmr.msra.gmra.mxu1 %vm325_vm0, %v2345_v49  ;;  %v2347_v45 = vmul.f32 %v2345_v49, %v4990_v14 }
 0x495   :  { %v2348_v50 = vsub.f32 %v2346_v43, %v2347_v45 }
 0x497   :  { %2910 = vmatmul.mubr.msk.f32.vlgmr.msra.gmra.mxu0 %vm325_vm0, %v2348_v50 }
 0x553   :  { %v2418_v47 = vpop.f32.mrf.mxu1 }
 0x554   :  { %v2500_v55 = vrot.slane %v2418_v47, %v5026_v63 }
 0x555   :  { %v2420_v62 = vpop.f32.mrf.mxu1 }
 0x556   :  { %v2504_v9 = vrot.slane %v2420_v62, %v5026_v63  ;;  %v2505_v19 = vmul.f32 %v2500_v55, %v4844_v38  ;;  %v2549_v59 = vmul.f32 %v2500_v55, %v4890_v37 }
 0x557   :  { %v2492_v17 = vpop.f32.mrf.mxu0 }
 0x558   :  { %v2510_v60 = vrot.slane %v2492_v17, %v5026_v63  ;;  %v2506_v0 = vmul.f32 %v2504_v9, %v4848_v42  ;;  %v2550_v5 = vmul.f32 %v2504_v9, %v4894_v44 }
 0x559   :  { %v2494_v61 = vpop.f32.mrf.mxu0 }
 0x55a   :  { %v2515_v14 = vadd.f32 %v2510_v60, %v2505_v19  ;;  %v2551_v2 = vadd.f32 %v2549_v59, %v2510_v60  ;;  %v2514_v3 = vrot.slane %v2494_v61, %v5026_v63 }
 0x55c   :  { %v2519_v6 = vmul.f32 0.2, %v2515_v14  ;;  %v2555_v7 = vmul.f32 0.2, %v2551_v2  ;;  %v2516_v38 = vadd.f32 %v2514_v3, %v2506_v0  ;;  %vm2553_vm2 = vcmp.ge.f32.partialorder %v2551_v2, 0.0 }
 0x55d   :  { %v2552_v37 = vadd.f32 %v2550_v5, %v2514_v3  ;;  %vm2517_vm3 = vcmp.ge.f32.partialorder %v2515_v14, 0.0 }
 0x55e   :  { %v2520_v10 = vmul.f32 0.2, %v2516_v38  ;;  %vm2518_vm4 = vcmp.ge.f32.partialorder %v2516_v38, 0.0  ;;  %v2521_v42 = vsel %vm2517_vm3, %v2515_v14, %v2519_v6  ;;  %v2557_v12 = vsel %vm2553_vm2, %v2551_v2, %v2555_v7 }
 0x55f   :  { %vm2554_vm5 = vcmp.ge.f32.partialorder %v2552_v37, 0.0  ;;  %v2556_v16 = vmul.f32 0.2, %v2552_v37  ;;  %v2527_v52 = vmul.f32 %v2523_v4, %v2521_v42  ;;  %v2563_v26 = vmul.f32 %v2557_v12, %v2523_v4 }
 0x560   :  { %v2522_v63 = vsel %vm2518_vm4, %v2516_v38, %v2520_v10 }
 0x561   :  { %v2528_v18 = vmul.f32 %v2525_v8, %v2522_v63  ;;  %v2558_v15 = vsel %vm2554_vm5, %v2552_v37, %v2556_v16  ;;  %v2529_v44 = vsel %vm1864_vm1, %v2527_v52, 0.0  ;;  %v2565_v29 = vsel %vm1864_vm1, %v2563_v26, 0.0 }
 0x562   :  { %v2564_v24 = vmul.f32 %v2558_v15, %v2525_v8 }
 0x563   :  { %v2530_v51 = vsel %vm1864_vm1, %v2528_v18, 0.0 }
 0x564   :  { %v2531_v27 = vadd.f32 %v2530_v51, %v2529_v44  ;;  %v2566_v28 = vsel %vm1864_vm1, %v2564_v24, 0.0 }
 0x565   :  { %v2567_v30 = vadd.f32 %v2566_v28, %v2565_v29 }
 0x566   :  { %2532 = vadd.xlane.f32.xlu0 %v2531_v27 }
 0x56a   :  { %2568 = vadd.xlane.f32.xlu0 %v2567_v30 }
 0x5ef   :  { %v2533_v31 = vpop.xlane.xlu0 %2532 }
 0x5f0   :  { %v2534_v32 = vsel %vm1864_vm1, %v2533_v31, 0.0 }
 0x5f1   :  { %v2535_v56 = vrot.slane %v2534_v32, 4 }
 0x5f3   :  { %v2536_v13 = vadd.f32 %v2535_v56, %v2534_v32  ;;  %v2569_v1 = vpop.xlane.xlu0 %2568 }
 0x5f4   :  { %v2570_v11 = vsel %vm1864_vm1, %v2569_v1, 0.0 }
 0x5f5   :  { %v2537_v48 = vrot.slane %v2536_v13, 2  ;;  %v2571_v53 = vrot.slane %v2570_v11, 4 }
 0x5f7   :  { %v2538_v54 = vadd.f32 %v2537_v48, %v2536_v13  ;;  %v2572_v46 = vadd.f32 %v2571_v53, %v2570_v11 }
 0x5f9   :  { %v2539_v20 = vrot.slane %v2538_v54, 1  ;;  %v2573_v57 = vrot.slane %v2572_v46, 2 }
 0x5fb   :  { %v2540_v58 = vadd.f32 %v2539_v20, %v2538_v54  ;;  %v2574_v23 = vadd.f32 %v2573_v57, %v2572_v46 }
 0x5fd   :  { %v2541_v25 = vsub.f32 0.0, %v2540_v58  ;;  %v2575_v21 = vrot.slane %v2574_v23, 1 }
 0x5ff   :  { %v2542_v33 = vmul.f32 1.442695, %v2541_v25  ;;  %v2576_v34 = vadd.f32 %v2575_v21, %v2574_v23 }
 0x601   :  { %3320 = vpow2.f32 %v2542_v33  ;;  %v2577_v35 = vsub.f32 0.0, %v2576_v34 }
 0x603   :  { %v2578_v36 = vmul.f32 1.442695, %v2577_v35 }
 0x605   :  { %3322 = vpow2.f32 %v2578_v36 }
 0x60e   :  { %v3321_v22 = vpop.eup %3320 }
 0x60f   :  { %v2544_v39 = vadd.f32 1.0, %v3321_v22 }
 0x611   :  { %3324 = vrcp.f32 %v2544_v39 }
 0x612   :  { %v3323_v40 = vpop.eup %3322 }
 0x613   :  { %v2580_v41 = vadd.f32 1.0, %v3323_v40 }
 0x615   :  { %3326 = vrcp.f32 %v2580_v41 }
 0x61e   :  { %v3325_v49 = vpop.eup %3324 }
 0x61f   :  { %2548 = vst.msk [vmem:[%s5110_s8] sm:$0x1] %vm2547_vm6, %v3325_v49 }
 0x622   :  { %v3327_v43 = vpop.eup %3326 }
 0x623   :  { %2583 = vst.msk [vmem:[%s5110_s8 + $0x1] sm:$0x1] %vm2547_vm6, %v3327_v43 }

</bundles_post_ra>
